<compile_context>
chip_gen: v7x
topology: tpu7x:2x2x1
jax: 0.10.0
libtpu: 0.0.40
codegen_flags: <defaults>
</compile_context>

<pallas_src>
import jax
import jax.numpy as jnp
from jax.experimental import pallas as pl
from jax.experimental.pallas import tpu as pltpu

# ---- small synthetic dims (stand-ins for ESM2 320 / ChemBERTa 384 hidden sizes) ----
B = 256                       # total batch
TB = 128                      # batch tile (one full f32 MXU-height tile on v5e)
S_PROT, D_PROT = 8, 64
S_MOL, D_MOL = 8, 64
C = D_PROT + D_MOL            # combined_dim = 128
CB = C // 2                   # per-branch stage-2 out channels (2 branches: k=1, k=3)
HIDDEN = (96, 64, 48, 32, 1)  # scaled-down regressor hidden_sizes, final output = 1
HP = 128                      # lane-padded regressor width
EPS = 1e-5                    # BatchNorm eps

N_WCHUNK = 8 + len(HIDDEN)    # 13 x (128,128) bf16 weight chunks
N_BROW = 6 + len(HIDDEN)      # 11 x (128,) f32 bias rows


def _softplus(x):
    return jnp.maximum(x, 0.0) + jnp.log1p(jnp.exp(-jnp.abs(x)))


def _mish(x):
    return x * jnp.tanh(_softplus(x))


# ------------------------------------ kernel ---------------------------------------

def affinity_kernel(prot_ref, mol_ref, w_ref, b_ref, out_ref):
    # per-modality mean pool (bf16 in, f32 accumulate), lane-concatenated -> (TB, C)
    # (the 1/S scale cannot be folded into W1 because x itself feeds the residual add)
    xp = jnp.mean(prot_ref[...].astype(jnp.float32), axis=1)     # (TB, D_PROT)
    xm = jnp.mean(mol_ref[...].astype(jnp.float32), axis=1)      # (TB, D_MOL)
    x = jnp.concatenate([xp, xm], axis=-1)                       # (TB, C)

    def dot(h, wi):
        # static w_ref[wi] slice is free; bf16 operands, f32 accumulation
        return jnp.dot(h.astype(jnp.bfloat16), w_ref[wi],
                       preferred_element_type=jnp.float32)

    def bias(bi):
        return b_ref[bi:bi + 1, :]                               # (1, 128), broadcasts

    def inception(x, w0, b0):
        # stage 1: each branch's BN-folded 1x1 conv (128,128) matmul
        hl = jnp.maximum(dot(x, w0 + 0) + bias(b0 + 0), 0.0)     # branch0 (k=1)
        hr = jnp.maximum(dot(x, w0 + 1) + bias(b0 + 1), 0.0)     # branch1 (k=3 center tap)
        # stage 2: per-branch conv; chunks are pre-placed so branch0 -> lanes [0,CB),
        # branch1 -> lanes [CB,C): a single f32 add realizes the channel concat.
        y = jnp.maximum(dot(hl, w0 + 2) + dot(hr, w0 + 3) + bias(b0 + 2), 0.0)
        # residual_adjust = Identity, Dropout = identity (eval)
        return jnp.maximum(y + x, 0.0)

    x = inception(x, 0, 0)    # inc1
    x = inception(x, 4, 3)    # inc2

    # regressor: (Linear -> Mish) x4 -> Linear; everything zero-padded to 128 lanes,
    # padded lanes stay exactly 0 through Mish (mish(0)=0, zero weights/biases).
    h = x
    for li in range(len(HIDDEN)):
        h = dot(h, 8 + li) + bias(6 + li)
        if li < len(HIDDEN) - 1:
            h = _mish(h)
    out_ref[...] = h          # lane-dense (TB, 128) f32; column 0 = prediction


def affinity_predictor(prot_h, mol_h, wslab, bslab):
    b = prot_h.shape[0]
    assert b % TB == 0
    out = pl.pallas_call(
        affinity_kernel,
        out_shape=jax.ShapeDtypeStruct((b, HP), jnp.float32),
        grid=(b // TB,),
        in_specs=[
            pl.BlockSpec((TB, S_PROT, D_PROT), lambda i: (i, 0, 0)),   # streams with batch
            pl.BlockSpec((TB, S_MOL, D_MOL), lambda i: (i, 0, 0)),     # streams with batch
            pl.BlockSpec((N_WCHUNK, 128, 128), lambda i: (0, 0, 0)),   # weights VMEM-resident
            pl.BlockSpec((N_BROW, 128), lambda i: (0, 0)),             # biases VMEM-resident
        ],
        out_specs=pl.BlockSpec((TB, HP), lambda i: (i, 0)),
        compiler_params=pltpu.CompilerParams(
            dimension_semantics=("parallel",)),                        # megacore on v7x
    )(prot_h, mol_h, wslab, bslab)
    return out[:, :1]                                                  # (B, 1)


# ----------------------------- parameter construction ------------------------------

def init_raw_params(key):
    """Raw (unfused) parameters mirroring the PyTorch module in eval mode."""
    keys = iter(jax.random.split(key, 64))

    def nrm(shape, scale=0.1):
        return scale * jax.random.normal(next(keys), shape, jnp.float32)

    # 4 = (block0-branch0, block0-branch1, block1-branch0, block1-branch1)
    c1w = nrm((4, C, C));   c1b = nrm((4, 1, C))      # 1x1 conv, stored (in, out)
    c2w = nrm((4, C, CB));  c2b = nrm((4, 1, CB))     # center tap of k=1 / k=3 conv

    def make_bn(d):
        gamma = 1.0 + nrm((4, 1, d))
        beta = nrm((4, 1, d))
        mean = nrm((4, 1, d))
        var = 0.5 + jax.random.uniform(next(keys), (4, 1, d), jnp.float32)
        return (gamma, beta, mean, var)

    bn1 = make_bn(C)
    bn2 = make_bn(CB)

    dims = (C,) + HIDDEN
    rws = [nrm((dims[i], dims[i + 1])) for i in range(len(HIDDEN))]
    rbs = [nrm((1, dims[i + 1])) for i in range(len(HIDDEN))]
    return dict(c1w=c1w, c1b=c1b, bn1=bn1, c2w=c2w, c2b=c2b, bn2=bn2, rws=rws, rbs=rbs)


def _fold_bn(w, b, gamma, beta, mean, var):
    scale = gamma * jax.lax.rsqrt(var + EPS)                     # (1, out)
    return w * scale, (b - mean) * scale + beta


def pack_params(p):
    """Fold BN, lay out per-branch chunks, lane-pad the regressor, build the two slabs."""
    g1, bt1, m1, v1 = p['bn1']
    g2, bt2, m2, v2 = p['bn2']
    wchunks, brows = [], []
    for blk in range(2):
        w2h, b2h = [], []
        for br in range(2):
            i = blk * 2 + br
            w1, b1 = _fold_bn(p['c1w'][i], p['c1b'][i], g1[i], bt1[i], m1[i], v1[i])
            w2, b2 = _fold_bn(p['c2w'][i], p['c2b'][i], g2[i], bt2[i], m2[i], v2[i])
            wchunks.append(w1)                                   # (C, C) stage-1 branch
            brows.append(b1)                                     # (1, C)
            w2h.append(w2); b2h.append(b2)
        zero = jnp.zeros((C, CB), jnp.float32)
        wchunks.append(jnp.concatenate([w2h[0], zero], axis=1))  # branch0 -> lanes [0, CB)
        wchunks.append(jnp.concatenate([zero, w2h[1]], axis=1))  # branch1 -> lanes [CB, C)
        brows.append(jnp.concatenate([b2h[0], b2h[1]], axis=1))  # (1, C)

    def pad(w, rows, cols):
        out = jnp.zeros((rows, cols), jnp.float32)
        return out.at[:w.shape[0], :w.shape[1]].set(w)

    for li in range(len(HIDDEN)):
        wchunks.append(pad(p['rws'][li], HP, HP))
        brows.append(pad(p['rbs'][li], 1, HP))

    wslab = jnp.stack(wchunks, axis=0).astype(jnp.bfloat16)      # (13, 128, 128)
    bslab = jnp.concatenate(brows, axis=0)                       # (11, 128) f32
    assert wslab.shape == (N_WCHUNK, 128, 128) and bslab.shape == (N_BROW, 128)
    return wslab, bslab


# ----------------------------------- references ------------------------------------

def reference_packed(prot_h, mol_h, wslab, bslab):
    """Exact mirror of the kernel math (same bf16 operands, f32 accumulation)."""
    def dot(h, wi):
        return jnp.dot(h.astype(jnp.bfloat16), wslab[wi], preferred_element_type=jnp.float32)

    def bias(bi):
        return bslab[bi:bi + 1, :]

    x = jnp.concatenate([jnp.mean(prot_h.astype(jnp.float32), axis=1),
                         jnp.mean(mol_h.astype(jnp.float32), axis=1)], axis=-1)

    def inception(x, w0, b0):
        hl = jnp.maximum(dot(x, w0 + 0) + bias(b0 + 0), 0.0)
        hr = jnp.maximum(dot(x, w0 + 1) + bias(b0 + 1), 0.0)
        y = jnp.maximum(dot(hl, w0 + 2) + dot(hr, w0 + 3) + bias(b0 + 2), 0.0)
        return jnp.maximum(y + x, 0.0)

    x = inception(x, 0, 0)
    x = inception(x, 4, 3)
    h = x
    for li in range(len(HIDDEN)):
        h = dot(h, 8 + li) + bias(6 + li)
        if li < len(HIDDEN) - 1:
            h = _mish(h)
    return h[:, :1]


def reference_f32(prot_h, mol_h, p):
    """Unfused full-precision eval-mode forward (module semantics check)."""
    x = jnp.concatenate([jnp.mean(prot_h.astype(jnp.float32), axis=1),
                         jnp.mean(mol_h.astype(jnp.float32), axis=1)], axis=-1)
    g1, bt1, m1, v1 = p['bn1']
    g2, bt2, m2, v2 = p['bn2']

    def bn(h, g, bt, m, v):
        return (h - m) * jax.lax.rsqrt(v + EPS) * g + bt

    def block(x, blk):
        outs = []
        for br in range(2):
            i = blk * 2 + br
            h = jnp.maximum(bn(x @ p['c1w'][i] + p['c1b'][i], g1[i], bt1[i], m1[i], v1[i]), 0.0)
            h = jnp.maximum(bn(h @ p['c2w'][i] + p['c2b'][i], g2[i], bt2[i], m2[i], v2[i]), 0.0)
            outs.append(h)
        return jnp.maximum(jnp.concatenate(outs, axis=-1) + x, 0.0)

    x = block(x, 0)
    x = block(x, 1)
    h = x
    for li in range(len(HIDDEN)):
        h = h @ p['rws'][li] + p['rbs'][li]
        if li < len(HIDDEN) - 1:
            h = _mish(h)
    return h


if __name__ == "__main__":
    key = jax.random.PRNGKey(0)
    kp, km, kw = jax.random.split(key, 3)
    # synthetic transformer last_hidden_state outputs, fed to the kernel as bf16
    prot_h = jax.random.normal(kp, (B, S_PROT, D_PROT), jnp.float32).astype(jnp.bfloat16)
    mol_h = jax.random.normal(km, (B, S_MOL, D_MOL), jnp.float32).astype(jnp.bfloat16)
    raw = init_raw_params(kw)
    wslab, bslab = pack_params(raw)

    out = jax.block_until_ready(affinity_predictor(prot_h, mol_h, wslab, bslab))
    assert out.shape == (B, 1), out.shape

    # kernel vs exact bf16 mirror (kernel correctness)
    ref_exact = reference_packed(prot_h, mol_h, wslab, bslab)
    assert jnp.allclose(out, ref_exact, rtol=5e-3, atol=5e-3), (out, ref_exact)

    # kernel vs unfused f32 module math (BN folding / chunk layout / padding correctness;
    # looser tolerance for bf16 matmul operands)
    ref_full = reference_f32(prot_h, mol_h, raw)
    assert jnp.allclose(out, ref_full, rtol=5e-2, atol=5e-2), (out, ref_full)

    print("KERNEL_OK")
</pallas_src>

<mosaic_0001>
module attributes {stable_mosaic.version = 11 : i64} {
  func.func @affinity_kernel(%arg0: i32, %arg1: memref<128x8x64xbf16, #tpu.memory_space<vmem>>, %arg2: memref<128x8x64xbf16, #tpu.memory_space<vmem>>, %arg3: memref<13x128x128xbf16, #tpu.memory_space<vmem>>, %arg4: memref<11x128xf32, #tpu.memory_space<vmem>>, %arg5: memref<128x128xf32, #tpu.memory_space<vmem>>) attributes {dimension_semantics = [#tpu.dimension_semantics<parallel>], iteration_bounds = array<i64: 2>, scalar_prefetch = 0 : i64, scratch_operands = 0 : i64, tpu.core_type = #tpu.core_type<tc>, window_params = [{transform_indices = @transform_0, window_bounds = array<i64: 128, 8, 64>}, {transform_indices = @transform_1, window_bounds = array<i64: 128, 8, 64>}, {pipeline_mode = #tpu.pipeline_mode<synchronous>, transform_indices = @transform_2, window_bounds = array<i64: 13, 128, 128>}, {pipeline_mode = #tpu.pipeline_mode<synchronous>, transform_indices = @transform_3, window_bounds = array<i64: 11, 128>}, {transform_indices = @transform_4, window_bounds = array<i64: 128, 128>}]} {
    %c0 = arith.constant 0 : index
    %c0_0 = arith.constant 0 : index
    %c0_1 = arith.constant 0 : index
    %0 = vector.load %arg1[%c0, %c0_0, %c0_1] : memref<128x8x64xbf16, #tpu.memory_space<vmem>>, vector<128x8x64xbf16>
    %1 = arith.extf %0 : vector<128x8x64xbf16> to vector<128x8x64xf32>
    %cst = arith.constant dense<0.000000e+00> : vector<128x64xf32>
    %2 = vector.multi_reduction <add>, %1, %cst [1] : vector<128x8x64xf32> to vector<128x64xf32>
    %cst_2 = arith.constant 8.000000e+00 : f32
    %3 = vector.broadcast %cst_2 : f32 to vector<128x64xf32>
    %4 = arith.divf %2, %3 : vector<128x64xf32>
    %c0_3 = arith.constant 0 : index
    %c0_4 = arith.constant 0 : index
    %c0_5 = arith.constant 0 : index
    %5 = vector.load %arg2[%c0_3, %c0_4, %c0_5] : memref<128x8x64xbf16, #tpu.memory_space<vmem>>, vector<128x8x64xbf16>
    %6 = arith.extf %5 : vector<128x8x64xbf16> to vector<128x8x64xf32>
    %cst_6 = arith.constant dense<0.000000e+00> : vector<128x64xf32>
    %7 = vector.multi_reduction <add>, %6, %cst_6 [1] : vector<128x8x64xf32> to vector<128x64xf32>
    %cst_7 = arith.constant 8.000000e+00 : f32
    %8 = vector.broadcast %cst_7 : f32 to vector<128x64xf32>
    %9 = arith.divf %7, %8 : vector<128x64xf32>
    %10 = tpu.concatenate %4, %9 in 1 : vector<128x64xf32>, vector<128x64xf32> -> vector<128x128xf32>
    %11 = arith.truncf %10 : vector<128x128xf32> to vector<128x128xbf16>
    %c0_8 = arith.constant 0 : index
    %c0_9 = arith.constant 0 : index
    %c0_10 = arith.constant 0 : index
    %12 = vector.load %arg3[%c0_8, %c0_9, %c0_10] : memref<13x128x128xbf16, #tpu.memory_space<vmem>>, vector<1x128x128xbf16>
    %13 = vector.shape_cast %12 : vector<1x128x128xbf16> to vector<128x128xbf16>
    %cst_11 = arith.constant dense<0.000000e+00> : vector<128x128xf32>
    %14 = tpu.matmul %11, %13, %cst_11 {dimension_numbers = #tpu.dot_dimension_numbers<[1], [0], [0], [1], [0, 0, 1, 1], [], []>} : vector<128x128xbf16>, vector<128x128xbf16>, vector<128x128xf32> -> vector<128x128xf32>
    %c0_12 = arith.constant 0 : index
    %c0_13 = arith.constant 0 : index
    %15 = vector.load %arg4[%c0_12, %c0_13] : memref<11x128xf32, #tpu.memory_space<vmem>>, vector<1x128xf32>
    %16 = vector.broadcast %15 : vector<1x128xf32> to vector<128x128xf32>
    %17 = arith.addf %14, %16 : vector<128x128xf32>
    %cst_14 = arith.constant 0.000000e+00 : f32
    %18 = vector.broadcast %cst_14 : f32 to vector<128x128xf32>
    %19 = arith.maximumf %17, %18 : vector<128x128xf32>
    %20 = arith.truncf %10 : vector<128x128xf32> to vector<128x128xbf16>
    %c1 = arith.constant 1 : index
    %c0_15 = arith.constant 0 : index
    %c0_16 = arith.constant 0 : index
    %21 = vector.load %arg3[%c1, %c0_15, %c0_16] : memref<13x128x128xbf16, #tpu.memory_space<vmem>>, vector<1x128x128xbf16>
    %22 = vector.shape_cast %21 : vector<1x128x128xbf16> to vector<128x128xbf16>
    %cst_17 = arith.constant dense<0.000000e+00> : vector<128x128xf32>
    %23 = tpu.matmul %20, %22, %cst_17 {dimension_numbers = #tpu.dot_dimension_numbers<[1], [0], [0], [1], [0, 0, 1, 1], [], []>} : vector<128x128xbf16>, vector<128x128xbf16>, vector<128x128xf32> -> vector<128x128xf32>
    %c1_18 = arith.constant 1 : index
    %c0_19 = arith.constant 0 : index
    %24 = vector.load %arg4[%c1_18, %c0_19] : memref<11x128xf32, #tpu.memory_space<vmem>>, vector<1x128xf32>
    %25 = vector.broadcast %24 : vector<1x128xf32> to vector<128x128xf32>
    %26 = arith.addf %23, %25 : vector<128x128xf32>
    %cst_20 = arith.constant 0.000000e+00 : f32
    %27 = vector.broadcast %cst_20 : f32 to vector<128x128xf32>
    %28 = arith.maximumf %26, %27 : vector<128x128xf32>
    %29 = arith.truncf %19 : vector<128x128xf32> to vector<128x128xbf16>
    %c2 = arith.constant 2 : index
    %c0_21 = arith.constant 0 : index
    %c0_22 = arith.constant 0 : index
    %30 = vector.load %arg3[%c2, %c0_21, %c0_22] : memref<13x128x128xbf16, #tpu.memory_space<vmem>>, vector<1x128x128xbf16>
    %31 = vector.shape_cast %30 : vector<1x128x128xbf16> to vector<128x128xbf16>
    %cst_23 = arith.constant dense<0.000000e+00> : vector<128x128xf32>
    %32 = tpu.matmul %29, %31, %cst_23 {dimension_numbers = #tpu.dot_dimension_numbers<[1], [0], [0], [1], [0, 0, 1, 1], [], []>} : vector<128x128xbf16>, vector<128x128xbf16>, vector<128x128xf32> -> vector<128x128xf32>
    %33 = arith.truncf %28 : vector<128x128xf32> to vector<128x128xbf16>
    %c3 = arith.constant 3 : index
    %c0_24 = arith.constant 0 : index
    %c0_25 = arith.constant 0 : index
    %34 = vector.load %arg3[%c3, %c0_24, %c0_25] : memref<13x128x128xbf16, #tpu.memory_space<vmem>>, vector<1x128x128xbf16>
    %35 = vector.shape_cast %34 : vector<1x128x128xbf16> to vector<128x128xbf16>
    %cst_26 = arith.constant dense<0.000000e+00> : vector<128x128xf32>
    %36 = tpu.matmul %33, %35, %cst_26 {dimension_numbers = #tpu.dot_dimension_numbers<[1], [0], [0], [1], [0, 0, 1, 1], [], []>} : vector<128x128xbf16>, vector<128x128xbf16>, vector<128x128xf32> -> vector<128x128xf32>
    %37 = arith.addf %32, %36 : vector<128x128xf32>
    %c2_27 = arith.constant 2 : index
    %c0_28 = arith.constant 0 : index
    %38 = vector.load %arg4[%c2_27, %c0_28] : memref<11x128xf32, #tpu.memory_space<vmem>>, vector<1x128xf32>
    %39 = vector.broadcast %38 : vector<1x128xf32> to vector<128x128xf32>
    %40 = arith.addf %37, %39 : vector<128x128xf32>
    %cst_29 = arith.constant 0.000000e+00 : f32
    %41 = vector.broadcast %cst_29 : f32 to vector<128x128xf32>
    %42 = arith.maximumf %40, %41 : vector<128x128xf32>
    %43 = arith.addf %42, %10 : vector<128x128xf32>
    %cst_30 = arith.constant 0.000000e+00 : f32
    %44 = vector.broadcast %cst_30 : f32 to vector<128x128xf32>
    %45 = arith.maximumf %43, %44 : vector<128x128xf32>
    %46 = arith.truncf %45 : vector<128x128xf32> to vector<128x128xbf16>
    %c4 = arith.constant 4 : index
    %c0_31 = arith.constant 0 : index
    %c0_32 = arith.constant 0 : index
    %47 = vector.load %arg3[%c4, %c0_31, %c0_32] : memref<13x128x128xbf16, #tpu.memory_space<vmem>>, vector<1x128x128xbf16>
    %48 = vector.shape_cast %47 : vector<1x128x128xbf16> to vector<128x128xbf16>
    %cst_33 = arith.constant dense<0.000000e+00> : vector<128x128xf32>
    %49 = tpu.matmul %46, %48, %cst_33 {dimension_numbers = #tpu.dot_dimension_numbers<[1], [0], [0], [1], [0, 0, 1, 1], [], []>} : vector<128x128xbf16>, vector<128x128xbf16>, vector<128x128xf32> -> vector<128x128xf32>
    %c3_34 = arith.constant 3 : index
    %c0_35 = arith.constant 0 : index
    %50 = vector.load %arg4[%c3_34, %c0_35] : memref<11x128xf32, #tpu.memory_space<vmem>>, vector<1x128xf32>
    %51 = vector.broadcast %50 : vector<1x128xf32> to vector<128x128xf32>
    %52 = arith.addf %49, %51 : vector<128x128xf32>
    %cst_36 = arith.constant 0.000000e+00 : f32
    %53 = vector.broadcast %cst_36 : f32 to vector<128x128xf32>
    %54 = arith.maximumf %52, %53 : vector<128x128xf32>
    %55 = arith.truncf %45 : vector<128x128xf32> to vector<128x128xbf16>
    %c5 = arith.constant 5 : index
    %c0_37 = arith.constant 0 : index
    %c0_38 = arith.constant 0 : index
    %56 = vector.load %arg3[%c5, %c0_37, %c0_38] : memref<13x128x128xbf16, #tpu.memory_space<vmem>>, vector<1x128x128xbf16>
    %57 = vector.shape_cast %56 : vector<1x128x128xbf16> to vector<128x128xbf16>
    %cst_39 = arith.constant dense<0.000000e+00> : vector<128x128xf32>
    %58 = tpu.matmul %55, %57, %cst_39 {dimension_numbers = #tpu.dot_dimension_numbers<[1], [0], [0], [1], [0, 0, 1, 1], [], []>} : vector<128x128xbf16>, vector<128x128xbf16>, vector<128x128xf32> -> vector<128x128xf32>
    %c4_40 = arith.constant 4 : index
    %c0_41 = arith.constant 0 : index
    %59 = vector.load %arg4[%c4_40, %c0_41] : memref<11x128xf32, #tpu.memory_space<vmem>>, vector<1x128xf32>
    %60 = vector.broadcast %59 : vector<1x128xf32> to vector<128x128xf32>
    %61 = arith.addf %58, %60 : vector<128x128xf32>
    %cst_42 = arith.constant 0.000000e+00 : f32
    %62 = vector.broadcast %cst_42 : f32 to vector<128x128xf32>
    %63 = arith.maximumf %61, %62 : vector<128x128xf32>
    %64 = arith.truncf %54 : vector<128x128xf32> to vector<128x128xbf16>
    %c6 = arith.constant 6 : index
    %c0_43 = arith.constant 0 : index
    %c0_44 = arith.constant 0 : index
    %65 = vector.load %arg3[%c6, %c0_43, %c0_44] : memref<13x128x128xbf16, #tpu.memory_space<vmem>>, vector<1x128x128xbf16>
    %66 = vector.shape_cast %65 : vector<1x128x128xbf16> to vector<128x128xbf16>
    %cst_45 = arith.constant dense<0.000000e+00> : vector<128x128xf32>
    %67 = tpu.matmul %64, %66, %cst_45 {dimension_numbers = #tpu.dot_dimension_numbers<[1], [0], [0], [1], [0, 0, 1, 1], [], []>} : vector<128x128xbf16>, vector<128x128xbf16>, vector<128x128xf32> -> vector<128x128xf32>
    %68 = arith.truncf %63 : vector<128x128xf32> to vector<128x128xbf16>
    %c7 = arith.constant 7 : index
    %c0_46 = arith.constant 0 : index
    %c0_47 = arith.constant 0 : index
    %69 = vector.load %arg3[%c7, %c0_46, %c0_47] : memref<13x128x128xbf16, #tpu.memory_space<vmem>>, vector<1x128x128xbf16>
    %70 = vector.shape_cast %69 : vector<1x128x128xbf16> to vector<128x128xbf16>
    %cst_48 = arith.constant dense<0.000000e+00> : vector<128x128xf32>
    %71 = tpu.matmul %68, %70, %cst_48 {dimension_numbers = #tpu.dot_dimension_numbers<[1], [0], [0], [1], [0, 0, 1, 1], [], []>} : vector<128x128xbf16>, vector<128x128xbf16>, vector<128x128xf32> -> vector<128x128xf32>
    %72 = arith.addf %67, %71 : vector<128x128xf32>
    %c5_49 = arith.constant 5 : index
    %c0_50 = arith.constant 0 : index
    %73 = vector.load %arg4[%c5_49, %c0_50] : memref<11x128xf32, #tpu.memory_space<vmem>>, vector<1x128xf32>
    %74 = vector.broadcast %73 : vector<1x128xf32> to vector<128x128xf32>
    %75 = arith.addf %72, %74 : vector<128x128xf32>
    %cst_51 = arith.constant 0.000000e+00 : f32
    %76 = vector.broadcast %cst_51 : f32 to vector<128x128xf32>
    %77 = arith.maximumf %75, %76 : vector<128x128xf32>
    %78 = arith.addf %77, %45 : vector<128x128xf32>
    %cst_52 = arith.constant 0.000000e+00 : f32
    %79 = vector.broadcast %cst_52 : f32 to vector<128x128xf32>
    %80 = arith.maximumf %78, %79 : vector<128x128xf32>
    %81 = arith.truncf %80 : vector<128x128xf32> to vector<128x128xbf16>
    %c8 = arith.constant 8 : index
    %c0_53 = arith.constant 0 : index
    %c0_54 = arith.constant 0 : index
    %82 = vector.load %arg3[%c8, %c0_53, %c0_54] : memref<13x128x128xbf16, #tpu.memory_space<vmem>>, vector<1x128x128xbf16>
    %83 = vector.shape_cast %82 : vector<1x128x128xbf16> to vector<128x128xbf16>
    %cst_55 = arith.constant dense<0.000000e+00> : vector<128x128xf32>
    %84 = tpu.matmul %81, %83, %cst_55 {dimension_numbers = #tpu.dot_dimension_numbers<[1], [0], [0], [1], [0, 0, 1, 1], [], []>} : vector<128x128xbf16>, vector<128x128xbf16>, vector<128x128xf32> -> vector<128x128xf32>
    %c6_56 = arith.constant 6 : index
    %c0_57 = arith.constant 0 : index
    %85 = vector.load %arg4[%c6_56, %c0_57] : memref<11x128xf32, #tpu.memory_space<vmem>>, vector<1x128xf32>
    %86 = vector.broadcast %85 : vector<1x128xf32> to vector<128x128xf32>
    %87 = arith.addf %84, %86 : vector<128x128xf32>
    %cst_58 = arith.constant 0.000000e+00 : f32
    %88 = vector.broadcast %cst_58 : f32 to vector<128x128xf32>
    %89 = arith.maximumf %87, %88 : vector<128x128xf32>
    %90 = math.absf %87 : vector<128x128xf32>
    %cst_59 = arith.constant 0.000000e+00 : f32
    %91 = vector.broadcast %cst_59 : f32 to vector<128x128xf32>
    %92 = arith.subf %91, %90 : vector<128x128xf32>
    %93 = math.exp %92 : vector<128x128xf32>
    %94 = math.log1p %93 : vector<128x128xf32>
    %95 = arith.addf %89, %94 : vector<128x128xf32>
    %96 = math.tanh %95 : vector<128x128xf32>
    %97 = arith.mulf %87, %96 : vector<128x128xf32>
    %98 = arith.truncf %97 : vector<128x128xf32> to vector<128x128xbf16>
    %c9 = arith.constant 9 : index
    %c0_60 = arith.constant 0 : index
    %c0_61 = arith.constant 0 : index
    %99 = vector.load %arg3[%c9, %c0_60, %c0_61] : memref<13x128x128xbf16, #tpu.memory_space<vmem>>, vector<1x128x128xbf16>
    %100 = vector.shape_cast %99 : vector<1x128x128xbf16> to vector<128x128xbf16>
    %cst_62 = arith.constant dense<0.000000e+00> : vector<128x128xf32>
    %101 = tpu.matmul %98, %100, %cst_62 {dimension_numbers = #tpu.dot_dimension_numbers<[1], [0], [0], [1], [0, 0, 1, 1], [], []>} : vector<128x128xbf16>, vector<128x128xbf16>, vector<128x128xf32> -> vector<128x128xf32>
    %c7_63 = arith.constant 7 : index
    %c0_64 = arith.constant 0 : index
    %102 = vector.load %arg4[%c7_63, %c0_64] : memref<11x128xf32, #tpu.memory_space<vmem>>, vector<1x128xf32>
    %103 = vector.broadcast %102 : vector<1x128xf32> to vector<128x128xf32>
    %104 = arith.addf %101, %103 : vector<128x128xf32>
    %cst_65 = arith.constant 0.000000e+00 : f32
    %105 = vector.broadcast %cst_65 : f32 to vector<128x128xf32>
    %106 = arith.maximumf %104, %105 : vector<128x128xf32>
    %107 = math.absf %104 : vector<128x128xf32>
    %cst_66 = arith.constant 0.000000e+00 : f32
    %108 = vector.broadcast %cst_66 : f32 to vector<128x128xf32>
    %109 = arith.subf %108, %107 : vector<128x128xf32>
    %110 = math.exp %109 : vector<128x128xf32>
    %111 = math.log1p %110 : vector<128x128xf32>
    %112 = arith.addf %106, %111 : vector<128x128xf32>
    %113 = math.tanh %112 : vector<128x128xf32>
    %114 = arith.mulf %104, %113 : vector<128x128xf32>
    %115 = arith.truncf %114 : vector<128x128xf32> to vector<128x128xbf16>
    %c10 = arith.constant 10 : index
    %c0_67 = arith.constant 0 : index
    %c0_68 = arith.constant 0 : index
    %116 = vector.load %arg3[%c10, %c0_67, %c0_68] : memref<13x128x128xbf16, #tpu.memory_space<vmem>>, vector<1x128x128xbf16>
    %117 = vector.shape_cast %116 : vector<1x128x128xbf16> to vector<128x128xbf16>
    %cst_69 = arith.constant dense<0.000000e+00> : vector<128x128xf32>
    %118 = tpu.matmul %115, %117, %cst_69 {dimension_numbers = #tpu.dot_dimension_numbers<[1], [0], [0], [1], [0, 0, 1, 1], [], []>} : vector<128x128xbf16>, vector<128x128xbf16>, vector<128x128xf32> -> vector<128x128xf32>
    %c8_70 = arith.constant 8 : index
    %c0_71 = arith.constant 0 : index
    %119 = vector.load %arg4[%c8_70, %c0_71] : memref<11x128xf32, #tpu.memory_space<vmem>>, vector<1x128xf32>
    %120 = vector.broadcast %119 : vector<1x128xf32> to vector<128x128xf32>
    %121 = arith.addf %118, %120 : vector<128x128xf32>
    %cst_72 = arith.constant 0.000000e+00 : f32
    %122 = vector.broadcast %cst_72 : f32 to vector<128x128xf32>
    %123 = arith.maximumf %121, %122 : vector<128x128xf32>
    %124 = math.absf %121 : vector<128x128xf32>
    %cst_73 = arith.constant 0.000000e+00 : f32
    %125 = vector.broadcast %cst_73 : f32 to vector<128x128xf32>
    %126 = arith.subf %125, %124 : vector<128x128xf32>
    %127 = math.exp %126 : vector<128x128xf32>
    %128 = math.log1p %127 : vector<128x128xf32>
    %129 = arith.addf %123, %128 : vector<128x128xf32>
    %130 = math.tanh %129 : vector<128x128xf32>
    %131 = arith.mulf %121, %130 : vector<128x128xf32>
    %132 = arith.truncf %131 : vector<128x128xf32> to vector<128x128xbf16>
    %c11 = arith.constant 11 : index
    %c0_74 = arith.constant 0 : index
    %c0_75 = arith.constant 0 : index
    %133 = vector.load %arg3[%c11, %c0_74, %c0_75] : memref<13x128x128xbf16, #tpu.memory_space<vmem>>, vector<1x128x128xbf16>
    %134 = vector.shape_cast %133 : vector<1x128x128xbf16> to vector<128x128xbf16>
    %cst_76 = arith.constant dense<0.000000e+00> : vector<128x128xf32>
    %135 = tpu.matmul %132, %134, %cst_76 {dimension_numbers = #tpu.dot_dimension_numbers<[1], [0], [0], [1], [0, 0, 1, 1], [], []>} : vector<128x128xbf16>, vector<128x128xbf16>, vector<128x128xf32> -> vector<128x128xf32>
    %c9_77 = arith.constant 9 : index
    %c0_78 = arith.constant 0 : index
    %136 = vector.load %arg4[%c9_77, %c0_78] : memref<11x128xf32, #tpu.memory_space<vmem>>, vector<1x128xf32>
    %137 = vector.broadcast %136 : vector<1x128xf32> to vector<128x128xf32>
    %138 = arith.addf %135, %137 : vector<128x128xf32>
    %cst_79 = arith.constant 0.000000e+00 : f32
    %139 = vector.broadcast %cst_79 : f32 to vector<128x128xf32>
    %140 = arith.maximumf %138, %139 : vector<128x128xf32>
    %141 = math.absf %138 : vector<128x128xf32>
    %cst_80 = arith.constant 0.000000e+00 : f32
    %142 = vector.broadcast %cst_80 : f32 to vector<128x128xf32>
    %143 = arith.subf %142, %141 : vector<128x128xf32>
    %144 = math.exp %143 : vector<128x128xf32>
    %145 = math.log1p %144 : vector<128x128xf32>
    %146 = arith.addf %140, %145 : vector<128x128xf32>
    %147 = math.tanh %146 : vector<128x128xf32>
    %148 = arith.mulf %138, %147 : vector<128x128xf32>
    %149 = arith.truncf %148 : vector<128x128xf32> to vector<128x128xbf16>
    %c12 = arith.constant 12 : index
    %c0_81 = arith.constant 0 : index
    %c0_82 = arith.constant 0 : index
    %150 = vector.load %arg3[%c12, %c0_81, %c0_82] : memref<13x128x128xbf16, #tpu.memory_space<vmem>>, vector<1x128x128xbf16>
    %151 = vector.shape_cast %150 : vector<1x128x128xbf16> to vector<128x128xbf16>
    %cst_83 = arith.constant dense<0.000000e+00> : vector<128x128xf32>
    %152 = tpu.matmul %149, %151, %cst_83 {dimension_numbers = #tpu.dot_dimension_numbers<[1], [0], [0], [1], [0, 0, 1, 1], [], []>} : vector<128x128xbf16>, vector<128x128xbf16>, vector<128x128xf32> -> vector<128x128xf32>
    %c10_84 = arith.constant 10 : index
    %c0_85 = arith.constant 0 : index
    %153 = vector.load %arg4[%c10_84, %c0_85] : memref<11x128xf32, #tpu.memory_space<vmem>>, vector<1x128xf32>
    %154 = vector.broadcast %153 : vector<1x128xf32> to vector<128x128xf32>
    %155 = arith.addf %152, %154 : vector<128x128xf32>
    %c0_86 = arith.constant 0 : index
    %c0_87 = arith.constant 0 : index
    %156 = vector.load %arg5[%c0_86, %c0_87] : memref<128x128xf32, #tpu.memory_space<vmem>>, vector<128x128xf32>
    tpu.vector_store %arg5[%c0_86, %c0_87], %155 {strides = array<i32>} : memref<128x128xf32, #tpu.memory_space<vmem>>, vector<128x128xf32>,
    return
  }
  func.func @transform_0(%arg0: i32) -> (i32, i32, i32) {
    %c0_i32 = arith.constant 0 : i32
    %c0_i32_0 = arith.constant 0 : i32
    %c0_i32_1 = arith.constant 0 : i32
    return %arg0, %c0_i32, %c0_i32_0 : i32, i32, i32
  }
  func.func @transform_1(%arg0: i32) -> (i32, i32, i32) {
    %c0_i32 = arith.constant 0 : i32
    %c0_i32_0 = arith.constant 0 : i32
    %c0_i32_1 = arith.constant 0 : i32
    return %arg0, %c0_i32, %c0_i32_0 : i32, i32, i32
  }
  func.func @transform_2(%arg0: i32) -> (i32, i32, i32) {
    %c0_i32 = arith.constant 0 : i32
    %c0_i32_0 = arith.constant 0 : i32
    %c0_i32_1 = arith.constant 0 : i32
    %c0_i32_2 = arith.constant 0 : i32
    return %c0_i32, %c0_i32_0, %c0_i32_1 : i32, i32, i32
  }
  func.func @transform_3(%arg0: i32) -> (i32, i32) {
    %c0_i32 = arith.constant 0 : i32
    %c0_i32_0 = arith.constant 0 : i32
    %c0_i32_1 = arith.constant 0 : i32
    return %c0_i32, %c0_i32_0 : i32, i32
  }
  func.func @transform_4(%arg0: i32) -> (i32, i32) {
    %c0_i32 = arith.constant 0 : i32
    %c0_i32_0 = arith.constant 0 : i32
    return %arg0, %c0_i32 : i32, i32
  }
}

</mosaic_0001>

<bundles_post_ra>
// kernel: tpu_custom_call.1
= control target key start
LH: loop header
LB: loop body
LE: loop exit
PB: predicated region body
PF: predicated region fallthrough
CT: control target
= control target key end

     0   :  { %9 = vsyncpa [#allocation3], 0  ;;  %s11422_s0 = inlined_call_operand.vmem [shape: bf16[256,8,64], index: 0, kind: input, shape index: {}]   ;;  %s11423_s1 = inlined_call_operand.vmem [shape: bf16[256,8,64], index: 1, kind: input, shape index: {}]   ;;  %s11424_s2 = inlined_call_operand.vmem [shape: bf16[13,128,128], index: 2, kind: input, shape index: {}]   ;;  %s11425_s3 = inlined_call_operand.vmem [shape: f32[11,128], index: 3, kind: input, shape index: {}]   ;;  %s11426_s4 = inlined_call_operand.hbm [shape: f32[256,128], index: 4, kind: output, shape index: {}]  }
   0x1   :  { %11 = vsyncpa [#allocation3 + $0x1], 0  ;;  %s9238_s15 = smov 0   ;;  %s9240_s16 = smov 0  }
   0x2   :  { %s9242_s17 = smov 0   ;;  %s9244_s18 = smov 0  }
   0x3 LB: > { %s9259_s19 = sadd.s32 4294967295, %s9207_s18   ;;  %s6983_s20 = sadd.s32 4294967294, %s9207_s18   ;;  %s9207_s18 = sphi %s9244_s18, %s11490_s18   ;;  %s9203_s17 = sphi %s9242_s17, %s11489_s17   ;;  %s9199_s16 = sphi %s9240_s16, %s11488_s16   ;;  %s9195_s15 = sphi %s9238_s15, %s11487_s15  }
   0x4   : > { %s9263_s21 = sadd.s32 1, %s9207_s18   ;;  %s118_s22 = sadd.s32 1, %s9203_s17 }
   0x5   : > { %s115_s23 = ssub.s32 %s9207_s18, %s9263_s21  ;;  %p128_p0 = scmp.ne.s32.totalorder %s9203_s17, %s9199_s16 }
   0x6   : > { %p116_p1 = scmp.eq.s32.totalorder %s115_s23, 0  ;;  %p129_p2 = scmp.eq.s32.totalorder %s9259_s19, 1 }
   0x7   : > { %p134_p3 = scmp.ne.s32.totalorder %s9199_s16, %s9195_s15  ;;  %p135_p4 = scmp.eq.s32.totalorder %s6983_s20, 1 }
   0x8   : > { %s9274_s24 = scalar_select %p116_p1, %s9203_s17, %s118_s22  }
   0x9   : > { %p9276_p5 = por %p129_p2, %p128_p0  ;;  %p9280_p6 = por %p135_p4, %p134_p3 }
   0xa   : > { %p6986_p7 = scmp.ge.s32.totalorder %s9207_s18, 1  ;;  %p177_p8 = scmp.lt.s32.totalorder %s9207_s18, 3 }
   0xc   : > { %p178_p9 = pnand %p6986_p7, %p177_p8 }
   0xd   : > { %s6988_s27 = sshll.u32 (!%p178_p9), %s9259_s19, 7  ;;  %vm478_vm0 = vcmask (!%p178_p9), 523264   ;;  %vm2912_vm1 = vcmask (!%p178_p9), 1041409   ;;  %vm2914_vm2 = vcmask (!%p178_p9), 1042434   ;;  %vm2916_vm3 = vcmask (!%p178_p9), 1043459   ;;  %s9209_s6 = smov (!%p178_p9), 64  }
   0xe   : > { %181 = sbr.rel (%p178_p9) target bundleno = 3014 (0xbc6), region = 36  ;;  %p209_p10 = scmp.lt.s32.totalorder (!%p178_p9), %s6988_s27, 255  ;;  %vm2918_vm4 = vcmask (!%p178_p9), 1044484   ;;  %vm2920_vm5 = vcmask (!%p178_p9), 1045509   ;;  %vm2922_vm6 = vcmask (!%p178_p9), 1046534   ;;  %vm2924_vm7 = vcmask (!%p178_p9), 1047559  }
   0xf   : > { %s205_s8 = sand.u32 (!%p178_p9), 1, %s9199_s16   ;;  %s9210_s20 = smov (!%p178_p9), [#allocation2]  }
  0x10   : > { %s6987_s9 = sshll.u32 (!%p178_p9), %s205_s8, 7  ;;  %s9149_s22 = sshll.u32 (!%p178_p9), %s9210_s20, 4  ;;  %s9150_s22 = int_to_ptr.vmem [resolvable:$false] %s9149_s22 }
  0x11   : > { %s11352_s12 = scalar_lea.vmem (!%p178_p9), [#allocation2], %s6987_s9  ;;  %s9151_s23 = scalar_lea.vmem (!%p178_p9), %s9150_s22, 4096 }
  0x12   : > { %s6909_s13 = sshll.u32 (!%p178_p9), %s11352_s12, 4  ;;  %s11374_s13 = int_to_ptr.vmem [resolvable:$true] %s6909_s13 }
  0x13   : > { %p9152_p0 = scmp.lt.s32.totalorder (!%p178_p9), %s11374_s13, %s9150_s22 }
  0x15   : > { %s11492_s27 = smov (!%p209_p10, %s6988_s27), 255 }
  0x16   : > { %s6989_s28 = sshll.u32 %s11492_s27, 2 }
  0x17   : > { %s9295_s5 = scalar_lea.vmem %s11423_s1, %s6989_s28  ;;  %s9662_s14 = scalar_lea.vmem %s11422_s0, %s6989_s28 }
  0x18   : > { %v7887_v0 = vld [vmem:[%s9295_s5 + $0x40] sm:$0xff]   ;;  %v7888_v1 = vld [vmem:[%s9295_s5 + $0x48] sm:$0xff]   ;;  %v7889_v2 = vld [vmem:[%s9295_s5 + $0x50] sm:$0xff]  }
  0x19   : > { %v7595_v3 = vunpack.c.l.bf16 %v7887_v0  ;;  %v7596_v4 = vunpack.c.h.bf16 %v7887_v0  ;;  %v7599_v5 = vunpack.c.l.bf16 %v7888_v1  ;;  %v7600_v6 = vunpack.c.h.bf16 %v7888_v1  ;;  %v7890_v7 = vld [vmem:[%s9295_s5 + $0x58] sm:$0xff]   ;;  %v7562_v56 = vld [vmem:[%s9295_s5] sm:$0xff]   ;;  %v7880_v61 = vld [vmem:[%s9295_s5 + $0x8] sm:$0xff]  }
  0x1a   : > { %v7603_v8 = vunpack.c.l.bf16 %v7889_v2  ;;  %v7604_v9 = vunpack.c.h.bf16 %v7889_v2  ;;  %v7607_v10 = vunpack.c.l.bf16 %v7890_v7  ;;  %v7608_v11 = vunpack.c.h.bf16 %v7890_v7  ;;  %v7881_v2 = vld [vmem:[%s9295_s5 + $0x10] sm:$0xff]   ;;  %v7882_v7 = vld [vmem:[%s9295_s5 + $0x18] sm:$0xff]  }
  0x1b   : > { %v1872_v12 = vsel %vm478_vm0, %v7595_v3, 0.0  ;;  %v1879_v13 = vsel %vm478_vm0, %v7596_v4, 0.0  ;;  %v1886_v14 = vsel %vm478_vm0, %v7599_v5, 0.0  ;;  %v1893_v15 = vsel %vm478_vm0, %v7600_v6, 0.0 }
  0x1c   : > { %v1873_v16 = vrot.slane %v1872_v12, 4  ;;  %v1880_v17 = vrot.slane %v1879_v13, 4  ;;  %v1887_v18 = vrot.slane %v1886_v14, 4  ;;  %v1894_v19 = vrot.slane %v1893_v15, 4 }
  0x1d   : > { %v1900_v20 = vsel %vm478_vm0, %v7603_v8, 0.0  ;;  %v1907_v21 = vsel %vm478_vm0, %v7604_v9, 0.0  ;;  %v1914_v22 = vsel %vm478_vm0, %v7607_v10, 0.0  ;;  %v1921_v23 = vsel %vm478_vm0, %v7608_v11, 0.0 }
  0x1e   : > { %v1874_v24 = vadd.f32 %v1873_v16, %v1872_v12  ;;  %v1881_v25 = vadd.f32 %v1880_v17, %v1879_v13  ;;  %v1888_v26 = vadd.f32 %v1887_v18, %v1886_v14  ;;  %v1895_v27 = vadd.f32 %v1894_v19, %v1893_v15 }
  0x1f   : > { %v1901_v28 = vrot.slane %v1900_v20, 4  ;;  %v1908_v29 = vrot.slane %v1907_v21, 4  ;;  %v1915_v30 = vrot.slane %v1914_v22, 4  ;;  %v1922_v31 = vrot.slane %v1921_v23, 4 }
  0x20   : > { %v1875_v32 = vrot.slane %v1874_v24, 2  ;;  %v1882_v33 = vrot.slane %v1881_v25, 2  ;;  %v1889_v34 = vrot.slane %v1888_v26, 2  ;;  %v1896_v35 = vrot.slane %v1895_v27, 2 }
  0x21   : > { %v1902_v36 = vadd.f32 %v1901_v28, %v1900_v20  ;;  %v1909_v37 = vadd.f32 %v1908_v29, %v1907_v21  ;;  %v1916_v38 = vadd.f32 %v1915_v30, %v1914_v22  ;;  %v1923_v39 = vadd.f32 %v1922_v31, %v1921_v23 }
  0x22   : > { %v1876_v40 = vadd.f32 %v1875_v32, %v1874_v24  ;;  %v1883_v41 = vadd.f32 %v1882_v33, %v1881_v25  ;;  %v1890_v42 = vadd.f32 %v1889_v34, %v1888_v26  ;;  %v1897_v43 = vadd.f32 %v1896_v35, %v1895_v27 }
  0x23   : > { %v1903_v44 = vrot.slane %v1902_v36, 2  ;;  %v1910_v45 = vrot.slane %v1909_v37, 2  ;;  %v1917_v46 = vrot.slane %v1916_v38, 2  ;;  %v1924_v47 = vrot.slane %v1923_v39, 2 }
  0x24   : > { %v1877_v48 = vrot.slane %v1876_v40, 1  ;;  %v1884_v49 = vrot.slane %v1883_v41, 1  ;;  %v1891_v50 = vrot.slane %v1890_v42, 1  ;;  %v1898_v51 = vrot.slane %v1897_v43, 1 }
  0x25   : > { %v1904_v52 = vadd.f32 %v1903_v44, %v1902_v36  ;;  %v1911_v53 = vadd.f32 %v1910_v45, %v1909_v37  ;;  %v1918_v54 = vadd.f32 %v1917_v46, %v1916_v38  ;;  %v1925_v55 = vadd.f32 %v1924_v47, %v1923_v39 }
  0x26   : > { %v1878_v57 = vadd.f32 %v1877_v48, %v1876_v40  ;;  %v1885_v58 = vadd.f32 %v1884_v49, %v1883_v41  ;;  %v1892_v59 = vadd.f32 %v1891_v50, %v1890_v42  ;;  %v1899_v60 = vadd.f32 %v1898_v51, %v1897_v43 }
  0x27   : > { %v1905_v62 = vrot.slane %v1904_v52, 1  ;;  %v1912_v63 = vrot.slane %v1911_v53, 1  ;;  %v1919_v0 = vrot.slane %v1918_v54, 1  ;;  %v1926_v1 = vrot.slane %v1925_v55, 1 }
  0x28   : > { %v2672_v3 = vmul.f32 0.125, %v1878_v57  ;;  %v2673_v4 = vmul.f32 0.125, %v1885_v58  ;;  %v2674_v5 = vmul.f32 0.125, %v1892_v59  ;;  %v2675_v6 = vmul.f32 0.125, %v1899_v60 }
  0x29   : > { %v1906_v8 = vadd.f32 %v1905_v62, %v1904_v52  ;;  %v1913_v9 = vadd.f32 %v1912_v63, %v1911_v53  ;;  %v1920_v10 = vadd.f32 %v1919_v0, %v1918_v54  ;;  %v1927_v11 = vadd.f32 %v1926_v1, %v1925_v55 }
  0x2a   : > { %v3189_v12 = vsel %vm2912_vm1, %v2673_v4, %v2672_v3  ;;  %v7563_v13 = vunpack.c.l.bf16 %v7562_v56  ;;  %v7564_v14 = vunpack.c.h.bf16 %v7562_v56  ;;  %v7567_v15 = vunpack.c.l.bf16 %v7880_v61  ;;  %v7891_v4 = vld [vmem:[%s9295_s5 + $0x60] sm:$0xff]  }
  0x2b   : > { %v2676_v16 = vmul.f32 0.125, %v1906_v8  ;;  %v2677_v17 = vmul.f32 0.125, %v1913_v9  ;;  %v2678_v18 = vmul.f32 0.125, %v1920_v10  ;;  %v2679_v19 = vmul.f32 0.125, %v1927_v11 }
  0x2c   : > { %v3190_v20 = vsel %vm2914_vm2, %v2674_v5, %v3189_v12  ;;  %v7568_v21 = vunpack.c.h.bf16 %v7880_v61  ;;  %v7571_v22 = vunpack.c.l.bf16 %v7881_v2  ;;  %v7572_v23 = vunpack.c.h.bf16 %v7881_v2 }
  0x2d   : > { %v3191_v24 = vsel %vm2916_vm3, %v2675_v6, %v3190_v20  ;;  %v7575_v25 = vunpack.c.l.bf16 %v7882_v7  ;;  %v7576_v26 = vunpack.c.h.bf16 %v7882_v7  ;;  %v1760_v27 = vsel %vm478_vm0, %v7563_v13, 0.0  ;;  %v7892_v13 = vld [vmem:[%s9295_s5 + $0x68] sm:$0xff]  }
  0x2e   : > { %v3192_v28 = vsel %vm2918_vm4, %v2676_v16, %v3191_v24  ;;  %v1761_v29 = vrot.slane %v1760_v27, 4  ;;  %v1767_v30 = vsel %vm478_vm0, %v7564_v14, 0.0  ;;  %v1774_v31 = vsel %vm478_vm0, %v7567_v15, 0.0 }
  0x2f   : > { %v3193_v32 = vsel %vm2920_vm5, %v2677_v17, %v3192_v28  ;;  %v1768_v33 = vrot.slane %v1767_v30, 4  ;;  %v1775_v34 = vrot.slane %v1774_v31, 4  ;;  %v1781_v35 = vsel %vm478_vm0, %v7568_v21, 0.0 }
  0x30   : > { %v3194_v36 = vsel %vm2922_vm6, %v2678_v18, %v3193_v32  ;;  %v1762_v37 = vadd.f32 %v1761_v29, %v1760_v27  ;;  %v1782_v38 = vrot.slane %v1781_v35, 4  ;;  %v1788_v39 = vsel %vm478_vm0, %v7571_v22, 0.0  ;;  %v7893_v22 = vld [vmem:[%s9295_s5 + $0x70] sm:$0xff]  }
  0x31   : > { %v3195_v40 = vsel %vm2924_vm7, %v2679_v19, %v3194_v36  ;;  %v1769_v41 = vadd.f32 %v1768_v33, %v1767_v30  ;;  %v1776_v42 = vadd.f32 %v1775_v34, %v1774_v31  ;;  %v1789_v43 = vrot.slane %v1788_v39, 4 }
  0x32   : > { %3291 = vrot.lane.b32.xlu1 %v3195_v40, %s9209_s6  ;;  %v1763_v44 = vrot.slane %v1762_v37, 2  ;;  %v1783_v45 = vadd.f32 %v1782_v38, %v1781_v35  ;;  %v1795_v46 = vsel %vm478_vm0, %v7572_v23, 0.0  ;;  %v1802_v47 = vsel %vm478_vm0, %v7575_v25, 0.0  ;;  %v7894_v35 = vld [vmem:[%s9295_s5 + $0x78] sm:$0xff]  }
  0x33   : > { %v1770_v48 = vrot.slane %v1769_v41, 2  ;;  %v1777_v49 = vrot.slane %v1776_v42, 2  ;;  %v1790_v50 = vadd.f32 %v1789_v43, %v1788_v39  ;;  %v1796_v51 = vrot.slane %v1795_v46, 4 }
  0x34   : > { %v1764_v52 = vadd.f32 %v1763_v44, %v1762_v37  ;;  %v1784_v53 = vrot.slane %v1783_v45, 2  ;;  %v1803_v54 = vrot.slane %v1802_v47, 4  ;;  %v1809_v55 = vsel %vm478_vm0, %v7576_v26, 0.0 }
  0x35   : > { %v1771_v56 = vadd.f32 %v1770_v48, %v1769_v41  ;;  %v1778_v57 = vadd.f32 %v1777_v49, %v1776_v42  ;;  %v1791_v58 = vrot.slane %v1790_v50, 2  ;;  %v1797_v59 = vadd.f32 %v1796_v51, %v1795_v46 }
  0x36   : > { %v1765_v60 = vrot.slane %v1764_v52, 1  ;;  %v1785_v61 = vadd.f32 %v1784_v53, %v1783_v45  ;;  %v1804_v62 = vadd.f32 %v1803_v54, %v1802_v47  ;;  %v1810_v63 = vrot.slane %v1809_v55, 4 }
  0x37   : > { %v1772_v0 = vrot.slane %v1771_v56, 1  ;;  %v1779_v1 = vrot.slane %v1778_v57, 1  ;;  %v1792_v2 = vadd.f32 %v1791_v58, %v1790_v50  ;;  %v1798_v3 = vrot.slane %v1797_v59, 2 }
  0x38   : > { %v1766_v5 = vadd.f32 %v1765_v60, %v1764_v52  ;;  %v1786_v6 = vrot.slane %v1785_v61, 1  ;;  %v1805_v7 = vrot.slane %v1804_v62, 2  ;;  %v1811_v8 = vadd.f32 %v1810_v63, %v1809_v55 }
  0x39   : > { %v1773_v9 = vadd.f32 %v1772_v0, %v1771_v56  ;;  %v1780_v10 = vadd.f32 %v1779_v1, %v1778_v57  ;;  %v1793_v11 = vrot.slane %v1792_v2, 1  ;;  %v1799_v12 = vadd.f32 %v1798_v3, %v1797_v59 }
  0x3a   : > { %v1787_v14 = vadd.f32 %v1786_v6, %v1785_v61  ;;  %v1806_v15 = vadd.f32 %v1805_v7, %v1804_v62  ;;  %v1812_v16 = vrot.slane %v1811_v8, 2  ;;  %v2656_v17 = vmul.f32 0.125, %v1766_v5 }
  0x3b   : > { %v1794_v18 = vadd.f32 %v1793_v11, %v1792_v2  ;;  %v1800_v19 = vrot.slane %v1799_v12, 1  ;;  %v2657_v20 = vmul.f32 0.125, %v1773_v9  ;;  %v2658_v21 = vmul.f32 0.125, %v1780_v10 }
  0x3c   : > { %v1807_v23 = vrot.slane %v1806_v15, 1  ;;  %v1813_v24 = vadd.f32 %v1812_v16, %v1811_v8  ;;  %v2659_v25 = vmul.f32 0.125, %v1787_v14  ;;  %v7611_v26 = vunpack.c.l.bf16 %v7891_v4 }
  0x3d   : > { %v1801_v27 = vadd.f32 %v1800_v19, %v1799_v12  ;;  %v2660_v28 = vmul.f32 0.125, %v1794_v18  ;;  %v3175_v29 = vsel %vm2912_vm1, %v2657_v20, %v2656_v17  ;;  %v7612_v30 = vunpack.c.h.bf16 %v7891_v4 }
  0x3e   : > { %v1808_v31 = vadd.f32 %v1807_v23, %v1806_v15  ;;  %v1814_v32 = vrot.slane %v1813_v24, 1  ;;  %v3176_v33 = vsel %vm2914_vm2, %v2658_v21, %v3175_v29  ;;  %v7615_v34 = vunpack.c.l.bf16 %v7892_v13 }
  0x3f   : > { %v2661_v36 = vmul.f32 0.125, %v1801_v27  ;;  %v3177_v37 = vsel %vm2916_vm3, %v2659_v25, %v3176_v33  ;;  %v7616_v38 = vunpack.c.h.bf16 %v7892_v13  ;;  %v7619_v39 = vunpack.c.l.bf16 %v7893_v22 }
  0x40   : > { %v1815_v40 = vadd.f32 %v1814_v32, %v1813_v24  ;;  %v2662_v41 = vmul.f32 0.125, %v1808_v31  ;;  %v3178_v42 = vsel %vm2918_vm4, %v2660_v28, %v3177_v37  ;;  %v7620_v43 = vunpack.c.h.bf16 %v7893_v22  ;;  %v7883_v32 = vld [vmem:[%s9295_s5 + $0x20] sm:$0xff]   ;;  %v7884_v37 = vld [vmem:[%s9295_s5 + $0x28] sm:$0xff]  }
  0x41   : > { %v3179_v44 = vsel %vm2920_vm5, %v2661_v36, %v3178_v42  ;;  %v7623_v45 = vunpack.c.l.bf16 %v7894_v35  ;;  %v7624_v46 = vunpack.c.h.bf16 %v7894_v35  ;;  %v1928_v47 = vsel %vm478_vm0, %v7611_v26, 0.0  ;;  %v7885_v42 = vld [vmem:[%s9295_s5 + $0x30] sm:$0xff]  }
  0x42   : > { %v2663_v48 = vmul.f32 0.125, %v1815_v40  ;;  %v3180_v49 = vsel %vm2922_vm6, %v2662_v41, %v3179_v44  ;;  %v1929_v50 = vrot.slane %v1928_v47, 4  ;;  %v1935_v51 = vsel %vm478_vm0, %v7612_v30, 0.0 }
  0x43   : > { %v1936_v52 = vrot.slane %v1935_v51, 4  ;;  %v1942_v53 = vsel %vm478_vm0, %v7615_v34, 0.0  ;;  %v1949_v54 = vsel %vm478_vm0, %v7616_v38, 0.0  ;;  %v1956_v55 = vsel %vm478_vm0, %v7619_v39, 0.0 }
  0x44   : > { %v3181_v56 = vsel %vm2924_vm7, %v2663_v48, %v3180_v49  ;;  %v1930_v57 = vadd.f32 %v1929_v50, %v1928_v47  ;;  %v1943_v58 = vrot.slane %v1942_v53, 4  ;;  %v1950_v59 = vrot.slane %v1949_v54, 4 }
  0x45   : > { %3287 = vrot.lane.b32.xlu0 %v3181_v56, %s9209_s6  ;;  %v1937_v60 = vadd.f32 %v1936_v52, %v1935_v51  ;;  %v1957_v61 = vrot.slane %v1956_v55, 4  ;;  %v1963_v62 = vsel %vm478_vm0, %v7620_v43, 0.0  ;;  %v1970_v63 = vsel %vm478_vm0, %v7623_v45, 0.0  ;;  %v7886_v43 = vld [vmem:[%s9295_s5 + $0x38] sm:$0xff]  }
  0x46   : > { %v1931_v0 = vrot.slane %v1930_v57, 2  ;;  %v1944_v1 = vadd.f32 %v1943_v58, %v1942_v53  ;;  %v1951_v2 = vadd.f32 %v1950_v59, %v1949_v54  ;;  %v1964_v3 = vrot.slane %v1963_v62, 4 }
  0x47   : > { %v1938_v4 = vrot.slane %v1937_v60, 2  ;;  %v1958_v5 = vadd.f32 %v1957_v61, %v1956_v55  ;;  %v1971_v6 = vrot.slane %v1970_v63, 4  ;;  %v1977_v7 = vsel %vm478_vm0, %v7624_v46, 0.0 }
  0x48   : > { %v1932_v8 = vadd.f32 %v1931_v0, %v1930_v57  ;;  %v1945_v9 = vrot.slane %v1944_v1, 2  ;;  %v1952_v10 = vrot.slane %v1951_v2, 2  ;;  %v1965_v11 = vadd.f32 %v1964_v3, %v1963_v62 }
  0x49   : > { %v1939_v12 = vadd.f32 %v1938_v4, %v1937_v60  ;;  %v1959_v13 = vrot.slane %v1958_v5, 2  ;;  %v1972_v14 = vadd.f32 %v1971_v6, %v1970_v63  ;;  %v1978_v15 = vrot.slane %v1977_v7, 4 }
  0x4a   : > { %v1933_v16 = vrot.slane %v1932_v8, 1  ;;  %v1946_v17 = vadd.f32 %v1945_v9, %v1944_v1  ;;  %v1953_v18 = vadd.f32 %v1952_v10, %v1951_v2  ;;  %v1966_v19 = vrot.slane %v1965_v11, 2 }
  0x4b   : > { %v1940_v20 = vrot.slane %v1939_v12, 1  ;;  %v1960_v21 = vadd.f32 %v1959_v13, %v1958_v5  ;;  %v1973_v22 = vrot.slane %v1972_v14, 2  ;;  %v1979_v23 = vadd.f32 %v1978_v15, %v1977_v7 }
  0x4c   : > { %v1934_v24 = vadd.f32 %v1933_v16, %v1932_v8  ;;  %v1947_v25 = vrot.slane %v1946_v17, 1  ;;  %v1954_v26 = vrot.slane %v1953_v18, 1  ;;  %v1967_v27 = vadd.f32 %v1966_v19, %v1965_v11 }
  0x4d   : > { %v1941_v28 = vadd.f32 %v1940_v20, %v1939_v12  ;;  %v1961_v29 = vrot.slane %v1960_v21, 1  ;;  %v1974_v30 = vadd.f32 %v1973_v22, %v1972_v14  ;;  %v1980_v31 = vrot.slane %v1979_v23, 2 }
  0x4e   : > { %v1948_v33 = vadd.f32 %v1947_v25, %v1946_v17  ;;  %v1955_v34 = vadd.f32 %v1954_v26, %v1953_v18  ;;  %v1968_v35 = vrot.slane %v1967_v27, 1  ;;  %v2680_v36 = vmul.f32 0.125, %v1934_v24 }
  0x4f   : > { %v1962_v38 = vadd.f32 %v1961_v29, %v1960_v21  ;;  %v1975_v39 = vrot.slane %v1974_v30, 1  ;;  %v1981_v40 = vadd.f32 %v1980_v31, %v1979_v23  ;;  %v2681_v41 = vmul.f32 0.125, %v1941_v28 }
  0x50   : > { %v1969_v44 = vadd.f32 %v1968_v35, %v1967_v27  ;;  %v2682_v45 = vmul.f32 0.125, %v1948_v33  ;;  %v2683_v46 = vmul.f32 0.125, %v1955_v34  ;;  %v7579_v47 = vunpack.c.l.bf16 %v7883_v32 }
  0x51   : > { %v1976_v48 = vadd.f32 %v1975_v39, %v1974_v30  ;;  %v1982_v49 = vrot.slane %v1981_v40, 1  ;;  %v2684_v50 = vmul.f32 0.125, %v1962_v38  ;;  %v3196_v51 = vsel %vm2912_vm1, %v2681_v41, %v2680_v36 }
  0x52   : > { %v2685_v52 = vmul.f32 0.125, %v1969_v44  ;;  %v3197_v53 = vsel %vm2914_vm2, %v2682_v45, %v3196_v51  ;;  %v7580_v54 = vunpack.c.h.bf16 %v7883_v32  ;;  %v7583_v55 = vunpack.c.l.bf16 %v7884_v37 }
  0x53   : > { %v1983_v56 = vadd.f32 %v1982_v49, %v1981_v40  ;;  %v2686_v57 = vmul.f32 0.125, %v1976_v48  ;;  %v3198_v58 = vsel %vm2916_vm3, %v2683_v46, %v3197_v53  ;;  %v7584_v59 = vunpack.c.h.bf16 %v7884_v37  ;;  %v7899_v48 = vld [vmem:[%s9295_s5 + $0xa0] sm:$0xff]   ;;  %v7900_v53 = vld [vmem:[%s9295_s5 + $0xa8] sm:$0xff]  }
  0x54   : > { %v3199_v60 = vsel %vm2918_vm4, %v2684_v50, %v3198_v58  ;;  %v7587_v61 = vunpack.c.l.bf16 %v7885_v42  ;;  %v7588_v62 = vunpack.c.h.bf16 %v7885_v42  ;;  %v7591_v63 = vunpack.c.l.bf16 %v7886_v43  ;;  %v7901_v58 = vld [vmem:[%s9295_s5 + $0xb0] sm:$0xff]  }
  0x55   : > { %v2687_v0 = vmul.f32 0.125, %v1983_v56  ;;  %v3200_v1 = vsel %vm2920_vm5, %v2685_v52, %v3199_v60  ;;  %v7592_v2 = vunpack.c.h.bf16 %v7886_v43  ;;  %v1816_v3 = vsel %vm478_vm0, %v7579_v47, 0.0 }
  0x56   : > { %v3201_v4 = vsel %vm2922_vm6, %v2686_v57, %v3200_v1  ;;  %v1817_v5 = vrot.slane %v1816_v3, 4  ;;  %v1823_v6 = vsel %vm478_vm0, %v7580_v54, 0.0  ;;  %v1830_v7 = vsel %vm478_vm0, %v7583_v55, 0.0 }
  0x57   : > { %v3202_v8 = vsel %vm2924_vm7, %v2687_v0, %v3201_v4  ;;  %v1824_v9 = vrot.slane %v1823_v6, 4  ;;  %v1831_v10 = vrot.slane %v1830_v7, 4  ;;  %v1837_v11 = vsel %vm478_vm0, %v7584_v59, 0.0 }
  0x58   : > { %3293 = vrot.lane.b32.xlu1 %v3202_v8, %s9209_s6  ;;  %v1818_v12 = vadd.f32 %v1817_v5, %v1816_v3  ;;  %v1838_v13 = vrot.slane %v1837_v11, 4  ;;  %v1844_v14 = vsel %vm478_vm0, %v7587_v61, 0.0  ;;  %v1851_v15 = vsel %vm478_vm0, %v7588_v62, 0.0  ;;  %v7902_v3 = vld [vmem:[%s9295_s5 + $0xb8] sm:$0xff]  }
  0x59   : > { %v1825_v16 = vadd.f32 %v1824_v9, %v1823_v6  ;;  %v1832_v17 = vadd.f32 %v1831_v10, %v1830_v7  ;;  %v1845_v18 = vrot.slane %v1844_v14, 4  ;;  %v1852_v19 = vrot.slane %v1851_v15, 4 }
  0x5a   : > { %v1819_v20 = vrot.slane %v1818_v12, 2  ;;  %v1839_v21 = vadd.f32 %v1838_v13, %v1837_v11  ;;  %v1858_v22 = vsel %vm478_vm0, %v7591_v63, 0.0  ;;  %v1865_v23 = vsel %vm478_vm0, %v7592_v2, 0.0 }
  0x5b   : > { %v1826_v24 = vrot.slane %v1825_v16, 2  ;;  %v1833_v25 = vrot.slane %v1832_v17, 2  ;;  %v1846_v26 = vadd.f32 %v1845_v18, %v1844_v14  ;;  %v1853_v27 = vadd.f32 %v1852_v19, %v1851_v15 }
  0x5c   : > { %v1820_v28 = vadd.f32 %v1819_v20, %v1818_v12  ;;  %v1840_v29 = vrot.slane %v1839_v21, 2  ;;  %v1859_v30 = vrot.slane %v1858_v22, 4  ;;  %v1866_v31 = vrot.slane %v1865_v23, 4 }
  0x5d   : > { %v1827_v32 = vadd.f32 %v1826_v24, %v1825_v16  ;;  %v1834_v33 = vadd.f32 %v1833_v25, %v1832_v17  ;;  %v1847_v34 = vrot.slane %v1846_v26, 2  ;;  %v1854_v35 = vrot.slane %v1853_v27, 2 }
  0x5e   : > { %v1821_v36 = vrot.slane %v1820_v28, 1  ;;  %v1841_v37 = vadd.f32 %v1840_v29, %v1839_v21  ;;  %v1860_v38 = vadd.f32 %v1859_v30, %v1858_v22  ;;  %v1867_v39 = vadd.f32 %v1866_v31, %v1865_v23 }
  0x5f   : > { %v1828_v40 = vrot.slane %v1827_v32, 1  ;;  %v1835_v41 = vrot.slane %v1834_v33, 1  ;;  %v1848_v42 = vadd.f32 %v1847_v34, %v1846_v26  ;;  %v1855_v43 = vadd.f32 %v1854_v35, %v1853_v27 }
  0x60   : > { %v1822_v44 = vadd.f32 %v1821_v36, %v1820_v28  ;;  %v1842_v45 = vrot.slane %v1841_v37, 1  ;;  %v1861_v46 = vrot.slane %v1860_v38, 2  ;;  %v1868_v47 = vrot.slane %v1867_v39, 2 }
  0x61   : > { %v1829_v49 = vadd.f32 %v1828_v40, %v1827_v32  ;;  %v1836_v50 = vadd.f32 %v1835_v41, %v1834_v33  ;;  %v1849_v51 = vrot.slane %v1848_v42, 1  ;;  %v1856_v52 = vrot.slane %v1855_v43, 1 }
  0x62   : > { %v1843_v54 = vadd.f32 %v1842_v45, %v1841_v37  ;;  %v1862_v55 = vadd.f32 %v1861_v46, %v1860_v38  ;;  %v1869_v56 = vadd.f32 %v1868_v47, %v1867_v39  ;;  %v2664_v57 = vmul.f32 0.125, %v1822_v44 }
  0x63   : > { %v1850_v59 = vadd.f32 %v1849_v51, %v1848_v42  ;;  %v1857_v60 = vadd.f32 %v1856_v52, %v1855_v43  ;;  %v2665_v61 = vmul.f32 0.125, %v1829_v49  ;;  %v2666_v62 = vmul.f32 0.125, %v1836_v50 }
  0x64   : > { %v1863_v63 = vrot.slane %v1862_v55, 1  ;;  %v1870_v0 = vrot.slane %v1869_v56, 1  ;;  %v2667_v1 = vmul.f32 0.125, %v1843_v54  ;;  %v7643_v2 = vunpack.c.l.bf16 %v7899_v48 }
  0x65   : > { %v2668_v4 = vmul.f32 0.125, %v1850_v59  ;;  %v2669_v5 = vmul.f32 0.125, %v1857_v60  ;;  %v3182_v6 = vsel %vm2912_vm1, %v2665_v61, %v2664_v57  ;;  %v7644_v7 = vunpack.c.h.bf16 %v7899_v48 }
  0x66   : > { %v1864_v8 = vadd.f32 %v1863_v63, %v1862_v55  ;;  %v1871_v9 = vadd.f32 %v1870_v0, %v1869_v56  ;;  %v3183_v10 = vsel %vm2914_vm2, %v2666_v62, %v3182_v6  ;;  %v7647_v11 = vunpack.c.l.bf16 %v7900_v53  ;;  %v7895_v0 = vld [vmem:[%s9295_s5 + $0x80] sm:$0xff]  }
  0x67   : > { %v3184_v12 = vsel %vm2916_vm3, %v2667_v1, %v3183_v10  ;;  %v7648_v13 = vunpack.c.h.bf16 %v7900_v53  ;;  %v7651_v14 = vunpack.c.l.bf16 %v7901_v58  ;;  %v7652_v15 = vunpack.c.h.bf16 %v7901_v58 }
  0x68   : > { %v2670_v16 = vmul.f32 0.125, %v1864_v8  ;;  %v2671_v17 = vmul.f32 0.125, %v1871_v9  ;;  %v3185_v18 = vsel %vm2918_vm4, %v2668_v4, %v3184_v12  ;;  %v7655_v19 = vunpack.c.l.bf16 %v7902_v3  ;;  %v7896_v9 = vld [vmem:[%s9295_s5 + $0x88] sm:$0xff]  }
  0x69   : > { %v3186_v20 = vsel %vm2920_vm5, %v2669_v5, %v3185_v18  ;;  %v7656_v21 = vunpack.c.h.bf16 %v7902_v3  ;;  %v2040_v22 = vsel %vm478_vm0, %v7643_v2, 0.0  ;;  %v2047_v23 = vsel %vm478_vm0, %v7644_v7, 0.0  ;;  %v7897_v18 = vld [vmem:[%s9295_s5 + $0x90] sm:$0xff]  }
  0x6a   : > { %v3187_v24 = vsel %vm2922_vm6, %v2670_v16, %v3186_v20  ;;  %v2041_v25 = vrot.slane %v2040_v22, 4  ;;  %v2048_v26 = vrot.slane %v2047_v23, 4  ;;  %v2054_v27 = vsel %vm478_vm0, %v7647_v11, 0.0 }
  0x6b   : > { %v3188_v28 = vsel %vm2924_vm7, %v2671_v17, %v3187_v24  ;;  %v2055_v29 = vrot.slane %v2054_v27, 4  ;;  %v2061_v30 = vsel %vm478_vm0, %v7648_v13, 0.0  ;;  %v2068_v31 = vsel %vm478_vm0, %v7651_v14, 0.0 }
  0x6c   : > { %3289 = vrot.lane.b32.xlu0 %v3188_v28, %s9209_s6  ;;  %v2042_v32 = vadd.f32 %v2041_v25, %v2040_v22  ;;  %v2049_v33 = vadd.f32 %v2048_v26, %v2047_v23  ;;  %v2062_v34 = vrot.slane %v2061_v30, 4  ;;  %v2069_v35 = vrot.slane %v2068_v31, 4 }
  0x6d   : > { %v2056_v36 = vadd.f32 %v2055_v29, %v2054_v27  ;;  %v2075_v37 = vsel %vm478_vm0, %v7652_v15, 0.0  ;;  %v2082_v38 = vsel %vm478_vm0, %v7655_v19, 0.0  ;;  %v2089_v39 = vsel %vm478_vm0, %v7656_v21, 0.0  ;;  %v7898_v19 = vld [vmem:[%s9295_s5 + $0x98] sm:$0xff]  }
  0x6e   : > { %v2043_v40 = vrot.slane %v2042_v32, 2  ;;  %v2050_v41 = vrot.slane %v2049_v33, 2  ;;  %v2063_v42 = vadd.f32 %v2062_v34, %v2061_v30  ;;  %v2070_v43 = vadd.f32 %v2069_v35, %v2068_v31 }
  0x6f   : > { %v2057_v44 = vrot.slane %v2056_v36, 2  ;;  %v2076_v45 = vrot.slane %v2075_v37, 4  ;;  %v2083_v46 = vrot.slane %v2082_v38, 4  ;;  %v2090_v47 = vrot.slane %v2089_v39, 4 }
  0x70   : > { %v2044_v48 = vadd.f32 %v2043_v40, %v2042_v32  ;;  %v2051_v49 = vadd.f32 %v2050_v41, %v2049_v33  ;;  %v2064_v50 = vrot.slane %v2063_v42, 2  ;;  %v2071_v51 = vrot.slane %v2070_v43, 2 }
  0x71   : > { %v2058_v52 = vadd.f32 %v2057_v44, %v2056_v36  ;;  %v2077_v53 = vadd.f32 %v2076_v45, %v2075_v37  ;;  %v2084_v54 = vadd.f32 %v2083_v46, %v2082_v38  ;;  %v2091_v55 = vadd.f32 %v2090_v47, %v2089_v39 }
  0x72   : > { %v2045_v56 = vrot.slane %v2044_v48, 1  ;;  %v2052_v57 = vrot.slane %v2051_v49, 1  ;;  %v2065_v58 = vadd.f32 %v2064_v50, %v2063_v42  ;;  %v2072_v59 = vadd.f32 %v2071_v51, %v2070_v43 }
  0x73   : > { %v2059_v60 = vrot.slane %v2058_v52, 1  ;;  %v2078_v61 = vrot.slane %v2077_v53, 2  ;;  %v2085_v62 = vrot.slane %v2084_v54, 2  ;;  %v2092_v63 = vrot.slane %v2091_v55, 2 }
  0x74   : > { %v2046_v1 = vadd.f32 %v2045_v56, %v2044_v48  ;;  %v2053_v2 = vadd.f32 %v2052_v57, %v2051_v49  ;;  %v2066_v3 = vrot.slane %v2065_v58, 1  ;;  %v2073_v4 = vrot.slane %v2072_v59, 1 }
  0x75   : > { %v2060_v5 = vadd.f32 %v2059_v60, %v2058_v52  ;;  %v2079_v6 = vadd.f32 %v2078_v61, %v2077_v53  ;;  %v2086_v7 = vadd.f32 %v2085_v62, %v2084_v54  ;;  %v2093_v8 = vadd.f32 %v2092_v63, %v2091_v55 }
  0x76   : > { %v2067_v10 = vadd.f32 %v2066_v3, %v2065_v58  ;;  %v2074_v11 = vadd.f32 %v2073_v4, %v2072_v59  ;;  %v2696_v12 = vmul.f32 0.125, %v2046_v1  ;;  %v2697_v13 = vmul.f32 0.125, %v2053_v2 }
  0x77   : > { %v2080_v14 = vrot.slane %v2079_v6, 1  ;;  %v2087_v15 = vrot.slane %v2086_v7, 1  ;;  %v2094_v16 = vrot.slane %v2093_v8, 1  ;;  %v2698_v17 = vmul.f32 0.125, %v2060_v5 }
  0x78   : > { %v2699_v20 = vmul.f32 0.125, %v2067_v10  ;;  %v2700_v21 = vmul.f32 0.125, %v2074_v11  ;;  %v3210_v22 = vsel %vm2912_vm1, %v2697_v13, %v2696_v12  ;;  %v7627_v23 = vunpack.c.l.bf16 %v7895_v0 }
  0x79   : > { %v2081_v24 = vadd.f32 %v2080_v14, %v2079_v6  ;;  %v2088_v25 = vadd.f32 %v2087_v15, %v2086_v7  ;;  %v2095_v26 = vadd.f32 %v2094_v16, %v2093_v8  ;;  %v3211_v27 = vsel %vm2914_vm2, %v2698_v17, %v3210_v22 }
  0x7a   : > { %v3212_v28 = vsel %vm2916_vm3, %v2699_v20, %v3211_v27  ;;  %v7628_v29 = vunpack.c.h.bf16 %v7895_v0  ;;  %v7631_v30 = vunpack.c.l.bf16 %v7896_v9  ;;  %v7632_v31 = vunpack.c.h.bf16 %v7896_v9 }
  0x7b   : > { %v2701_v32 = vmul.f32 0.125, %v2081_v24  ;;  %v2702_v33 = vmul.f32 0.125, %v2088_v25  ;;  %v2703_v34 = vmul.f32 0.125, %v2095_v26  ;;  %v3213_v35 = vsel %vm2918_vm4, %v2700_v21, %v3212_v28  ;;  %v7907_v24 = vld [vmem:[%s9295_s5 + $0xe0] sm:$0xff]  }
  0x7c   : > { %v7635_v36 = vunpack.c.l.bf16 %v7897_v18  ;;  %v7636_v37 = vunpack.c.h.bf16 %v7897_v18  ;;  %v7639_v38 = vunpack.c.l.bf16 %v7898_v19  ;;  %v7640_v39 = vunpack.c.h.bf16 %v7898_v19 }
  0x7d   : > { %v3214_v40 = vsel %vm2920_vm5, %v2701_v32, %v3213_v35  ;;  %v1984_v41 = vsel %vm478_vm0, %v7627_v23, 0.0  ;;  %v1991_v42 = vsel %vm478_vm0, %v7628_v29, 0.0  ;;  %v1998_v43 = vsel %vm478_vm0, %v7631_v30, 0.0  ;;  %v7908_v29 = vld [vmem:[%s9295_s5 + $0xe8] sm:$0xff]  }
  0x7e   : > { %v3215_v44 = vsel %vm2922_vm6, %v2702_v33, %v3214_v40  ;;  %v1985_v45 = vrot.slane %v1984_v41, 4  ;;  %v1992_v46 = vrot.slane %v1991_v42, 4  ;;  %v1999_v47 = vrot.slane %v1998_v43, 4 }
  0x7f   : > { %v3216_v48 = vsel %vm2924_vm7, %v2703_v34, %v3215_v44  ;;  %v2005_v49 = vsel %vm478_vm0, %v7632_v31, 0.0  ;;  %v2012_v50 = vsel %vm478_vm0, %v7635_v36, 0.0  ;;  %v2019_v51 = vsel %vm478_vm0, %v7636_v37, 0.0  ;;  %v7909_v34 = vld [vmem:[%s9295_s5 + $0xf0] sm:$0xff]  }
  0x80   : > { %3297 = vrot.lane.b32.xlu1 %v3216_v48, %s9209_s6  ;;  %v1986_v52 = vadd.f32 %v1985_v45, %v1984_v41  ;;  %v1993_v53 = vadd.f32 %v1992_v46, %v1991_v42  ;;  %v2000_v54 = vadd.f32 %v1999_v47, %v1998_v43  ;;  %v2006_v55 = vrot.slane %v2005_v49, 4  ;;  %v7910_v43 = vld [vmem:[%s9295_s5 + $0xf8] sm:$0xff]  }
  0x81   : > { %v2013_v56 = vrot.slane %v2012_v50, 4  ;;  %v2020_v57 = vrot.slane %v2019_v51, 4  ;;  %v2026_v58 = vsel %vm478_vm0, %v7639_v38, 0.0  ;;  %v2033_v59 = vsel %vm478_vm0, %v7640_v39, 0.0 }
  0x82   : > { %v1987_v60 = vrot.slane %v1986_v52, 2  ;;  %v1994_v61 = vrot.slane %v1993_v53, 2  ;;  %v2001_v62 = vrot.slane %v2000_v54, 2  ;;  %v2007_v63 = vadd.f32 %v2006_v55, %v2005_v49 }
  0x83   : > { %v2014_v0 = vadd.f32 %v2013_v56, %v2012_v50  ;;  %v2021_v1 = vadd.f32 %v2020_v57, %v2019_v51  ;;  %v2027_v2 = vrot.slane %v2026_v58, 4  ;;  %v2034_v3 = vrot.slane %v2033_v59, 4 }
  0x84   : > { %v1988_v4 = vadd.f32 %v1987_v60, %v1986_v52  ;;  %v1995_v5 = vadd.f32 %v1994_v61, %v1993_v53  ;;  %v2002_v6 = vadd.f32 %v2001_v62, %v2000_v54  ;;  %v2008_v7 = vrot.slane %v2007_v63, 2 }
  0x85   : > { %v2015_v8 = vrot.slane %v2014_v0, 2  ;;  %v2022_v9 = vrot.slane %v2021_v1, 2  ;;  %v2028_v10 = vadd.f32 %v2027_v2, %v2026_v58  ;;  %v2035_v11 = vadd.f32 %v2034_v3, %v2033_v59 }
  0x86   : > { %v1989_v12 = vrot.slane %v1988_v4, 1  ;;  %v1996_v13 = vrot.slane %v1995_v5, 1  ;;  %v2003_v14 = vrot.slane %v2002_v6, 1  ;;  %v2009_v15 = vadd.f32 %v2008_v7, %v2007_v63 }
  0x87   : > { %v2016_v16 = vadd.f32 %v2015_v8, %v2014_v0  ;;  %v2023_v17 = vadd.f32 %v2022_v9, %v2021_v1  ;;  %v2029_v18 = vrot.slane %v2028_v10, 2  ;;  %v2036_v19 = vrot.slane %v2035_v11, 2 }
  0x88   : > { %v1990_v20 = vadd.f32 %v1989_v12, %v1988_v4  ;;  %v1997_v21 = vadd.f32 %v1996_v13, %v1995_v5  ;;  %v2004_v22 = vadd.f32 %v2003_v14, %v2002_v6  ;;  %v2010_v23 = vrot.slane %v2009_v15, 1 }
  0x89   : > { %v2017_v25 = vrot.slane %v2016_v16, 1  ;;  %v2024_v26 = vrot.slane %v2023_v17, 1  ;;  %v2030_v27 = vadd.f32 %v2029_v18, %v2028_v10  ;;  %v2037_v28 = vadd.f32 %v2036_v19, %v2035_v11 }
  0x8a   : > { %v2011_v30 = vadd.f32 %v2010_v23, %v2009_v15  ;;  %v2688_v31 = vmul.f32 0.125, %v1990_v20  ;;  %v2689_v32 = vmul.f32 0.125, %v1997_v21  ;;  %v2690_v33 = vmul.f32 0.125, %v2004_v22 }
  0x8b   : > { %v2018_v35 = vadd.f32 %v2017_v25, %v2016_v16  ;;  %v2025_v36 = vadd.f32 %v2024_v26, %v2023_v17  ;;  %v2031_v37 = vrot.slane %v2030_v27, 1  ;;  %v2038_v38 = vrot.slane %v2037_v28, 1 }
  0x8c   : > { %v2691_v39 = vmul.f32 0.125, %v2011_v30  ;;  %v3203_v40 = vsel %vm2912_vm1, %v2689_v32, %v2688_v31  ;;  %v7675_v41 = vunpack.c.l.bf16 %v7907_v24  ;;  %v7676_v42 = vunpack.c.h.bf16 %v7907_v24 }
  0x8d   : > { %v2032_v44 = vadd.f32 %v2031_v37, %v2030_v27  ;;  %v2039_v45 = vadd.f32 %v2038_v38, %v2037_v28  ;;  %v2692_v46 = vmul.f32 0.125, %v2018_v35  ;;  %v2693_v47 = vmul.f32 0.125, %v2025_v36 }
  0x8e   : > { %v3204_v48 = vsel %vm2914_vm2, %v2690_v33, %v3203_v40  ;;  %v7679_v49 = vunpack.c.l.bf16 %v7908_v29  ;;  %v7680_v50 = vunpack.c.h.bf16 %v7908_v29  ;;  %v7683_v51 = vunpack.c.l.bf16 %v7909_v34 }
  0x8f   : > { %v2694_v52 = vmul.f32 0.125, %v2032_v44  ;;  %v2695_v53 = vmul.f32 0.125, %v2039_v45  ;;  %v3205_v54 = vsel %vm2916_vm3, %v2691_v39, %v3204_v48  ;;  %v7684_v55 = vunpack.c.h.bf16 %v7909_v34  ;;  %v7903_v44 = vld [vmem:[%s9295_s5 + $0xc0] sm:$0xff]  }
  0x90   : > { %v3206_v56 = vsel %vm2918_vm4, %v2692_v46, %v3205_v54  ;;  %v7687_v57 = vunpack.c.l.bf16 %v7910_v43  ;;  %v7688_v58 = vunpack.c.h.bf16 %v7910_v43  ;;  %v2152_v59 = vsel %vm478_vm0, %v7675_v41, 0.0 }
  0x91   : > { %v3207_v60 = vsel %vm2920_vm5, %v2693_v47, %v3206_v56  ;;  %v2153_v61 = vrot.slane %v2152_v59, 4  ;;  %v2159_v62 = vsel %vm478_vm0, %v7676_v42, 0.0  ;;  %v2166_v63 = vsel %vm478_vm0, %v7679_v49, 0.0 }
  0x92   : > { %v3208_v0 = vsel %vm2922_vm6, %v2694_v52, %v3207_v60  ;;  %v2160_v1 = vrot.slane %v2159_v62, 4  ;;  %v2167_v2 = vrot.slane %v2166_v63, 4  ;;  %v2173_v3 = vsel %vm478_vm0, %v7680_v50, 0.0 }
  0x93   : > { %v3209_v4 = vsel %vm2924_vm7, %v2695_v53, %v3208_v0  ;;  %v2154_v5 = vadd.f32 %v2153_v61, %v2152_v59  ;;  %v2174_v6 = vrot.slane %v2173_v3, 4  ;;  %v2180_v7 = vsel %vm478_vm0, %v7683_v51, 0.0  ;;  %v7904_v53 = vld [vmem:[%s9295_s5 + $0xc8] sm:$0xff]  }
  0x94   : > { %3295 = vrot.lane.b32.xlu0 %v3209_v4, %s9209_s6  ;;  %v2161_v8 = vadd.f32 %v2160_v1, %v2159_v62  ;;  %v2168_v9 = vadd.f32 %v2167_v2, %v2166_v63  ;;  %v2181_v10 = vrot.slane %v2180_v7, 4  ;;  %v2187_v11 = vsel %vm478_vm0, %v7684_v55, 0.0  ;;  %v7906_v63 = vld [vmem:[%s9295_s5 + $0xd8] sm:$0xff]  }
  0x95   : > { %v2155_v12 = vrot.slane %v2154_v5, 2  ;;  %v2175_v13 = vadd.f32 %v2174_v6, %v2173_v3  ;;  %v2188_v14 = vrot.slane %v2187_v11, 4  ;;  %v2194_v15 = vsel %vm478_vm0, %v7687_v57, 0.0 }
  0x96   : > { %v2162_v16 = vrot.slane %v2161_v8, 2  ;;  %v2169_v17 = vrot.slane %v2168_v9, 2  ;;  %v2182_v18 = vadd.f32 %v2181_v10, %v2180_v7  ;;  %v2195_v19 = vrot.slane %v2194_v15, 4 }
  0x97   : > { %v2156_v20 = vadd.f32 %v2155_v12, %v2154_v5  ;;  %v2176_v21 = vrot.slane %v2175_v13, 2  ;;  %v2189_v22 = vadd.f32 %v2188_v14, %v2187_v11  ;;  %v2201_v23 = vsel %vm478_vm0, %v7688_v58, 0.0  ;;  %v7905_v58 = vld [vmem:[%s9295_s5 + $0xd0] sm:$0xff]  }
  0x98   : > { %v2163_v24 = vadd.f32 %v2162_v16, %v2161_v8  ;;  %v2170_v25 = vadd.f32 %v2169_v17, %v2168_v9  ;;  %v2183_v26 = vrot.slane %v2182_v18, 2  ;;  %v2196_v27 = vadd.f32 %v2195_v19, %v2194_v15 }
  0x99   : > { %v2157_v28 = vrot.slane %v2156_v20, 1  ;;  %v2177_v29 = vadd.f32 %v2176_v21, %v2175_v13  ;;  %v2190_v30 = vrot.slane %v2189_v22, 2  ;;  %v2202_v31 = vrot.slane %v2201_v23, 4 }
  0x9a   : > { %v2164_v32 = vrot.slane %v2163_v24, 1  ;;  %v2171_v33 = vrot.slane %v2170_v25, 1  ;;  %v2184_v34 = vadd.f32 %v2183_v26, %v2182_v18  ;;  %v2197_v35 = vrot.slane %v2196_v27, 2 }
  0x9b   : > { %v2158_v36 = vadd.f32 %v2157_v28, %v2156_v20  ;;  %v2178_v37 = vrot.slane %v2177_v29, 1  ;;  %v2191_v38 = vadd.f32 %v2190_v30, %v2189_v22  ;;  %v2203_v39 = vadd.f32 %v2202_v31, %v2201_v23 }
  0x9c   : > { %v2165_v40 = vadd.f32 %v2164_v32, %v2163_v24  ;;  %v2172_v41 = vadd.f32 %v2171_v33, %v2170_v25  ;;  %v2185_v42 = vrot.slane %v2184_v34, 1  ;;  %v2198_v43 = vadd.f32 %v2197_v35, %v2196_v27 }
  0x9d   : > { %v2179_v45 = vadd.f32 %v2178_v37, %v2177_v29  ;;  %v2192_v46 = vrot.slane %v2191_v38, 1  ;;  %v2204_v47 = vrot.slane %v2203_v39, 2  ;;  %v2712_v48 = vmul.f32 0.125, %v2158_v36 }
  0x9e   : > { %v2186_v49 = vadd.f32 %v2185_v42, %v2184_v34  ;;  %v2199_v50 = vrot.slane %v2198_v43, 1  ;;  %v2713_v51 = vmul.f32 0.125, %v2165_v40  ;;  %v2714_v52 = vmul.f32 0.125, %v2172_v41 }
  0x9f   : > { %v2193_v54 = vadd.f32 %v2192_v46, %v2191_v38  ;;  %v2205_v55 = vadd.f32 %v2204_v47, %v2203_v39  ;;  %v2715_v56 = vmul.f32 0.125, %v2179_v45  ;;  %v7659_v57 = vunpack.c.l.bf16 %v7903_v44 }
  0xa0   : > { %v2200_v59 = vadd.f32 %v2199_v50, %v2198_v43  ;;  %v2716_v60 = vmul.f32 0.125, %v2186_v49  ;;  %v3224_v61 = vsel %vm2912_vm1, %v2713_v51, %v2712_v48  ;;  %v7660_v62 = vunpack.c.h.bf16 %v7903_v44 }
  0xa1   : > { %v2206_v0 = vrot.slane %v2205_v55, 1  ;;  %v2717_v1 = vmul.f32 0.125, %v2193_v54  ;;  %v3225_v2 = vsel %vm2914_vm2, %v2714_v52, %v3224_v61  ;;  %v7663_v3 = vunpack.c.l.bf16 %v7904_v53 }
  0xa2   : > { %v2718_v4 = vmul.f32 0.125, %v2200_v59  ;;  %v3226_v5 = vsel %vm2916_vm3, %v2715_v56, %v3225_v2  ;;  %v7664_v6 = vunpack.c.h.bf16 %v7904_v53  ;;  %v7667_v7 = vunpack.c.l.bf16 %v7905_v58 }
  0xa3   : > { %v2207_v8 = vadd.f32 %v2206_v0, %v2205_v55  ;;  %v3227_v9 = vsel %vm2918_vm4, %v2716_v60, %v3226_v5  ;;  %v7668_v10 = vunpack.c.h.bf16 %v7905_v58  ;;  %v7671_v11 = vunpack.c.l.bf16 %v7906_v63  ;;  %v7915_v0 = vld [vmem:[%s9295_s5 + $0x120] sm:$0xff]  }
  0xa4   : > { %v3228_v12 = vsel %vm2920_vm5, %v2717_v1, %v3227_v9  ;;  %v7672_v13 = vunpack.c.h.bf16 %v7906_v63  ;;  %v2096_v14 = vsel %vm478_vm0, %v7659_v57, 0.0  ;;  %v2103_v15 = vsel %vm478_vm0, %v7660_v62, 0.0  ;;  %v7916_v9 = vld [vmem:[%s9295_s5 + $0x128] sm:$0xff]  }
  0xa5   : > { %v2719_v16 = vmul.f32 0.125, %v2207_v8  ;;  %v3229_v17 = vsel %vm2922_vm6, %v2718_v4, %v3228_v12  ;;  %v2097_v18 = vrot.slane %v2096_v14, 4  ;;  %v2104_v19 = vrot.slane %v2103_v15, 4 }
  0xa6   : > { %v2110_v20 = vsel %vm478_vm0, %v7663_v3, 0.0  ;;  %v2117_v21 = vsel %vm478_vm0, %v7664_v6, 0.0  ;;  %v2124_v22 = vsel %vm478_vm0, %v7667_v7, 0.0  ;;  %v2131_v23 = vsel %vm478_vm0, %v7668_v10, 0.0 }
  0xa7   : > { %v3230_v24 = vsel %vm2924_vm7, %v2719_v16, %v3229_v17  ;;  %v2098_v25 = vadd.f32 %v2097_v18, %v2096_v14  ;;  %v2105_v26 = vadd.f32 %v2104_v19, %v2103_v15  ;;  %v2111_v27 = vrot.slane %v2110_v20, 4  ;;  %v7917_v14 = vld [vmem:[%s9295_s5 + $0x130] sm:$0xff]   ;;  %v7918_v19 = vld [vmem:[%s9295_s5 + $0x138] sm:$0xff]  }
  0xa8   : > { %3301 = vrot.lane.b32.xlu1 %v3230_v24, %s9209_s6  ;;  %v2118_v28 = vrot.slane %v2117_v21, 4  ;;  %v2125_v29 = vrot.slane %v2124_v22, 4  ;;  %v2132_v30 = vrot.slane %v2131_v23, 4  ;;  %v2138_v31 = vsel %vm478_vm0, %v7671_v11, 0.0 }
  0xa9   : > { %v2099_v32 = vrot.slane %v2098_v25, 2  ;;  %v2106_v33 = vrot.slane %v2105_v26, 2  ;;  %v2112_v34 = vadd.f32 %v2111_v27, %v2110_v20  ;;  %v2139_v35 = vrot.slane %v2138_v31, 4 }
  0xaa   : > { %v2119_v36 = vadd.f32 %v2118_v28, %v2117_v21  ;;  %v2126_v37 = vadd.f32 %v2125_v29, %v2124_v22  ;;  %v2133_v38 = vadd.f32 %v2132_v30, %v2131_v23  ;;  %v2145_v39 = vsel %vm478_vm0, %v7672_v13, 0.0 }
  0xab   : > { %v2100_v40 = vadd.f32 %v2099_v32, %v2098_v25  ;;  %v2107_v41 = vadd.f32 %v2106_v33, %v2105_v26  ;;  %v2113_v42 = vrot.slane %v2112_v34, 2  ;;  %v2140_v43 = vadd.f32 %v2139_v35, %v2138_v31 }
  0xac   : > { %v2120_v44 = vrot.slane %v2119_v36, 2  ;;  %v2127_v45 = vrot.slane %v2126_v37, 2  ;;  %v2134_v46 = vrot.slane %v2133_v38, 2  ;;  %v2146_v47 = vrot.slane %v2145_v39, 4 }
  0xad   : > { %v2101_v48 = vrot.slane %v2100_v40, 1  ;;  %v2108_v49 = vrot.slane %v2107_v41, 1  ;;  %v2114_v50 = vadd.f32 %v2113_v42, %v2112_v34  ;;  %v2141_v51 = vrot.slane %v2140_v43, 2 }
  0xae   : > { %v2121_v52 = vadd.f32 %v2120_v44, %v2119_v36  ;;  %v2128_v53 = vadd.f32 %v2127_v45, %v2126_v37  ;;  %v2135_v54 = vadd.f32 %v2134_v46, %v2133_v38  ;;  %v2147_v55 = vadd.f32 %v2146_v47, %v2145_v39 }
  0xaf   : > { %v2102_v56 = vadd.f32 %v2101_v48, %v2100_v40  ;;  %v2109_v57 = vadd.f32 %v2108_v49, %v2107_v41  ;;  %v2115_v58 = vrot.slane %v2114_v50, 1  ;;  %v2142_v59 = vadd.f32 %v2141_v51, %v2140_v43 }
  0xb0   : > { %v2122_v60 = vrot.slane %v2121_v52, 1  ;;  %v2129_v61 = vrot.slane %v2128_v53, 1  ;;  %v2136_v62 = vrot.slane %v2135_v54, 1  ;;  %v2148_v63 = vrot.slane %v2147_v55, 2 }
  0xb1   : > { %v2116_v1 = vadd.f32 %v2115_v58, %v2114_v50  ;;  %v2143_v2 = vrot.slane %v2142_v59, 1  ;;  %v2704_v3 = vmul.f32 0.125, %v2102_v56  ;;  %v2705_v4 = vmul.f32 0.125, %v2109_v57 }
  0xb2   : > { %v2123_v5 = vadd.f32 %v2122_v60, %v2121_v52  ;;  %v2130_v6 = vadd.f32 %v2129_v61, %v2128_v53  ;;  %v2137_v7 = vadd.f32 %v2136_v62, %v2135_v54  ;;  %v2149_v8 = vadd.f32 %v2148_v63, %v2147_v55 }
  0xb3   : > { %v2144_v10 = vadd.f32 %v2143_v2, %v2142_v59  ;;  %v2706_v11 = vmul.f32 0.125, %v2116_v1  ;;  %v3217_v12 = vsel %vm2912_vm1, %v2705_v4, %v2704_v3  ;;  %v7707_v13 = vunpack.c.l.bf16 %v7915_v0 }
  0xb4   : > { %v2150_v15 = vrot.slane %v2149_v8, 1  ;;  %v2707_v16 = vmul.f32 0.125, %v2123_v5  ;;  %v2708_v17 = vmul.f32 0.125, %v2130_v6  ;;  %v2709_v18 = vmul.f32 0.125, %v2137_v7 }
  0xb5   : > { %v2710_v20 = vmul.f32 0.125, %v2144_v10  ;;  %v3218_v21 = vsel %vm2914_vm2, %v2706_v11, %v3217_v12  ;;  %v7708_v22 = vunpack.c.h.bf16 %v7915_v0  ;;  %v7711_v23 = vunpack.c.l.bf16 %v7916_v9 }
  0xb6   : > { %v2151_v24 = vadd.f32 %v2150_v15, %v2149_v8  ;;  %v3219_v25 = vsel %vm2916_vm3, %v2707_v16, %v3218_v21  ;;  %v7712_v26 = vunpack.c.h.bf16 %v7916_v9  ;;  %v7715_v27 = vunpack.c.l.bf16 %v7917_v14 }
  0xb7   : > { %v3220_v28 = vsel %vm2918_vm4, %v2708_v17, %v3219_v25  ;;  %v7716_v29 = vunpack.c.h.bf16 %v7917_v14  ;;  %v7719_v30 = vunpack.c.l.bf16 %v7918_v19  ;;  %v7720_v31 = vunpack.c.h.bf16 %v7918_v19 }
  0xb8   : > { %v2711_v32 = vmul.f32 0.125, %v2151_v24  ;;  %v3221_v33 = vsel %vm2920_vm5, %v2709_v18, %v3220_v28  ;;  %v2264_v34 = vsel %vm478_vm0, %v7707_v13, 0.0  ;;  %v2271_v35 = vsel %vm478_vm0, %v7708_v22, 0.0 }
  0xb9   : > { %v3222_v36 = vsel %vm2922_vm6, %v2710_v20, %v3221_v33  ;;  %v2265_v37 = vrot.slane %v2264_v34, 4  ;;  %v2272_v38 = vrot.slane %v2271_v35, 4  ;;  %v2278_v39 = vsel %vm478_vm0, %v7711_v23, 0.0  ;;  %v7911_v20 = vld [vmem:[%s9295_s5 + $0x100] sm:$0xff]  }
  0xba   : > { %v3223_v40 = vsel %vm2924_vm7, %v2711_v32, %v3222_v36  ;;  %v2279_v41 = vrot.slane %v2278_v39, 4  ;;  %v2285_v42 = vsel %vm478_vm0, %v7712_v26, 0.0  ;;  %v2292_v43 = vsel %vm478_vm0, %v7715_v27, 0.0 }
  0xbb   : > { %3299 = vrot.lane.b32.xlu0 %v3223_v40, %s9209_s6  ;;  %v2266_v44 = vadd.f32 %v2265_v37, %v2264_v34  ;;  %v2273_v45 = vadd.f32 %v2272_v38, %v2271_v35  ;;  %v2286_v46 = vrot.slane %v2285_v42, 4  ;;  %v2293_v47 = vrot.slane %v2292_v43, 4  ;;  %v7913_v38 = vld [vmem:[%s9295_s5 + $0x110] sm:$0xff]  }
  0xbc   : > { %v2280_v48 = vadd.f32 %v2279_v41, %v2278_v39  ;;  %v2299_v49 = vsel %vm478_vm0, %v7716_v29, 0.0  ;;  %v2306_v50 = vsel %vm478_vm0, %v7719_v30, 0.0  ;;  %v2313_v51 = vsel %vm478_vm0, %v7720_v31, 0.0  ;;  %v7912_v29 = vld [vmem:[%s9295_s5 + $0x108] sm:$0xff]   ;;  %v7914_v39 = vld [vmem:[%s9295_s5 + $0x118] sm:$0xff]  }
  0xbd   : > { %v2267_v52 = vrot.slane %v2266_v44, 2  ;;  %v2274_v53 = vrot.slane %v2273_v45, 2  ;;  %v2287_v54 = vadd.f32 %v2286_v46, %v2285_v42  ;;  %v2294_v55 = vadd.f32 %v2293_v47, %v2292_v43 }
  0xbe   : > { %v2281_v56 = vrot.slane %v2280_v48, 2  ;;  %v2300_v57 = vrot.slane %v2299_v49, 4  ;;  %v2307_v58 = vrot.slane %v2306_v50, 4  ;;  %v2314_v59 = vrot.slane %v2313_v51, 4 }
  0xbf   : > { %v2268_v60 = vadd.f32 %v2267_v52, %v2266_v44  ;;  %v2275_v61 = vadd.f32 %v2274_v53, %v2273_v45  ;;  %v2288_v62 = vrot.slane %v2287_v54, 2  ;;  %v2295_v63 = vrot.slane %v2294_v55, 2 }
  0xc0   : > { %v2282_v0 = vadd.f32 %v2281_v56, %v2280_v48  ;;  %v2301_v1 = vadd.f32 %v2300_v57, %v2299_v49  ;;  %v2308_v2 = vadd.f32 %v2307_v58, %v2306_v50  ;;  %v2315_v3 = vadd.f32 %v2314_v59, %v2313_v51 }
  0xc1   : > { %v2269_v4 = vrot.slane %v2268_v60, 1  ;;  %v2276_v5 = vrot.slane %v2275_v61, 1  ;;  %v2289_v6 = vadd.f32 %v2288_v62, %v2287_v54  ;;  %v2296_v7 = vadd.f32 %v2295_v63, %v2294_v55 }
  0xc2   : > { %v2283_v8 = vrot.slane %v2282_v0, 1  ;;  %v2302_v9 = vrot.slane %v2301_v1, 2  ;;  %v2309_v10 = vrot.slane %v2308_v2, 2  ;;  %v2316_v11 = vrot.slane %v2315_v3, 2 }
  0xc3   : > { %v2270_v12 = vadd.f32 %v2269_v4, %v2268_v60  ;;  %v2277_v13 = vadd.f32 %v2276_v5, %v2275_v61  ;;  %v2290_v14 = vrot.slane %v2289_v6, 1  ;;  %v2297_v15 = vrot.slane %v2296_v7, 1 }
  0xc4   : > { %v2284_v16 = vadd.f32 %v2283_v8, %v2282_v0  ;;  %v2303_v17 = vadd.f32 %v2302_v9, %v2301_v1  ;;  %v2310_v18 = vadd.f32 %v2309_v10, %v2308_v2  ;;  %v2317_v19 = vadd.f32 %v2316_v11, %v2315_v3 }
  0xc5   : > { %v2291_v21 = vadd.f32 %v2290_v14, %v2289_v6  ;;  %v2298_v22 = vadd.f32 %v2297_v15, %v2296_v7  ;;  %v2728_v23 = vmul.f32 0.125, %v2270_v12  ;;  %v2729_v24 = vmul.f32 0.125, %v2277_v13 }
  0xc6   : > { %v2304_v25 = vrot.slane %v2303_v17, 1  ;;  %v2311_v26 = vrot.slane %v2310_v18, 1  ;;  %v2318_v27 = vrot.slane %v2317_v19, 1  ;;  %v2730_v28 = vmul.f32 0.125, %v2284_v16 }
  0xc7   : > { %v2731_v30 = vmul.f32 0.125, %v2291_v21  ;;  %v2732_v31 = vmul.f32 0.125, %v2298_v22  ;;  %v3238_v32 = vsel %vm2912_vm1, %v2729_v24, %v2728_v23  ;;  %v7691_v33 = vunpack.c.l.bf16 %v7911_v20 }
  0xc8   : > { %v2305_v34 = vadd.f32 %v2304_v25, %v2303_v17  ;;  %v2312_v35 = vadd.f32 %v2311_v26, %v2310_v18  ;;  %v2319_v36 = vadd.f32 %v2318_v27, %v2317_v19  ;;  %v3239_v37 = vsel %vm2914_vm2, %v2730_v28, %v3238_v32 }
  0xc9   : > { %v3240_v40 = vsel %vm2916_vm3, %v2731_v30, %v3239_v37  ;;  %v7692_v41 = vunpack.c.h.bf16 %v7911_v20  ;;  %v7695_v42 = vunpack.c.l.bf16 %v7912_v29  ;;  %v7696_v43 = vunpack.c.h.bf16 %v7912_v29 }
  0xca   : > { %v2733_v44 = vmul.f32 0.125, %v2305_v34  ;;  %v2734_v45 = vmul.f32 0.125, %v2312_v35  ;;  %v2735_v46 = vmul.f32 0.125, %v2319_v36  ;;  %v3241_v47 = vsel %vm2918_vm4, %v2732_v31, %v3240_v40  ;;  %v7923_v40 = vld [vmem:[%s9295_s5 + $0x160] sm:$0xff]  }
  0xcb   : > { %v7699_v48 = vunpack.c.l.bf16 %v7913_v38  ;;  %v7700_v49 = vunpack.c.h.bf16 %v7913_v38  ;;  %v7703_v50 = vunpack.c.l.bf16 %v7914_v39  ;;  %v7704_v51 = vunpack.c.h.bf16 %v7914_v39 }
  0xcc   : > { %v3242_v52 = vsel %vm2920_vm5, %v2733_v44, %v3241_v47  ;;  %v2208_v53 = vsel %vm478_vm0, %v7691_v33, 0.0  ;;  %v2215_v54 = vsel %vm478_vm0, %v7692_v41, 0.0  ;;  %v2222_v55 = vsel %vm478_vm0, %v7695_v42, 0.0  ;;  %v8659_v47 = vld [vmem:[%s11424_s2 + $0x8] sm:$0xff]  }
  0xcd   : > { %v3243_v56 = vsel %vm2922_vm6, %v2734_v45, %v3242_v52  ;;  %v2209_v57 = vrot.slane %v2208_v53, 4  ;;  %v2216_v58 = vrot.slane %v2215_v54, 4  ;;  %v2223_v59 = vrot.slane %v2222_v55, 4  ;;  %v8657_v45 = vld [vmem:[%s11424_s2] sm:$0xff]   ;;  %v7924_v52 = vld [vmem:[%s9295_s5 + $0x168] sm:$0xff]  }
  0xce   : > { %v3244_v60 = vsel %vm2924_vm7, %v2735_v46, %v3243_v56  ;;  %v2229_v61 = vsel %vm478_vm0, %v7696_v43, 0.0  ;;  %v2236_v62 = vsel %vm478_vm0, %v7699_v48, 0.0  ;;  %v2243_v63 = vsel %vm478_vm0, %v7700_v49, 0.0  ;;  %v8658_v46 = vld [vmem:[%s11424_s2 + $0x40] sm:$0xff]   ;;  %8151 = vmatprep.subr.bf16.mxu0 %v8657_v45 }
  0xcf   : > { %3305 = vrot.lane.b32.xlu1 %v3244_v60, %s9209_s6  ;;  %v2210_v0 = vadd.f32 %v2209_v57, %v2208_v53  ;;  %v2217_v1 = vadd.f32 %v2216_v58, %v2215_v54  ;;  %v2224_v2 = vadd.f32 %v2223_v59, %v2222_v55  ;;  %v2230_v3 = vrot.slane %v2229_v61, 4  ;;  %v7925_v53 = vld [vmem:[%s9295_s5 + $0x170] sm:$0xff]   ;;  %v8660_v54 = vld [vmem:[%s11424_s2 + $0x48] sm:$0xff]   ;;  %8183 = vmatprep.subr.bf16.mxu1 %v8658_v46 }
  0xd0   : > { %v2237_v4 = vrot.slane %v2236_v62, 4  ;;  %v2244_v5 = vrot.slane %v2243_v63, 4  ;;  %v2250_v6 = vsel %vm478_vm0, %v7703_v50, 0.0  ;;  %v2257_v7 = vsel %vm478_vm0, %v7704_v51, 0.0  ;;  %8152 = vmatpush3.bf16.msra.mxu0 %v8657_v45  ;;  %8184 = vmatpush3.bf16.msra.mxu1 %v8658_v46 }
  0xd1   : > { %v2211_v8 = vrot.slane %v2210_v0, 2  ;;  %v2218_v9 = vrot.slane %v2217_v1, 2  ;;  %v2225_v10 = vrot.slane %v2224_v2, 2  ;;  %v2231_v11 = vadd.f32 %v2230_v3, %v2229_v61  ;;  %8153 = vmatprep.subr.bf16.mxu0 %v8659_v47  ;;  %8185 = vmatprep.subr.bf16.mxu1 %v8660_v54 }
  0xd2   : > { %v2238_v12 = vadd.f32 %v2237_v4, %v2236_v62  ;;  %v2245_v13 = vadd.f32 %v2244_v5, %v2243_v63  ;;  %v2251_v14 = vrot.slane %v2250_v6, 4  ;;  %v2258_v15 = vrot.slane %v2257_v7, 4  ;;  %v7926_v63 = vld [vmem:[%s9295_s5 + $0x178] sm:$0xff]   ;;  %v8661_v4 = vld [vmem:[%s11424_s2 + $0x10] sm:$0xff]  }
  0xd3   : > { %v2212_v16 = vadd.f32 %v2211_v8, %v2210_v0  ;;  %v2219_v17 = vadd.f32 %v2218_v9, %v2217_v1  ;;  %v2226_v18 = vadd.f32 %v2225_v10, %v2224_v2  ;;  %v2232_v19 = vrot.slane %v2231_v11, 2  ;;  %v8662_v5 = vld [vmem:[%s11424_s2 + $0x50] sm:$0xff]  }
  0xd4   : > { %v2239_v20 = vrot.slane %v2238_v12, 2  ;;  %v2246_v21 = vrot.slane %v2245_v13, 2  ;;  %v2252_v22 = vadd.f32 %v2251_v14, %v2250_v6  ;;  %v2259_v23 = vadd.f32 %v2258_v15, %v2257_v7  ;;  %8154 = vmatpush3.bf16.msra.mxu0 %v8659_v47  ;;  %8186 = vmatpush3.bf16.msra.mxu1 %v8660_v54 }
  0xd5   : > { %v2213_v24 = vrot.slane %v2212_v16, 1  ;;  %v2220_v25 = vrot.slane %v2219_v17, 1  ;;  %v2227_v26 = vrot.slane %v2226_v18, 1  ;;  %v2233_v27 = vadd.f32 %v2232_v19, %v2231_v11  ;;  %8155 = vmatprep.subr.bf16.mxu0 %v8661_v4  ;;  %8187 = vmatprep.subr.bf16.mxu1 %v8662_v5 }
  0xd6   : > { %v2240_v28 = vadd.f32 %v2239_v20, %v2238_v12  ;;  %v2247_v29 = vadd.f32 %v2246_v21, %v2245_v13  ;;  %v2253_v30 = vrot.slane %v2252_v22, 2  ;;  %v2260_v31 = vrot.slane %v2259_v23, 2 }
  0xd7   : > { %v2214_v32 = vadd.f32 %v2213_v24, %v2212_v16  ;;  %v2221_v33 = vadd.f32 %v2220_v25, %v2219_v17  ;;  %v2228_v34 = vadd.f32 %v2227_v26, %v2226_v18  ;;  %v2234_v35 = vrot.slane %v2233_v27, 1 }
  0xd8   : > { %v2241_v36 = vrot.slane %v2240_v28, 1  ;;  %v2248_v37 = vrot.slane %v2247_v29, 1  ;;  %v2254_v38 = vadd.f32 %v2253_v30, %v2252_v22  ;;  %v2261_v39 = vadd.f32 %v2260_v31, %v2259_v23  ;;  %v8663_v22 = vld [vmem:[%s11424_s2 + $0x18] sm:$0xff]   ;;  %8156 = vmatpush3.bf16.msra.mxu0 %v8661_v4  ;;  %8188 = vmatpush3.bf16.msra.mxu1 %v8662_v5  ;;  %v7919_v4 = vld [vmem:[%s9295_s5 + $0x140] sm:$0xff]  }
  0xd9   : > { %v2235_v41 = vadd.f32 %v2234_v35, %v2233_v27  ;;  %v2720_v42 = vmul.f32 0.125, %v2214_v32  ;;  %v2721_v43 = vmul.f32 0.125, %v2221_v33  ;;  %v2722_v44 = vmul.f32 0.125, %v2228_v34  ;;  %v8664_v23 = vld [vmem:[%s11424_s2 + $0x58] sm:$0xff]   ;;  %8157 = vmatprep.subr.bf16.mxu0 %v8663_v22 }
  0xda   : > { %v2242_v48 = vadd.f32 %v2241_v36, %v2240_v28  ;;  %v2249_v49 = vadd.f32 %v2248_v37, %v2247_v29  ;;  %v2255_v50 = vrot.slane %v2254_v38, 1  ;;  %v2262_v51 = vrot.slane %v2261_v39, 1  ;;  %8189 = vmatprep.subr.bf16.mxu1 %v8664_v23 }
  0xdb   : > { %v2723_v55 = vmul.f32 0.125, %v2235_v41  ;;  %v3231_v56 = vsel %vm2912_vm1, %v2721_v43, %v2720_v42  ;;  %v7739_v57 = vunpack.c.l.bf16 %v7923_v40  ;;  %v7740_v58 = vunpack.c.h.bf16 %v7923_v40  ;;  %v8665_v40 = vld [vmem:[%s11424_s2 + $0x20] sm:$0xff]  }
  0xdc   : > { %v2256_v59 = vadd.f32 %v2255_v50, %v2254_v38  ;;  %v2263_v60 = vadd.f32 %v2262_v51, %v2261_v39  ;;  %v2724_v61 = vmul.f32 0.125, %v2242_v48  ;;  %v2725_v62 = vmul.f32 0.125, %v2249_v49  ;;  %v8666_v41 = vld [vmem:[%s11424_s2 + $0x60] sm:$0xff]   ;;  %8158 = vmatpush3.bf16.msra.mxu0 %v8663_v22  ;;  %8190 = vmatpush3.bf16.msra.mxu1 %v8664_v23  ;;  %v7922_v23 = vld [vmem:[%s9295_s5 + $0x158] sm:$0xff]  }
  0xdd   : > { %v3232_v0 = vsel %vm2914_vm2, %v2722_v44, %v3231_v56  ;;  %v7743_v1 = vunpack.c.l.bf16 %v7924_v52  ;;  %v7744_v2 = vunpack.c.h.bf16 %v7924_v52  ;;  %v7747_v3 = vunpack.c.l.bf16 %v7925_v53  ;;  %8159 = vmatprep.subr.bf16.mxu0 %v8665_v40  ;;  %8191 = vmatprep.subr.bf16.mxu1 %v8666_v41 }
  0xde   : > { %v2726_v6 = vmul.f32 0.125, %v2256_v59  ;;  %v2727_v7 = vmul.f32 0.125, %v2263_v60  ;;  %v3233_v8 = vsel %vm2916_vm3, %v2723_v55, %v3232_v0  ;;  %v7748_v9 = vunpack.c.h.bf16 %v7925_v53  ;;  %v8668_v59 = vld [vmem:[%s11424_s2 + $0x68] sm:$0xff]  }
  0xdf   : > { %v3234_v10 = vsel %vm2918_vm4, %v2724_v61, %v3233_v8  ;;  %v7751_v11 = vunpack.c.l.bf16 %v7926_v63  ;;  %v7752_v12 = vunpack.c.h.bf16 %v7926_v63  ;;  %v2376_v13 = vsel %vm478_vm0, %v7739_v57, 0.0 }
  0xe0   : > { %v3235_v14 = vsel %vm2920_vm5, %v2725_v62, %v3234_v10  ;;  %v2377_v15 = vrot.slane %v2376_v13, 4  ;;  %v2383_v16 = vsel %vm478_vm0, %v7740_v58, 0.0  ;;  %v2390_v17 = vsel %vm478_vm0, %v7743_v1, 0.0  ;;  %v8667_v58 = vld [vmem:[%s11424_s2 + $0x28] sm:$0xff]   ;;  %8160 = vmatpush3.bf16.msra.mxu0 %v8665_v40  ;;  %8192 = vmatpush3.bf16.msra.mxu1 %v8666_v41 }
  0xe1   : > { %v3236_v18 = vsel %vm2922_vm6, %v2726_v6, %v3235_v14  ;;  %v2384_v19 = vrot.slane %v2383_v16, 4  ;;  %v2391_v20 = vrot.slane %v2390_v17, 4  ;;  %v2397_v21 = vsel %vm478_vm0, %v7744_v2, 0.0  ;;  %8161 = vmatprep.subr.bf16.mxu0 %v8667_v58  ;;  %8193 = vmatprep.subr.bf16.mxu1 %v8668_v59 }
  0xe2   : > { %v3237_v24 = vsel %vm2924_vm7, %v2727_v7, %v3236_v18  ;;  %v2378_v25 = vadd.f32 %v2377_v15, %v2376_v13  ;;  %v2398_v26 = vrot.slane %v2397_v21, 4  ;;  %v2404_v27 = vsel %vm478_vm0, %v7747_v3, 0.0  ;;  %v7920_v13 = vld [vmem:[%s9295_s5 + $0x148] sm:$0xff]   ;;  %v7921_v18 = vld [vmem:[%s9295_s5 + $0x150] sm:$0xff]  }
  0xe3   : > { %3303 = vrot.lane.b32.xlu0 %v3237_v24, %s9209_s6  ;;  %v2385_v28 = vadd.f32 %v2384_v19, %v2383_v16  ;;  %v2392_v29 = vadd.f32 %v2391_v20, %v2390_v17  ;;  %v2405_v30 = vrot.slane %v2404_v27, 4  ;;  %v2411_v31 = vsel %vm478_vm0, %v7748_v9, 0.0 }
  0xe4   : > { %v2379_v32 = vrot.slane %v2378_v25, 2  ;;  %v2399_v33 = vadd.f32 %v2398_v26, %v2397_v21  ;;  %v2412_v34 = vrot.slane %v2411_v31, 4  ;;  %v2418_v35 = vsel %vm478_vm0, %v7751_v11, 0.0  ;;  %8162 = vmatpush3.bf16.msra.mxu0 %v8667_v58  ;;  %8194 = vmatpush3.bf16.msra.mxu1 %v8668_v59 }
  0xe5   : > { %v2386_v36 = vrot.slane %v2385_v28, 2  ;;  %v2393_v37 = vrot.slane %v2392_v29, 2  ;;  %v2406_v38 = vadd.f32 %v2405_v30, %v2404_v27  ;;  %v2419_v39 = vrot.slane %v2418_v35, 4 }
  0xe6   : > { %v2380_v42 = vadd.f32 %v2379_v32, %v2378_v25  ;;  %v2400_v43 = vrot.slane %v2399_v33, 2  ;;  %v2413_v44 = vadd.f32 %v2412_v34, %v2411_v31  ;;  %v2425_v45 = vsel %vm478_vm0, %v7752_v12, 0.0 }
  0xe7   : > { %v2387_v46 = vadd.f32 %v2386_v36, %v2385_v28  ;;  %v2394_v47 = vadd.f32 %v2393_v37, %v2392_v29  ;;  %v2407_v48 = vrot.slane %v2406_v38, 2  ;;  %v2420_v49 = vadd.f32 %v2419_v39, %v2418_v35 }
  0xe8   : > { %v2381_v50 = vrot.slane %v2380_v42, 1  ;;  %v2401_v51 = vadd.f32 %v2400_v43, %v2399_v33  ;;  %v2414_v52 = vrot.slane %v2413_v44, 2  ;;  %v2426_v53 = vrot.slane %v2425_v45, 4 }
  0xe9   : > { %v2388_v54 = vrot.slane %v2387_v46, 1  ;;  %v2395_v55 = vrot.slane %v2394_v47, 1  ;;  %v2408_v56 = vadd.f32 %v2407_v48, %v2406_v38  ;;  %v2421_v57 = vrot.slane %v2420_v49, 2 }
  0xea   : > { %v2382_v60 = vadd.f32 %v2381_v50, %v2380_v42  ;;  %v2402_v61 = vrot.slane %v2401_v51, 1  ;;  %v2415_v62 = vadd.f32 %v2414_v52, %v2413_v44  ;;  %v2427_v63 = vadd.f32 %v2426_v53, %v2425_v45 }
  0xeb   : > { %v2389_v0 = vadd.f32 %v2388_v54, %v2387_v46  ;;  %v2396_v1 = vadd.f32 %v2395_v55, %v2394_v47  ;;  %v2409_v2 = vrot.slane %v2408_v56, 1  ;;  %v2422_v3 = vadd.f32 %v2421_v57, %v2420_v49 }
  0xec   : > { %v2403_v5 = vadd.f32 %v2402_v61, %v2401_v51  ;;  %v2416_v6 = vrot.slane %v2415_v62, 1  ;;  %v2428_v7 = vrot.slane %v2427_v63, 2  ;;  %v2744_v8 = vmul.f32 0.125, %v2382_v60 }
  0xed   : > { %v2410_v9 = vadd.f32 %v2409_v2, %v2408_v56  ;;  %v2423_v10 = vrot.slane %v2422_v3, 1  ;;  %v2745_v11 = vmul.f32 0.125, %v2389_v0  ;;  %v2746_v12 = vmul.f32 0.125, %v2396_v1 }
  0xee   : > { %v2417_v14 = vadd.f32 %v2416_v6, %v2415_v62  ;;  %v2429_v15 = vadd.f32 %v2428_v7, %v2427_v63  ;;  %v2747_v16 = vmul.f32 0.125, %v2403_v5  ;;  %v7723_v17 = vunpack.c.l.bf16 %v7919_v4 }
  0xef   : > { %v2424_v19 = vadd.f32 %v2423_v10, %v2422_v3  ;;  %v2748_v20 = vmul.f32 0.125, %v2410_v9  ;;  %v3252_v21 = vsel %vm2912_vm1, %v2745_v11, %v2744_v8  ;;  %v7724_v22 = vunpack.c.h.bf16 %v7919_v4 }
  0xf0   : > { %v2430_v24 = vrot.slane %v2429_v15, 1  ;;  %v2749_v25 = vmul.f32 0.125, %v2417_v14  ;;  %v3253_v26 = vsel %vm2914_vm2, %v2746_v12, %v3252_v21  ;;  %v7727_v27 = vunpack.c.l.bf16 %v7920_v13 }
  0xf1   : > { %v2750_v28 = vmul.f32 0.125, %v2424_v19  ;;  %v3254_v29 = vsel %vm2916_vm3, %v2747_v16, %v3253_v26  ;;  %v7728_v30 = vunpack.c.h.bf16 %v7920_v13  ;;  %v7731_v31 = vunpack.c.l.bf16 %v7921_v18 }
  0xf2   : > { %v2431_v32 = vadd.f32 %v2430_v24, %v2429_v15  ;;  %v3255_v33 = vsel %vm2918_vm4, %v2748_v20, %v3254_v29  ;;  %v7732_v34 = vunpack.c.h.bf16 %v7921_v18  ;;  %v7735_v35 = vunpack.c.l.bf16 %v7922_v23  ;;  %v7931_v24 = vld [vmem:[%s9295_s5 + $0x1a0] sm:$0xff]  }
  0xf3   : > { %v3256_v36 = vsel %vm2920_vm5, %v2749_v25, %v3255_v33  ;;  %v7736_v37 = vunpack.c.h.bf16 %v7922_v23  ;;  %v2320_v38 = vsel %vm478_vm0, %v7723_v17, 0.0  ;;  %v2327_v39 = vsel %vm478_vm0, %v7724_v22, 0.0  ;;  %v7932_v33 = vld [vmem:[%s9295_s5 + $0x1a8] sm:$0xff]  }
  0xf4   : > { %v2751_v40 = vmul.f32 0.125, %v2431_v32  ;;  %v3257_v41 = vsel %vm2922_vm6, %v2750_v28, %v3256_v36  ;;  %v2321_v42 = vrot.slane %v2320_v38, 4  ;;  %v2328_v43 = vrot.slane %v2327_v39, 4 }
  0xf5   : > { %v2334_v44 = vsel %vm478_vm0, %v7727_v27, 0.0  ;;  %v2341_v45 = vsel %vm478_vm0, %v7728_v30, 0.0  ;;  %v2348_v46 = vsel %vm478_vm0, %v7731_v31, 0.0  ;;  %v2355_v47 = vsel %vm478_vm0, %v7732_v34, 0.0  ;;  %v8669_v34 = vld [vmem:[%s11424_s2 + $0x30] sm:$0xff]  }
  0xf6   : > { %v3258_v48 = vsel %vm2924_vm7, %v2751_v40, %v3257_v41  ;;  %v2322_v49 = vadd.f32 %v2321_v42, %v2320_v38  ;;  %v2329_v50 = vadd.f32 %v2328_v43, %v2327_v39  ;;  %v2335_v51 = vrot.slane %v2334_v44, 4  ;;  %v7933_v40 = vld [vmem:[%s9295_s5 + $0x1b0] sm:$0xff]   ;;  %8163 = vmatprep.subr.bf16.mxu0 %v8669_v34 }
  0xf7   : > { %3309 = vrot.lane.b32.xlu1 %v3258_v48, %s9209_s6  ;;  %v2342_v52 = vrot.slane %v2341_v45, 4  ;;  %v2349_v53 = vrot.slane %v2348_v46, 4  ;;  %v2356_v54 = vrot.slane %v2355_v47, 4  ;;  %v2362_v55 = vsel %vm478_vm0, %v7735_v35, 0.0  ;;  %v8670_v35 = vld [vmem:[%s11424_s2 + $0x70] sm:$0xff]   ;;  %8164 = vmatpush3.bf16.msra.mxu0 %v8669_v34 }
  0xf8   : > { %v2323_v56 = vrot.slane %v2322_v49, 2  ;;  %v2330_v57 = vrot.slane %v2329_v50, 2  ;;  %v2336_v58 = vadd.f32 %v2335_v51, %v2334_v44  ;;  %v2363_v59 = vrot.slane %v2362_v55, 4  ;;  %8195 = vmatprep.subr.bf16.mxu1 %v8670_v35 }
  0xf9   : > { %v2343_v60 = vadd.f32 %v2342_v52, %v2341_v45  ;;  %v2350_v61 = vadd.f32 %v2349_v53, %v2348_v46  ;;  %v2357_v62 = vadd.f32 %v2356_v54, %v2355_v47  ;;  %v2369_v63 = vsel %vm478_vm0, %v7736_v37, 0.0  ;;  %v7934_v45 = vld [vmem:[%s9295_s5 + $0x1b8] sm:$0xff]   ;;  %8196 = vmatpush3.bf16.msra.mxu1 %v8670_v35 }
  0xfa   : > { %v2324_v0 = vadd.f32 %v2323_v56, %v2322_v49  ;;  %v2331_v1 = vadd.f32 %v2330_v57, %v2329_v50  ;;  %v2337_v2 = vrot.slane %v2336_v58, 2  ;;  %v2364_v3 = vadd.f32 %v2363_v59, %v2362_v55 }
  0xfb   : > { %v2344_v4 = vrot.slane %v2343_v60, 2  ;;  %v2351_v5 = vrot.slane %v2350_v61, 2  ;;  %v2358_v6 = vrot.slane %v2357_v62, 2  ;;  %v2370_v7 = vrot.slane %v2369_v63, 4 }
  0xfc   : > { %v2325_v8 = vrot.slane %v2324_v0, 1  ;;  %v2332_v9 = vrot.slane %v2331_v1, 1  ;;  %v2338_v10 = vadd.f32 %v2337_v2, %v2336_v58  ;;  %v2365_v11 = vrot.slane %v2364_v3, 2 }
  0xfd   : > { %v2345_v12 = vadd.f32 %v2344_v4, %v2343_v60  ;;  %v2352_v13 = vadd.f32 %v2351_v5, %v2350_v61  ;;  %v2359_v14 = vadd.f32 %v2358_v6, %v2357_v62  ;;  %v2371_v15 = vadd.f32 %v2370_v7, %v2369_v63 }
  0xfe   : > { %v2326_v16 = vadd.f32 %v2325_v8, %v2324_v0  ;;  %v2333_v17 = vadd.f32 %v2332_v9, %v2331_v1  ;;  %v2339_v18 = vrot.slane %v2338_v10, 1  ;;  %v2366_v19 = vadd.f32 %v2365_v11, %v2364_v3 }
  0xff   : > { %v2346_v20 = vrot.slane %v2345_v12, 1  ;;  %v2353_v21 = vrot.slane %v2352_v13, 1  ;;  %v2360_v22 = vrot.slane %v2359_v14, 1  ;;  %v2372_v23 = vrot.slane %v2371_v15, 2 }
 0x100   : > { %v2340_v25 = vadd.f32 %v2339_v18, %v2338_v10  ;;  %v2367_v26 = vrot.slane %v2366_v19, 1  ;;  %v2736_v27 = vmul.f32 0.125, %v2326_v16  ;;  %v2737_v28 = vmul.f32 0.125, %v2333_v17 }
 0x101   : > { %v2347_v29 = vadd.f32 %v2346_v20, %v2345_v12  ;;  %v2354_v30 = vadd.f32 %v2353_v21, %v2352_v13  ;;  %v2361_v31 = vadd.f32 %v2360_v22, %v2359_v14  ;;  %v2373_v32 = vadd.f32 %v2372_v23, %v2371_v15 }
 0x102   : > { %v2368_v36 = vadd.f32 %v2367_v26, %v2366_v19  ;;  %v2738_v37 = vmul.f32 0.125, %v2340_v25  ;;  %v3245_v38 = vsel %vm2912_vm1, %v2737_v28, %v2736_v27  ;;  %v7771_v39 = vunpack.c.l.bf16 %v7931_v24 }
 0x103   : > { %v2374_v41 = vrot.slane %v2373_v32, 1  ;;  %v2739_v42 = vmul.f32 0.125, %v2347_v29  ;;  %v2740_v43 = vmul.f32 0.125, %v2354_v30  ;;  %v2741_v44 = vmul.f32 0.125, %v2361_v31 }
 0x104   : > { %v2742_v46 = vmul.f32 0.125, %v2368_v36  ;;  %v3246_v47 = vsel %vm2914_vm2, %v2738_v37, %v3245_v38  ;;  %v7772_v48 = vunpack.c.h.bf16 %v7931_v24  ;;  %v7775_v49 = vunpack.c.l.bf16 %v7932_v33 }
 0x105   : > { %v2375_v50 = vadd.f32 %v2374_v41, %v2373_v32  ;;  %v3247_v51 = vsel %vm2916_vm3, %v2739_v42, %v3246_v47  ;;  %v7776_v52 = vunpack.c.h.bf16 %v7932_v33  ;;  %v7779_v53 = vunpack.c.l.bf16 %v7933_v40 }
 0x106   : > { %v3248_v54 = vsel %vm2918_vm4, %v2740_v43, %v3247_v51  ;;  %v7780_v55 = vunpack.c.h.bf16 %v7933_v40  ;;  %v7783_v56 = vunpack.c.l.bf16 %v7934_v45  ;;  %v7784_v57 = vunpack.c.h.bf16 %v7934_v45 }
 0x107   : > { %v2743_v58 = vmul.f32 0.125, %v2375_v50  ;;  %v3249_v59 = vsel %vm2920_vm5, %v2741_v44, %v3248_v54  ;;  %v2488_v60 = vsel %vm478_vm0, %v7771_v39, 0.0  ;;  %v2495_v61 = vsel %vm478_vm0, %v7772_v48, 0.0 }
 0x108   : > { %v3250_v62 = vsel %vm2922_vm6, %v2742_v46, %v3249_v59  ;;  %v2489_v63 = vrot.slane %v2488_v60, 4  ;;  %v2496_v0 = vrot.slane %v2495_v61, 4  ;;  %v2502_v1 = vsel %vm478_vm0, %v7775_v49, 0.0  ;;  %v7927_v46 = vld [vmem:[%s9295_s5 + $0x180] sm:$0xff]  }
 0x109   : > { %v3251_v2 = vsel %vm2924_vm7, %v2743_v58, %v3250_v62  ;;  %v2503_v3 = vrot.slane %v2502_v1, 4  ;;  %v2509_v4 = vsel %vm478_vm0, %v7776_v52, 0.0  ;;  %v2516_v5 = vsel %vm478_vm0, %v7779_v53, 0.0 }
 0x10a   : > { %3307 = vrot.lane.b32.xlu0 %v3251_v2, %s9209_s6  ;;  %v2490_v6 = vadd.f32 %v2489_v63, %v2488_v60  ;;  %v2497_v7 = vadd.f32 %v2496_v0, %v2495_v61  ;;  %v2510_v8 = vrot.slane %v2509_v4, 4  ;;  %v2517_v9 = vrot.slane %v2516_v5, 4  ;;  %v7929_v0 = vld [vmem:[%s9295_s5 + $0x190] sm:$0xff]  }
 0x10b   : > { %v2504_v10 = vadd.f32 %v2503_v3, %v2502_v1  ;;  %v2523_v11 = vsel %vm478_vm0, %v7780_v55, 0.0  ;;  %v2530_v12 = vsel %vm478_vm0, %v7783_v56, 0.0  ;;  %v2537_v13 = vsel %vm478_vm0, %v7784_v57, 0.0  ;;  %v7928_v55 = vld [vmem:[%s9295_s5 + $0x188] sm:$0xff]   ;;  %v7930_v1 = vld [vmem:[%s9295_s5 + $0x198] sm:$0xff]  }
 0x10c   : > { %v2491_v14 = vrot.slane %v2490_v6, 2  ;;  %v2498_v15 = vrot.slane %v2497_v7, 2  ;;  %v2511_v16 = vadd.f32 %v2510_v8, %v2509_v4  ;;  %v2518_v17 = vadd.f32 %v2517_v9, %v2516_v5 }
 0x10d   : > { %v2505_v18 = vrot.slane %v2504_v10, 2  ;;  %v2524_v19 = vrot.slane %v2523_v11, 4  ;;  %v2531_v20 = vrot.slane %v2530_v12, 4  ;;  %v2538_v21 = vrot.slane %v2537_v13, 4 }
 0x10e   : > { %v2492_v22 = vadd.f32 %v2491_v14, %v2490_v6  ;;  %v2499_v23 = vadd.f32 %v2498_v15, %v2497_v7  ;;  %v2512_v24 = vrot.slane %v2511_v16, 2  ;;  %v2519_v25 = vrot.slane %v2518_v17, 2 }
 0x10f   : > { %v2506_v26 = vadd.f32 %v2505_v18, %v2504_v10  ;;  %v2525_v27 = vadd.f32 %v2524_v19, %v2523_v11  ;;  %v2532_v28 = vadd.f32 %v2531_v20, %v2530_v12  ;;  %v2539_v29 = vadd.f32 %v2538_v21, %v2537_v13 }
 0x110   : > { %v2493_v30 = vrot.slane %v2492_v22, 1  ;;  %v2500_v31 = vrot.slane %v2499_v23, 1  ;;  %v2513_v32 = vadd.f32 %v2512_v24, %v2511_v16  ;;  %v2520_v33 = vadd.f32 %v2519_v25, %v2518_v17 }
 0x111   : > { %v2507_v34 = vrot.slane %v2506_v26, 1  ;;  %v2526_v35 = vrot.slane %v2525_v27, 2  ;;  %v2533_v36 = vrot.slane %v2532_v28, 2  ;;  %v2540_v37 = vrot.slane %v2539_v29, 2 }
 0x112   : > { %v2494_v38 = vadd.f32 %v2493_v30, %v2492_v22  ;;  %v2501_v39 = vadd.f32 %v2500_v31, %v2499_v23  ;;  %v2514_v40 = vrot.slane %v2513_v32, 1  ;;  %v2521_v41 = vrot.slane %v2520_v33, 1 }
 0x113   : > { %v2508_v42 = vadd.f32 %v2507_v34, %v2506_v26  ;;  %v2527_v43 = vadd.f32 %v2526_v35, %v2525_v27  ;;  %v2534_v44 = vadd.f32 %v2533_v36, %v2532_v28  ;;  %v2541_v45 = vadd.f32 %v2540_v37, %v2539_v29 }
 0x114   : > { %v2515_v47 = vadd.f32 %v2514_v40, %v2513_v32  ;;  %v2522_v48 = vadd.f32 %v2521_v41, %v2520_v33  ;;  %v2760_v49 = vmul.f32 0.125, %v2494_v38  ;;  %v2761_v50 = vmul.f32 0.125, %v2501_v39 }
 0x115   : > { %v2528_v51 = vrot.slane %v2527_v43, 1  ;;  %v2535_v52 = vrot.slane %v2534_v44, 1  ;;  %v2542_v53 = vrot.slane %v2541_v45, 1  ;;  %v2762_v54 = vmul.f32 0.125, %v2508_v42 }
 0x116   : > { %v2763_v56 = vmul.f32 0.125, %v2515_v47  ;;  %v2764_v57 = vmul.f32 0.125, %v2522_v48  ;;  %v3266_v58 = vsel %vm2912_vm1, %v2761_v50, %v2760_v49  ;;  %v7755_v59 = vunpack.c.l.bf16 %v7927_v46 }
 0x117   : > { %v2529_v60 = vadd.f32 %v2528_v51, %v2527_v43  ;;  %v2536_v61 = vadd.f32 %v2535_v52, %v2534_v44  ;;  %v2543_v62 = vadd.f32 %v2542_v53, %v2541_v45  ;;  %v3267_v63 = vsel %vm2914_vm2, %v2762_v54, %v3266_v58 }
 0x118   : > { %v3268_v2 = vsel %vm2916_vm3, %v2763_v56, %v3267_v63  ;;  %v7756_v3 = vunpack.c.h.bf16 %v7927_v46  ;;  %v7759_v4 = vunpack.c.l.bf16 %v7928_v55  ;;  %v7760_v5 = vunpack.c.h.bf16 %v7928_v55 }
 0x119   : > { %v2765_v6 = vmul.f32 0.125, %v2529_v60  ;;  %v2766_v7 = vmul.f32 0.125, %v2536_v61  ;;  %v2767_v8 = vmul.f32 0.125, %v2543_v62  ;;  %v3269_v9 = vsel %vm2918_vm4, %v2764_v57, %v3268_v2  ;;  %v7939_v2 = vld [vmem:[%s9295_s5 + $0x1e0] sm:$0xff]  }
 0x11a   : > { %v7763_v10 = vunpack.c.l.bf16 %v7929_v0  ;;  %v7764_v11 = vunpack.c.h.bf16 %v7929_v0  ;;  %v7767_v12 = vunpack.c.l.bf16 %v7930_v1  ;;  %v7768_v13 = vunpack.c.h.bf16 %v7930_v1 }
 0x11b   : > { %v3270_v14 = vsel %vm2920_vm5, %v2765_v6, %v3269_v9  ;;  %v2432_v15 = vsel %vm478_vm0, %v7755_v59, 0.0  ;;  %v2439_v16 = vsel %vm478_vm0, %v7756_v3, 0.0  ;;  %v2446_v17 = vsel %vm478_vm0, %v7759_v4, 0.0 }
 0x11c   : > { %v3271_v18 = vsel %vm2922_vm6, %v2766_v7, %v3270_v14  ;;  %v2433_v19 = vrot.slane %v2432_v15, 4  ;;  %v2440_v20 = vrot.slane %v2439_v16, 4  ;;  %v2447_v21 = vrot.slane %v2446_v17, 4 }
 0x11d   : > { %v3272_v22 = vsel %vm2924_vm7, %v2767_v8, %v3271_v18  ;;  %v2453_v23 = vsel %vm478_vm0, %v7760_v5, 0.0  ;;  %v2460_v24 = vsel %vm478_vm0, %v7763_v10, 0.0  ;;  %v2467_v25 = vsel %vm478_vm0, %v7764_v11, 0.0  ;;  %v7940_v11 = vld [vmem:[%s9295_s5 + $0x1e8] sm:$0xff]   ;;  %v8672_v18 = vld [vmem:[%s11424_s2 + $0x78] sm:$0xff]  }
 0x11e   : > { %3313 = vrot.lane.b32.xlu1 %v3272_v22, %s9209_s6  ;;  %v2434_v26 = vadd.f32 %v2433_v19, %v2432_v15  ;;  %v2441_v27 = vadd.f32 %v2440_v20, %v2439_v16  ;;  %v2448_v28 = vadd.f32 %v2447_v21, %v2446_v17  ;;  %v2454_v29 = vrot.slane %v2453_v23, 4  ;;  %v8671_v17 = vld [vmem:[%s11424_s2 + $0x38] sm:$0xff]   ;;  %8197 = vmatprep.subr.bf16.mxu1 %v8672_v18 }
 0x11f   : > { %v2461_v30 = vrot.slane %v2460_v24, 4  ;;  %v2468_v31 = vrot.slane %v2467_v25, 4  ;;  %v2474_v32 = vsel %vm478_vm0, %v7767_v12, 0.0  ;;  %v2481_v33 = vsel %vm478_vm0, %v7768_v13, 0.0  ;;  %v7941_v12 = vld [vmem:[%s9295_s5 + $0x1f0] sm:$0xff]   ;;  %8165 = vmatprep.subr.bf16.mxu0 %v8671_v17  ;;  %8198 = vmatpush3.bf16.msra.mxu1 %v8672_v18 }
 0x120   : > { %v2435_v34 = vrot.slane %v2434_v26, 2  ;;  %v2442_v35 = vrot.slane %v2441_v27, 2  ;;  %v2449_v36 = vrot.slane %v2448_v28, 2  ;;  %v2455_v37 = vadd.f32 %v2454_v29, %v2453_v23  ;;  %v7942_v23 = vld [vmem:[%s9295_s5 + $0x1f8] sm:$0xff]   ;;  %8166 = vmatpush3.bf16.msra.mxu0 %v8671_v17 }
 0x121   : > { %v2462_v38 = vadd.f32 %v2461_v30, %v2460_v24  ;;  %v2469_v39 = vadd.f32 %v2468_v31, %v2467_v25  ;;  %v2475_v40 = vrot.slane %v2474_v32, 4  ;;  %v2482_v41 = vrot.slane %v2481_v33, 4 }
 0x122   : > { %v2436_v42 = vadd.f32 %v2435_v34, %v2434_v26  ;;  %v2443_v43 = vadd.f32 %v2442_v35, %v2441_v27  ;;  %v2450_v44 = vadd.f32 %v2449_v36, %v2448_v28  ;;  %v2456_v45 = vrot.slane %v2455_v37, 2 }
 0x123   : > { %v2463_v46 = vrot.slane %v2462_v38, 2  ;;  %v2470_v47 = vrot.slane %v2469_v39, 2  ;;  %v2476_v48 = vadd.f32 %v2475_v40, %v2474_v32  ;;  %v2483_v49 = vadd.f32 %v2482_v41, %v2481_v33 }
 0x124   : > { %v2437_v50 = vrot.slane %v2436_v42, 1  ;;  %v2444_v51 = vrot.slane %v2443_v43, 1  ;;  %v2451_v52 = vrot.slane %v2450_v44, 1  ;;  %v2457_v53 = vadd.f32 %v2456_v45, %v2455_v37 }
 0x125   : > { %v2464_v54 = vadd.f32 %v2463_v46, %v2462_v38  ;;  %v2471_v55 = vadd.f32 %v2470_v47, %v2469_v39  ;;  %v2477_v56 = vrot.slane %v2476_v48, 2  ;;  %v2484_v57 = vrot.slane %v2483_v49, 2 }
 0x126   : > { %v2438_v58 = vadd.f32 %v2437_v50, %v2436_v42  ;;  %v2445_v59 = vadd.f32 %v2444_v51, %v2443_v43  ;;  %v2452_v60 = vadd.f32 %v2451_v52, %v2450_v44  ;;  %v2458_v61 = vrot.slane %v2457_v53, 1 }
 0x127   : > { %v2465_v62 = vrot.slane %v2464_v54, 1  ;;  %v2472_v63 = vrot.slane %v2471_v55, 1  ;;  %v2478_v0 = vadd.f32 %v2477_v56, %v2476_v48  ;;  %v2485_v1 = vadd.f32 %v2484_v57, %v2483_v49 }
 0x128   : > { %v2459_v3 = vadd.f32 %v2458_v61, %v2457_v53  ;;  %v2752_v4 = vmul.f32 0.125, %v2438_v58  ;;  %v2753_v5 = vmul.f32 0.125, %v2445_v59  ;;  %v2754_v6 = vmul.f32 0.125, %v2452_v60 }
 0x129   : > { %v2466_v7 = vadd.f32 %v2465_v62, %v2464_v54  ;;  %v2473_v8 = vadd.f32 %v2472_v63, %v2471_v55  ;;  %v2479_v9 = vrot.slane %v2478_v0, 1  ;;  %v2486_v10 = vrot.slane %v2485_v1, 1 }
 0x12a   : > { %v2755_v13 = vmul.f32 0.125, %v2459_v3  ;;  %v3259_v14 = vsel %vm2912_vm1, %v2753_v5, %v2752_v4  ;;  %v7803_v15 = vunpack.c.l.bf16 %v7939_v2  ;;  %v7804_v16 = vunpack.c.h.bf16 %v7939_v2 }
 0x12b   : > { %v2480_v19 = vadd.f32 %v2479_v9, %v2478_v0  ;;  %v2487_v20 = vadd.f32 %v2486_v10, %v2485_v1  ;;  %v2756_v21 = vmul.f32 0.125, %v2466_v7  ;;  %v2757_v22 = vmul.f32 0.125, %v2473_v8 }
 0x12c   : > { %v3260_v24 = vsel %vm2914_vm2, %v2754_v6, %v3259_v14  ;;  %v7807_v25 = vunpack.c.l.bf16 %v7940_v11  ;;  %v7808_v26 = vunpack.c.h.bf16 %v7940_v11  ;;  %v7811_v27 = vunpack.c.l.bf16 %v7941_v12 }
 0x12d   : > { %v2758_v28 = vmul.f32 0.125, %v2480_v19  ;;  %v2759_v29 = vmul.f32 0.125, %v2487_v20  ;;  %v3261_v30 = vsel %vm2916_vm3, %v2755_v13, %v3260_v24  ;;  %v7812_v31 = vunpack.c.h.bf16 %v7941_v12  ;;  %v7935_v20 = vld [vmem:[%s9295_s5 + $0x1c0] sm:$0xff]  }
 0x12e   : > { %v3262_v32 = vsel %vm2918_vm4, %v2756_v21, %v3261_v30  ;;  %v7815_v33 = vunpack.c.l.bf16 %v7942_v23  ;;  %v7816_v34 = vunpack.c.h.bf16 %v7942_v23  ;;  %v2600_v35 = vsel %vm478_vm0, %v7803_v15, 0.0 }
 0x12f   : > { %v3263_v36 = vsel %vm2920_vm5, %v2757_v22, %v3262_v32  ;;  %v2601_v37 = vrot.slane %v2600_v35, 4  ;;  %v2607_v38 = vsel %vm478_vm0, %v7804_v16, 0.0  ;;  %v2614_v39 = vsel %vm478_vm0, %v7807_v25, 0.0 }
 0x130   : > { %v3264_v40 = vsel %vm2922_vm6, %v2758_v28, %v3263_v36  ;;  %v2608_v41 = vrot.slane %v2607_v38, 4  ;;  %v2615_v42 = vrot.slane %v2614_v39, 4  ;;  %v2621_v43 = vsel %vm478_vm0, %v7808_v26, 0.0 }
 0x131   : > { %v3265_v44 = vsel %vm2924_vm7, %v2759_v29, %v3264_v40  ;;  %v2602_v45 = vadd.f32 %v2601_v37, %v2600_v35  ;;  %v2622_v46 = vrot.slane %v2621_v43, 4  ;;  %v2628_v47 = vsel %vm478_vm0, %v7811_v27, 0.0  ;;  %v7936_v29 = vld [vmem:[%s9295_s5 + $0x1c8] sm:$0xff]  }
 0x132   : > { %3311 = vrot.lane.b32.xlu0 %v3265_v44, %s9209_s6  ;;  %v2609_v48 = vadd.f32 %v2608_v41, %v2607_v38  ;;  %v2616_v49 = vadd.f32 %v2615_v42, %v2614_v39  ;;  %v2629_v50 = vrot.slane %v2628_v47, 4  ;;  %v2635_v51 = vsel %vm478_vm0, %v7812_v31, 0.0  ;;  %v7938_v39 = vld [vmem:[%s9295_s5 + $0x1d8] sm:$0xff]  }
 0x133   : > { %v2603_v52 = vrot.slane %v2602_v45, 2  ;;  %v2623_v53 = vadd.f32 %v2622_v46, %v2621_v43  ;;  %v2636_v54 = vrot.slane %v2635_v51, 4  ;;  %v2642_v55 = vsel %vm478_vm0, %v7815_v33, 0.0 }
 0x134   : > { %v2610_v56 = vrot.slane %v2609_v48, 2  ;;  %v2617_v57 = vrot.slane %v2616_v49, 2  ;;  %v2630_v58 = vadd.f32 %v2629_v50, %v2628_v47  ;;  %v2643_v59 = vrot.slane %v2642_v55, 4 }
 0x135   : > { %v2604_v60 = vadd.f32 %v2603_v52, %v2602_v45  ;;  %v2624_v61 = vrot.slane %v2623_v53, 2  ;;  %v2637_v62 = vadd.f32 %v2636_v54, %v2635_v51  ;;  %v2649_v63 = vsel %vm478_vm0, %v7816_v34, 0.0  ;;  %v7937_v34 = vld [vmem:[%s9295_s5 + $0x1d0] sm:$0xff]   ;;  %s7304_s5 = sshll.u32 %s9259_s19, 11  ;;  %s11381_s19 = scalar_lea.sflag [#allocation3], %s205_s8 }
 0x136   : > { %v2611_v0 = vadd.f32 %v2610_v56, %v2609_v48  ;;  %v2618_v1 = vadd.f32 %v2617_v57, %v2616_v49  ;;  %v2631_v2 = vrot.slane %v2630_v58, 2  ;;  %v2644_v3 = vadd.f32 %v2643_v59, %v2642_v55 }
 0x137   : > { %v2605_v4 = vrot.slane %v2604_v60, 1  ;;  %v2625_v5 = vadd.f32 %v2624_v61, %v2623_v53  ;;  %v2638_v6 = vrot.slane %v2637_v62, 2  ;;  %v2650_v7 = vrot.slane %v2649_v63, 4 }
 0x138   : > { %v2612_v8 = vrot.slane %v2611_v0, 1  ;;  %v2619_v9 = vrot.slane %v2618_v1, 1  ;;  %v2632_v10 = vadd.f32 %v2631_v2, %v2630_v58  ;;  %v2645_v11 = vrot.slane %v2644_v3, 2 }
 0x139   : > { %v2606_v12 = vadd.f32 %v2605_v4, %v2604_v60  ;;  %v2626_v13 = vrot.slane %v2625_v5, 1  ;;  %v2639_v14 = vadd.f32 %v2638_v6, %v2637_v62  ;;  %v2651_v15 = vadd.f32 %v2650_v7, %v2649_v63 }
 0x13a   : > { %v2613_v16 = vadd.f32 %v2612_v8, %v2611_v0  ;;  %v2620_v17 = vadd.f32 %v2619_v9, %v2618_v1  ;;  %v2633_v18 = vrot.slane %v2632_v10, 1  ;;  %v2646_v19 = vadd.f32 %v2645_v11, %v2644_v3 }
 0x13b   : > { %v2627_v21 = vadd.f32 %v2626_v13, %v2625_v5  ;;  %v2640_v22 = vrot.slane %v2639_v14, 1  ;;  %v2652_v23 = vrot.slane %v2651_v15, 2  ;;  %v2776_v24 = vmul.f32 0.125, %v2606_v12 }
 0x13c   : > { %v2634_v25 = vadd.f32 %v2633_v18, %v2632_v10  ;;  %v2647_v26 = vrot.slane %v2646_v19, 1  ;;  %v2777_v27 = vmul.f32 0.125, %v2613_v16  ;;  %v2778_v28 = vmul.f32 0.125, %v2620_v17 }
 0x13d   : > { %v2641_v30 = vadd.f32 %v2640_v22, %v2639_v14  ;;  %v2653_v31 = vadd.f32 %v2652_v23, %v2651_v15  ;;  %v2779_v32 = vmul.f32 0.125, %v2627_v21  ;;  %v7787_v33 = vunpack.c.l.bf16 %v7935_v20 }
 0x13e   : > { %v2648_v35 = vadd.f32 %v2647_v26, %v2646_v19  ;;  %v2780_v36 = vmul.f32 0.125, %v2634_v25  ;;  %v3280_v37 = vsel %vm2912_vm1, %v2777_v27, %v2776_v24  ;;  %v7788_v38 = vunpack.c.h.bf16 %v7935_v20 }
 0x13f   : > { %v2654_v40 = vrot.slane %v2653_v31, 1  ;;  %v2781_v41 = vmul.f32 0.125, %v2641_v30  ;;  %v3281_v42 = vsel %vm2914_vm2, %v2778_v28, %v3280_v37  ;;  %v7791_v43 = vunpack.c.l.bf16 %v7936_v29 }
 0x140   : > { %v2782_v44 = vmul.f32 0.125, %v2648_v35  ;;  %v3282_v45 = vsel %vm2916_vm3, %v2779_v32, %v3281_v42  ;;  %v7792_v46 = vunpack.c.h.bf16 %v7936_v29  ;;  %v7795_v47 = vunpack.c.l.bf16 %v7937_v34 }
 0x141   : > { %v2655_v48 = vadd.f32 %v2654_v40, %v2653_v31  ;;  %v3283_v49 = vsel %vm2918_vm4, %v2780_v36, %v3282_v45  ;;  %v7796_v50 = vunpack.c.h.bf16 %v7937_v34  ;;  %v7799_v51 = vunpack.c.l.bf16 %v7938_v39  ;;  %v7824_v40 = vld [vmem:[%s9662_s14 + $0x40] sm:$0xff]  }
 0x142   : > { %v3284_v52 = vsel %vm2920_vm5, %v2781_v41, %v3283_v49  ;;  %v7800_v53 = vunpack.c.h.bf16 %v7938_v39  ;;  %v2544_v54 = vsel %vm478_vm0, %v7787_v33, 0.0  ;;  %v2551_v55 = vsel %vm478_vm0, %v7788_v38, 0.0  ;;  %v7825_v49 = vld [vmem:[%s9662_s14 + $0x48] sm:$0xff]  }
 0x143   : > { %v2783_v56 = vmul.f32 0.125, %v2655_v48  ;;  %v3285_v57 = vsel %vm2922_vm6, %v2782_v44, %v3284_v52  ;;  %v2545_v58 = vrot.slane %v2544_v54, 4  ;;  %v2552_v59 = vrot.slane %v2551_v55, 4 }
 0x144   : > { %v2558_v60 = vsel %vm478_vm0, %v7791_v43, 0.0  ;;  %v2565_v61 = vsel %vm478_vm0, %v7792_v46, 0.0  ;;  %v2572_v62 = vsel %vm478_vm0, %v7795_v47, 0.0  ;;  %v2579_v63 = vsel %vm478_vm0, %v7796_v50, 0.0 }
 0x145   : > { %v3286_v0 = vsel %vm2924_vm7, %v2783_v56, %v3285_v57  ;;  %v2546_v1 = vadd.f32 %v2545_v58, %v2544_v54  ;;  %v2553_v2 = vadd.f32 %v2552_v59, %v2551_v55  ;;  %v2559_v3 = vrot.slane %v2558_v60, 4  ;;  %v7826_v54 = vld [vmem:[%s9662_s14 + $0x50] sm:$0xff]   ;;  %v7827_v59 = vld [vmem:[%s9662_s14 + $0x58] sm:$0xff]  }
 0x146   : > { %3317 = vrot.lane.b32.xlu1 %v3286_v0, %s9209_s6  ;;  %v2566_v4 = vrot.slane %v2565_v61, 4  ;;  %v2573_v5 = vrot.slane %v2572_v62, 4  ;;  %v2580_v6 = vrot.slane %v2579_v63, 4  ;;  %v2586_v7 = vsel %vm478_vm0, %v7799_v51, 0.0 }
 0x147   : > { %v2547_v8 = vrot.slane %v2546_v1, 2  ;;  %v2554_v9 = vrot.slane %v2553_v2, 2  ;;  %v2560_v10 = vadd.f32 %v2559_v3, %v2558_v60  ;;  %v2587_v11 = vrot.slane %v2586_v7, 4 }
 0x148   : > { %v2567_v12 = vadd.f32 %v2566_v4, %v2565_v61  ;;  %v2574_v13 = vadd.f32 %v2573_v5, %v2572_v62  ;;  %v2581_v14 = vadd.f32 %v2580_v6, %v2579_v63  ;;  %v2593_v15 = vsel %vm478_vm0, %v7800_v53, 0.0 }
 0x149   : > { %v2548_v16 = vadd.f32 %v2547_v8, %v2546_v1  ;;  %v2555_v17 = vadd.f32 %v2554_v9, %v2553_v2  ;;  %v2561_v18 = vrot.slane %v2560_v10, 2  ;;  %v2588_v19 = vadd.f32 %v2587_v11, %v2586_v7 }
 0x14a   : > { %v2568_v20 = vrot.slane %v2567_v12, 2  ;;  %v2575_v21 = vrot.slane %v2574_v13, 2  ;;  %v2582_v22 = vrot.slane %v2581_v14, 2  ;;  %v2594_v23 = vrot.slane %v2593_v15, 4 }
 0x14b   : > { %v2549_v24 = vrot.slane %v2548_v16, 1  ;;  %v2556_v25 = vrot.slane %v2555_v17, 1  ;;  %v2562_v26 = vadd.f32 %v2561_v18, %v2560_v10  ;;  %v2589_v27 = vrot.slane %v2588_v19, 2 }
 0x14c   : > { %v2569_v28 = vadd.f32 %v2568_v20, %v2567_v12  ;;  %v2576_v29 = vadd.f32 %v2575_v21, %v2574_v13  ;;  %v2583_v30 = vadd.f32 %v2582_v22, %v2581_v14  ;;  %v2595_v31 = vadd.f32 %v2594_v23, %v2593_v15 }
 0x14d   : > { %v2550_v32 = vadd.f32 %v2549_v24, %v2548_v16  ;;  %v2557_v33 = vadd.f32 %v2556_v25, %v2555_v17  ;;  %v2563_v34 = vrot.slane %v2562_v26, 1  ;;  %v2590_v35 = vadd.f32 %v2589_v27, %v2588_v19 }
 0x14e   : > { %v2570_v36 = vrot.slane %v2569_v28, 1  ;;  %v2577_v37 = vrot.slane %v2576_v29, 1  ;;  %v2584_v38 = vrot.slane %v2583_v30, 1  ;;  %v2596_v39 = vrot.slane %v2595_v31, 2 }
 0x14f   : > { %v2564_v41 = vadd.f32 %v2563_v34, %v2562_v26  ;;  %v2591_v42 = vrot.slane %v2590_v35, 1  ;;  %v2768_v43 = vmul.f32 0.125, %v2550_v32  ;;  %v2769_v44 = vmul.f32 0.125, %v2557_v33 }
 0x150   : > { %v2571_v45 = vadd.f32 %v2570_v36, %v2569_v28  ;;  %v2578_v46 = vadd.f32 %v2577_v37, %v2576_v29  ;;  %v2585_v47 = vadd.f32 %v2584_v38, %v2583_v30  ;;  %v2597_v48 = vadd.f32 %v2596_v39, %v2595_v31 }
 0x151   : > { %v2592_v50 = vadd.f32 %v2591_v42, %v2590_v35  ;;  %v2770_v51 = vmul.f32 0.125, %v2564_v41  ;;  %v3273_v52 = vsel %vm2912_vm1, %v2769_v44, %v2768_v43  ;;  %v7339_v53 = vunpack.c.l.bf16 %v7824_v40 }
 0x152   : > { %v2598_v55 = vrot.slane %v2597_v48, 1  ;;  %v2771_v56 = vmul.f32 0.125, %v2571_v45  ;;  %v2772_v57 = vmul.f32 0.125, %v2578_v46  ;;  %v2773_v58 = vmul.f32 0.125, %v2585_v47 }
 0x153   : > { %v2774_v60 = vmul.f32 0.125, %v2592_v50  ;;  %v3274_v61 = vsel %vm2914_vm2, %v2770_v51, %v3273_v52  ;;  %v7340_v62 = vunpack.c.h.bf16 %v7824_v40  ;;  %v7343_v63 = vunpack.c.l.bf16 %v7825_v49 }
 0x154   : > { %v2599_v0 = vadd.f32 %v2598_v55, %v2597_v48  ;;  %v3275_v1 = vsel %vm2916_vm3, %v2771_v56, %v3274_v61  ;;  %v7344_v2 = vunpack.c.h.bf16 %v7825_v49  ;;  %v7347_v3 = vunpack.c.l.bf16 %v7826_v54 }
 0x155   : > { %v3276_v4 = vsel %vm2918_vm4, %v2772_v57, %v3275_v1  ;;  %v7348_v5 = vunpack.c.h.bf16 %v7826_v54  ;;  %v7351_v6 = vunpack.c.l.bf16 %v7827_v59  ;;  %v7352_v7 = vunpack.c.h.bf16 %v7827_v59 }
 0x156   : > { %v2775_v8 = vmul.f32 0.125, %v2599_v0  ;;  %v3277_v9 = vsel %vm2920_vm5, %v2773_v58, %v3276_v4  ;;  %v591_v10 = vsel %vm478_vm0, %v7339_v53, 0.0  ;;  %v598_v11 = vsel %vm478_vm0, %v7340_v62, 0.0 }
 0x157   : > { %v3278_v12 = vsel %vm2922_vm6, %v2774_v60, %v3277_v9  ;;  %v592_v13 = vrot.slane %v591_v10, 4  ;;  %v599_v14 = vrot.slane %v598_v11, 4  ;;  %v605_v15 = vsel %vm478_vm0, %v7343_v63, 0.0  ;;  %v7306_v60 = vld [vmem:[%s9662_s14] sm:$0xff]  }
 0x158   : > { %v3279_v16 = vsel %vm2924_vm7, %v2775_v8, %v3278_v12  ;;  %v606_v17 = vrot.slane %v605_v15, 4  ;;  %v612_v18 = vsel %vm478_vm0, %v7344_v2, 0.0  ;;  %v619_v19 = vsel %vm478_vm0, %v7347_v3, 0.0 }
 0x159   : > { %3315 = vrot.lane.b32.xlu0 %v3279_v16, %s9209_s6  ;;  %v593_v20 = vadd.f32 %v592_v13, %v591_v10  ;;  %v600_v21 = vadd.f32 %v599_v14, %v598_v11  ;;  %v613_v22 = vrot.slane %v612_v18, 4  ;;  %v620_v23 = vrot.slane %v619_v19, 4  ;;  %v7818_v14 = vld [vmem:[%s9662_s14 + $0x10] sm:$0xff]   ;;  %s9145_s6 = scalar_lea.vmem %s11374_s13, 2048 }
 0x15a   : > { %v607_v24 = vadd.f32 %v606_v17, %v605_v15  ;;  %v626_v25 = vsel %vm478_vm0, %v7348_v5, 0.0  ;;  %v633_v26 = vsel %vm478_vm0, %v7351_v6, 0.0  ;;  %v640_v27 = vsel %vm478_vm0, %v7352_v7, 0.0  ;;  %v7817_v5 = vld [vmem:[%s9662_s14 + $0x8] sm:$0xff]   ;;  %v7819_v15 = vld [vmem:[%s9662_s14 + $0x18] sm:$0xff]   ;;  %p9146_p11 = scmp.ne.s32.totalorder %s11374_s13, %s9145_s6  ;;  %p9153_p1 = scmp.lt.s32.totalorder %s9151_s23, %s9145_s6 }
 0x15b   : > { %v594_v28 = vrot.slane %v593_v20, 2  ;;  %v601_v29 = vrot.slane %v600_v21, 2  ;;  %v614_v30 = vadd.f32 %v613_v22, %v612_v18  ;;  %v621_v31 = vadd.f32 %v620_v23, %v619_v19 }
 0x15c   : > { %v608_v32 = vrot.slane %v607_v24, 2  ;;  %v627_v33 = vrot.slane %v626_v25, 4  ;;  %v634_v34 = vrot.slane %v633_v26, 4  ;;  %v641_v35 = vrot.slane %v640_v27, 4  ;;  %p9147_p12 = pnand %p9146_p11, %p9276_p5  ;;  %p9154_p2 = por %p9153_p1, %p9152_p0 }
 0x15d   : > { %v595_v36 = vadd.f32 %v594_v28, %v593_v20  ;;  %v602_v37 = vadd.f32 %v601_v29, %v600_v21  ;;  %v615_v38 = vrot.slane %v614_v30, 2  ;;  %v622_v39 = vrot.slane %v621_v31, 2  ;;  %v3292_v28 = vpop.permute.xlu1 %3291 }
 0x15e   : > { %v609_v40 = vadd.f32 %v608_v32, %v607_v24  ;;  %v628_v41 = vadd.f32 %v627_v33, %v626_v25  ;;  %v635_v42 = vadd.f32 %v634_v34, %v633_v26  ;;  %v642_v43 = vadd.f32 %v641_v35, %v640_v27  ;;  %p9148_p13 = pneg %p9147_p12 }
 0x15f   : > { %v596_v44 = vrot.slane %v595_v36, 1  ;;  %v603_v45 = vrot.slane %v602_v37, 1  ;;  %v616_v46 = vadd.f32 %v615_v38, %v614_v30  ;;  %v623_v47 = vadd.f32 %v622_v39, %v621_v31 }
 0x160   : > { %v610_v48 = vrot.slane %v609_v40, 1  ;;  %v629_v49 = vrot.slane %v628_v41, 2  ;;  %v636_v50 = vrot.slane %v635_v42, 2  ;;  %v643_v51 = vrot.slane %v642_v43, 2  ;;  %p9155_p3 = pnand %p9154_p2, %p9148_p13 }
 0x161   : > { %v597_v52 = vadd.f32 %v596_v44, %v595_v36  ;;  %v604_v53 = vadd.f32 %v603_v45, %v602_v37  ;;  %v617_v54 = vrot.slane %v616_v46, 1  ;;  %v624_v55 = vrot.slane %v623_v47, 1 }
 0x162   : > { %v611_v56 = vadd.f32 %v610_v48, %v609_v40  ;;  %v630_v57 = vadd.f32 %v629_v49, %v628_v41  ;;  %v637_v58 = vadd.f32 %v636_v50, %v635_v42  ;;  %v644_v59 = vadd.f32 %v643_v51, %v642_v43 }
 0x163   : > { %v618_v61 = vadd.f32 %v617_v54, %v616_v46  ;;  %v625_v62 = vadd.f32 %v624_v55, %v623_v47  ;;  %v1392_v63 = vmul.f32 0.125, %v597_v52  ;;  %v1393_v0 = vmul.f32 0.125, %v604_v53 }
 0x164   : > { %v631_v1 = vrot.slane %v630_v57, 1  ;;  %v638_v2 = vrot.slane %v637_v58, 1  ;;  %v645_v3 = vrot.slane %v644_v59, 1  ;;  %v1394_v4 = vmul.f32 0.125, %v611_v56 }
 0x165   : > { %v1395_v6 = vmul.f32 0.125, %v618_v61  ;;  %v1396_v7 = vmul.f32 0.125, %v625_v62  ;;  %v2933_v8 = vsel %vm2912_vm1, %v1393_v0, %v1392_v63  ;;  %v7307_v9 = vunpack.c.l.bf16 %v7306_v60 }
 0x166   : > { %v632_v10 = vadd.f32 %v631_v1, %v630_v57  ;;  %v639_v11 = vadd.f32 %v638_v2, %v637_v58  ;;  %v646_v12 = vadd.f32 %v645_v3, %v644_v59  ;;  %v2934_v13 = vsel %vm2914_vm2, %v1394_v4, %v2933_v8 }
 0x167   : > { %v2935_v16 = vsel %vm2916_vm3, %v1395_v6, %v2934_v13  ;;  %v7308_v17 = vunpack.c.h.bf16 %v7306_v60  ;;  %v7311_v18 = vunpack.c.l.bf16 %v7817_v5  ;;  %v7312_v19 = vunpack.c.h.bf16 %v7817_v5 }
 0x168   : > { %v1397_v20 = vmul.f32 0.125, %v632_v10  ;;  %v1398_v21 = vmul.f32 0.125, %v639_v11  ;;  %v1399_v22 = vmul.f32 0.125, %v646_v12  ;;  %v2936_v23 = vsel %vm2918_vm4, %v1396_v7, %v2935_v16 }
 0x169   : > { %v7315_v24 = vunpack.c.l.bf16 %v7818_v14  ;;  %v7316_v25 = vunpack.c.h.bf16 %v7818_v14  ;;  %v7319_v26 = vunpack.c.l.bf16 %v7819_v15  ;;  %v7320_v27 = vunpack.c.h.bf16 %v7819_v15 }
 0x16a   : > { %v2937_v29 = vsel %vm2920_vm5, %v1397_v20, %v2936_v23  ;;  %v479_v30 = vsel %vm478_vm0, %v7307_v9, 0.0  ;;  %v486_v31 = vsel %vm478_vm0, %v7308_v17, 0.0  ;;  %v493_v32 = vsel %vm478_vm0, %v7311_v18, 0.0  ;;  %v7828_v17 = vld [vmem:[%s9662_s14 + $0x60] sm:$0xff]  }
 0x16b   : > { %v2938_v33 = vsel %vm2922_vm6, %v1398_v21, %v2937_v29  ;;  %v480_v34 = vrot.slane %v479_v30, 4  ;;  %v487_v35 = vrot.slane %v486_v31, 4  ;;  %v494_v36 = vrot.slane %v493_v32, 4 }
 0x16c   : > { %v2939_v37 = vsel %vm2924_vm7, %v1399_v22, %v2938_v33  ;;  %v500_v38 = vsel %vm478_vm0, %v7312_v19, 0.0  ;;  %v507_v39 = vsel %vm478_vm0, %v7315_v24, 0.0  ;;  %v514_v40 = vsel %vm478_vm0, %v7316_v25, 0.0 }
 0x16d   : > { %v9702_v41 = vsel %vm478_vm0, %v2939_v37, %v3292_v28  ;;  %v481_v42 = vadd.f32 %v480_v34, %v479_v30  ;;  %v488_v43 = vadd.f32 %v487_v35, %v486_v31  ;;  %v495_v44 = vadd.f32 %v494_v36, %v493_v32  ;;  %v7830_v31 = vld [vmem:[%s9662_s14 + $0x70] sm:$0xff]   ;;  %v7831_v36 = vld [vmem:[%s9662_s14 + $0x78] sm:$0xff]  }
 0x16e   : > { %v501_v45 = vrot.slane %v500_v38, 4  ;;  %v508_v46 = vrot.slane %v507_v39, 4  ;;  %v515_v47 = vrot.slane %v514_v40, 4  ;;  %v521_v48 = vsel %vm478_vm0, %v7319_v26, 0.0  ;;  %v7829_v26 = vld [vmem:[%s9662_s14 + $0x68] sm:$0xff]  }
 0x16f   : > { %v482_v49 = vrot.slane %v481_v42, 2  ;;  %v489_v50 = vrot.slane %v488_v43, 2  ;;  %v496_v51 = vrot.slane %v495_v44, 2  ;;  %v522_v52 = vrot.slane %v521_v48, 4 }
 0x170   : > { %v502_v53 = vadd.f32 %v501_v45, %v500_v38  ;;  %v509_v54 = vadd.f32 %v508_v46, %v507_v39  ;;  %v516_v55 = vadd.f32 %v515_v47, %v514_v40  ;;  %v528_v56 = vsel %vm478_vm0, %v7320_v27, 0.0 }
 0x171   : > { %v483_v57 = vadd.f32 %v482_v49, %v481_v42  ;;  %v490_v58 = vadd.f32 %v489_v50, %v488_v43  ;;  %v497_v59 = vadd.f32 %v496_v51, %v495_v44  ;;  %v523_v60 = vadd.f32 %v522_v52, %v521_v48  ;;  %v3288_v50 = vpop.permute.xlu0 %3287 }
 0x172   : > { %v503_v61 = vrot.slane %v502_v53, 2  ;;  %v510_v62 = vrot.slane %v509_v54, 2  ;;  %v517_v63 = vrot.slane %v516_v55, 2  ;;  %v529_v0 = vrot.slane %v528_v56, 4 }
 0x173   : > { %v484_v1 = vrot.slane %v483_v57, 1  ;;  %v491_v2 = vrot.slane %v490_v58, 1  ;;  %v498_v3 = vrot.slane %v497_v59, 1  ;;  %v524_v4 = vrot.slane %v523_v60, 2 }
 0x174   : > { %v504_v5 = vadd.f32 %v503_v61, %v502_v53  ;;  %v511_v6 = vadd.f32 %v510_v62, %v509_v54  ;;  %v518_v7 = vadd.f32 %v517_v63, %v516_v55  ;;  %v530_v8 = vadd.f32 %v529_v0, %v528_v56 }
 0x175   : > { %v485_v9 = vadd.f32 %v484_v1, %v483_v57  ;;  %v492_v10 = vadd.f32 %v491_v2, %v490_v58  ;;  %v499_v11 = vadd.f32 %v498_v3, %v497_v59  ;;  %v525_v12 = vadd.f32 %v524_v4, %v523_v60 }
 0x176   : > { %v505_v13 = vrot.slane %v504_v5, 1  ;;  %v512_v14 = vrot.slane %v511_v6, 1  ;;  %v519_v15 = vrot.slane %v518_v7, 1  ;;  %v531_v16 = vrot.slane %v530_v8, 2 }
 0x177   : > { %v526_v18 = vrot.slane %v525_v12, 1  ;;  %v1376_v19 = vmul.f32 0.125, %v485_v9  ;;  %v1377_v20 = vmul.f32 0.125, %v492_v10  ;;  %v1378_v21 = vmul.f32 0.125, %v499_v11 }
 0x178   : > { %v506_v22 = vadd.f32 %v505_v13, %v504_v5  ;;  %v513_v23 = vadd.f32 %v512_v14, %v511_v6  ;;  %v520_v24 = vadd.f32 %v519_v15, %v518_v7  ;;  %v532_v25 = vadd.f32 %v531_v16, %v530_v8 }
 0x179   : > { %v527_v27 = vadd.f32 %v526_v18, %v525_v12  ;;  %v2913_v28 = vsel %vm2912_vm1, %v1377_v20, %v1376_v19  ;;  %v7355_v29 = vunpack.c.l.bf16 %v7828_v17  ;;  %v7356_v30 = vunpack.c.h.bf16 %v7828_v17 }
 0x17a   : > { %v533_v32 = vrot.slane %v532_v25, 1  ;;  %v1379_v33 = vmul.f32 0.125, %v506_v22  ;;  %v1380_v34 = vmul.f32 0.125, %v513_v23  ;;  %v1381_v35 = vmul.f32 0.125, %v520_v24 }
 0x17b   : > { %v1382_v37 = vmul.f32 0.125, %v527_v27  ;;  %v2915_v38 = vsel %vm2914_vm2, %v1378_v21, %v2913_v28  ;;  %v7359_v39 = vunpack.c.l.bf16 %v7829_v26  ;;  %v7360_v40 = vunpack.c.h.bf16 %v7829_v26 }
 0x17c   : > { %v534_v42 = vadd.f32 %v533_v32, %v532_v25  ;;  %v2917_v43 = vsel %vm2916_vm3, %v1379_v33, %v2915_v38  ;;  %v7363_v44 = vunpack.c.l.bf16 %v7830_v31  ;;  %v7364_v45 = vunpack.c.h.bf16 %v7830_v31 }
 0x17d   : > { %v2919_v46 = vsel %vm2918_vm4, %v1380_v34, %v2917_v43  ;;  %v7367_v47 = vunpack.c.l.bf16 %v7831_v36  ;;  %v7368_v48 = vunpack.c.h.bf16 %v7831_v36  ;;  %v647_v49 = vsel %vm478_vm0, %v7355_v29, 0.0 }
 0x17e   : > { %v1383_v51 = vmul.f32 0.125, %v534_v42  ;;  %v2921_v52 = vsel %vm2920_vm5, %v1381_v35, %v2919_v46  ;;  %v648_v53 = vrot.slane %v647_v49, 4  ;;  %v654_v54 = vsel %vm478_vm0, %v7356_v30, 0.0  ;;  %v7820_v35 = vld [vmem:[%s9662_s14 + $0x20] sm:$0xff]  }
 0x17f   : > { %v2923_v55 = vsel %vm2922_vm6, %v1382_v37, %v2921_v52  ;;  %v655_v56 = vrot.slane %v654_v54, 4  ;;  %v661_v57 = vsel %vm478_vm0, %v7359_v39, 0.0  ;;  %v668_v58 = vsel %vm478_vm0, %v7360_v40, 0.0 }
 0x180   : > { %v2925_v59 = vsel %vm2924_vm7, %v1383_v51, %v2923_v55  ;;  %v649_v60 = vadd.f32 %v648_v53, %v647_v49  ;;  %v662_v61 = vrot.slane %v661_v57, 4  ;;  %v669_v62 = vrot.slane %v668_v58, 4 }
 0x181   : > { %v9722_v63 = vsel %vm478_vm0, %v2925_v59, %v3288_v50  ;;  %v656_v0 = vadd.f32 %v655_v56, %v654_v54  ;;  %v675_v1 = vsel %vm478_vm0, %v7363_v44, 0.0  ;;  %v682_v2 = vsel %vm478_vm0, %v7364_v45, 0.0  ;;  %v7821_v45 = vld [vmem:[%s9662_s14 + $0x28] sm:$0xff]   ;;  %v7822_v54 = vld [vmem:[%s9662_s14 + $0x30] sm:$0xff]   ;;  %v7823_v59 = vld [vmem:[%s9662_s14 + $0x38] sm:$0xff]  }
 0x182   : > { %v650_v3 = vrot.slane %v649_v60, 2  ;;  %v663_v4 = vadd.f32 %v662_v61, %v661_v57  ;;  %v670_v5 = vadd.f32 %v669_v62, %v668_v58  ;;  %v676_v6 = vrot.slane %v675_v1, 4 }
 0x183   : > { %v657_v7 = vrot.slane %v656_v0, 2  ;;  %v683_v8 = vrot.slane %v682_v2, 4  ;;  %v689_v9 = vsel %vm478_vm0, %v7367_v47, 0.0  ;;  %v696_v10 = vsel %vm478_vm0, %v7368_v48, 0.0 }
 0x184   : > { %v651_v11 = vadd.f32 %v650_v3, %v649_v60  ;;  %v664_v12 = vrot.slane %v663_v4, 2  ;;  %v671_v13 = vrot.slane %v670_v5, 2  ;;  %v677_v14 = vadd.f32 %v676_v6, %v675_v1 }
 0x185   : > { %v658_v15 = vadd.f32 %v657_v7, %v656_v0  ;;  %v684_v16 = vadd.f32 %v683_v8, %v682_v2  ;;  %v690_v17 = vrot.slane %v689_v9, 4  ;;  %v697_v18 = vrot.slane %v696_v10, 4 }
 0x186   : > { %v652_v19 = vrot.slane %v651_v11, 1  ;;  %v665_v20 = vadd.f32 %v664_v12, %v663_v4  ;;  %v672_v21 = vadd.f32 %v671_v13, %v670_v5  ;;  %v678_v22 = vrot.slane %v677_v14, 2 }
 0x187   : > { %v659_v23 = vrot.slane %v658_v15, 1  ;;  %v685_v24 = vrot.slane %v684_v16, 2  ;;  %v691_v25 = vadd.f32 %v690_v17, %v689_v9  ;;  %v698_v26 = vadd.f32 %v697_v18, %v696_v10  ;;  %v3294_v9 = vpop.permute.xlu1 %3293 }
 0x188   : > { %v653_v27 = vadd.f32 %v652_v19, %v651_v11  ;;  %v666_v28 = vrot.slane %v665_v20, 1  ;;  %v673_v29 = vrot.slane %v672_v21, 1  ;;  %v679_v30 = vadd.f32 %v678_v22, %v677_v14 }
 0x189   : > { %v660_v31 = vadd.f32 %v659_v23, %v658_v15  ;;  %v686_v32 = vadd.f32 %v685_v24, %v684_v16  ;;  %v692_v33 = vrot.slane %v691_v25, 2  ;;  %v699_v34 = vrot.slane %v698_v26, 2 }
 0x18a   : > { %v667_v36 = vadd.f32 %v666_v28, %v665_v20  ;;  %v674_v37 = vadd.f32 %v673_v29, %v672_v21  ;;  %v680_v38 = vrot.slane %v679_v30, 1  ;;  %v1400_v39 = vmul.f32 0.125, %v653_v27 }
 0x18b   : > { %v687_v40 = vrot.slane %v686_v32, 1  ;;  %v693_v42 = vadd.f32 %v692_v33, %v691_v25  ;;  %v700_v43 = vadd.f32 %v699_v34, %v698_v26  ;;  %v1401_v44 = vmul.f32 0.125, %v660_v31 }
 0x18c   : > { %v681_v46 = vadd.f32 %v680_v38, %v679_v30  ;;  %v1402_v47 = vmul.f32 0.125, %v667_v36  ;;  %v1403_v48 = vmul.f32 0.125, %v674_v37  ;;  %v7323_v49 = vunpack.c.l.bf16 %v7820_v35 }
 0x18d   : > { %v688_v50 = vadd.f32 %v687_v40, %v686_v32  ;;  %v694_v51 = vrot.slane %v693_v42, 1  ;;  %v701_v52 = vrot.slane %v700_v43, 1  ;;  %v2940_v53 = vsel %vm2912_vm1, %v1401_v44, %v1400_v39 }
 0x18e   : > { %v1404_v55 = vmul.f32 0.125, %v681_v46  ;;  %v2941_v56 = vsel %vm2914_vm2, %v1402_v47, %v2940_v53  ;;  %v7324_v57 = vunpack.c.h.bf16 %v7820_v35  ;;  %v7327_v58 = vunpack.c.l.bf16 %v7821_v45 }
 0x18f   : > { %v695_v60 = vadd.f32 %v694_v51, %v693_v42  ;;  %v702_v61 = vadd.f32 %v701_v52, %v700_v43  ;;  %v1405_v62 = vmul.f32 0.125, %v688_v50  ;;  %v2942_v0 = vsel %vm2916_vm3, %v1403_v48, %v2941_v56 }
 0x190   : > { %v2943_v1 = vsel %vm2918_vm4, %v1404_v55, %v2942_v0  ;;  %v7328_v2 = vunpack.c.h.bf16 %v7821_v45  ;;  %v7331_v3 = vunpack.c.l.bf16 %v7822_v54  ;;  %v7332_v4 = vunpack.c.h.bf16 %v7822_v54  ;;  %v7836_v0 = vld [vmem:[%s9662_s14 + $0xa0] sm:$0xff]  }
 0x191   : > { %v1406_v5 = vmul.f32 0.125, %v695_v60  ;;  %v1407_v6 = vmul.f32 0.125, %v702_v61  ;;  %v2944_v7 = vsel %vm2920_vm5, %v1405_v62, %v2943_v1  ;;  %v7335_v8 = vunpack.c.l.bf16 %v7823_v59 }
 0x192   : > { %v7336_v10 = vunpack.c.h.bf16 %v7823_v59  ;;  %v535_v11 = vsel %vm478_vm0, %v7323_v49, 0.0  ;;  %v542_v12 = vsel %vm478_vm0, %v7324_v57, 0.0  ;;  %v549_v13 = vsel %vm478_vm0, %v7327_v58, 0.0 }
 0x193   : > { %v2945_v14 = vsel %vm2922_vm6, %v1406_v5, %v2944_v7  ;;  %v536_v15 = vrot.slane %v535_v11, 4  ;;  %v543_v16 = vrot.slane %v542_v12, 4  ;;  %v550_v17 = vrot.slane %v549_v13, 4 }
 0x194   : > { %v2946_v18 = vsel %vm2924_vm7, %v1407_v6, %v2945_v14  ;;  %v556_v19 = vsel %vm478_vm0, %v7328_v2, 0.0  ;;  %v563_v20 = vsel %vm478_vm0, %v7331_v3, 0.0  ;;  %v570_v21 = vsel %vm478_vm0, %v7332_v4, 0.0  ;;  %v7838_v14 = vld [vmem:[%s9662_s14 + $0xb0] sm:$0xff]  }
 0x195   : > { %v9746_v22 = vsel %vm478_vm0, %v2946_v18, %v3294_v9  ;;  %v537_v23 = vadd.f32 %v536_v15, %v535_v11  ;;  %v544_v24 = vadd.f32 %v543_v16, %v542_v12  ;;  %v551_v25 = vadd.f32 %v550_v17, %v549_v13  ;;  %v7837_v9 = vld [vmem:[%s9662_s14 + $0xa8] sm:$0xff]  }
 0x196   : > { %v9750_v26 = vpack.c.bf16 %v9746_v22, %v9702_v41  ;;  %v557_v27 = vrot.slane %v556_v19, 4  ;;  %v564_v28 = vrot.slane %v563_v20, 4  ;;  %v571_v29 = vrot.slane %v570_v21, 4 }
 0x197   : > { %v538_v30 = vrot.slane %v537_v23, 2  ;;  %v545_v31 = vrot.slane %v544_v24, 2  ;;  %v552_v32 = vrot.slane %v551_v25, 2  ;;  %v577_v33 = vsel %vm478_vm0, %v7335_v8, 0.0 }
 0x198   : > { %v558_v34 = vadd.f32 %v557_v27, %v556_v19  ;;  %v565_v35 = vadd.f32 %v564_v28, %v563_v20  ;;  %v572_v36 = vadd.f32 %v571_v29, %v570_v21  ;;  %v578_v37 = vrot.slane %v577_v33, 4  ;;  %v7839_v19 = vld [vmem:[%s9662_s14 + $0xb8] sm:$0xff]  }
 0x199   : > { %v539_v38 = vadd.f32 %v538_v30, %v537_v23  ;;  %v546_v39 = vadd.f32 %v545_v31, %v544_v24  ;;  %v553_v40 = vadd.f32 %v552_v32, %v551_v25  ;;  %v584_v42 = vsel %vm478_vm0, %v7336_v10, 0.0 }
 0x19a   : > { %v559_v43 = vrot.slane %v558_v34, 2  ;;  %v566_v44 = vrot.slane %v565_v35, 2  ;;  %v573_v45 = vrot.slane %v572_v36, 2  ;;  %v579_v46 = vadd.f32 %v578_v37, %v577_v33 }
 0x19b   : > { %v540_v47 = vrot.slane %v539_v38, 1  ;;  %v547_v48 = vrot.slane %v546_v39, 1  ;;  %v554_v49 = vrot.slane %v553_v40, 1  ;;  %v585_v50 = vrot.slane %v584_v42, 4 }
 0x19c   : > { %v560_v51 = vadd.f32 %v559_v43, %v558_v34  ;;  %v567_v52 = vadd.f32 %v566_v44, %v565_v35  ;;  %v574_v53 = vadd.f32 %v573_v45, %v572_v36  ;;  %v580_v54 = vrot.slane %v579_v46, 2 }
 0x19d   : > { %v541_v55 = vadd.f32 %v540_v47, %v539_v38  ;;  %v548_v56 = vadd.f32 %v547_v48, %v546_v39  ;;  %v555_v57 = vadd.f32 %v554_v49, %v553_v40  ;;  %v586_v58 = vadd.f32 %v585_v50, %v584_v42  ;;  %v3290_v38 = vpop.permute.xlu0 %3289 }
 0x19e   : > { %v561_v59 = vrot.slane %v560_v51, 1  ;;  %v568_v60 = vrot.slane %v567_v52, 1  ;;  %v575_v61 = vrot.slane %v574_v53, 1  ;;  %v581_v62 = vadd.f32 %v580_v54, %v579_v46 }
 0x19f   : > { %v587_v1 = vrot.slane %v586_v58, 2  ;;  %v1384_v2 = vmul.f32 0.125, %v541_v55  ;;  %v1385_v3 = vmul.f32 0.125, %v548_v56  ;;  %v1386_v4 = vmul.f32 0.125, %v555_v57 }
 0x1a0   : > { %v562_v5 = vadd.f32 %v561_v59, %v560_v51  ;;  %v569_v6 = vadd.f32 %v568_v60, %v567_v52  ;;  %v576_v7 = vadd.f32 %v575_v61, %v574_v53  ;;  %v582_v8 = vrot.slane %v581_v62, 1 }
 0x1a1   : > { %v588_v10 = vadd.f32 %v587_v1, %v586_v58  ;;  %v2926_v11 = vsel %vm2912_vm1, %v1385_v3, %v1384_v2  ;;  %v7387_v12 = vunpack.c.l.bf16 %v7836_v0  ;;  %v7388_v13 = vunpack.c.h.bf16 %v7836_v0 }
 0x1a2   : > { %v583_v15 = vadd.f32 %v582_v8, %v581_v62  ;;  %v1387_v16 = vmul.f32 0.125, %v562_v5  ;;  %v1388_v17 = vmul.f32 0.125, %v569_v6  ;;  %v1389_v18 = vmul.f32 0.125, %v576_v7 }
 0x1a3   : > { %v589_v20 = vrot.slane %v588_v10, 1  ;;  %v2927_v21 = vsel %vm2914_vm2, %v1386_v4, %v2926_v11  ;;  %v7391_v23 = vunpack.c.l.bf16 %v7837_v9  ;;  %v7392_v24 = vunpack.c.h.bf16 %v7837_v9 }
 0x1a4   : > { %v1390_v25 = vmul.f32 0.125, %v583_v15  ;;  %v2928_v27 = vsel %vm2916_vm3, %v1387_v16, %v2927_v21  ;;  %v7395_v28 = vunpack.c.l.bf16 %v7838_v14  ;;  %v7396_v29 = vunpack.c.h.bf16 %v7838_v14 }
 0x1a5   : > { %v590_v30 = vadd.f32 %v589_v20, %v588_v10  ;;  %v2929_v31 = vsel %vm2918_vm4, %v1388_v17, %v2928_v27  ;;  %v7399_v32 = vunpack.c.l.bf16 %v7839_v19  ;;  %v7400_v33 = vunpack.c.h.bf16 %v7839_v19 }
 0x1a6   : > { %v2930_v34 = vsel %vm2920_vm5, %v1389_v18, %v2929_v31  ;;  %v759_v35 = vsel %vm478_vm0, %v7387_v12, 0.0  ;;  %v766_v36 = vsel %vm478_vm0, %v7388_v13, 0.0  ;;  %v773_v37 = vsel %vm478_vm0, %v7391_v23, 0.0 }
 0x1a7   : > { %v1391_v39 = vmul.f32 0.125, %v590_v30  ;;  %v2931_v40 = vsel %vm2922_vm6, %v1390_v25, %v2930_v34  ;;  %v760_v42 = vrot.slane %v759_v35, 4  ;;  %v767_v43 = vrot.slane %v766_v36, 4 }
 0x1a8   : > { %v774_v44 = vrot.slane %v773_v37, 4  ;;  %v780_v45 = vsel %vm478_vm0, %v7392_v24, 0.0  ;;  %v787_v46 = vsel %vm478_vm0, %v7395_v28, 0.0  ;;  %v794_v47 = vsel %vm478_vm0, %v7396_v29, 0.0 }
 0x1a9   : > { %v2932_v48 = vsel %vm2924_vm7, %v1391_v39, %v2931_v40  ;;  %v761_v49 = vadd.f32 %v760_v42, %v759_v35  ;;  %v768_v50 = vadd.f32 %v767_v43, %v766_v36  ;;  %v781_v51 = vrot.slane %v780_v45, 4  ;;  %v7833_v35 = vld [vmem:[%s9662_s14 + $0x88] sm:$0xff]   ;;  %v7834_v40 = vld [vmem:[%s9662_s14 + $0x90] sm:$0xff]  }
 0x1aa   : > { %v9772_v52 = vsel %vm478_vm0, %v2932_v48, %v3290_v38  ;;  %v775_v53 = vadd.f32 %v774_v44, %v773_v37  ;;  %v788_v54 = vrot.slane %v787_v46, 4  ;;  %v795_v55 = vrot.slane %v794_v47, 4 }
 0x1ab   : > { %v3351_v56 = vpack.c.bf16 %v9772_v52, %v9722_v63  ;;  %v762_v57 = vrot.slane %v761_v49, 2  ;;  %v769_v58 = vrot.slane %v768_v50, 2  ;;  %v782_v59 = vadd.f32 %v781_v51, %v780_v45 }
 0x1ac   : > { %v776_v60 = vrot.slane %v775_v53, 2  ;;  %v789_v61 = vadd.f32 %v788_v54, %v787_v46  ;;  %v796_v62 = vadd.f32 %v795_v55, %v794_v47  ;;  %v801_v0 = vsel %vm478_vm0, %v7399_v32, 0.0  ;;  %v7835_v46 = vld [vmem:[%s9662_s14 + $0x98] sm:$0xff]  }
 0x1ad   : > { %8167 = vmatprep.mubr.bf16.mxu0 %v3351_v56  ;;  %8199 = vmatprep.mubr.bf16.mxu1 %v3351_v56  ;;  %v763_v1 = vadd.f32 %v762_v57, %v761_v49  ;;  %v770_v2 = vadd.f32 %v769_v58, %v768_v50  ;;  %v783_v3 = vrot.slane %v782_v59, 2  ;;  %v802_v4 = vrot.slane %v801_v0, 4 }
 0x1ae   : > { %v777_v5 = vadd.f32 %v776_v60, %v775_v53  ;;  %v790_v6 = vrot.slane %v789_v61, 2  ;;  %v797_v7 = vrot.slane %v796_v62, 2  ;;  %v808_v8 = vsel %vm478_vm0, %v7400_v33, 0.0  ;;  %8168 = vmatmul.mubr.bf16.vlgmr.msra.gmra.mrb[0].mxu0 %v9750_v26  ;;  %8200 = vmatmul.mubr.bf16.vlgmr.msra.gmra.mrb[0].mxu1 %v9750_v26  ;;  %v7832_v26 = vld [vmem:[%s9662_s14 + $0x80] sm:$0xff]  }
 0x1af   : > { %v764_v9 = vrot.slane %v763_v1, 1  ;;  %v771_v10 = vrot.slane %v770_v2, 1  ;;  %v784_v11 = vadd.f32 %v783_v3, %v782_v59  ;;  %v803_v12 = vadd.f32 %v802_v4, %v801_v0 }
 0x1b0   : > { %v778_v13 = vrot.slane %v777_v5, 1  ;;  %v791_v14 = vadd.f32 %v790_v6, %v789_v61  ;;  %v798_v15 = vadd.f32 %v797_v7, %v796_v62  ;;  %v809_v16 = vrot.slane %v808_v8, 4 }
 0x1b1   : > { %v765_v17 = vadd.f32 %v764_v9, %v763_v1  ;;  %v772_v18 = vadd.f32 %v771_v10, %v770_v2  ;;  %v785_v19 = vrot.slane %v784_v11, 1  ;;  %v804_v20 = vrot.slane %v803_v12, 2 }
 0x1b2   : > { %v779_v21 = vadd.f32 %v778_v13, %v777_v5  ;;  %v792_v23 = vrot.slane %v791_v14, 1  ;;  %v799_v24 = vrot.slane %v798_v15, 1  ;;  %v810_v25 = vadd.f32 %v809_v16, %v808_v8  ;;  %v3298_v5 = vpop.permute.xlu1 %3297 }
 0x1b3   : > { %v786_v27 = vadd.f32 %v785_v19, %v784_v11  ;;  %v805_v28 = vadd.f32 %v804_v20, %v803_v12  ;;  %v1416_v29 = vmul.f32 0.125, %v765_v17  ;;  %v1417_v30 = vmul.f32 0.125, %v772_v18 }
 0x1b4   : > { %v793_v31 = vadd.f32 %v792_v23, %v791_v14  ;;  %v800_v32 = vadd.f32 %v799_v24, %v798_v15  ;;  %v811_v33 = vrot.slane %v810_v25, 2  ;;  %v1418_v34 = vmul.f32 0.125, %v779_v21 }
 0x1b5   : > { %v806_v36 = vrot.slane %v805_v28, 1  ;;  %v1419_v37 = vmul.f32 0.125, %v786_v27  ;;  %v2954_v38 = vsel %vm2912_vm1, %v1417_v30, %v1416_v29  ;;  %v7371_v39 = vunpack.c.l.bf16 %v7832_v26 }
 0x1b6   : > { %v812_v42 = vadd.f32 %v811_v33, %v810_v25  ;;  %v1420_v43 = vmul.f32 0.125, %v793_v31  ;;  %v1421_v44 = vmul.f32 0.125, %v800_v32  ;;  %v2955_v45 = vsel %vm2914_vm2, %v1418_v34, %v2954_v38 }
 0x1b7   : > { %v807_v47 = vadd.f32 %v806_v36, %v805_v28  ;;  %v2956_v48 = vsel %vm2916_vm3, %v1419_v37, %v2955_v45  ;;  %v7372_v49 = vunpack.c.h.bf16 %v7832_v26  ;;  %v7375_v50 = vunpack.c.l.bf16 %v7833_v35 }
 0x1b8   : > { %v813_v51 = vrot.slane %v812_v42, 1  ;;  %v2957_v53 = vsel %vm2918_vm4, %v1420_v43, %v2956_v48  ;;  %v7376_v54 = vunpack.c.h.bf16 %v7833_v35  ;;  %v7379_v55 = vunpack.c.l.bf16 %v7834_v40 }
 0x1b9   : > { %v1422_v56 = vmul.f32 0.125, %v807_v47  ;;  %v2958_v57 = vsel %vm2920_vm5, %v1421_v44, %v2957_v53  ;;  %v7380_v58 = vunpack.c.h.bf16 %v7834_v40  ;;  %v7383_v59 = vunpack.c.l.bf16 %v7835_v46  ;;  %v7844_v53 = vld [vmem:[%s9662_s14 + $0xe0] sm:$0xff]  }
 0x1ba   : > { %v814_v60 = vadd.f32 %v813_v51, %v812_v42  ;;  %v7384_v61 = vunpack.c.h.bf16 %v7835_v46  ;;  %v703_v62 = vsel %vm478_vm0, %v7371_v39, 0.0  ;;  %v710_v0 = vsel %vm478_vm0, %v7372_v49, 0.0 }
 0x1bb   : > { %v2959_v1 = vsel %vm2922_vm6, %v1422_v56, %v2958_v57  ;;  %v704_v2 = vrot.slane %v703_v62, 4  ;;  %v711_v3 = vrot.slane %v710_v0, 4  ;;  %v717_v4 = vsel %vm478_vm0, %v7375_v50, 0.0 }
 0x1bc   : > { %v1423_v6 = vmul.f32 0.125, %v814_v60  ;;  %v718_v7 = vrot.slane %v717_v4, 4  ;;  %v724_v8 = vsel %vm478_vm0, %v7376_v54, 0.0  ;;  %v731_v9 = vsel %vm478_vm0, %v7379_v55, 0.0 }
 0x1bd   : > { %v705_v10 = vadd.f32 %v704_v2, %v703_v62  ;;  %v712_v11 = vadd.f32 %v711_v3, %v710_v0  ;;  %v725_v12 = vrot.slane %v724_v8, 4  ;;  %v732_v13 = vrot.slane %v731_v9, 4  ;;  %v7845_v62 = vld [vmem:[%s9662_s14 + $0xe8] sm:$0xff]  }
 0x1be   : > { %v2960_v14 = vsel %vm2924_vm7, %v1423_v6, %v2959_v1  ;;  %v719_v15 = vadd.f32 %v718_v7, %v717_v4  ;;  %v738_v16 = vsel %vm478_vm0, %v7380_v58, 0.0  ;;  %v745_v17 = vsel %vm478_vm0, %v7383_v59, 0.0 }
 0x1bf   : > { %v9799_v18 = vsel %vm478_vm0, %v2960_v14, %v3298_v5  ;;  %v706_v19 = vrot.slane %v705_v10, 2  ;;  %v713_v20 = vrot.slane %v712_v11, 2  ;;  %v726_v21 = vadd.f32 %v725_v12, %v724_v8  ;;  %v7846_v8 = vld [vmem:[%s9662_s14 + $0xf0] sm:$0xff]  }
 0x1c0   : > { %v720_v23 = vrot.slane %v719_v15, 2  ;;  %v733_v24 = vadd.f32 %v732_v13, %v731_v9  ;;  %v739_v25 = vrot.slane %v738_v16, 4  ;;  %v746_v26 = vrot.slane %v745_v17, 4  ;;  %v7847_v9 = vld [vmem:[%s9662_s14 + $0xf8] sm:$0xff]  }
 0x1c1   : > { %v707_v27 = vadd.f32 %v706_v19, %v705_v10  ;;  %v714_v28 = vadd.f32 %v713_v20, %v712_v11  ;;  %v727_v29 = vrot.slane %v726_v21, 2  ;;  %v752_v30 = vsel %vm478_vm0, %v7384_v61, 0.0 }
 0x1c2   : > { %v721_v31 = vadd.f32 %v720_v23, %v719_v15  ;;  %v734_v32 = vrot.slane %v733_v24, 2  ;;  %v740_v33 = vadd.f32 %v739_v25, %v738_v16  ;;  %v747_v34 = vadd.f32 %v746_v26, %v745_v17 }
 0x1c3   : > { %v708_v35 = vrot.slane %v707_v27, 1  ;;  %v715_v36 = vrot.slane %v714_v28, 1  ;;  %v728_v37 = vadd.f32 %v727_v29, %v726_v21  ;;  %v753_v38 = vrot.slane %v752_v30, 4 }
 0x1c4   : > { %v722_v39 = vrot.slane %v721_v31, 1  ;;  %v735_v40 = vadd.f32 %v734_v32, %v733_v24  ;;  %v741_v42 = vrot.slane %v740_v33, 2  ;;  %v748_v43 = vrot.slane %v747_v34, 2 }
 0x1c5   : > { %v709_v44 = vadd.f32 %v708_v35, %v707_v27  ;;  %v716_v45 = vadd.f32 %v715_v36, %v714_v28  ;;  %v729_v46 = vrot.slane %v728_v37, 1  ;;  %v754_v47 = vadd.f32 %v753_v38, %v752_v30  ;;  %v3296_v28 = vpop.permute.xlu0 %3295 }
 0x1c6   : > { %v723_v48 = vadd.f32 %v722_v39, %v721_v31  ;;  %v736_v49 = vrot.slane %v735_v40, 1  ;;  %v742_v50 = vadd.f32 %v741_v42, %v740_v33  ;;  %v749_v51 = vadd.f32 %v748_v43, %v747_v34 }
 0x1c7   : > { %v730_v54 = vadd.f32 %v729_v46, %v728_v37  ;;  %v755_v55 = vrot.slane %v754_v47, 2  ;;  %v1408_v56 = vmul.f32 0.125, %v709_v44  ;;  %v1409_v57 = vmul.f32 0.125, %v716_v45 }
 0x1c8   : > { %v737_v58 = vadd.f32 %v736_v49, %v735_v40  ;;  %v743_v59 = vrot.slane %v742_v50, 1  ;;  %v750_v60 = vrot.slane %v749_v51, 1  ;;  %v1410_v61 = vmul.f32 0.125, %v723_v48 }
 0x1c9   : > { %v756_v0 = vadd.f32 %v755_v55, %v754_v47  ;;  %v1411_v1 = vmul.f32 0.125, %v730_v54  ;;  %v2947_v2 = vsel %vm2912_vm1, %v1409_v57, %v1408_v56  ;;  %v7419_v3 = vunpack.c.l.bf16 %v7844_v53 }
 0x1ca   : > { %v744_v4 = vadd.f32 %v743_v59, %v742_v50  ;;  %v751_v5 = vadd.f32 %v750_v60, %v749_v51  ;;  %v1412_v6 = vmul.f32 0.125, %v737_v58  ;;  %v2948_v7 = vsel %vm2914_vm2, %v1410_v61, %v2947_v2 }
 0x1cb   : > { %v757_v10 = vrot.slane %v756_v0, 1  ;;  %v2949_v11 = vsel %vm2916_vm3, %v1411_v1, %v2948_v7  ;;  %v7420_v12 = vunpack.c.h.bf16 %v7844_v53  ;;  %v7423_v13 = vunpack.c.l.bf16 %v7845_v62 }
 0x1cc   : > { %v1413_v14 = vmul.f32 0.125, %v744_v4  ;;  %v1414_v15 = vmul.f32 0.125, %v751_v5  ;;  %v2950_v16 = vsel %vm2918_vm4, %v1412_v6, %v2949_v11  ;;  %v7424_v17 = vunpack.c.h.bf16 %v7845_v62 }
 0x1cd   : > { %v758_v19 = vadd.f32 %v757_v10, %v756_v0  ;;  %v7427_v20 = vunpack.c.l.bf16 %v7846_v8  ;;  %v7428_v21 = vunpack.c.h.bf16 %v7846_v8  ;;  %v7431_v23 = vunpack.c.l.bf16 %v7847_v9 }
 0x1ce   : > { %v2951_v24 = vsel %vm2920_vm5, %v1413_v14, %v2950_v16  ;;  %v7432_v25 = vunpack.c.h.bf16 %v7847_v9  ;;  %v871_v26 = vsel %vm478_vm0, %v7419_v3, 0.0  ;;  %v878_v27 = vsel %vm478_vm0, %v7420_v12, 0.0  ;;  %v7840_v16 = vld [vmem:[%s9662_s14 + $0xc0] sm:$0xff]  }
 0x1cf   : > { %v1415_v29 = vmul.f32 0.125, %v758_v19  ;;  %v2952_v30 = vsel %vm2922_vm6, %v1414_v15, %v2951_v24  ;;  %v872_v31 = vrot.slane %v871_v26, 4  ;;  %v879_v32 = vrot.slane %v878_v27, 4 }
 0x1d0   : > { %v885_v33 = vsel %vm478_vm0, %v7423_v13, 0.0  ;;  %v892_v34 = vsel %vm478_vm0, %v7424_v17, 0.0  ;;  %v899_v35 = vsel %vm478_vm0, %v7427_v20, 0.0  ;;  %v906_v36 = vsel %vm478_vm0, %v7428_v21, 0.0 }
 0x1d1   : > { %v2953_v37 = vsel %vm2924_vm7, %v1415_v29, %v2952_v30  ;;  %v873_v38 = vadd.f32 %v872_v31, %v871_v26  ;;  %v880_v39 = vadd.f32 %v879_v32, %v878_v27  ;;  %v886_v40 = vrot.slane %v885_v33, 4  ;;  %v7841_v27 = vld [vmem:[%s9662_s14 + $0xc8] sm:$0xff]   ;;  %v7842_v32 = vld [vmem:[%s9662_s14 + $0xd0] sm:$0xff]  }
 0x1d2   : > { %v9820_v42 = vsel %vm478_vm0, %v2953_v37, %v3296_v28  ;;  %v893_v43 = vrot.slane %v892_v34, 4  ;;  %v900_v44 = vrot.slane %v899_v35, 4  ;;  %v907_v45 = vrot.slane %v906_v36, 4  ;;  %v7843_v37 = vld [vmem:[%s9662_s14 + $0xd8] sm:$0xff]  }
 0x1d3   : > { %v3353_v46 = vpack.c.bf16 %v9799_v18, %v9820_v42  ;;  %v874_v47 = vrot.slane %v873_v38, 2  ;;  %v881_v48 = vrot.slane %v880_v39, 2  ;;  %v887_v49 = vadd.f32 %v886_v40, %v885_v33 }
 0x1d4   : > { %v894_v50 = vadd.f32 %v893_v43, %v892_v34  ;;  %v901_v51 = vadd.f32 %v900_v44, %v899_v35  ;;  %v908_v53 = vadd.f32 %v907_v45, %v906_v36  ;;  %v913_v54 = vsel %vm478_vm0, %v7431_v23, 0.0 }
 0x1d5   : > { %v875_v55 = vadd.f32 %v874_v47, %v873_v38  ;;  %v882_v56 = vadd.f32 %v881_v48, %v880_v39  ;;  %v888_v57 = vrot.slane %v887_v49, 2  ;;  %v914_v58 = vrot.slane %v913_v54, 4  ;;  %8171 = vmatprep.mubr.bf16.mxu0 %v3353_v46  ;;  %8203 = vmatprep.mubr.bf16.mxu1 %v3353_v46 }
 0x1d6   : > { %v895_v59 = vrot.slane %v894_v50, 2  ;;  %v902_v60 = vrot.slane %v901_v51, 2  ;;  %v909_v61 = vrot.slane %v908_v53, 2  ;;  %v920_v62 = vsel %vm478_vm0, %v7432_v25, 0.0 }
 0x1d7   : > { %v876_v0 = vrot.slane %v875_v55, 1  ;;  %v883_v1 = vrot.slane %v882_v56, 1  ;;  %v889_v2 = vadd.f32 %v888_v57, %v887_v49  ;;  %v915_v3 = vadd.f32 %v914_v58, %v913_v54 }
 0x1d8   : > { %v896_v4 = vadd.f32 %v895_v59, %v894_v50  ;;  %v903_v5 = vadd.f32 %v902_v60, %v901_v51  ;;  %v910_v6 = vadd.f32 %v909_v61, %v908_v53  ;;  %v921_v7 = vrot.slane %v920_v62, 4  ;;  %v3302_v61 = vpop.permute.xlu1 %3301 }
 0x1d9   : > { %v877_v8 = vadd.f32 %v876_v0, %v875_v55  ;;  %v884_v9 = vadd.f32 %v883_v1, %v882_v56  ;;  %v890_v10 = vrot.slane %v889_v2, 1  ;;  %v916_v11 = vrot.slane %v915_v3, 2 }
 0x1da   : > { %v897_v12 = vrot.slane %v896_v4, 1  ;;  %v904_v13 = vrot.slane %v903_v5, 1  ;;  %v911_v14 = vrot.slane %v910_v6, 1  ;;  %v922_v15 = vadd.f32 %v921_v7, %v920_v62 }
 0x1db   : > { %v891_v17 = vadd.f32 %v890_v10, %v889_v2  ;;  %v917_v19 = vadd.f32 %v916_v11, %v915_v3  ;;  %v1432_v20 = vmul.f32 0.125, %v877_v8  ;;  %v1433_v21 = vmul.f32 0.125, %v884_v9 }
 0x1dc   : > { %v898_v23 = vadd.f32 %v897_v12, %v896_v4  ;;  %v905_v24 = vadd.f32 %v904_v13, %v903_v5  ;;  %v912_v25 = vadd.f32 %v911_v14, %v910_v6  ;;  %v923_v26 = vrot.slane %v922_v15, 2 }
 0x1dd   : > { %v918_v28 = vrot.slane %v917_v19, 1  ;;  %v1434_v29 = vmul.f32 0.125, %v891_v17  ;;  %v2968_v30 = vsel %vm2912_vm1, %v1433_v21, %v1432_v20  ;;  %v7403_v31 = vunpack.c.l.bf16 %v7840_v16 }
 0x1de   : > { %v924_v33 = vadd.f32 %v923_v26, %v922_v15  ;;  %v1435_v34 = vmul.f32 0.125, %v898_v23  ;;  %v1436_v35 = vmul.f32 0.125, %v905_v24  ;;  %v1437_v36 = vmul.f32 0.125, %v912_v25 }
 0x1df   : > { %v919_v38 = vadd.f32 %v918_v28, %v917_v19  ;;  %v2969_v39 = vsel %vm2914_vm2, %v1434_v29, %v2968_v30  ;;  %v7404_v40 = vunpack.c.h.bf16 %v7840_v16  ;;  %v7407_v43 = vunpack.c.l.bf16 %v7841_v27 }
 0x1e0   : > { %v925_v44 = vrot.slane %v924_v33, 1  ;;  %v2970_v45 = vsel %vm2916_vm3, %v1435_v34, %v2969_v39  ;;  %v7408_v46 = vunpack.c.h.bf16 %v7841_v27  ;;  %v7411_v47 = vunpack.c.l.bf16 %v7842_v32 }
 0x1e1   : > { %v1438_v48 = vmul.f32 0.125, %v919_v38  ;;  %v2971_v49 = vsel %vm2918_vm4, %v1436_v35, %v2970_v45  ;;  %v7412_v50 = vunpack.c.h.bf16 %v7842_v32  ;;  %v7415_v51 = vunpack.c.l.bf16 %v7843_v37 }
 0x1e2   : > { %v926_v53 = vadd.f32 %v925_v44, %v924_v33  ;;  %v2972_v54 = vsel %vm2920_vm5, %v1437_v36, %v2971_v49  ;;  %v7416_v55 = vunpack.c.h.bf16 %v7843_v37  ;;  %v815_v56 = vsel %vm478_vm0, %v7403_v31, 0.0 }
 0x1e3   : > { %v2973_v57 = vsel %vm2922_vm6, %v1438_v48, %v2972_v54  ;;  %v816_v58 = vrot.slane %v815_v56, 4  ;;  %v822_v59 = vsel %vm478_vm0, %v7404_v40, 0.0  ;;  %v829_v60 = vsel %vm478_vm0, %v7407_v43, 0.0 }
 0x1e4   : > { %v1439_v62 = vmul.f32 0.125, %v926_v53  ;;  %v823_v0 = vrot.slane %v822_v59, 4  ;;  %v830_v1 = vrot.slane %v829_v60, 4  ;;  %v836_v2 = vsel %vm478_vm0, %v7408_v46, 0.0 }
 0x1e5   : > { %v817_v3 = vadd.f32 %v816_v58, %v815_v56  ;;  %v837_v4 = vrot.slane %v836_v2, 4  ;;  %v843_v5 = vsel %vm478_vm0, %v7411_v47, 0.0  ;;  %v850_v6 = vsel %vm478_vm0, %v7412_v50, 0.0  ;;  %v7852_v47 = vld [vmem:[%s9662_s14 + $0x120] sm:$0xff]  }
 0x1e6   : > { %v2974_v7 = vsel %vm2924_vm7, %v1439_v62, %v2973_v57  ;;  %v824_v8 = vadd.f32 %v823_v0, %v822_v59  ;;  %v831_v9 = vadd.f32 %v830_v1, %v829_v60  ;;  %v844_v10 = vrot.slane %v843_v5, 4  ;;  %v7853_v57 = vld [vmem:[%s9662_s14 + $0x128] sm:$0xff]   ;;  %v7854_v62 = vld [vmem:[%s9662_s14 + $0x130] sm:$0xff]  }
 0x1e7   : > { %v9844_v11 = vsel %vm478_vm0, %v2974_v7, %v3302_v61  ;;  %v818_v12 = vrot.slane %v817_v3, 2  ;;  %v838_v13 = vadd.f32 %v837_v4, %v836_v2  ;;  %v851_v14 = vrot.slane %v850_v6, 4  ;;  %v7855_v4 = vld [vmem:[%s9662_s14 + $0x138] sm:$0xff]  }
 0x1e8   : > { %v825_v15 = vrot.slane %v824_v8, 2  ;;  %v832_v16 = vrot.slane %v831_v9, 2  ;;  %v845_v17 = vadd.f32 %v844_v10, %v843_v5  ;;  %v857_v19 = vsel %vm478_vm0, %v7415_v51, 0.0 }
 0x1e9   : > { %v819_v20 = vadd.f32 %v818_v12, %v817_v3  ;;  %v839_v21 = vrot.slane %v838_v13, 2  ;;  %v852_v23 = vadd.f32 %v851_v14, %v850_v6  ;;  %v858_v24 = vrot.slane %v857_v19, 4 }
 0x1ea   : > { %v826_v25 = vadd.f32 %v825_v15, %v824_v8  ;;  %v833_v26 = vadd.f32 %v832_v16, %v831_v9  ;;  %v846_v27 = vrot.slane %v845_v17, 2  ;;  %v864_v28 = vsel %vm478_vm0, %v7416_v55, 0.0 }
 0x1eb   : > { %v820_v29 = vrot.slane %v819_v20, 1  ;;  %v840_v30 = vadd.f32 %v839_v21, %v838_v13  ;;  %v853_v31 = vrot.slane %v852_v23, 2  ;;  %v859_v32 = vadd.f32 %v858_v24, %v857_v19 }
 0x1ec   : > { %v827_v33 = vrot.slane %v826_v25, 1  ;;  %v834_v34 = vrot.slane %v833_v26, 1  ;;  %v847_v35 = vadd.f32 %v846_v27, %v845_v17  ;;  %v865_v36 = vrot.slane %v864_v28, 4 }
 0x1ed   : > { %v821_v37 = vadd.f32 %v820_v29, %v819_v20  ;;  %v841_v38 = vrot.slane %v840_v30, 1  ;;  %v854_v39 = vadd.f32 %v853_v31, %v852_v23  ;;  %v860_v40 = vrot.slane %v859_v32, 2 }
 0x1ee   : > { %v828_v43 = vadd.f32 %v827_v33, %v826_v25  ;;  %v835_v44 = vadd.f32 %v834_v34, %v833_v26  ;;  %v848_v45 = vrot.slane %v847_v35, 1  ;;  %v866_v46 = vadd.f32 %v865_v36, %v864_v28  ;;  %v3300_v28 = vpop.permute.xlu0 %3299 }
 0x1ef   : > { %v842_v48 = vadd.f32 %v841_v38, %v840_v30  ;;  %v855_v49 = vrot.slane %v854_v39, 1  ;;  %v861_v50 = vadd.f32 %v860_v40, %v859_v32  ;;  %v1424_v51 = vmul.f32 0.125, %v821_v37 }
 0x1f0   : > { %v849_v53 = vadd.f32 %v848_v45, %v847_v35  ;;  %v867_v54 = vrot.slane %v866_v46, 2  ;;  %v1425_v55 = vmul.f32 0.125, %v828_v43  ;;  %v1426_v56 = vmul.f32 0.125, %v835_v44 }
 0x1f1   : > { %v856_v58 = vadd.f32 %v855_v49, %v854_v39  ;;  %v862_v59 = vrot.slane %v861_v50, 1  ;;  %v1427_v60 = vmul.f32 0.125, %v842_v48  ;;  %v7451_v61 = vunpack.c.l.bf16 %v7852_v47 }
 0x1f2   : > { %v868_v0 = vadd.f32 %v867_v54, %v866_v46  ;;  %v1428_v1 = vmul.f32 0.125, %v849_v53  ;;  %v2961_v2 = vsel %vm2912_vm1, %v1425_v55, %v1424_v51  ;;  %v7452_v3 = vunpack.c.h.bf16 %v7852_v47 }
 0x1f3   : > { %v863_v5 = vadd.f32 %v862_v59, %v861_v50  ;;  %v1429_v6 = vmul.f32 0.125, %v856_v58  ;;  %v2962_v7 = vsel %vm2914_vm2, %v1426_v56, %v2961_v2  ;;  %v7455_v8 = vunpack.c.l.bf16 %v7853_v57 }
 0x1f4   : > { %v869_v9 = vrot.slane %v868_v0, 1  ;;  %v2963_v10 = vsel %vm2916_vm3, %v1427_v60, %v2962_v7  ;;  %v7456_v12 = vunpack.c.h.bf16 %v7853_v57  ;;  %v7459_v13 = vunpack.c.l.bf16 %v7854_v62 }
 0x1f5   : > { %v1430_v14 = vmul.f32 0.125, %v863_v5  ;;  %v2964_v15 = vsel %vm2918_vm4, %v1428_v1, %v2963_v10  ;;  %v7460_v16 = vunpack.c.h.bf16 %v7854_v62  ;;  %v7463_v17 = vunpack.c.l.bf16 %v7855_v4 }
 0x1f6   : > { %v870_v19 = vadd.f32 %v869_v9, %v868_v0  ;;  %v2965_v20 = vsel %vm2920_vm5, %v1429_v6, %v2964_v15  ;;  %v7464_v21 = vunpack.c.h.bf16 %v7855_v4  ;;  %v983_v23 = vsel %vm478_vm0, %v7451_v61, 0.0 }
 0x1f7   : > { %v2966_v24 = vsel %vm2922_vm6, %v1430_v14, %v2965_v20  ;;  %v984_v25 = vrot.slane %v983_v23, 4  ;;  %v990_v26 = vsel %vm478_vm0, %v7452_v3, 0.0  ;;  %v997_v27 = vsel %vm478_vm0, %v7455_v8, 0.0  ;;  %v7848_v14 = vld [vmem:[%s9662_s14 + $0x100] sm:$0xff]  }
 0x1f8   : > { %v1431_v29 = vmul.f32 0.125, %v870_v19  ;;  %v991_v30 = vrot.slane %v990_v26, 4  ;;  %v998_v31 = vrot.slane %v997_v27, 4  ;;  %v1004_v32 = vsel %vm478_vm0, %v7456_v12, 0.0 }
 0x1f9   : > { %v985_v33 = vadd.f32 %v984_v25, %v983_v23  ;;  %v1005_v34 = vrot.slane %v1004_v32, 4  ;;  %v1011_v35 = vsel %vm478_vm0, %v7459_v13, 0.0  ;;  %v1018_v36 = vsel %vm478_vm0, %v7460_v16, 0.0  ;;  %v7849_v25 = vld [vmem:[%s9662_s14 + $0x108] sm:$0xff]  }
 0x1fa   : > { %v2967_v37 = vsel %vm2924_vm7, %v1431_v29, %v2966_v24  ;;  %v992_v38 = vadd.f32 %v991_v30, %v990_v26  ;;  %v999_v39 = vadd.f32 %v998_v31, %v997_v27  ;;  %v1012_v40 = vrot.slane %v1011_v35, 4  ;;  %v7850_v30 = vld [vmem:[%s9662_s14 + $0x110] sm:$0xff]  }
 0x1fb   : > { %v9866_v43 = vsel %vm478_vm0, %v2967_v37, %v3300_v28  ;;  %v986_v44 = vrot.slane %v985_v33, 2  ;;  %v1006_v45 = vadd.f32 %v1005_v34, %v1004_v32  ;;  %v1019_v46 = vrot.slane %v1018_v36, 4 }
 0x1fc   : > { %v3354_v47 = vpack.c.bf16 %v9844_v11, %v9866_v43  ;;  %v993_v48 = vrot.slane %v992_v38, 2  ;;  %v1000_v49 = vrot.slane %v999_v39, 2  ;;  %v1013_v50 = vadd.f32 %v1012_v40, %v1011_v35  ;;  %v7851_v35 = vld [vmem:[%s9662_s14 + $0x118] sm:$0xff]  }
 0x1fd   : > { %v987_v51 = vadd.f32 %v986_v44, %v985_v33  ;;  %v1007_v53 = vrot.slane %v1006_v45, 2  ;;  %v1020_v54 = vadd.f32 %v1019_v46, %v1018_v36  ;;  %v1025_v55 = vsel %vm478_vm0, %v7463_v17, 0.0 }
 0x1fe   : > { %v994_v56 = vadd.f32 %v993_v48, %v992_v38  ;;  %v1001_v57 = vadd.f32 %v1000_v49, %v999_v39  ;;  %v1014_v58 = vrot.slane %v1013_v50, 2  ;;  %v1026_v59 = vrot.slane %v1025_v55, 4  ;;  %8172 = vmatmul.mubr.bf16.gmra.mrb[4].mxu0 %v3354_v47  ;;  %8204 = vmatmul.mubr.bf16.gmra.mrb[4].mxu1 %v3354_v47 }
 0x1ff   : > { %v988_v60 = vrot.slane %v987_v51, 1  ;;  %v1008_v61 = vadd.f32 %v1007_v53, %v1006_v45  ;;  %v1021_v62 = vrot.slane %v1020_v54, 2  ;;  %v1032_v0 = vsel %vm478_vm0, %v7464_v21, 0.0 }
 0x200   : > { %v995_v1 = vrot.slane %v994_v56, 1  ;;  %v1002_v2 = vrot.slane %v1001_v57, 1  ;;  %v1015_v3 = vadd.f32 %v1014_v58, %v1013_v50  ;;  %v1027_v4 = vadd.f32 %v1026_v59, %v1025_v55 }
 0x201   : > { %v989_v5 = vadd.f32 %v988_v60, %v987_v51  ;;  %v1009_v6 = vrot.slane %v1008_v61, 1  ;;  %v1022_v7 = vadd.f32 %v1021_v62, %v1020_v54  ;;  %v1033_v8 = vrot.slane %v1032_v0, 4 }
 0x202   : > { %v996_v9 = vadd.f32 %v995_v1, %v994_v56  ;;  %v1003_v10 = vadd.f32 %v1002_v2, %v1001_v57  ;;  %v1016_v12 = vrot.slane %v1015_v3, 1  ;;  %v1028_v13 = vrot.slane %v1027_v4, 2  ;;  %v3306_v1 = vpop.permute.xlu1 %3305 }
 0x203   : > { %v1010_v15 = vadd.f32 %v1009_v6, %v1008_v61  ;;  %v1023_v16 = vrot.slane %v1022_v7, 1  ;;  %v1034_v17 = vadd.f32 %v1033_v8, %v1032_v0  ;;  %v1448_v19 = vmul.f32 0.125, %v989_v5 }
 0x204   : > { %v1017_v20 = vadd.f32 %v1016_v12, %v1015_v3  ;;  %v1029_v21 = vadd.f32 %v1028_v13, %v1027_v4  ;;  %v1449_v23 = vmul.f32 0.125, %v996_v9  ;;  %v1450_v24 = vmul.f32 0.125, %v1003_v10 }
 0x205   : > { %v1024_v26 = vadd.f32 %v1023_v16, %v1022_v7  ;;  %v1035_v27 = vrot.slane %v1034_v17, 2  ;;  %v1451_v28 = vmul.f32 0.125, %v1010_v15  ;;  %v7435_v29 = vunpack.c.l.bf16 %v7848_v14 }
 0x206   : > { %v1030_v31 = vrot.slane %v1029_v21, 1  ;;  %v1452_v32 = vmul.f32 0.125, %v1017_v20  ;;  %v2982_v33 = vsel %vm2912_vm1, %v1449_v23, %v1448_v19  ;;  %v7436_v34 = vunpack.c.h.bf16 %v7848_v14 }
 0x207   : > { %v1036_v36 = vadd.f32 %v1035_v27, %v1034_v17  ;;  %v1453_v37 = vmul.f32 0.125, %v1024_v26  ;;  %v2983_v38 = vsel %vm2914_vm2, %v1450_v24, %v2982_v33  ;;  %v7439_v39 = vunpack.c.l.bf16 %v7849_v25 }
 0x208   : > { %v1031_v40 = vadd.f32 %v1030_v31, %v1029_v21  ;;  %v2984_v44 = vsel %vm2916_vm3, %v1451_v28, %v2983_v38  ;;  %v7440_v45 = vunpack.c.h.bf16 %v7849_v25  ;;  %v7443_v46 = vunpack.c.l.bf16 %v7850_v30 }
 0x209   : > { %v1037_v47 = vrot.slane %v1036_v36, 1  ;;  %v2985_v48 = vsel %vm2918_vm4, %v1452_v32, %v2984_v44  ;;  %v7444_v49 = vunpack.c.h.bf16 %v7850_v30  ;;  %v7447_v50 = vunpack.c.l.bf16 %v7851_v35 }
 0x20a   : > { %v1454_v51 = vmul.f32 0.125, %v1031_v40  ;;  %v2986_v53 = vsel %vm2920_vm5, %v1453_v37, %v2985_v48  ;;  %v7448_v54 = vunpack.c.h.bf16 %v7851_v35  ;;  %v927_v55 = vsel %vm478_vm0, %v7435_v29, 0.0  ;;  %v7860_v48 = vld [vmem:[%s9662_s14 + $0x160] sm:$0xff]  }
 0x20b   : > { %v1038_v56 = vadd.f32 %v1037_v47, %v1036_v36  ;;  %v928_v57 = vrot.slane %v927_v55, 4  ;;  %v934_v58 = vsel %vm478_vm0, %v7436_v34, 0.0  ;;  %v941_v59 = vsel %vm478_vm0, %v7439_v39, 0.0 }
 0x20c   : > { %v2987_v60 = vsel %vm2922_vm6, %v1454_v51, %v2986_v53  ;;  %v935_v61 = vrot.slane %v934_v58, 4  ;;  %v942_v62 = vrot.slane %v941_v59, 4  ;;  %v948_v0 = vsel %vm478_vm0, %v7440_v45, 0.0 }
 0x20d   : > { %v1455_v2 = vmul.f32 0.125, %v1038_v56  ;;  %v929_v3 = vadd.f32 %v928_v57, %v927_v55  ;;  %v949_v4 = vrot.slane %v948_v0, 4  ;;  %v955_v5 = vsel %vm478_vm0, %v7443_v46, 0.0 }
 0x20e   : > { %v936_v6 = vadd.f32 %v935_v61, %v934_v58  ;;  %v943_v7 = vadd.f32 %v942_v62, %v941_v59  ;;  %v956_v8 = vrot.slane %v955_v5, 4  ;;  %v962_v9 = vsel %vm478_vm0, %v7444_v49, 0.0  ;;  %v7861_v58 = vld [vmem:[%s9662_s14 + $0x168] sm:$0xff]  }
 0x20f   : > { %v2988_v10 = vsel %vm2924_vm7, %v1455_v2, %v2987_v60  ;;  %v930_v12 = vrot.slane %v929_v3, 2  ;;  %v950_v13 = vadd.f32 %v949_v4, %v948_v0  ;;  %v963_v14 = vrot.slane %v962_v9, 4  ;;  %v7862_v0 = vld [vmem:[%s9662_s14 + $0x170] sm:$0xff]  }
 0x210   : > { %v9890_v15 = vsel %vm478_vm0, %v2988_v10, %v3306_v1  ;;  %v937_v16 = vrot.slane %v936_v6, 2  ;;  %v944_v17 = vrot.slane %v943_v7, 2  ;;  %v957_v19 = vadd.f32 %v956_v8, %v955_v5  ;;  %v9899_v5 = vld [vmem:[%s9662_s14 + $0x178] sm:$0xff]  }
 0x211   : > { %v931_v20 = vadd.f32 %v930_v12, %v929_v3  ;;  %v951_v21 = vrot.slane %v950_v13, 2  ;;  %v964_v23 = vadd.f32 %v963_v14, %v962_v9  ;;  %v969_v24 = vsel %vm478_vm0, %v7447_v50, 0.0 }
 0x212   : > { %v938_v25 = vadd.f32 %v937_v16, %v936_v6  ;;  %v945_v26 = vadd.f32 %v944_v17, %v943_v7  ;;  %v958_v27 = vrot.slane %v957_v19, 2  ;;  %v970_v28 = vrot.slane %v969_v24, 4 }
 0x213   : > { %v932_v29 = vrot.slane %v931_v20, 1  ;;  %v952_v30 = vadd.f32 %v951_v21, %v950_v13  ;;  %v965_v31 = vrot.slane %v964_v23, 2  ;;  %v976_v32 = vsel %vm478_vm0, %v7448_v54, 0.0 }
 0x214   : > { %v939_v33 = vrot.slane %v938_v25, 1  ;;  %v946_v34 = vrot.slane %v945_v26, 1  ;;  %v959_v35 = vadd.f32 %v958_v27, %v957_v19  ;;  %v971_v36 = vadd.f32 %v970_v28, %v969_v24 }
 0x215   : > { %v933_v37 = vadd.f32 %v932_v29, %v931_v20  ;;  %v953_v38 = vrot.slane %v952_v30, 1  ;;  %v966_v39 = vadd.f32 %v965_v31, %v964_v23  ;;  %v977_v40 = vrot.slane %v976_v32, 4  ;;  %v8674_v31 = vld [vmem:[%s11424_s2 + $0xc8] sm:$0xff]  }
 0x216   : > { %v940_v44 = vadd.f32 %v939_v33, %v938_v25  ;;  %v947_v45 = vadd.f32 %v946_v34, %v945_v26  ;;  %v960_v46 = vrot.slane %v959_v35, 1  ;;  %v972_v47 = vrot.slane %v971_v36, 2 }
 0x217   : > { %v954_v49 = vadd.f32 %v953_v38, %v952_v30  ;;  %v967_v50 = vrot.slane %v966_v39, 1  ;;  %v978_v51 = vadd.f32 %v977_v40, %v976_v32  ;;  %v1440_v53 = vmul.f32 0.125, %v933_v37  ;;  %v8673_v30 = vld [vmem:[%s11424_s2 + $0xc0] sm:$0xff]  }
 0x218   : > { %v961_v54 = vadd.f32 %v960_v46, %v959_v35  ;;  %v973_v55 = vadd.f32 %v972_v47, %v971_v36  ;;  %v1441_v56 = vmul.f32 0.125, %v940_v44  ;;  %v1442_v57 = vmul.f32 0.125, %v947_v45  ;;  %v3304_v36 = vpop.permute.xlu0 %3303  ;;  %8215 = vmatprep.subr.bf16.mxu0 %v8673_v30 }
 0x219   : > { %v968_v59 = vadd.f32 %v967_v50, %v966_v39  ;;  %v979_v60 = vrot.slane %v978_v51, 2  ;;  %v1443_v61 = vmul.f32 0.125, %v954_v49  ;;  %v7483_v62 = vunpack.c.l.bf16 %v7860_v48  ;;  %8216 = vmatpush3.bf16.msra.mxu0 %v8673_v30 }
 0x21a   : > { %v974_v1 = vrot.slane %v973_v55, 1  ;;  %v1444_v2 = vmul.f32 0.125, %v961_v54  ;;  %v2975_v3 = vsel %vm2912_vm1, %v1441_v56, %v1440_v53  ;;  %v7484_v4 = vunpack.c.h.bf16 %v7860_v48  ;;  %8217 = vmatprep.subr.bf16.mxu0 %v8674_v31 }
 0x21b   : > { %v980_v6 = vadd.f32 %v979_v60, %v978_v51  ;;  %v1445_v7 = vmul.f32 0.125, %v968_v59  ;;  %v2976_v8 = vsel %vm2914_vm2, %v1442_v57, %v2975_v3  ;;  %v7487_v9 = vunpack.c.l.bf16 %v7861_v58  ;;  %v8675_v57 = vld [vmem:[%s11424_s2 + $0xd0] sm:$0xff]  }
 0x21c   : > { %v975_v10 = vadd.f32 %v974_v1, %v973_v55  ;;  %v2977_v12 = vsel %vm2916_vm3, %v1443_v61, %v2976_v8  ;;  %v7488_v13 = vunpack.c.h.bf16 %v7861_v58  ;;  %v7491_v14 = vunpack.c.l.bf16 %v7862_v0 }
 0x21d   : > { %v981_v16 = vrot.slane %v980_v6, 1  ;;  %v2978_v17 = vsel %vm2918_vm4, %v1444_v2, %v2977_v12  ;;  %v7492_v19 = vunpack.c.h.bf16 %v7862_v0  ;;  %v7495_v20 = vunpack.c.l.bf16 %v9899_v5  ;;  %8218 = vmatpush3.bf16.msra.mxu0 %v8674_v31 }
 0x21e   : > { %v1446_v21 = vmul.f32 0.125, %v975_v10  ;;  %v2979_v23 = vsel %vm2920_vm5, %v1445_v7, %v2978_v17  ;;  %v7496_v24 = vunpack.c.h.bf16 %v9899_v5  ;;  %v1095_v25 = vsel %vm478_vm0, %v7483_v62, 0.0  ;;  %v8676_v7 = vld [vmem:[%s11424_s2 + $0xd8] sm:$0xff]   ;;  %8219 = vmatprep.subr.bf16.mxu0 %v8675_v57 }
 0x21f   : > { %v982_v26 = vadd.f32 %v981_v16, %v980_v6  ;;  %v1096_v27 = vrot.slane %v1095_v25, 4  ;;  %v1102_v28 = vsel %vm478_vm0, %v7484_v4, 0.0  ;;  %v1109_v29 = vsel %vm478_vm0, %v7487_v9, 0.0 }
 0x220   : > { %v2980_v32 = vsel %vm2922_vm6, %v1446_v21, %v2979_v23  ;;  %v1103_v33 = vrot.slane %v1102_v28, 4  ;;  %v1110_v34 = vrot.slane %v1109_v29, 4  ;;  %v1116_v35 = vsel %vm478_vm0, %v7488_v13, 0.0 }
 0x221   : > { %v1447_v37 = vmul.f32 0.125, %v982_v26  ;;  %v1097_v38 = vadd.f32 %v1096_v27, %v1095_v25  ;;  %v1117_v39 = vrot.slane %v1116_v35, 4  ;;  %v1123_v40 = vsel %vm478_vm0, %v7491_v14, 0.0  ;;  %v7856_v25 = vld [vmem:[%s9662_s14 + $0x140] sm:$0xff]   ;;  %8220 = vmatpush3.bf16.msra.mxu0 %v8675_v57 }
 0x222   : > { %v1104_v44 = vadd.f32 %v1103_v33, %v1102_v28  ;;  %v1111_v45 = vadd.f32 %v1110_v34, %v1109_v29  ;;  %v1124_v46 = vrot.slane %v1123_v40, 4  ;;  %v1130_v47 = vsel %vm478_vm0, %v7492_v19, 0.0  ;;  %8221 = vmatprep.subr.bf16.mxu0 %v8676_v7  ;;  %v7857_v34 = vld [vmem:[%s9662_s14 + $0x148] sm:$0xff]  }
 0x223   : > { %v2981_v48 = vsel %vm2924_vm7, %v1447_v37, %v2980_v32  ;;  %v1098_v49 = vrot.slane %v1097_v38, 2  ;;  %v1118_v50 = vadd.f32 %v1117_v39, %v1116_v35  ;;  %v1131_v51 = vrot.slane %v1130_v47, 4  ;;  %v7858_v39 = vld [vmem:[%s9662_s14 + $0x150] sm:$0xff]  }
 0x224   : > { %v9922_v53 = vsel %vm478_vm0, %v2981_v48, %v3304_v36  ;;  %v1105_v54 = vrot.slane %v1104_v44, 2  ;;  %v1112_v55 = vrot.slane %v1111_v45, 2  ;;  %v1125_v56 = vadd.f32 %v1124_v46, %v1123_v40 }
 0x225   : > { %v3355_v58 = vpack.c.bf16 %v9890_v15, %v9922_v53  ;;  %v1099_v59 = vadd.f32 %v1098_v49, %v1097_v38  ;;  %v1119_v60 = vrot.slane %v1118_v50, 2  ;;  %v1132_v61 = vadd.f32 %v1131_v51, %v1130_v47  ;;  %v9942_v47 = vld [vmem:[%s9662_s14 + $0x158] sm:$0xff]   ;;  %8222 = vmatpush3.bf16.msra.mxu0 %v8676_v7 }
 0x226   : > { %v1106_v62 = vadd.f32 %v1105_v54, %v1104_v44  ;;  %v1113_v0 = vadd.f32 %v1112_v55, %v1111_v45  ;;  %v1126_v1 = vrot.slane %v1125_v56, 2  ;;  %v1137_v2 = vsel %vm478_vm0, %v7495_v20, 0.0  ;;  %v8678_v54 = vld [vmem:[%s11424_s2 + $0xe8] sm:$0xff]  }
 0x227   : > { %v1100_v3 = vrot.slane %v1099_v59, 1  ;;  %v1120_v4 = vadd.f32 %v1119_v60, %v1118_v50  ;;  %v1133_v5 = vrot.slane %v1132_v61, 2  ;;  %v1138_v6 = vrot.slane %v1137_v2, 4  ;;  %8175 = vmatprep.mubr.bf16.mxu0 %v3355_v58  ;;  %8207 = vmatprep.mubr.bf16.mxu1 %v3355_v58 }
 0x228   : > { %v1107_v8 = vrot.slane %v1106_v62, 1  ;;  %v1114_v9 = vrot.slane %v1113_v0, 1  ;;  %v1127_v10 = vadd.f32 %v1126_v1, %v1125_v56  ;;  %v1144_v12 = vsel %vm478_vm0, %v7496_v24, 0.0  ;;  %v8677_v24 = vld [vmem:[%s11424_s2 + $0xe0] sm:$0xff]  }
 0x229   : > { %v1101_v13 = vadd.f32 %v1100_v3, %v1099_v59  ;;  %v1121_v14 = vrot.slane %v1120_v4, 1  ;;  %v1134_v16 = vadd.f32 %v1133_v5, %v1132_v61  ;;  %v1139_v17 = vadd.f32 %v1138_v6, %v1137_v2  ;;  %8223 = vmatprep.subr.bf16.mxu0 %v8677_v24 }
 0x22a   : > { %v1108_v19 = vadd.f32 %v1107_v8, %v1106_v62  ;;  %v1115_v20 = vadd.f32 %v1114_v9, %v1113_v0  ;;  %v1128_v21 = vrot.slane %v1127_v10, 1  ;;  %v1145_v23 = vrot.slane %v1144_v12, 4  ;;  %8224 = vmatpush3.bf16.msra.mxu0 %v8677_v24  ;;  %v8679_v8 = vld [vmem:[%s11424_s2 + $0xf0] sm:$0xff]  }
 0x22b   : > { %v1122_v26 = vadd.f32 %v1121_v14, %v1120_v4  ;;  %v1135_v27 = vrot.slane %v1134_v16, 1  ;;  %v1140_v28 = vrot.slane %v1139_v17, 2  ;;  %v1464_v29 = vmul.f32 0.125, %v1101_v13  ;;  %8225 = vmatprep.subr.bf16.mxu0 %v8678_v54 }
 0x22c   : > { %v1129_v30 = vadd.f32 %v1128_v21, %v1127_v10  ;;  %v1146_v31 = vadd.f32 %v1145_v23, %v1144_v12  ;;  %v1465_v32 = vmul.f32 0.125, %v1108_v19  ;;  %v1466_v33 = vmul.f32 0.125, %v1115_v20  ;;  %v3310_v20 = vpop.permute.xlu1 %3309 }
 0x22d   : > { %v1136_v35 = vadd.f32 %v1135_v27, %v1134_v16  ;;  %v1141_v36 = vadd.f32 %v1140_v28, %v1139_v17  ;;  %v1467_v37 = vmul.f32 0.125, %v1122_v26  ;;  %v7467_v38 = vunpack.c.l.bf16 %v7856_v25 }
 0x22e   : > { %v1147_v40 = vrot.slane %v1146_v31, 2  ;;  %v1468_v44 = vmul.f32 0.125, %v1129_v30  ;;  %v2996_v45 = vsel %vm2912_vm1, %v1465_v32, %v1464_v29  ;;  %v7468_v46 = vunpack.c.h.bf16 %v7856_v25  ;;  %8226 = vmatpush3.bf16.msra.mxu0 %v8678_v54  ;;  %v8680_v30 = vld [vmem:[%s11424_s2 + $0xf8] sm:$0xff]  }
 0x22f   : > { %v1142_v48 = vrot.slane %v1141_v36, 1  ;;  %v1469_v49 = vmul.f32 0.125, %v1136_v35  ;;  %v2997_v50 = vsel %vm2914_vm2, %v1466_v33, %v2996_v45  ;;  %v7471_v51 = vunpack.c.l.bf16 %v7857_v34  ;;  %8227 = vmatprep.subr.bf16.mxu0 %v8679_v8 }
 0x230   : > { %v1148_v55 = vadd.f32 %v1147_v40, %v1146_v31  ;;  %v2998_v56 = vsel %vm2916_vm3, %v1467_v37, %v2997_v50  ;;  %v7472_v57 = vunpack.c.h.bf16 %v7857_v34  ;;  %v7475_v58 = vunpack.c.l.bf16 %v7858_v39 }
 0x231   : > { %v1143_v59 = vadd.f32 %v1142_v48, %v1141_v36  ;;  %v2999_v60 = vsel %vm2918_vm4, %v1468_v44, %v2998_v56  ;;  %v7476_v61 = vunpack.c.h.bf16 %v7858_v39  ;;  %v7479_v62 = vunpack.c.l.bf16 %v9942_v47 }
 0x232   : > { %v1149_v0 = vrot.slane %v1148_v55, 1  ;;  %v3000_v1 = vsel %vm2920_vm5, %v1469_v49, %v2999_v60  ;;  %v7480_v2 = vunpack.c.h.bf16 %v9942_v47  ;;  %v1039_v3 = vsel %vm478_vm0, %v7467_v38, 0.0  ;;  %8228 = vmatpush3.bf16.msra.mxu0 %v8679_v8 }
 0x233   : > { %v1470_v4 = vmul.f32 0.125, %v1143_v59  ;;  %v1040_v5 = vrot.slane %v1039_v3, 4  ;;  %v1046_v6 = vsel %vm478_vm0, %v7468_v46, 0.0  ;;  %v1053_v7 = vsel %vm478_vm0, %v7471_v51, 0.0  ;;  %8229 = vmatprep.subr.bf16.mxu0 %v8680_v30 }
 0x234   : > { %v1150_v9 = vadd.f32 %v1149_v0, %v1148_v55  ;;  %v1047_v10 = vrot.slane %v1046_v6, 4  ;;  %v1054_v12 = vrot.slane %v1053_v7, 4  ;;  %v1060_v13 = vsel %vm478_vm0, %v7472_v57, 0.0 }
 0x235   : > { %v3001_v14 = vsel %vm2922_vm6, %v1470_v4, %v3000_v1  ;;  %v1041_v16 = vadd.f32 %v1040_v5, %v1039_v3  ;;  %v1061_v17 = vrot.slane %v1060_v13, 4  ;;  %v1067_v19 = vsel %vm478_vm0, %v7475_v58, 0.0  ;;  %v7868_v1 = vld [vmem:[%s9662_s14 + $0x1a0] sm:$0xff]  }
 0x236   : > { %v1471_v21 = vmul.f32 0.125, %v1150_v9  ;;  %v1048_v23 = vadd.f32 %v1047_v10, %v1046_v6  ;;  %v1055_v25 = vadd.f32 %v1054_v12, %v1053_v7  ;;  %v1068_v26 = vrot.slane %v1067_v19, 4  ;;  %8230 = vmatpush3.bf16.msra.mxu0 %v8680_v30  ;;  %v7869_v10 = vld [vmem:[%s9662_s14 + $0x1a8] sm:$0xff]  }
 0x237   : > { %v1042_v27 = vrot.slane %v1041_v16, 2  ;;  %v1062_v28 = vadd.f32 %v1061_v17, %v1060_v13  ;;  %v1074_v29 = vsel %vm478_vm0, %v7476_v61, 0.0  ;;  %v1081_v24 = vsel %vm478_vm0, %v7479_v62, 0.0  ;;  %v7870_v17 = vld [vmem:[%s9662_s14 + $0x1b0] sm:$0xff]  }
 0x238   : > { %v3002_v31 = vsel %vm2924_vm7, %v1471_v21, %v3001_v14  ;;  %v1049_v32 = vrot.slane %v1048_v23, 2  ;;  %v1056_v33 = vrot.slane %v1055_v25, 2  ;;  %v1069_v34 = vadd.f32 %v1068_v26, %v1067_v19 }
 0x239   : > { %v9969_v35 = vsel %vm478_vm0, %v3002_v31, %v3310_v20  ;;  %v1043_v36 = vadd.f32 %v1042_v27, %v1041_v16  ;;  %v1063_v37 = vrot.slane %v1062_v28, 2  ;;  %v1075_v38 = vrot.slane %v1074_v29, 4 }
 0x23a   : > { %v1050_v39 = vadd.f32 %v1049_v32, %v1048_v23  ;;  %v1057_v40 = vadd.f32 %v1056_v33, %v1055_v25  ;;  %v1070_v44 = vrot.slane %v1069_v34, 2  ;;  %v1082_v45 = vrot.slane %v1081_v24, 4 }
 0x23b   : > { %v1044_v46 = vrot.slane %v1043_v36, 1  ;;  %v1064_v47 = vadd.f32 %v1063_v37, %v1062_v28  ;;  %v1076_v48 = vadd.f32 %v1075_v38, %v1074_v29  ;;  %v1088_v49 = vsel %vm478_vm0, %v7480_v2, 0.0  ;;  %v7871_v29 = vld [vmem:[%s9662_s14 + $0x1b8] sm:$0xff]  }
 0x23c   : > { %v1051_v50 = vrot.slane %v1050_v39, 1  ;;  %v1058_v51 = vrot.slane %v1057_v40, 1  ;;  %v1071_v54 = vadd.f32 %v1070_v44, %v1069_v34  ;;  %v1083_v55 = vadd.f32 %v1082_v45, %v1081_v24 }
 0x23d   : > { %v1045_v56 = vadd.f32 %v1044_v46, %v1043_v36  ;;  %v1065_v57 = vrot.slane %v1064_v47, 1  ;;  %v1077_v58 = vrot.slane %v1076_v48, 2  ;;  %v1089_v59 = vrot.slane %v1088_v49, 4 }
 0x23e   : > { %v1052_v60 = vadd.f32 %v1051_v50, %v1050_v39  ;;  %v1059_v61 = vadd.f32 %v1058_v51, %v1057_v40  ;;  %v1072_v62 = vrot.slane %v1071_v54, 1  ;;  %v1084_v0 = vrot.slane %v1083_v55, 2 }
 0x23f   : > { %v1066_v3 = vadd.f32 %v1065_v57, %v1064_v47  ;;  %v1078_v4 = vadd.f32 %v1077_v58, %v1076_v48  ;;  %v1090_v2 = vadd.f32 %v1089_v59, %v1088_v49  ;;  %v1456_v5 = vmul.f32 0.125, %v1045_v56 }
 0x240   : > { %v1073_v6 = vadd.f32 %v1072_v62, %v1071_v54  ;;  %v1085_v7 = vadd.f32 %v1084_v0, %v1083_v55  ;;  %v1457_v8 = vmul.f32 0.125, %v1052_v60  ;;  %v1458_v9 = vmul.f32 0.125, %v1059_v61  ;;  %v3308_v55 = vpop.permute.xlu0 %3307 }
 0x241   : > { %v1079_v12 = vrot.slane %v1078_v4, 1  ;;  %v1091_v13 = vrot.slane %v1090_v2, 2  ;;  %v1459_v14 = vmul.f32 0.125, %v1066_v3  ;;  %v7515_v16 = vunpack.c.l.bf16 %v7868_v1 }
 0x242   : > { %v1086_v19 = vrot.slane %v1085_v7, 1  ;;  %v1460_v20 = vmul.f32 0.125, %v1073_v6  ;;  %v2989_v21 = vsel %vm2912_vm1, %v1457_v8, %v1456_v5  ;;  %v7516_v23 = vunpack.c.h.bf16 %v7868_v1 }
 0x243   : > { %v1080_v25 = vadd.f32 %v1079_v12, %v1078_v4  ;;  %v1092_v26 = vadd.f32 %v1091_v13, %v1090_v2  ;;  %v2990_v27 = vsel %vm2914_vm2, %v1458_v9, %v2989_v21  ;;  %v7519_v28 = vunpack.c.l.bf16 %v7869_v10 }
 0x244   : > { %v1087_v24 = vadd.f32 %v1086_v19, %v1085_v7  ;;  %v2991_v30 = vsel %vm2916_vm3, %v1459_v14, %v2990_v27  ;;  %v7520_v31 = vunpack.c.h.bf16 %v7869_v10  ;;  %v7523_v32 = vunpack.c.l.bf16 %v7870_v17 }
 0x245   : > { %v1093_v33 = vrot.slane %v1092_v26, 1  ;;  %v1461_v34 = vmul.f32 0.125, %v1080_v25  ;;  %v2992_v36 = vsel %vm2918_vm4, %v1460_v20, %v2991_v30  ;;  %v7524_v37 = vunpack.c.h.bf16 %v7870_v17 }
 0x246   : > { %v1462_v38 = vmul.f32 0.125, %v1087_v24  ;;  %v7527_v39 = vunpack.c.l.bf16 %v7871_v29  ;;  %v7528_v40 = vunpack.c.h.bf16 %v7871_v29  ;;  %v1207_v44 = vsel %vm478_vm0, %v7515_v16, 0.0 }
 0x247   : > { %v1094_v45 = vadd.f32 %v1093_v33, %v1092_v26  ;;  %v2993_v46 = vsel %vm2920_vm5, %v1461_v34, %v2992_v36  ;;  %v1208_v47 = vrot.slane %v1207_v44, 4  ;;  %v1214_v48 = vsel %vm478_vm0, %v7516_v23, 0.0 }
 0x248   : > { %v2994_v49 = vsel %vm2922_vm6, %v1462_v38, %v2993_v46  ;;  %v1215_v50 = vrot.slane %v1214_v48, 4  ;;  %v1221_v51 = vsel %vm478_vm0, %v7519_v28, 0.0  ;;  %v1228_v54 = vsel %vm478_vm0, %v7520_v31, 0.0  ;;  %v7864_v38 = vld [vmem:[%s9662_s14 + $0x180] sm:$0xff]  }
 0x249   : > { %v1463_v56 = vmul.f32 0.125, %v1094_v45  ;;  %v1209_v57 = vadd.f32 %v1208_v47, %v1207_v44  ;;  %v1222_v58 = vrot.slane %v1221_v51, 4  ;;  %v1229_v59 = vrot.slane %v1228_v54, 4 }
 0x24a   : > { %v1216_v60 = vadd.f32 %v1215_v50, %v1214_v48  ;;  %v1235_v61 = vsel %vm478_vm0, %v7523_v32, 0.0  ;;  %v1242_v62 = vsel %vm478_vm0, %v7524_v37, 0.0  ;;  %v1249_v0 = vsel %vm478_vm0, %v7527_v39, 0.0  ;;  %v7865_v50 = vld [vmem:[%s9662_s14 + $0x188] sm:$0xff]  }
 0x24b   : > { %v2995_v1 = vsel %vm2924_vm7, %v1463_v56, %v2994_v49  ;;  %v1210_v3 = vrot.slane %v1209_v57, 2  ;;  %v1223_v4 = vadd.f32 %v1222_v58, %v1221_v51  ;;  %v1230_v2 = vadd.f32 %v1229_v59, %v1228_v54 }
 0x24c   : > { %v9991_v5 = vsel %vm478_vm0, %v2995_v1, %v3308_v55  ;;  %v1217_v6 = vrot.slane %v1216_v60, 2  ;;  %v1236_v7 = vrot.slane %v1235_v61, 4  ;;  %v1243_v8 = vrot.slane %v1242_v62, 4 }
 0x24d   : > { %v3356_v9 = vpack.c.bf16 %v9969_v35, %v9991_v5  ;;  %v1211_v10 = vadd.f32 %v1210_v3, %v1209_v57  ;;  %v1224_v12 = vrot.slane %v1223_v4, 2  ;;  %v1231_v13 = vrot.slane %v1230_v2, 2 }
 0x24e   : > { %v1218_v14 = vadd.f32 %v1217_v6, %v1216_v60  ;;  %v1237_v16 = vadd.f32 %v1236_v7, %v1235_v61  ;;  %v1244_v17 = vadd.f32 %v1243_v8, %v1242_v62  ;;  %v1250_v19 = vrot.slane %v1249_v0, 4  ;;  %v7866_v61 = vld [vmem:[%s9662_s14 + $0x190] sm:$0xff]  }
 0x24f   : > { %v1212_v20 = vrot.slane %v1211_v10, 1  ;;  %v1225_v21 = vadd.f32 %v1224_v12, %v1223_v4  ;;  %v1232_v23 = vadd.f32 %v1231_v13, %v1230_v2  ;;  %v1256_v25 = vsel %vm478_vm0, %v7528_v40, 0.0  ;;  %8176 = vmatmul.mubr.bf16.gmra.mrb[8].mxu0 %v3356_v9  ;;  %8208 = vmatmul.mubr.bf16.gmra.mrb[8].mxu1 %v3356_v9  ;;  %v7867_v4 = vld [vmem:[%s9662_s14 + $0x198] sm:$0xff]   ;;  %v10006_v9 = vld [vmem:[%s11424_s2 + $0x80] sm:$0xff]  }
 0x250   : > { %v1219_v26 = vrot.slane %v1218_v14, 1  ;;  %v1238_v27 = vrot.slane %v1237_v16, 2  ;;  %v1245_v28 = vrot.slane %v1244_v17, 2  ;;  %v1251_v29 = vadd.f32 %v1250_v19, %v1249_v0  ;;  %8247 = vmatprep.subr.bf16.mxu0 %v10006_v9 }
 0x251   : > { %v1213_v24 = vadd.f32 %v1212_v20, %v1211_v10  ;;  %v1226_v30 = vrot.slane %v1225_v21, 1  ;;  %v1233_v31 = vrot.slane %v1232_v23, 1  ;;  %v1257_v32 = vrot.slane %v1256_v25, 4 }
 0x252   : > { %v1220_v33 = vadd.f32 %v1219_v26, %v1218_v14  ;;  %v1239_v34 = vadd.f32 %v1238_v27, %v1237_v16  ;;  %v1246_v36 = vadd.f32 %v1245_v28, %v1244_v17  ;;  %v1252_v37 = vrot.slane %v1251_v29, 2 }
 0x253   : > { %v1227_v39 = vadd.f32 %v1226_v30, %v1225_v21  ;;  %v1234_v44 = vadd.f32 %v1233_v31, %v1232_v23  ;;  %v1258_v40 = vadd.f32 %v1257_v32, %v1256_v25  ;;  %v1480_v45 = vmul.f32 0.125, %v1213_v24  ;;  %v3314_v30 = vpop.permute.xlu1 %3313 }
 0x254   : > { %v1240_v46 = vrot.slane %v1239_v34, 1  ;;  %v1247_v47 = vrot.slane %v1246_v36, 1  ;;  %v1253_v48 = vadd.f32 %v1252_v37, %v1251_v29  ;;  %v1481_v49 = vmul.f32 0.125, %v1220_v33 }
 0x255   : > { %v1259_v51 = vrot.slane %v1258_v40, 2  ;;  %v1482_v54 = vmul.f32 0.125, %v1227_v39  ;;  %v1483_v55 = vmul.f32 0.125, %v1234_v44  ;;  %v7499_v56 = vunpack.c.l.bf16 %v7864_v38 }
 0x256   : > { %v1241_v57 = vadd.f32 %v1240_v46, %v1239_v34  ;;  %v1248_v58 = vadd.f32 %v1247_v47, %v1246_v36  ;;  %v1254_v59 = vrot.slane %v1253_v48, 1  ;;  %v3010_v60 = vsel %vm2912_vm1, %v1481_v49, %v1480_v45 }
 0x257   : > { %v1260_v62 = vadd.f32 %v1259_v51, %v1258_v40  ;;  %v3011_v0 = vsel %vm2914_vm2, %v1482_v54, %v3010_v60  ;;  %v7500_v1 = vunpack.c.h.bf16 %v7864_v38  ;;  %v7503_v3 = vunpack.c.l.bf16 %v7865_v50 }
 0x258   : > { %v1255_v2 = vadd.f32 %v1254_v59, %v1253_v48  ;;  %v1484_v6 = vmul.f32 0.125, %v1241_v57  ;;  %v1485_v7 = vmul.f32 0.125, %v1248_v58  ;;  %v3012_v8 = vsel %vm2916_vm3, %v1483_v55, %v3011_v0 }
 0x259   : > { %v1261_v10 = vrot.slane %v1260_v62, 1  ;;  %v7504_v12 = vunpack.c.h.bf16 %v7865_v50  ;;  %v7507_v13 = vunpack.c.l.bf16 %v7866_v61  ;;  %v7508_v14 = vunpack.c.h.bf16 %v7866_v61 }
 0x25a   : > { %v1486_v16 = vmul.f32 0.125, %v1255_v2  ;;  %v3013_v17 = vsel %vm2918_vm4, %v1484_v6, %v3012_v8  ;;  %v7511_v19 = vunpack.c.l.bf16 %v7867_v4  ;;  %v7512_v20 = vunpack.c.h.bf16 %v7867_v4 }
 0x25b   : > { %v1262_v21 = vadd.f32 %v1261_v10, %v1260_v62  ;;  %v3014_v23 = vsel %vm2920_vm5, %v1485_v7, %v3013_v17  ;;  %v1151_v25 = vsel %vm478_vm0, %v7499_v56, 0.0  ;;  %v1158_v26 = vsel %vm478_vm0, %v7500_v1, 0.0 }
 0x25c   : > { %v3015_v27 = vsel %vm2922_vm6, %v1486_v16, %v3014_v23  ;;  %v1152_v28 = vrot.slane %v1151_v25, 4  ;;  %v1159_v29 = vrot.slane %v1158_v26, 4  ;;  %v1165_v24 = vsel %vm478_vm0, %v7503_v3, 0.0 }
 0x25d   : > { %v1487_v31 = vmul.f32 0.125, %v1262_v21  ;;  %v1166_v32 = vrot.slane %v1165_v24, 4  ;;  %v1172_v33 = vsel %vm478_vm0, %v7504_v12, 0.0  ;;  %v1179_v34 = vsel %vm478_vm0, %v7507_v13, 0.0 }
 0x25e   : > { %v1153_v36 = vadd.f32 %v1152_v28, %v1151_v25  ;;  %v1160_v37 = vadd.f32 %v1159_v29, %v1158_v26  ;;  %v1173_v38 = vrot.slane %v1172_v33, 4  ;;  %v1180_v39 = vrot.slane %v1179_v34, 4  ;;  %v7876_v25 = vld [vmem:[%s9662_s14 + $0x1e0] sm:$0xff]  }
 0x25f   : > { %v3016_v44 = vsel %vm2924_vm7, %v1487_v31, %v3015_v27  ;;  %v1167_v40 = vadd.f32 %v1166_v32, %v1165_v24  ;;  %v1186_v45 = vsel %vm478_vm0, %v7508_v14, 0.0  ;;  %v1193_v46 = vsel %vm478_vm0, %v7511_v19, 0.0 }
 0x260   : > { %v10021_v47 = vsel %vm478_vm0, %v3016_v44, %v3314_v30  ;;  %v1154_v48 = vrot.slane %v1153_v36, 2  ;;  %v1161_v49 = vrot.slane %v1160_v37, 2  ;;  %v1174_v50 = vadd.f32 %v1173_v38, %v1172_v33  ;;  %v7877_v33 = vld [vmem:[%s9662_s14 + $0x1e8] sm:$0xff]  }
 0x261   : > { %v1168_v51 = vrot.slane %v1167_v40, 2  ;;  %v1181_v54 = vadd.f32 %v1180_v39, %v1179_v34  ;;  %v1187_v55 = vrot.slane %v1186_v45, 4  ;;  %v1194_v56 = vrot.slane %v1193_v46, 4 }
 0x262   : > { %v1155_v57 = vadd.f32 %v1154_v48, %v1153_v36  ;;  %v1162_v58 = vadd.f32 %v1161_v49, %v1160_v37  ;;  %v1175_v59 = vrot.slane %v1174_v50, 2  ;;  %v1200_v60 = vsel %vm478_vm0, %v7512_v20, 0.0  ;;  %v7879_v48 = vld [vmem:[%s9662_s14 + $0x1f8] sm:$0xff]  }
 0x263   : > { %v1169_v61 = vadd.f32 %v1168_v51, %v1167_v40  ;;  %v1182_v62 = vrot.slane %v1181_v54, 2  ;;  %v1188_v0 = vadd.f32 %v1187_v55, %v1186_v45  ;;  %v1195_v1 = vadd.f32 %v1194_v56, %v1193_v46  ;;  %v7878_v46 = vld [vmem:[%s9662_s14 + $0x1f0] sm:$0xff]  }
 0x264   : > { %v1156_v3 = vrot.slane %v1155_v57, 1  ;;  %v1163_v4 = vrot.slane %v1162_v58, 1  ;;  %v1176_v2 = vadd.f32 %v1175_v59, %v1174_v50  ;;  %v1201_v6 = vrot.slane %v1200_v60, 4 }
 0x265   : > { %v1170_v7 = vrot.slane %v1169_v61, 1  ;;  %v1183_v8 = vadd.f32 %v1182_v62, %v1181_v54  ;;  %v1189_v10 = vrot.slane %v1188_v0, 2  ;;  %v1196_v12 = vrot.slane %v1195_v1, 2 }
 0x266   : > { %v1157_v13 = vadd.f32 %v1156_v3, %v1155_v57  ;;  %v1164_v14 = vadd.f32 %v1163_v4, %v1162_v58  ;;  %v1177_v16 = vrot.slane %v1176_v2, 1  ;;  %v1202_v17 = vadd.f32 %v1201_v6, %v1200_v60 }
 0x267   : > { %v1171_v19 = vadd.f32 %v1170_v7, %v1169_v61  ;;  %v1184_v20 = vrot.slane %v1183_v8, 1  ;;  %v1190_v21 = vadd.f32 %v1189_v10, %v1188_v0  ;;  %v1197_v23 = vadd.f32 %v1196_v12, %v1195_v1 }
 0x268   : > { %v1178_v26 = vadd.f32 %v1177_v16, %v1176_v2  ;;  %v1203_v27 = vrot.slane %v1202_v17, 2  ;;  %v1472_v28 = vmul.f32 0.125, %v1157_v13  ;;  %v1473_v29 = vmul.f32 0.125, %v1164_v14  ;;  %v3312_v2 = vpop.permute.xlu0 %3311 }
 0x269   : > { %v1185_v24 = vadd.f32 %v1184_v20, %v1183_v8  ;;  %v1191_v30 = vrot.slane %v1190_v21, 1  ;;  %v1198_v31 = vrot.slane %v1197_v23, 1  ;;  %v1474_v32 = vmul.f32 0.125, %v1171_v19 }
 0x26a   : > { %v1204_v34 = vadd.f32 %v1203_v27, %v1202_v17  ;;  %v1475_v36 = vmul.f32 0.125, %v1178_v26  ;;  %v3003_v37 = vsel %vm2912_vm1, %v1473_v29, %v1472_v28  ;;  %v7547_v38 = vunpack.c.l.bf16 %v7876_v25 }
 0x26b   : > { %v1192_v39 = vadd.f32 %v1191_v30, %v1190_v21  ;;  %v1199_v44 = vadd.f32 %v1198_v31, %v1197_v23  ;;  %v1476_v40 = vmul.f32 0.125, %v1185_v24  ;;  %v3004_v45 = vsel %vm2914_vm2, %v1474_v32, %v3003_v37 }
 0x26c   : > { %v1205_v49 = vrot.slane %v1204_v34, 1  ;;  %v3005_v50 = vsel %vm2916_vm3, %v1475_v36, %v3004_v45  ;;  %v7548_v51 = vunpack.c.h.bf16 %v7876_v25  ;;  %v7551_v54 = vunpack.c.l.bf16 %v7877_v33 }
 0x26d   : > { %v1477_v55 = vmul.f32 0.125, %v1192_v39  ;;  %v1478_v56 = vmul.f32 0.125, %v1199_v44  ;;  %v3006_v57 = vsel %vm2918_vm4, %v1476_v40, %v3005_v50  ;;  %v7552_v58 = vunpack.c.h.bf16 %v7877_v33 }
 0x26e   : > { %v1206_v59 = vadd.f32 %v1205_v49, %v1204_v34  ;;  %v7555_v60 = vunpack.c.l.bf16 %v7878_v46  ;;  %v7556_v61 = vunpack.c.h.bf16 %v7878_v46  ;;  %v7559_v62 = vunpack.c.l.bf16 %v7879_v48 }
 0x26f   : > { %v3007_v0 = vsel %vm2920_vm5, %v1477_v55, %v3006_v57  ;;  %v7560_v1 = vunpack.c.h.bf16 %v7879_v48  ;;  %v1319_v3 = vsel %vm478_vm0, %v7547_v38, 0.0  ;;  %v1326_v4 = vsel %vm478_vm0, %v7548_v51, 0.0 }
 0x270   : > { %v1479_v6 = vmul.f32 0.125, %v1206_v59  ;;  %v3008_v7 = vsel %vm2922_vm6, %v1478_v56, %v3007_v0  ;;  %v1320_v8 = vrot.slane %v1319_v3, 4  ;;  %v1327_v10 = vrot.slane %v1326_v4, 4 }
 0x271   : > { %v1333_v12 = vsel %vm478_vm0, %v7551_v54, 0.0  ;;  %v1340_v13 = vsel %vm478_vm0, %v7552_v58, 0.0  ;;  %v1347_v14 = vsel %vm478_vm0, %v7555_v60, 0.0  ;;  %v1354_v16 = vsel %vm478_vm0, %v7556_v61, 0.0 }
 0x272   : > { %v3009_v17 = vsel %vm2924_vm7, %v1479_v6, %v3008_v7  ;;  %v1321_v19 = vadd.f32 %v1320_v8, %v1319_v3  ;;  %v1328_v20 = vadd.f32 %v1327_v10, %v1326_v4  ;;  %v1334_v21 = vrot.slane %v1333_v12, 4  ;;  %v7872_v8 = vld [vmem:[%s9662_s14 + $0x1c0] sm:$0xff]  }
 0x273   : > { %v10042_v23 = vsel %vm478_vm0, %v3009_v17, %v3312_v2  ;;  %v1341_v25 = vrot.slane %v1340_v13, 4  ;;  %v1348_v26 = vrot.slane %v1347_v14, 4  ;;  %v1355_v27 = vrot.slane %v1354_v16, 4 }
 0x274   : > { %v3357_v28 = vpack.c.bf16 %v10021_v47, %v10042_v23  ;;  %v1322_v29 = vrot.slane %v1321_v19, 2  ;;  %v1329_v24 = vrot.slane %v1328_v20, 2  ;;  %v1335_v30 = vadd.f32 %v1334_v21, %v1333_v12 }
 0x275   : > { %v1342_v31 = vadd.f32 %v1341_v25, %v1340_v13  ;;  %v1349_v32 = vadd.f32 %v1348_v26, %v1347_v14  ;;  %v1356_v33 = vadd.f32 %v1355_v27, %v1354_v16  ;;  %v1361_v34 = vsel %vm478_vm0, %v7559_v62, 0.0  ;;  %v7873_v16 = vld [vmem:[%s9662_s14 + $0x1c8] sm:$0xff]  }
 0x276   : > { %v1323_v36 = vadd.f32 %v1322_v29, %v1321_v19  ;;  %v1330_v37 = vadd.f32 %v1329_v24, %v1328_v20  ;;  %v1336_v38 = vrot.slane %v1335_v30, 2  ;;  %v1362_v39 = vrot.slane %v1361_v34, 4  ;;  %8179 = vmatprep.mubr.bf16.mxu0 %v3357_v28  ;;  %8211 = vmatprep.mubr.bf16.mxu1 %v3357_v28  ;;  %v7874_v28 = vld [vmem:[%s9662_s14 + $0x1d0] sm:$0xff]  }
 0x277   : > { %v1343_v44 = vrot.slane %v1342_v31, 2  ;;  %v1350_v40 = vrot.slane %v1349_v32, 2  ;;  %v1357_v45 = vrot.slane %v1356_v33, 2  ;;  %v1368_v46 = vsel %vm478_vm0, %v7560_v1, 0.0 }
 0x278   : > { %v1324_v48 = vrot.slane %v1323_v36, 1  ;;  %v1331_v49 = vrot.slane %v1330_v37, 1  ;;  %v1337_v50 = vadd.f32 %v1336_v38, %v1335_v30  ;;  %v1363_v51 = vadd.f32 %v1362_v39, %v1361_v34 }
 0x279   : > { %v1344_v54 = vadd.f32 %v1343_v44, %v1342_v31  ;;  %v1351_v55 = vadd.f32 %v1350_v40, %v1349_v32  ;;  %v1358_v56 = vadd.f32 %v1357_v45, %v1356_v33  ;;  %v1369_v57 = vrot.slane %v1368_v46, 4  ;;  %v7875_v32 = vld [vmem:[%s9662_s14 + $0x1d8] sm:$0xff]   ;;  %s11372_s14 = scalar_lea.hbm %s11426_s4, %s7304_s5 }
 0x27a   : > { %v1325_v58 = vadd.f32 %v1324_v48, %v1323_v36  ;;  %v1332_v59 = vadd.f32 %v1331_v49, %v1330_v37  ;;  %v1338_v60 = vrot.slane %v1337_v50, 1  ;;  %v1364_v61 = vrot.slane %v1363_v51, 2 }
 0x27b   : > { %v1345_v62 = vrot.slane %v1344_v54, 1  ;;  %v1352_v0 = vrot.slane %v1351_v55, 1  ;;  %v1359_v3 = vrot.slane %v1358_v56, 1  ;;  %v1370_v4 = vadd.f32 %v1369_v57, %v1368_v46 }
 0x27c   : > { %v1339_v2 = vadd.f32 %v1338_v60, %v1337_v50  ;;  %v1365_v1 = vadd.f32 %v1364_v61, %v1363_v51  ;;  %v1496_v6 = vmul.f32 0.125, %v1325_v58  ;;  %v1497_v7 = vmul.f32 0.125, %v1332_v59 }
 0x27d   : > { %v1346_v10 = vadd.f32 %v1345_v62, %v1344_v54  ;;  %v1353_v12 = vadd.f32 %v1352_v0, %v1351_v55  ;;  %v1360_v13 = vadd.f32 %v1359_v3, %v1358_v56  ;;  %v1371_v14 = vrot.slane %v1370_v4, 2 }
 0x27e   : > { %v1366_v17 = vrot.slane %v1365_v1, 1  ;;  %v1498_v19 = vmul.f32 0.125, %v1339_v2  ;;  %v3024_v20 = vsel %vm2912_vm1, %v1497_v7, %v1496_v6  ;;  %v7531_v27 = vunpack.c.l.bf16 %v7872_v8 }
 0x27f   : > { %v1372_v21 = vadd.f32 %v1371_v14, %v1370_v4  ;;  %v1499_v25 = vmul.f32 0.125, %v1346_v10  ;;  %v1500_v26 = vmul.f32 0.125, %v1353_v12  ;;  %v7532_v30 = vunpack.c.h.bf16 %v7872_v8 }
 0x280   : > { %v1367_v29 = vadd.f32 %v1366_v17, %v1365_v1  ;;  %v3025_v24 = vsel %vm2914_vm2, %v1498_v19, %v3024_v20  ;;  %v7535_v31 = vunpack.c.l.bf16 %v7873_v16  ;;  %v1501_v34 = vmul.f32 0.125, %v1360_v13 }
 0x281   : > { %v1373_v33 = vrot.slane %v1372_v21, 1  ;;  %v3026_v36 = vsel %vm2916_vm3, %v1499_v25, %v3025_v24  ;;  %v7536_v37 = vunpack.c.h.bf16 %v7873_v16  ;;  %v10055_v38 = vpop.f32.mrb[0].mxu0  ;;  %v10057_v39 = vpop.f32.mrb[0].mxu1  ;;  %v7539_v40 = vunpack.c.l.bf16 %v7874_v28 }
 0x282   : > { %v3027_v44 = vsel %vm2918_vm4, %v1500_v26, %v3026_v36  ;;  %v7540_v45 = vunpack.c.h.bf16 %v7874_v28  ;;  %v10060_v46 = vpop.f32.mrb[1].mxu0  ;;  %v10062_v48 = vpop.f32.mrb[1].mxu1  ;;  %v10064_v49 = vmul.f32 0.125, %v1367_v29  ;;  %v7543_v50 = vunpack.c.l.bf16 %v7875_v32 }
 0x283   : > { %v1263_v51 = vsel %vm478_vm0, %v7531_v27, 0.0  ;;  %v10067_v54 = vpop.f32.mrb[2].mxu0  ;;  %v10069_v55 = vpop.f32.mrb[2].mxu1  ;;  %v1374_v56 = vadd.f32 %v1373_v33, %v1372_v21  ;;  %v1270_v58 = vsel %vm478_vm0, %v7532_v30, 0.0  ;;  %v1277_v59 = vsel %vm478_vm0, %v7535_v31, 0.0 }
 0x284   : > { %v1264_v57 = vrot.slane %v1263_v51, 4  ;;  %v10073_v60 = vpop.f32.mrb[3].mxu0  ;;  %v10075_v61 = vpop.f32.mrb[3].mxu1  ;;  %v3028_v62 = vsel %vm2920_vm5, %v1501_v34, %v3027_v44  ;;  %v1271_v0 = vrot.slane %v1270_v58, 4  ;;  %v1278_v3 = vrot.slane %v1277_v59, 4 }
 0x285   : > { %v1284_v4 = vsel %vm478_vm0, %v7536_v37, 0.0  ;;  %v1291_v6 = vsel %vm478_vm0, %v7539_v40, 0.0  ;;  %v1298_v7 = vsel %vm478_vm0, %v7540_v45, 0.0  ;;  %v7544_v8 = vunpack.c.h.bf16 %v7875_v32 }
 0x286   : > { %v1265_v2 = vadd.f32 %v1264_v57, %v1263_v51  ;;  %v1285_v1 = vrot.slane %v1284_v4, 4  ;;  %v1272_v10 = vadd.f32 %v1271_v0, %v1270_v58  ;;  %v1279_v12 = vadd.f32 %v1278_v3, %v1277_v59 }
 0x287   : > { %v1292_v13 = vrot.slane %v1291_v6, 4  ;;  %v1503_v14 = vmul.f32 0.125, %v1374_v56  ;;  %v1299_v19 = vrot.slane %v1298_v7, 4  ;;  %v1305_v26 = vsel %vm478_vm0, %v7543_v50, 0.0 }
 0x288   : > { %v1266_v16 = vrot.slane %v1265_v2, 2  ;;  %v1286_v17 = vadd.f32 %v1285_v1, %v1284_v4  ;;  %v1273_v20 = vrot.slane %v1272_v10, 2  ;;  %v1280_v21 = vrot.slane %v1279_v12, 2 }
 0x289   : > { %v1293_v25 = vadd.f32 %v1292_v13, %v1291_v6  ;;  %v1300_v29 = vadd.f32 %v1299_v19, %v1298_v7  ;;  %v1306_v24 = vrot.slane %v1305_v26, 4  ;;  %v1312_v32 = vsel %vm478_vm0, %v7544_v8, 0.0 }
 0x28a   : > { %v1267_v27 = vadd.f32 %v1266_v16, %v1265_v2  ;;  %v1287_v28 = vrot.slane %v1286_v17, 2  ;;  %v1274_v30 = vadd.f32 %v1273_v20, %v1272_v10  ;;  %v1281_v31 = vadd.f32 %v1280_v21, %v1279_v12 }
 0x28b   : > { %v1294_v33 = vrot.slane %v1293_v25, 2  ;;  %v1301_v37 = vrot.slane %v1300_v29, 2  ;;  %v1307_v44 = vadd.f32 %v1306_v24, %v1305_v26  ;;  %v1313_v56 = vrot.slane %v1312_v32, 4  ;;  %v10093_v26 = vld [vmem:[%s11425_s3 + $0x1] ss:$0 sm:$0xff] }
 0x28c   : > { %v1268_v34 = vrot.slane %v1267_v27, 1  ;;  %v1288_v36 = vadd.f32 %v1287_v28, %v1286_v17  ;;  %v1275_v40 = vrot.slane %v1274_v30, 1  ;;  %v1282_v45 = vrot.slane %v1281_v31, 1  ;;  %v10086_v17 = vld [vmem:[%s11425_s3] ss:$0 sm:$0xff] }
 0x28d   : > { %v1295_v51 = vadd.f32 %v1294_v33, %v1293_v25  ;;  %v1302_v50 = vadd.f32 %v1301_v37, %v1300_v29  ;;  %v1308_v59 = vrot.slane %v1307_v44, 2  ;;  %v1314_v2 = vadd.f32 %v1313_v56, %v1312_v32 }
 0x28e   : > { %v1269_v57 = vadd.f32 %v1268_v34, %v1267_v27  ;;  %v1289_v58 = vrot.slane %v1288_v36, 1  ;;  %v1276_v0 = vadd.f32 %v1275_v40, %v1274_v30  ;;  %v1283_v3 = vadd.f32 %v1282_v45, %v1281_v31  ;;  %v3318_v45 = vpop.permute.xlu1 %3317 }
 0x28f   : > { %v1296_v4 = vrot.slane %v1295_v51, 1  ;;  %v1303_v6 = vrot.slane %v1302_v50, 1  ;;  %v1309_v7 = vadd.f32 %v1308_v59, %v1307_v44  ;;  %v1315_v12 = vrot.slane %v1314_v2, 2 }
 0x290   : > { %v1290_v1 = vadd.f32 %v1289_v58, %v1288_v36  ;;  %v1488_v8 = vmul.f32 0.125, %v1269_v57  ;;  %v1489_v13 = vmul.f32 0.125, %v1276_v0  ;;  %v1490_v16 = vmul.f32 0.125, %v1283_v3 }
 0x291   : > { %v1297_v10 = vadd.f32 %v1296_v4, %v1295_v51  ;;  %v3029_v19 = vsel %vm2922_vm6, %v10064_v49, %v3028_v62  ;;  %v1304_v20 = vadd.f32 %v1303_v6, %v1302_v50  ;;  %v1310_v21 = vrot.slane %v1309_v7, 1  ;;  %v3316_v50 = vpop.permute.xlu0 %3315 }
 0x292   : > { %v1491_v25 = vmul.f32 0.125, %v1290_v1  ;;  %v1316_v27 = vadd.f32 %v1315_v12, %v1314_v2  ;;  %v3017_v29 = vsel %vm2912_vm1, %v1489_v13, %v1488_v8  ;;  %v3471_v33 = vadd.f32 %v10055_v38, %v10086_v17  ;;  %v8682_v13 = vld [vmem:[%s11424_s2 + $0x88] sm:$0xff]  }
 0x293   : > { %v1492_v28 = vmul.f32 0.125, %v1297_v10  ;;  %v1311_v24 = vadd.f32 %v1310_v21, %v1309_v7  ;;  %v1493_v30 = vmul.f32 0.125, %v1304_v20  ;;  %v3018_v31 = vsel %vm2914_vm2, %v1490_v16, %v3017_v29  ;;  %v8683_v16 = vld [vmem:[%s11424_s2 + $0x90] sm:$0xff]  }
 0x294   : > { %v3030_v49 = vsel %vm2924_vm7, %v1503_v14, %v3029_v19  ;;  %v1317_v62 = vrot.slane %v1316_v27, 1  ;;  %v3019_v32 = vsel %vm2916_vm3, %v1491_v25, %v3018_v31  ;;  %v3654_v34 = vadd.f32 %v10057_v39, %v10093_v26  ;;  %v8684_v19 = vld [vmem:[%s11424_s2 + $0x98] sm:$0xff]  }
 0x295   : > { %v1494_v36 = vmul.f32 0.125, %v1311_v24  ;;  %v3020_v37 = vsel %vm2918_vm4, %v1492_v28, %v3019_v32  ;;  %v3463_v44 = vadd.f32 %v10086_v17, %v10060_v46  ;;  %v3474_v40 = vadd.f32 %v10067_v54, %v10086_v17 }
 0x296   : > { %v1318_v51 = vadd.f32 %v1317_v62, %v1316_v27  ;;  %v3021_v38 = vsel %vm2920_vm5, %v1493_v30, %v3020_v37  ;;  %v3646_v14 = vadd.f32 %v10093_v26, %v10062_v48  ;;  %v3657_v56 = vadd.f32 %v10069_v55, %v10093_v26 }
 0x297   : > { %v3022_v39 = vsel %vm2922_vm6, %v1494_v36, %v3021_v38  ;;  %v3527_v57 = vmax.f32 %v3471_v33, 0.0  ;;  %v3528_v58 = vmax.f32 %v3474_v40, 0.0  ;;  %v3466_v46 = vadd.f32 %v10086_v17, %v10073_v60 }
 0x298   : > { %v1495_v59 = vmul.f32 0.125, %v1318_v51  ;;  %v3710_v54 = vmax.f32 %v3654_v34, 0.0  ;;  %v3711_v0 = vmax.f32 %v3657_v56, 0.0  ;;  %v3649_v3 = vadd.f32 %v10093_v26, %v10075_v61 }
 0x299   : > { %v10119_v4 = vsel %vm478_vm0, %v3030_v49, %v3318_v45  ;;  %v3525_v48 = vmax.f32 %v3463_v44, 0.0  ;;  %v10121_v2 = vpack.c.bf16 %v3528_v58, %v3527_v57  ;;  %v3526_v55 = vmax.f32 %v3466_v46, 0.0 }
 0x29a   : > { %v3023_v1 = vsel %vm2924_vm7, %v1495_v59, %v3022_v39  ;;  %v3708_v6 = vmax.f32 %v3646_v14, 0.0  ;;  %v3750_v7 = vpack.c.bf16 %v3711_v0, %v3710_v54  ;;  %v3709_v8 = vmax.f32 %v3649_v3, 0.0  ;;  %v8686_v59 = vld [vmem:[%s11424_s2 + $0xa8] sm:$0xff]   ;;  %v8687_v54 = vld [vmem:[%s11424_s2 + $0xb0] sm:$0xff]   ;;  %v8688_v0 = vld [vmem:[%s11424_s2 + $0xb8] sm:$0xff]  }
 0x29b   : > { %v10125_v60 = vsel %vm478_vm0, %v3023_v1, %v3316_v50  ;;  %v10127_v10 = vpack.c.bf16 %v3526_v55, %v3525_v48  ;;  %v8685_v50 = vld [vmem:[%s11424_s2 + $0xa0] sm:$0xff]   ;;  %v8690_v48 = vld [vmem:[%s11424_s2 + $0x108] sm:$0xff]   ;;  %v8691_v55 = vld [vmem:[%s11424_s2 + $0x110] sm:$0xff]  }
 0x29c   : > { %v3358_v61 = vpack.c.bf16 %v10119_v4, %v10125_v60  ;;  %v3749_v12 = vpack.c.bf16 %v3709_v8, %v3708_v6  ;;  %v8689_v3 = vld [vmem:[%s11424_s2 + $0x100] sm:$0xff]  }
 0x29d   : > { %8279 = vmatprep.subr.bf16.mxu1 %v8689_v3 }
 0x29e   : > { %8180 = vmatmul.mubr.bf16.gmra.mrb[12].mxu0 %v3358_v61  ;;  %8212 = vmatmul.mubr.bf16.gmra.mrb[12].mxu1 %v3358_v61 }
 0x29f   : > { %8231 = vmatprep.mubr.bf16.mxu0 %v3749_v12  ;;  %8280 = vmatpush3.bf16.msra.mxu1 %v8689_v3 }
 0x2a0   : > { %8281 = vmatprep.subr.bf16.mxu1 %v8690_v48 }
 0x2a3   : > { %8282 = vmatpush3.bf16.msra.mxu1 %v8690_v48 }
 0x2a4   : > { %8283 = vmatprep.subr.bf16.mxu1 %v8691_v55 }
 0x2a6   : > { %8232 = vmatmul.mubr.bf16.vlgmr.msra.gmra.mrb[16].mxu0 %v3750_v7 }
 0x2a7   : > { %8248 = vmatpush3.bf16.msra.mxu0 %v10006_v9  ;;  %8284 = vmatpush3.bf16.msra.mxu1 %v8691_v55 }
 0x2a8   : > { %8249 = vmatprep.subr.bf16.mxu0 %v8682_v13 }
 0x2ab   : > { %8250 = vmatpush3.bf16.msra.mxu0 %v8682_v13 }
 0x2ac   : > { %8251 = vmatprep.subr.bf16.mxu0 %v8683_v16 }
 0x2af   : > { %8252 = vmatpush3.bf16.msra.mxu0 %v8683_v16 }
 0x2b0   : > { %8253 = vmatprep.subr.bf16.mxu0 %v8684_v19 }
 0x2b3   : > { %8254 = vmatpush3.bf16.msra.mxu0 %v8684_v19 }
 0x2b4   : > { %8255 = vmatprep.subr.bf16.mxu0 %v8685_v50 }
 0x2b7   : > { %8256 = vmatpush3.bf16.msra.mxu0 %v8685_v50 }
 0x2b8   : > { %8257 = vmatprep.subr.bf16.mxu0 %v8686_v59 }
 0x2bb   : > { %8258 = vmatpush3.bf16.msra.mxu0 %v8686_v59 }
 0x2bc   : > { %8259 = vmatprep.subr.bf16.mxu0 %v8687_v54 }
 0x2bf   : > { %8260 = vmatpush3.bf16.msra.mxu0 %v8687_v54 }
 0x2c0   : > { %8261 = vmatprep.subr.bf16.mxu0 %v8688_v0 }
 0x2c3   : > { %8262 = vmatpush3.bf16.msra.mxu0 %v8688_v0 }
 0x2d1   : > { %v8173_v20 = vpop.f32.mrb[4].mxu0  ;;  %v8205_v21 = vpop.f32.mrb[4].mxu1 }
 0x2d2   : > { %v3487_v25 = vadd.f32 %v8173_v20, %v10086_v17  ;;  %v3670_v9 = vadd.f32 %v8205_v21, %v10093_v26  ;;  %v3478_v27 = vpop.f32.mrb[5].mxu0  ;;  %v3661_v28 = vpop.f32.mrb[5].mxu1 }
 0x2d3   : > { %v3479_v29 = vadd.f32 %v10086_v17, %v3478_v27  ;;  %v3662_v24 = vadd.f32 %v10093_v26, %v3661_v28  ;;  %v8174_v30 = vpop.f32.mrb[6].mxu0  ;;  %v8206_v31 = vpop.f32.mrb[6].mxu1  ;;  %v8692_v28 = vld [vmem:[%s11424_s2 + $0x118] sm:$0xff]  }
 0x2d4   : > { %v3490_v33 = vadd.f32 %v8174_v30, %v10086_v17  ;;  %v3673_v49 = vadd.f32 %v8206_v31, %v10093_v26  ;;  %v3481_v62 = vpop.f32.mrb[7].mxu0  ;;  %v3664_v32 = vpop.f32.mrb[7].mxu1  ;;  %v3531_v37 = vmax.f32 %v3487_v25, 0.0  ;;  %v3714_v44 = vmax.f32 %v3670_v9, 0.0  ;;  %8285 = vmatprep.subr.bf16.mxu1 %v8692_v28 }
 0x2d5   : > { %v3482_v34 = vadd.f32 %v10086_v17, %v3481_v62  ;;  %v3665_v36 = vadd.f32 %v10093_v26, %v3664_v32  ;;  %v3529_v51 = vmax.f32 %v3479_v29, 0.0  ;;  %v3712_v38 = vmax.f32 %v3662_v24, 0.0  ;;  %8286 = vmatpush3.bf16.msra.mxu1 %v8692_v28 }
 0x2d6   : > { %v3532_v40 = vmax.f32 %v3490_v33, 0.0  ;;  %v3715_v45 = vmax.f32 %v3673_v49, 0.0 }
 0x2d7   : > { %v3530_v14 = vmax.f32 %v3482_v34, 0.0  ;;  %v3713_v56 = vmax.f32 %v3665_v36, 0.0 }
 0x2d8   : > { %v10149_v39 = vpack.c.bf16 %v3532_v40, %v3531_v37  ;;  %v3752_v57 = vpack.c.bf16 %v3715_v45, %v3714_v44  ;;  %v8693_v40 = vld [vmem:[%s11424_s2 + $0x120] sm:$0xff]  }
 0x2d9   : > { %v10151_v58 = vpack.c.bf16 %v3530_v14, %v3529_v51  ;;  %v3751_v46 = vpack.c.bf16 %v3713_v56, %v3712_v38  ;;  %8287 = vmatprep.subr.bf16.mxu1 %v8693_v40 }
 0x2da   : > { %8288 = vmatpush3.bf16.msra.mxu1 %v8693_v40 }
 0x2db   : > { %8235 = vmatprep.mubr.bf16.mxu0 %v3751_v46 }
 0x2dc   : > { %8236 = vmatmul.mubr.bf16.gmra.mrb[20].mxu0 %v3752_v57 }
 0x322   : > { %v8177_v1 = vpop.f32.mrb[8].mxu0  ;;  %v8209_v6 = vpop.f32.mrb[8].mxu1 }
 0x323   : > { %v3503_v7 = vadd.f32 %v8177_v1, %v10086_v17  ;;  %v3686_v8 = vadd.f32 %v8209_v6, %v10093_v26  ;;  %v3494_v61 = vpop.f32.mrb[9].mxu0  ;;  %v3677_v12 = vpop.f32.mrb[9].mxu1 }
 0x324   : > { %v3495_v13 = vadd.f32 %v10086_v17, %v3494_v61  ;;  %v3678_v16 = vadd.f32 %v10093_v26, %v3677_v12  ;;  %v8178_v19 = vpop.f32.mrb[10].mxu0  ;;  %v8210_v20 = vpop.f32.mrb[10].mxu1 }
 0x325   : > { %v3506_v21 = vadd.f32 %v8178_v19, %v10086_v17  ;;  %v3689_v25 = vadd.f32 %v8210_v20, %v10093_v26  ;;  %v3497_v9 = vpop.f32.mrb[11].mxu0  ;;  %v3680_v27 = vpop.f32.mrb[11].mxu1  ;;  %v3535_v30 = vmax.f32 %v3503_v7, 0.0  ;;  %v3718_v31 = vmax.f32 %v3686_v8, 0.0 }
 0x326   : > { %v3498_v29 = vadd.f32 %v10086_v17, %v3497_v9  ;;  %v3681_v24 = vadd.f32 %v10093_v26, %v3680_v27  ;;  %v3533_v62 = vmax.f32 %v3495_v13, 0.0  ;;  %v3716_v32 = vmax.f32 %v3678_v16, 0.0 }
 0x327   : > { %v3536_v33 = vmax.f32 %v3506_v21, 0.0  ;;  %v3719_v49 = vmax.f32 %v3689_v25, 0.0 }
 0x328   : > { %v3534_v34 = vmax.f32 %v3498_v29, 0.0  ;;  %v3717_v36 = vmax.f32 %v3681_v24, 0.0 }
 0x329   : > { %v3729_v37 = vpack.c.bf16 %v3536_v33, %v3535_v30  ;;  %v3754_v44 = vpack.c.bf16 %v3719_v49, %v3718_v31 }
 0x32a   : > { %v3728_v45 = vpack.c.bf16 %v3534_v34, %v3533_v62  ;;  %v3753_v51 = vpack.c.bf16 %v3717_v36, %v3716_v32 }
 0x32c   : > { %8239 = vmatprep.mubr.bf16.mxu0 %v3753_v51 }
 0x32d   : > { %8240 = vmatmul.mubr.bf16.gmra.mrb[24].mxu0 %v3754_v44 }
 0x371   : > { %v8181_v38 = vpop.f32.mrb[12].mxu0  ;;  %v8213_v14 = vpop.f32.mrb[12].mxu1 }
 0x372   : > { %v3519_v56 = vadd.f32 %v8181_v38, %v10086_v17  ;;  %v3702_v57 = vadd.f32 %v8213_v14, %v10093_v26  ;;  %v3510_v46 = vpop.f32.mrb[13].mxu0  ;;  %v3693_v50 = vpop.f32.mrb[13].mxu1 }
 0x373   : > { %v3511_v59 = vadd.f32 %v10086_v17, %v3510_v46  ;;  %v3694_v54 = vadd.f32 %v10093_v26, %v3693_v50  ;;  %v8182_v0 = vpop.f32.mrb[14].mxu0  ;;  %v8214_v3 = vpop.f32.mrb[14].mxu1 }
 0x374   : > { %v3522_v48 = vadd.f32 %v8182_v0, %v10086_v17  ;;  %v3705_v55 = vadd.f32 %v8214_v3, %v10093_v26  ;;  %v3513_v1 = vpop.f32.mrb[15].mxu0  ;;  %v3696_v6 = vpop.f32.mrb[15].mxu1  ;;  %v3539_v61 = vmax.f32 %v3519_v56, 0.0  ;;  %v3722_v12 = vmax.f32 %v3702_v57, 0.0 }
 0x375   : > { %v3514_v7 = vadd.f32 %v10086_v17, %v3513_v1  ;;  %v3697_v8 = vadd.f32 %v10093_v26, %v3696_v6  ;;  %v3537_v19 = vmax.f32 %v3511_v59, 0.0  ;;  %v3720_v20 = vmax.f32 %v3694_v54, 0.0  ;;  %v8694_v17 = vld [vmem:[%s11424_s2 + $0x128] sm:$0xff]   ;;  %v8695_v26 = vld [vmem:[%s11424_s2 + $0x130] sm:$0xff]  }
 0x376   : > { %v3540_v13 = vmax.f32 %v3522_v48, 0.0  ;;  %v3723_v16 = vmax.f32 %v3705_v55, 0.0  ;;  %8289 = vmatprep.subr.bf16.mxu1 %v8694_v17 }
 0x377   : > { %v3538_v21 = vmax.f32 %v3514_v7, 0.0  ;;  %v3721_v25 = vmax.f32 %v3697_v8, 0.0  ;;  %8290 = vmatpush3.bf16.msra.mxu1 %v8694_v17  ;;  %v8698_v7 = vld [vmem:[%s11424_s2 + $0x148] sm:$0xff]  }
 0x378   : > { %v3731_v9 = vpack.c.bf16 %v3540_v13, %v3539_v61  ;;  %v3756_v27 = vpack.c.bf16 %v3723_v16, %v3722_v12  ;;  %8291 = vmatprep.subr.bf16.mxu1 %v8695_v26 }
 0x379   : > { %v3730_v28 = vpack.c.bf16 %v3538_v21, %v3537_v19  ;;  %v3755_v29 = vpack.c.bf16 %v3721_v25, %v3720_v20 }
 0x37b   : > { %8243 = vmatprep.mubr.bf16.mxu0 %v3755_v29  ;;  %8292 = vmatpush3.bf16.msra.mxu1 %v8695_v26 }
 0x37c   : > { %8244 = vmatmul.mubr.bf16.gmra.mrb[28].mxu0 %v3756_v27 }
 0x37d   : > { %8263 = vmatprep.mubr.bf16.mxu0 %v10127_v10  ;;  %v8697_v10 = vld [vmem:[%s11424_s2 + $0x140] sm:$0xff]  }
 0x384   : > { %8264 = vmatmul.mubr.bf16.vlgmr.msra.gmra.mrb[16].mxu0 %v10121_v2  ;;  %v8696_v2 = vld [vmem:[%s11424_s2 + $0x138] sm:$0xff]  }
 0x385   : > { %8267 = vmatprep.mubr.bf16.mxu0 %v10151_v58  ;;  %8293 = vmatprep.subr.bf16.mxu1 %v8696_v2 }
 0x386   : > { %8294 = vmatpush3.bf16.msra.mxu1 %v8696_v2 }
 0x387   : > { %8311 = vmatprep.subr.bf16.mxu1 %v8697_v10 }
 0x38c   : > { %8268 = vmatmul.mubr.bf16.gmra.mrb[20].mxu0 %v10149_v39  ;;  %v10215_v39 = vld [vmem:[%s11425_s3 + $0x2] ss:$0 sm:$0xff] }
 0x38d   : > { %8271 = vmatprep.mubr.bf16.mxu0 %v3728_v45 }
 0x394   : > { %8272 = vmatmul.mubr.bf16.gmra.mrb[24].mxu0 %v3729_v37 }
 0x395   : > { %8275 = vmatprep.mubr.bf16.mxu0 %v3730_v28 }
 0x39c   : > { %8276 = vmatmul.mubr.bf16.gmra.mrb[28].mxu0 %v3731_v9 }
 0x457   : > { %v8265_v58 = vpop.f32.mrb[16].mxu0 }
 0x458   : > { %v4071_v24 = vadd.f32 %v8265_v58, %v10215_v39  ;;  %v4001_v30 = vpop.f32.mrb[17].mxu0 }
 0x459   : > { %v4069_v31 = vadd.f32 %v10215_v39, %v4001_v30  ;;  %v8266_v33 = vpop.f32.mrb[18].mxu0  ;;  %v8700_v30 = vld [vmem:[%s11424_s2 + $0x158] sm:$0xff]  }
 0x45a   : > { %v4087_v49 = vmax.f32 %v4071_v24, 0.0  ;;  %v4072_v62 = vadd.f32 %v8266_v33, %v10215_v39  ;;  %v4004_v32 = vpop.f32.mrb[19].mxu0 }
 0x45b   : > { %v4085_v34 = vmax.f32 %v4069_v31, 0.0  ;;  %v4070_v36 = vadd.f32 %v10215_v39, %v4004_v32 }
 0x45c   : > { %v4088_v37 = vmax.f32 %v4072_v62, 0.0  ;;  %v10225_v45 = vadd.f32 %v4087_v49, %v9702_v41 }
 0x45d   : > { %v10222_v44 = vadd.f32 %v4085_v34, %v9722_v63  ;;  %v4086_v40 = vmax.f32 %v4070_v36, 0.0 }
 0x45e   : > { %v10228_v51 = vadd.f32 %v4088_v37, %v9746_v22  ;;  %v4119_v54 = vmax.f32 %v10225_v45, 0.0 }
 0x45f   : > { %v10231_v38 = vadd.f32 %v4086_v40, %v9772_v52  ;;  %v8269_v14 = vpop.f32.mrb[20].mxu0  ;;  %v4117_v50 = vmax.f32 %v10222_v44, 0.0 }
 0x460   : > { %v4120_v56 = vmax.f32 %v10228_v51, 0.0  ;;  %v4075_v57 = vadd.f32 %v8269_v14, %v10215_v39  ;;  %v4017_v46 = vpop.f32.mrb[21].mxu0 }
 0x461   : > { %v4118_v63 = vmax.f32 %v10231_v38, 0.0  ;;  %v4073_v59 = vadd.f32 %v10215_v39, %v4017_v46  ;;  %v8270_v41 = vpop.f32.mrb[22].mxu0 }
 0x462   : > { %v4091_v22 = vmax.f32 %v4075_v57, 0.0  ;;  %v4076_v0 = vadd.f32 %v8270_v41, %v10215_v39  ;;  %v4020_v52 = vpop.f32.mrb[23].mxu0  ;;  %v10251_v1 = vpack.c.bf16 %v4120_v56, %v4119_v54 }
 0x463   : > { %v4089_v3 = vmax.f32 %v4073_v59, 0.0  ;;  %v4074_v48 = vadd.f32 %v10215_v39, %v4020_v52  ;;  %v10245_v55 = vpack.c.bf16 %v4118_v63, %v4117_v50 }
 0x464   : > { %v4092_v6 = vmax.f32 %v4076_v0, 0.0  ;;  %v10261_v12 = vadd.f32 %v4091_v22, %v9866_v43  ;;  %v8699_v43 = vld [vmem:[%s11424_s2 + $0x150] sm:$0xff]  }
 0x465   : > { %v10257_v8 = vadd.f32 %v4089_v3, %v9820_v42  ;;  %v4090_v61 = vmax.f32 %v4074_v48, 0.0  ;;  %8295 = vmatprep.mubr.bf16.mxu1 %v10245_v55 }
 0x466   : > { %v10264_v13 = vadd.f32 %v4092_v6, %v9844_v11  ;;  %8296 = vmatmul.mubr.bf16.vlgmr.msra.gmra.mrb[16].mxu1 %v10251_v1  ;;  %v4123_v27 = vmax.f32 %v10261_v12, 0.0  ;;  %v8702_v6 = vld [vmem:[%s11424_s2 + $0x168] sm:$0xff]  }
 0x467   : > { %v10268_v16 = vadd.f32 %v4090_v61, %v9799_v18  ;;  %8312 = vmatpush3.bf16.msra.mxu1 %v8697_v10  ;;  %v8273_v19 = vpop.f32.mrb[24].mxu0  ;;  %v4121_v11 = vmax.f32 %v10257_v8, 0.0 }
 0x468   : > { %v4124_v20 = vmax.f32 %v10264_v13, 0.0  ;;  %v4079_v42 = vadd.f32 %v8273_v19, %v10215_v39  ;;  %v4033_v21 = vpop.f32.mrb[25].mxu0  ;;  %8313 = vmatprep.subr.bf16.mxu1 %v8698_v7 }
 0x469   : > { %v4122_v25 = vmax.f32 %v10268_v16, 0.0  ;;  %v4077_v9 = vadd.f32 %v10215_v39, %v4033_v21  ;;  %v8274_v18 = vpop.f32.mrb[26].mxu0 }
 0x46a   : > { %v4095_v28 = vmax.f32 %v4079_v42, 0.0  ;;  %v4080_v29 = vadd.f32 %v8274_v18, %v10215_v39  ;;  %v4036_v17 = vpop.f32.mrb[27].mxu0  ;;  %v4136_v24 = vpack.c.bf16 %v4124_v20, %v4123_v27  ;;  %v8704_v18 = vld [vmem:[%s11424_s2 + $0x178] sm:$0xff]  }
 0x46b   : > { %v4093_v26 = vmax.f32 %v4077_v9, 0.0  ;;  %v4078_v2 = vadd.f32 %v10215_v39, %v4036_v17  ;;  %8314 = vmatpush3.bf16.msra.mxu1 %v8698_v7  ;;  %v4135_v10 = vpack.c.bf16 %v4122_v25, %v4121_v11  ;;  %v8709_v17 = vld [vmem:[%s11424_s2 + $0x1e0] sm:$0xff]  }
 0x46c   : > { %v4096_v58 = vmax.f32 %v4080_v29, 0.0  ;;  %8315 = vmatprep.subr.bf16.mxu1 %v8699_v43  ;;  %v10296_v49 = vadd.f32 %v4095_v28, %v9991_v5  ;;  %v8701_v5 = vld [vmem:[%s11424_s2 + $0x160] sm:$0xff]   ;;  %v8708_v29 = vld [vmem:[%s11424_s2 + $0x1d8] sm:$0xff]  }
 0x46d   : > { %v10293_v31 = vadd.f32 %v4093_v26, %v9922_v53  ;;  %v4094_v33 = vmax.f32 %v4078_v2, 0.0  ;;  %8299 = vmatprep.mubr.bf16.mxu1 %v4135_v10  ;;  %v8705_v28 = vld [vmem:[%s11424_s2 + $0x1c0] sm:$0xff]   ;;  %v8710_v26 = vld [vmem:[%s11424_s2 + $0x1e8] sm:$0xff]   ;;  %v8711_v2 = vld [vmem:[%s11424_s2 + $0x1f0] sm:$0xff]  }
 0x46e   : > { %v10299_v62 = vadd.f32 %v4096_v58, %v9969_v35  ;;  %8300 = vmatmul.mubr.bf16.gmra.mrb[20].mxu1 %v4136_v24  ;;  %v4127_v57 = vmax.f32 %v10296_v49, 0.0  ;;  %8343 = vmatprep.subr.bf16.mxu0 %v8705_v28  ;;  %v10385_v58 = vld [vmem:[%s11424_s2 + $0x180] sm:$0xff]  }
 0x46f   : > { %v10302_v32 = vadd.f32 %v4094_v33, %v9890_v15  ;;  %8316 = vmatpush3.bf16.msra.mxu1 %v8699_v43  ;;  %v8277_v34 = vpop.f32.mrb[28].mxu0  ;;  %v4125_v40 = vmax.f32 %v10293_v31, 0.0  ;;  %8344 = vmatpush3.bf16.msra.mxu0 %v8705_v28  ;;  %v8723_v33 = vld [vmem:[%s11424_s2 + $0x210] sm:$0xff]  }
 0x470   : > { %v4128_v36 = vmax.f32 %v10299_v62, 0.0  ;;  %v4083_v37 = vadd.f32 %v8277_v34, %v10215_v39  ;;  %v4049_v53 = vpop.f32.mrb[29].mxu0  ;;  %8317 = vmatprep.subr.bf16.mxu1 %v8700_v30  ;;  %v8724_v34 = vld [vmem:[%s11424_s2 + $0x218] sm:$0xff]  }
 0x471   : > { %v4126_v35 = vmax.f32 %v10302_v32, 0.0  ;;  %v4081_v14 = vadd.f32 %v10215_v39, %v4049_v53  ;;  %v8278_v15 = vpop.f32.mrb[30].mxu0  ;;  %v7091_v53 = vld [vmem:[%s11425_s3 + $0x3] ss:$0 sm:$0xff] }
 0x472   : > { %v4099_v46 = vmax.f32 %v4083_v37, 0.0  ;;  %v4084_v59 = vadd.f32 %v8278_v15, %v10215_v39  ;;  %v4052_v41 = vpop.f32.mrb[31].mxu0  ;;  %v4138_v48 = vpack.c.bf16 %v4128_v36, %v4127_v57  ;;  %v8725_v37 = vld [vmem:[%s11424_s2 + $0x220] sm:$0xff]  }
 0x473   : > { %v4097_v22 = vmax.f32 %v4081_v14, 0.0  ;;  %v4082_v0 = vadd.f32 %v10215_v39, %v4052_v41  ;;  %8318 = vmatpush3.bf16.msra.mxu1 %v8700_v30  ;;  %v4137_v52 = vpack.c.bf16 %v4126_v35, %v4125_v40  ;;  %v8722_v30 = vld [vmem:[%s11424_s2 + $0x208] sm:$0xff]  }
 0x474   : > { %v4100_v3 = vmax.f32 %v4084_v59, 0.0  ;;  %8319 = vmatprep.subr.bf16.mxu1 %v8701_v5  ;;  %v10330_v61 = vadd.f32 %v4099_v46, %v10125_v60 }
 0x475   : > { %v10327_v7 = vadd.f32 %v4097_v22, %v10042_v23  ;;  %v4098_v39 = vmax.f32 %v4082_v0, 0.0  ;;  %8303 = vmatprep.mubr.bf16.mxu1 %v4137_v52  ;;  %v8703_v23 = vld [vmem:[%s11424_s2 + $0x170] sm:$0xff]  }
 0x476   : > { %v10333_v19 = vadd.f32 %v4100_v3, %v10119_v4  ;;  %8304 = vmatmul.mubr.bf16.gmra.mrb[24].mxu1 %v4138_v48  ;;  %v4131_v9 = vmax.f32 %v10330_v61, 0.0 }
 0x477   : > { %v10336_v42 = vadd.f32 %v4098_v39, %v10021_v47  ;;  %8320 = vmatpush3.bf16.msra.mxu1 %v8701_v5  ;;  %v4129_v43 = vmax.f32 %v10327_v7, 0.0  ;;  %v8729_v7 = vld [vmem:[%s11424_s2 + $0x240] sm:$0xff]  }
 0x478   : > { %v4132_v21 = vmax.f32 %v10333_v19, 0.0  ;;  %8321 = vmatprep.subr.bf16.mxu1 %v8702_v6  ;;  %v8730_v19 = vld [vmem:[%s11424_s2 + $0x248] sm:$0xff]  }
 0x479   : > { %v4130_v60 = vmax.f32 %v10336_v42, 0.0  ;;  %v8731_v42 = vld [vmem:[%s11424_s2 + $0x250] sm:$0xff]  }
 0x47a   : > { %v4140_v4 = vpack.c.bf16 %v4132_v21, %v4131_v9 }
 0x47b   : > { %8322 = vmatpush3.bf16.msra.mxu1 %v8702_v6  ;;  %v4139_v47 = vpack.c.bf16 %v4130_v60, %v4129_v43 }
 0x47c   : > { %8323 = vmatprep.subr.bf16.mxu1 %v8703_v23 }
 0x47d   : > { %8307 = vmatprep.mubr.bf16.mxu1 %v4139_v47 }
 0x47e   : > { %8308 = vmatmul.mubr.bf16.gmra.mrb[28].mxu1 %v4140_v4 }
 0x47f   : > { %8324 = vmatpush3.bf16.msra.mxu1 %v8703_v23  ;;  %8327 = vmatprep.mubr.bf16.mxu1 %v10245_v55  ;;  %v8706_v55 = vld [vmem:[%s11424_s2 + $0x1c8] sm:$0xff]  }
 0x480   : > { %8325 = vmatprep.subr.bf16.mxu1 %v8704_v18  ;;  %8345 = vmatprep.subr.bf16.mxu0 %v8706_v55 }
 0x481   : > { %8346 = vmatpush3.bf16.msra.mxu0 %v8706_v55 }
 0x483   : > { %8326 = vmatpush3.bf16.msra.mxu1 %v8704_v18 }
 0x486   : > { %8328 = vmatmul.mubr.bf16.vlgmr.msra.gmra.mrb[32].mxu1 %v10251_v1  ;;  %v8707_v1 = vld [vmem:[%s11424_s2 + $0x1d0] sm:$0xff]  }
 0x487   : > { %8331 = vmatprep.mubr.bf16.mxu1 %v4135_v10  ;;  %8347 = vmatprep.subr.bf16.mxu0 %v8707_v1  ;;  %v8712_v10 = vld [vmem:[%s11424_s2 + $0x1f8] sm:$0xff]  }
 0x488   : > { %8348 = vmatpush3.bf16.msra.mxu0 %v8707_v1 }
 0x489   : > { %8349 = vmatprep.subr.bf16.mxu0 %v8708_v29 }
 0x48c   : > { %8350 = vmatpush3.bf16.msra.mxu0 %v8708_v29 }
 0x48d   : > { %8351 = vmatprep.subr.bf16.mxu0 %v8709_v17 }
 0x48e   : > { %8332 = vmatmul.mubr.bf16.gmra.mrb[36].mxu1 %v4136_v24  ;;  %v8721_v24 = vld [vmem:[%s11424_s2 + $0x200] sm:$0xff]  }
 0x48f   : > { %8335 = vmatprep.mubr.bf16.mxu1 %v4137_v52  ;;  %8407 = vmatprep.subr.bf16.mxu1 %v8721_v24 }
 0x490   : > { %8352 = vmatpush3.bf16.msra.mxu0 %v8709_v17  ;;  %8408 = vmatpush3.bf16.msra.mxu1 %v8721_v24 }
 0x491   : > { %8353 = vmatprep.subr.bf16.mxu0 %v8710_v26  ;;  %8409 = vmatprep.subr.bf16.mxu1 %v8722_v30 }
 0x494   : > { %8354 = vmatpush3.bf16.msra.mxu0 %v8710_v26  ;;  %8410 = vmatpush3.bf16.msra.mxu1 %v8722_v30 }
 0x495   : > { %8355 = vmatprep.subr.bf16.mxu0 %v8711_v2  ;;  %8411 = vmatprep.subr.bf16.mxu1 %v8723_v33 }
 0x496   : > { %8336 = vmatmul.mubr.bf16.gmra.mrb[40].mxu1 %v4138_v48 }
 0x497   : > { %8339 = vmatprep.mubr.bf16.mxu1 %v4139_v47 }
 0x498   : > { %8356 = vmatpush3.bf16.msra.mxu0 %v8711_v2  ;;  %8412 = vmatpush3.bf16.msra.mxu1 %v8723_v33 }
 0x499   : > { %8357 = vmatprep.subr.bf16.mxu0 %v8712_v10  ;;  %8413 = vmatprep.subr.bf16.mxu1 %v8724_v34 }
 0x49c   : > { %8358 = vmatpush3.bf16.msra.mxu0 %v8712_v10  ;;  %8414 = vmatpush3.bf16.msra.mxu1 %v8724_v34 }
 0x49d   : > { %8375 = vmatprep.subr.bf16.mxu0 %v10385_v58  ;;  %8415 = vmatprep.subr.bf16.mxu1 %v8725_v37 }
 0x49e   : > { %8340 = vmatmul.mubr.bf16.gmra.mrb[44].mxu1 %v4140_v4 }
 0x4a0   : > { %8416 = vmatpush3.bf16.msra.mxu1 %v8725_v37 }
 0x539   : > { %v8297_v5 = vpop.f32.mrb[16].mxu1 }
 0x53a   : > { %v4254_v14 = vadd.f32 %v8297_v5, %v7091_v53  ;;  %v4245_v15 = vpop.f32.mrb[17].mxu1 }
 0x53b   : > { %v4246_v46 = vadd.f32 %v7091_v53, %v4245_v15  ;;  %v8298_v59 = vpop.f32.mrb[18].mxu1 }
 0x53c   : > { %v4257_v41 = vadd.f32 %v8298_v59, %v7091_v53  ;;  %v4248_v22 = vpop.f32.mrb[19].mxu1  ;;  %v4310_v52 = vmax.f32 %v4254_v14, 0.0 }
 0x53d   : > { %v4249_v0 = vadd.f32 %v7091_v53, %v4248_v22  ;;  %v4308_v48 = vmax.f32 %v4246_v46, 0.0 }
 0x53e   : > { %v4311_v3 = vmax.f32 %v4257_v41, 0.0 }
 0x53f   : > { %v4309_v6 = vmax.f32 %v4249_v0, 0.0 }
 0x540   : > { %v10406_v39 = vpack.c.bf16 %v4311_v3, %v4310_v52 }
 0x541   : > { %v10408_v23 = vpack.c.bf16 %v4309_v6, %v4308_v48  ;;  %v8301_v47 = vpop.f32.mrb[20].mxu1 }
 0x542   : > { %v4270_v4 = vadd.f32 %v8301_v47, %v7091_v53  ;;  %v4261_v18 = vpop.f32.mrb[21].mxu1 }
 0x543   : > { %v4262_v28 = vadd.f32 %v7091_v53, %v4261_v18  ;;  %v8302_v55 = vpop.f32.mrb[22].mxu1 }
 0x544   : > { %v4273_v1 = vadd.f32 %v8302_v55, %v7091_v53  ;;  %v4264_v29 = vpop.f32.mrb[23].mxu1  ;;  %v4314_v26 = vmax.f32 %v4270_v4, 0.0 }
 0x545   : > { %v4265_v17 = vadd.f32 %v7091_v53, %v4264_v29  ;;  %v4312_v10 = vmax.f32 %v4262_v28, 0.0 }
 0x546   : > { %v4315_v2 = vmax.f32 %v4273_v1, 0.0 }
 0x547   : > { %v4313_v24 = vmax.f32 %v4265_v17, 0.0 }
 0x548   : > { %v10410_v30 = vpack.c.bf16 %v4315_v2, %v4314_v26 }
 0x549   : > { %v10412_v33 = vpack.c.bf16 %v4313_v24, %v4312_v10  ;;  %v8305_v34 = vpop.f32.mrb[24].mxu1 }
 0x54a   : > { %v4286_v37 = vadd.f32 %v8305_v34, %v7091_v53  ;;  %v4277_v5 = vpop.f32.mrb[25].mxu1  ;;  %v10421_v34 = vld [vmem:[%s11425_s3 + $0x4] ss:$0 sm:$0xff] }
 0x54b   : > { %v4278_v14 = vadd.f32 %v7091_v53, %v4277_v5  ;;  %v8306_v15 = vpop.f32.mrb[26].mxu1 }
 0x54c   : > { %v4289_v46 = vadd.f32 %v8306_v15, %v7091_v53  ;;  %v4280_v59 = vpop.f32.mrb[27].mxu1  ;;  %v4318_v22 = vmax.f32 %v4286_v37, 0.0 }
 0x54d   : > { %v4281_v41 = vadd.f32 %v7091_v53, %v4280_v59  ;;  %v4316_v52 = vmax.f32 %v4278_v14, 0.0 }
 0x54e   : > { %v4319_v0 = vmax.f32 %v4289_v46, 0.0 }
 0x54f   : > { %v4317_v3 = vmax.f32 %v4281_v41, 0.0 }
 0x550   : > { %v10414_v48 = vpack.c.bf16 %v4319_v0, %v4318_v22 }
 0x551   : > { %v10416_v6 = vpack.c.bf16 %v4317_v3, %v4316_v52  ;;  %v8309_v47 = vpop.f32.mrb[28].mxu1 }
 0x552   : > { %v4302_v4 = vadd.f32 %v8309_v47, %v7091_v53  ;;  %v4293_v18 = vpop.f32.mrb[29].mxu1 }
 0x553   : > { %v4294_v28 = vadd.f32 %v7091_v53, %v4293_v18  ;;  %v8310_v55 = vpop.f32.mrb[30].mxu1 }
 0x554   : > { %v4305_v1 = vadd.f32 %v8310_v55, %v7091_v53  ;;  %v4296_v29 = vpop.f32.mrb[31].mxu1  ;;  %v4322_v26 = vmax.f32 %v4302_v4, 0.0 }
 0x555   : > { %v4297_v17 = vadd.f32 %v7091_v53, %v4296_v29  ;;  %v4320_v10 = vmax.f32 %v4294_v28, 0.0 }
 0x556   : > { %v4323_v2 = vmax.f32 %v4305_v1, 0.0 }
 0x557   : > { %v4321_v24 = vmax.f32 %v4297_v17, 0.0  ;;  %v8714_v17 = vld [vmem:[%s11424_s2 + $0x188] sm:$0xff]  }
 0x558   : > { %v10423_v37 = vpack.c.bf16 %v4323_v2, %v4322_v26 }
 0x559   : > { %v10425_v5 = vpack.c.bf16 %v4321_v24, %v4320_v10  ;;  %v8329_v14 = vpop.f32.mrb[32].mxu1 }
 0x55a   : > { %v4437_v15 = vadd.f32 %v8329_v14, %v10421_v34  ;;  %v4428_v46 = vpop.f32.mrb[33].mxu1 }
 0x55b   : > { %v4429_v59 = vadd.f32 %v10421_v34, %v4428_v46  ;;  %v8330_v53 = vpop.f32.mrb[34].mxu1 }
 0x55c   : > { %v4440_v41 = vadd.f32 %v8330_v53, %v10421_v34  ;;  %v4431_v22 = vpop.f32.mrb[35].mxu1  ;;  %v4493_v52 = vmax.f32 %v4437_v15, 0.0 }
 0x55d   : > { %v4432_v0 = vadd.f32 %v10421_v34, %v4431_v22  ;;  %v4491_v47 = vmax.f32 %v4429_v59, 0.0  ;;  %v8715_v59 = vld [vmem:[%s11424_s2 + $0x190] sm:$0xff]  }
 0x55e   : > { %v4494_v3 = vmax.f32 %v4440_v41, 0.0 }
 0x55f   : > { %v4492_v4 = vmax.f32 %v4432_v0, 0.0 }
 0x560   : > { %v4533_v18 = vpack.c.bf16 %v4494_v3, %v4493_v52 }
 0x561   : > { %v4532_v28 = vpack.c.bf16 %v4492_v4, %v4491_v47  ;;  %v8333_v55 = vpop.f32.mrb[36].mxu1 }
 0x562   : > { %v4453_v1 = vadd.f32 %v8333_v55, %v10421_v34  ;;  %v4444_v29 = vpop.f32.mrb[37].mxu1 }
 0x563   : > { %v4445_v26 = vadd.f32 %v10421_v34, %v4444_v29  ;;  %v8334_v2 = vpop.f32.mrb[38].mxu1  ;;  %8359 = vmatprep.mubr.bf16.mxu0 %v4532_v28 }
 0x564   : > { %v4456_v10 = vadd.f32 %v8334_v2, %v10421_v34  ;;  %v4447_v24 = vpop.f32.mrb[39].mxu1  ;;  %8360 = vmatmul.mubr.bf16.vlgmr.msra.gmra.mrb[32].mxu0 %v4533_v18  ;;  %v4497_v15 = vmax.f32 %v4453_v1, 0.0 }
 0x565   : > { %v4448_v14 = vadd.f32 %v10421_v34, %v4447_v24  ;;  %8376 = vmatpush3.bf16.msra.mxu0 %v10385_v58  ;;  %v4495_v53 = vmax.f32 %v4445_v26, 0.0  ;;  %v8716_v58 = vld [vmem:[%s11424_s2 + $0x198] sm:$0xff]   ;;  %v8717_v26 = vld [vmem:[%s11424_s2 + $0x1a0] sm:$0xff]  }
 0x566   : > { %v4498_v46 = vmax.f32 %v4456_v10, 0.0  ;;  %8377 = vmatprep.subr.bf16.mxu0 %v8714_v17 }
 0x567   : > { %v4496_v41 = vmax.f32 %v4448_v14, 0.0 }
 0x568   : > { %v4535_v22 = vpack.c.bf16 %v4498_v46, %v4497_v15 }
 0x569   : > { %v4534_v0 = vpack.c.bf16 %v4496_v41, %v4495_v53  ;;  %8378 = vmatpush3.bf16.msra.mxu0 %v8714_v17  ;;  %v8337_v52 = vpop.f32.mrb[40].mxu1 }
 0x56a   : > { %v4469_v3 = vadd.f32 %v8337_v52, %v10421_v34  ;;  %v4460_v47 = vpop.f32.mrb[41].mxu1  ;;  %8379 = vmatprep.subr.bf16.mxu0 %v8715_v59 }
 0x56b   : > { %v4461_v4 = vadd.f32 %v10421_v34, %v4460_v47  ;;  %v8338_v18 = vpop.f32.mrb[42].mxu1  ;;  %8363 = vmatprep.mubr.bf16.mxu0 %v4534_v0 }
 0x56c   : > { %v4472_v28 = vadd.f32 %v8338_v18, %v10421_v34  ;;  %v4463_v55 = vpop.f32.mrb[43].mxu1  ;;  %8364 = vmatmul.mubr.bf16.gmra.mrb[36].mxu0 %v4535_v22  ;;  %v4501_v29 = vmax.f32 %v4469_v3, 0.0 }
 0x56d   : > { %v4464_v1 = vadd.f32 %v10421_v34, %v4463_v55  ;;  %8380 = vmatpush3.bf16.msra.mxu0 %v8715_v59  ;;  %v4499_v2 = vmax.f32 %v4461_v4, 0.0  ;;  %v8718_v59 = vld [vmem:[%s11424_s2 + $0x1a8] sm:$0xff]   ;;  %v8719_v4 = vld [vmem:[%s11424_s2 + $0x1b0] sm:$0xff]  }
 0x56e   : > { %v4502_v17 = vmax.f32 %v4472_v28, 0.0  ;;  %8381 = vmatprep.subr.bf16.mxu0 %v8716_v58 }
 0x56f   : > { %v4500_v10 = vmax.f32 %v4464_v1, 0.0 }
 0x570   : > { %v4537_v24 = vpack.c.bf16 %v4502_v17, %v4501_v29  ;;  %v8720_v29 = vld [vmem:[%s11424_s2 + $0x1b8] sm:$0xff]  }
 0x571   : > { %v4536_v14 = vpack.c.bf16 %v4500_v10, %v4499_v2  ;;  %8382 = vmatpush3.bf16.msra.mxu0 %v8716_v58  ;;  %v8341_v15 = vpop.f32.mrb[44].mxu1 }
 0x572   : > { %v4485_v46 = vadd.f32 %v8341_v15, %v10421_v34  ;;  %v4476_v53 = vpop.f32.mrb[45].mxu1  ;;  %8383 = vmatprep.subr.bf16.mxu0 %v8717_v26 }
 0x573   : > { %v4477_v41 = vadd.f32 %v10421_v34, %v4476_v53  ;;  %v8342_v22 = vpop.f32.mrb[46].mxu1  ;;  %8367 = vmatprep.mubr.bf16.mxu0 %v4536_v14 }
 0x574   : > { %v4488_v0 = vadd.f32 %v8342_v22, %v10421_v34  ;;  %v4479_v52 = vpop.f32.mrb[47].mxu1  ;;  %8368 = vmatmul.mubr.bf16.gmra.mrb[40].mxu0 %v4537_v24  ;;  %v4505_v47 = vmax.f32 %v4485_v46, 0.0 }
 0x575   : > { %v4480_v3 = vadd.f32 %v10421_v34, %v4479_v52  ;;  %8384 = vmatpush3.bf16.msra.mxu0 %v8717_v26  ;;  %v4503_v18 = vmax.f32 %v4477_v41, 0.0 }
 0x576   : > { %v4506_v58 = vmax.f32 %v4488_v0, 0.0  ;;  %8385 = vmatprep.subr.bf16.mxu0 %v8718_v59 }
 0x577   : > { %v4504_v28 = vmax.f32 %v4480_v3, 0.0 }
 0x578   : > { %v4539_v55 = vpack.c.bf16 %v4506_v58, %v4505_v47 }
 0x579   : > { %v4538_v1 = vpack.c.bf16 %v4504_v28, %v4503_v18  ;;  %8386 = vmatpush3.bf16.msra.mxu0 %v8718_v59 }
 0x57a   : > { %8387 = vmatprep.subr.bf16.mxu0 %v8719_v4 }
 0x57b   : > { %8371 = vmatprep.mubr.bf16.mxu0 %v4538_v1 }
 0x57c   : > { %8372 = vmatmul.mubr.bf16.gmra.mrb[44].mxu0 %v4539_v55 }
 0x57d   : > { %8388 = vmatpush3.bf16.msra.mxu0 %v8719_v4  ;;  %8391 = vmatprep.mubr.bf16.mxu0 %v10408_v23  ;;  %v8726_v23 = vld [vmem:[%s11424_s2 + $0x228] sm:$0xff]  }
 0x57e   : > { %8389 = vmatprep.subr.bf16.mxu0 %v8720_v29  ;;  %8417 = vmatprep.subr.bf16.mxu1 %v8726_v23 }
 0x57f   : > { %8418 = vmatpush3.bf16.msra.mxu1 %v8726_v23 }
 0x581   : > { %8390 = vmatpush3.bf16.msra.mxu0 %v8720_v29 }
 0x584   : > { %8392 = vmatmul.mubr.bf16.vlgmr.msra.gmra.mrb[32].mxu0 %v10406_v39  ;;  %v8727_v39 = vld [vmem:[%s11424_s2 + $0x230] sm:$0xff]  }
 0x585   : > { %8395 = vmatprep.mubr.bf16.mxu0 %v10412_v33  ;;  %8419 = vmatprep.subr.bf16.mxu1 %v8727_v39  ;;  %v10485_v33 = vld [vmem:[%s11425_s3 + $0x5] ss:$0 sm:$0xff] }
 0x586   : > { %8420 = vmatpush3.bf16.msra.mxu1 %v8727_v39 }
 0x58c   : > { %8396 = vmatmul.mubr.bf16.gmra.mrb[36].mxu0 %v10410_v30  ;;  %v8728_v30 = vld [vmem:[%s11424_s2 + $0x238] sm:$0xff]  }
 0x58d   : > { %8399 = vmatprep.mubr.bf16.mxu0 %v10416_v6  ;;  %8421 = vmatprep.subr.bf16.mxu1 %v8728_v30 }
 0x58e   : > { %8422 = vmatpush3.bf16.msra.mxu1 %v8728_v30 }
 0x58f   : > { %8439 = vmatprep.subr.bf16.mxu1 %v8729_v7 }
 0x594   : > { %8400 = vmatmul.mubr.bf16.gmra.mrb[40].mxu0 %v10414_v48 }
 0x595   : > { %8403 = vmatprep.mubr.bf16.mxu0 %v10425_v5 }
 0x59c   : > { %8404 = vmatmul.mubr.bf16.gmra.mrb[44].mxu0 %v10423_v37 }
 0x657   : > { %v8393_v48 = vpop.f32.mrb[32].mxu0 }
 0x658   : > { %v4854_v6 = vadd.f32 %v8393_v48, %v10485_v33  ;;  %v4784_v34 = vpop.f32.mrb[33].mxu0 }
 0x659   : > { %v4852_v37 = vadd.f32 %v10485_v33, %v4784_v34  ;;  %v8394_v5 = vpop.f32.mrb[34].mxu0 }
 0x65a   : > { %v4870_v17 = vmax.f32 %v4854_v6, 0.0  ;;  %v4855_v26 = vadd.f32 %v8394_v5, %v10485_v33  ;;  %v4787_v2 = vpop.f32.mrb[35].mxu0 }
 0x65b   : > { %v4868_v10 = vmax.f32 %v4852_v37, 0.0  ;;  %v4853_v24 = vadd.f32 %v10485_v33, %v4787_v2 }
 0x65c   : > { %v4886_v14 = vadd.f32 %v4870_v17, %v4119_v54  ;;  %v4871_v15 = vmax.f32 %v4855_v26, 0.0 }
 0x65d   : > { %v4884_v46 = vadd.f32 %v4868_v10, %v4117_v50  ;;  %v4869_v53 = vmax.f32 %v4853_v24, 0.0 }
 0x65e   : > { %v4887_v59 = vadd.f32 %v4871_v15, %v4120_v56  ;;  %v4902_v0 = vmax.f32 %v4886_v14, 0.0 }
 0x65f   : > { %v4885_v41 = vadd.f32 %v4869_v53, %v4118_v63  ;;  %v8397_v22 = vpop.f32.mrb[36].mxu0  ;;  %v4900_v58 = vmax.f32 %v4884_v46, 0.0 }
 0x660   : > { %v4903_v52 = vmax.f32 %v4887_v59, 0.0  ;;  %v4858_v3 = vadd.f32 %v8397_v22, %v10485_v33  ;;  %v4800_v47 = vpop.f32.mrb[37].mxu0 }
 0x661   : > { %v4901_v45 = vmax.f32 %v4885_v41, 0.0  ;;  %v4856_v54 = vadd.f32 %v10485_v33, %v4800_v47  ;;  %v8398_v4 = vpop.f32.mrb[38].mxu0 }
 0x662   : > { %v4917_v44 = vpack.c.bf16 %v4903_v52, %v4902_v0  ;;  %v4874_v50 = vmax.f32 %v4858_v3, 0.0  ;;  %v4859_v18 = vadd.f32 %v8398_v4, %v10485_v33  ;;  %v4803_v51 = vpop.f32.mrb[39].mxu0 }
 0x663   : > { %v4872_v56 = vmax.f32 %v4856_v54, 0.0  ;;  %v4857_v38 = vadd.f32 %v10485_v33, %v4803_v51  ;;  %v4916_v63 = vpack.c.bf16 %v4901_v45, %v4900_v58 }
 0x664   : > { %v4890_v28 = vadd.f32 %v4874_v50, %v4123_v27  ;;  %v4875_v55 = vmax.f32 %v4859_v18, 0.0 }
 0x665   : > { %v4888_v1 = vadd.f32 %v4872_v56, %v4121_v11  ;;  %v4873_v29 = vmax.f32 %v4857_v38, 0.0  ;;  %8423 = vmatprep.mubr.bf16.mxu1 %v4916_v63  ;;  %v8736_v63 = vld [vmem:[%s11424_s2 + $0x278] sm:$0xff]  }
 0x666   : > { %v4891_v23 = vadd.f32 %v4875_v55, %v4124_v20  ;;  %8424 = vmatmul.mubr.bf16.vlgmr.msra.gmra.mrb[48].mxu1 %v4917_v44  ;;  %v4906_v48 = vmax.f32 %v4890_v28, 0.0  ;;  %v10562_v28 = vld [vmem:[%s11425_s3 + $0x6] ss:$0 sm:$0xff] }
 0x667   : > { %v4889_v39 = vadd.f32 %v4873_v29, %v4122_v25  ;;  %v8401_v30 = vpop.f32.mrb[40].mxu0  ;;  %v4904_v27 = vmax.f32 %v4888_v1, 0.0  ;;  %8440 = vmatpush3.bf16.msra.mxu1 %v8729_v7 }
 0x668   : > { %v4907_v6 = vmax.f32 %v4891_v23, 0.0  ;;  %v4862_v34 = vadd.f32 %v8401_v30, %v10485_v33  ;;  %v4816_v12 = vpop.f32.mrb[41].mxu0  ;;  %8441 = vmatprep.subr.bf16.mxu1 %v8730_v19 }
 0x669   : > { %v4905_v37 = vmax.f32 %v4889_v39, 0.0  ;;  %v4860_v8 = vadd.f32 %v10485_v33, %v4816_v12  ;;  %v8402_v11 = vpop.f32.mrb[42].mxu0 }
 0x66a   : > { %v4878_v5 = vmax.f32 %v4862_v34, 0.0  ;;  %v4863_v17 = vadd.f32 %v8402_v11, %v10485_v33  ;;  %v4819_v13 = vpop.f32.mrb[43].mxu0  ;;  %v4919_v20 = vpack.c.bf16 %v4907_v6, %v4906_v48 }
 0x66b   : > { %v4876_v26 = vmax.f32 %v4860_v8, 0.0  ;;  %v4861_v16 = vadd.f32 %v10485_v33, %v4819_v13  ;;  %v4918_v25 = vpack.c.bf16 %v4905_v37, %v4904_v27  ;;  %8442 = vmatpush3.bf16.msra.mxu1 %v8730_v19 }
 0x66c   : > { %v4894_v2 = vadd.f32 %v4878_v5, %v4127_v57  ;;  %v4879_v10 = vmax.f32 %v4863_v17, 0.0  ;;  %8443 = vmatprep.subr.bf16.mxu1 %v8731_v42 }
 0x66d   : > { %v4892_v24 = vadd.f32 %v4876_v26, %v4125_v40  ;;  %v4877_v14 = vmax.f32 %v4861_v16, 0.0  ;;  %8427 = vmatprep.mubr.bf16.mxu1 %v4918_v25 }
 0x66e   : > { %v4895_v15 = vadd.f32 %v4879_v10, %v4128_v36  ;;  %8428 = vmatmul.mubr.bf16.gmra.mrb[52].mxu1 %v4919_v20  ;;  %v4910_v59 = vmax.f32 %v4894_v2, 0.0 }
 0x66f   : > { %v4893_v46 = vadd.f32 %v4877_v14, %v4126_v35  ;;  %v8405_v53 = vpop.f32.mrb[44].mxu0  ;;  %v4908_v57 = vmax.f32 %v4892_v24, 0.0  ;;  %8444 = vmatpush3.bf16.msra.mxu1 %v8731_v42 }
 0x670   : > { %v4911_v41 = vmax.f32 %v4895_v15, 0.0  ;;  %v4866_v22 = vadd.f32 %v8405_v53, %v10485_v33  ;;  %v4832_v49 = vpop.f32.mrb[45].mxu0 }
 0x671   : > { %v4909_v0 = vmax.f32 %v4893_v46, 0.0  ;;  %v4864_v31 = vadd.f32 %v10485_v33, %v4832_v49  ;;  %v8406_v40 = vpop.f32.mrb[46].mxu0 }
 0x672   : > { %v4882_v52 = vmax.f32 %v4866_v22, 0.0  ;;  %v4867_v3 = vadd.f32 %v8406_v40, %v10485_v33  ;;  %v4835_v62 = vpop.f32.mrb[47].mxu0  ;;  %v4921_v36 = vpack.c.bf16 %v4911_v41, %v4910_v59 }
 0x673   : > { %v4880_v47 = vmax.f32 %v4864_v31, 0.0  ;;  %v4865_v32 = vadd.f32 %v10485_v33, %v4835_v62  ;;  %v4920_v35 = vpack.c.bf16 %v4909_v0, %v4908_v57 }
 0x674   : > { %v4898_v58 = vadd.f32 %v4882_v52, %v4131_v9  ;;  %v4883_v45 = vmax.f32 %v4867_v3, 0.0  ;;  %v8735_v9 = vld [vmem:[%s11424_s2 + $0x270] sm:$0xff]  }
 0x675   : > { %v4896_v54 = vadd.f32 %v4880_v47, %v4129_v43  ;;  %v4881_v4 = vmax.f32 %v4865_v32, 0.0  ;;  %8431 = vmatprep.mubr.bf16.mxu1 %v4920_v35  ;;  %v8733_v43 = vld [vmem:[%s11424_s2 + $0x260] sm:$0xff]  }
 0x676   : > { %v4899_v44 = vadd.f32 %v4883_v45, %v4132_v21  ;;  %8432 = vmatmul.mubr.bf16.gmra.mrb[56].mxu1 %v4921_v36  ;;  %v4914_v18 = vmax.f32 %v4898_v58, 0.0  ;;  %v8732_v21 = vld [vmem:[%s11424_s2 + $0x258] sm:$0xff]  }
 0x677   : > { %v4897_v50 = vadd.f32 %v4881_v4, %v4130_v60  ;;  %v4912_v33 = vmax.f32 %v4896_v54, 0.0  ;;  %8445 = vmatprep.subr.bf16.mxu1 %v8732_v21  ;;  %v8734_v60 = vld [vmem:[%s11424_s2 + $0x268] sm:$0xff]  }
 0x678   : > { %v4915_v51 = vmax.f32 %v4899_v44, 0.0  ;;  %8446 = vmatpush3.bf16.msra.mxu1 %v8732_v21 }
 0x679   : > { %v4913_v56 = vmax.f32 %v4897_v50, 0.0  ;;  %8447 = vmatprep.subr.bf16.mxu1 %v8733_v43 }
 0x67a   : > { %v4923_v38 = vpack.c.bf16 %v4915_v51, %v4914_v18 }
 0x67b   : > { %v4922_v61 = vpack.c.bf16 %v4913_v56, %v4912_v33 }
 0x67c   : > { %8448 = vmatpush3.bf16.msra.mxu1 %v8733_v43 }
 0x67d   : > { %8435 = vmatprep.mubr.bf16.mxu1 %v4922_v61  ;;  %8449 = vmatprep.subr.bf16.mxu1 %v8734_v60 }
 0x67e   : > { %8436 = vmatmul.mubr.bf16.gmra.mrb[60].mxu1 %v4923_v38 }
 0x680   : > { %8450 = vmatpush3.bf16.msra.mxu1 %v8734_v60 }
 0x681   : > { %8451 = vmatprep.subr.bf16.mxu1 %v8735_v9 }
 0x684   : > { %8452 = vmatpush3.bf16.msra.mxu1 %v8735_v9 }
 0x685   : > { %8453 = vmatprep.subr.bf16.mxu1 %v8736_v63 }
 0x688   : > { %8454 = vmatpush3.bf16.msra.mxu1 %v8736_v63 }
 0x739   : > { %v8425_v55 = vpop.f32.mrb[48].mxu1 }
 0x73a   : > { %v10565_v1 = vadd.f32 %v8425_v55, %v10562_v28  ;;  %v5028_v29 = vpop.f32.mrb[49].mxu1 }
 0x73b   : > { %v10568_v23 = vadd.f32 %v10562_v28, %v5028_v29  ;;  %v8426_v39 = vpop.f32.mrb[50].mxu1 }
 0x73c   : > { %v5109_v30 = vand.u32 2147483647, %v10565_v1  ;;  %v10572_v48 = vadd.f32 %v8426_v39, %v10562_v28  ;;  %v5031_v6 = vpop.f32.mrb[51].mxu1  ;;  %v5093_v54 = vmax.f32 %v10565_v1, 0.0 }
 0x73d   : > { %v5107_v34 = vand.u32 2147483647, %v10568_v23  ;;  %v10576_v12 = vadd.f32 %v10562_v28, %v5031_v6  ;;  %v5091_v33 = vmax.f32 %v10568_v23, 0.0 }
 0x73e   : > { %v5125_v27 = vsub.f32 0.0, %v5109_v30  ;;  %v5110_v37 = vand.u32 2147483647, %v10572_v48  ;;  %v5094_v7 = vmax.f32 %v10572_v48, 0.0 }
 0x73f   : > { %v5123_v8 = vsub.f32 0.0, %v5107_v34  ;;  %v5108_v11 = vand.u32 2147483647, %v10576_v12  ;;  %v5092_v19 = vmax.f32 %v10576_v12, 0.0 }
 0x740   : > { %v5143_v5 = vmul.f32 1.442695, %v5125_v27  ;;  %v5126_v17 = vsub.f32 0.0, %v5110_v37 }
 0x741   : > { %v5139_v13 = vmul.f32 1.442695, %v5123_v8  ;;  %v5124_v20 = vsub.f32 0.0, %v5108_v11  ;;  %v8429_v26 = vpop.f32.mrb[52].mxu1 }
 0x742   : > { %8761 = vpow2.f32 %v5143_v5  ;;  %v5145_v16 = vmul.f32 1.442695, %v5126_v17  ;;  %v10581_v25 = vadd.f32 %v8429_v26, %v10562_v28  ;;  %v5044_v2 = vpop.f32.mrb[53].mxu1 }
 0x743   : > { %8763 = vpow2.f32 %v5139_v13  ;;  %v5141_v10 = vmul.f32 1.442695, %v5124_v20  ;;  %v10584_v24 = vadd.f32 %v10562_v28, %v5044_v2  ;;  %v8430_v14 = vpop.f32.mrb[54].mxu1 }
 0x744   : > { %8765 = vpow2.f32 %v5145_v16  ;;  %v5113_v15 = vand.u32 2147483647, %v10581_v25  ;;  %v10588_v46 = vadd.f32 %v8430_v14, %v10562_v28  ;;  %v5047_v53 = vpop.f32.mrb[55].mxu1  ;;  %v5097_v55 = vmax.f32 %v10581_v25, 0.0 }
 0x745   : > { %8767 = vpow2.f32 %v5141_v10  ;;  %v5111_v59 = vand.u32 2147483647, %v10584_v24  ;;  %v10592_v41 = vadd.f32 %v10562_v28, %v5047_v53  ;;  %v5095_v30 = vmax.f32 %v10584_v24, 0.0 }
 0x746   : > { %v5129_v22 = vsub.f32 0.0, %v5113_v15  ;;  %v5114_v49 = vand.u32 2147483647, %v10588_v46  ;;  %v5098_v37 = vmax.f32 %v10588_v46, 0.0 }
 0x747   : > { %v5127_v57 = vsub.f32 0.0, %v5111_v59  ;;  %v5112_v0 = vand.u32 2147483647, %v10592_v41  ;;  %v5096_v8 = vmax.f32 %v10592_v41, 0.0 }
 0x748   : > { %v5151_v31 = vmul.f32 1.442695, %v5129_v22  ;;  %v5130_v40 = vsub.f32 0.0, %v5114_v49 }
 0x749   : > { %v5147_v52 = vmul.f32 1.442695, %v5127_v57  ;;  %v5128_v3 = vsub.f32 0.0, %v5112_v0  ;;  %v8433_v62 = vpop.f32.mrb[56].mxu1 }
 0x74a   : > { %8769 = vpow2.f32 %v5151_v31  ;;  %v5153_v36 = vmul.f32 1.442695, %v5130_v40  ;;  %v10597_v47 = vadd.f32 %v8433_v62, %v10562_v28  ;;  %v5060_v32 = vpop.f32.mrb[57].mxu1 }
 0x74b   : > { %8771 = vpow2.f32 %v5147_v52  ;;  %v5149_v35 = vmul.f32 1.442695, %v5128_v3  ;;  %v8434_v58 = vpop.f32.mrb[58].mxu1  ;;  %v10619_v13 = vadd.f32 %v10562_v28, %v5060_v32 }
 0x74c   : > { %v8762_v45 = vpop.eup %8761  ;;  %8773 = vpow2.f32 %v5153_v36  ;;  %v5117_v4 = vand.u32 2147483647, %v10597_v47  ;;  %v10601_v44 = vpop.f32.mrb[59].mxu1  ;;  %v10628_v14 = vadd.f32 %v8434_v58, %v10562_v28 }
 0x74d   : > { %v8764_v50 = vpop.eup %8763  ;;  %v5189_v18 = vadd.f32 1.0, %v8762_v45  ;;  %v5192_v51 = vmul.f32 -0.5, %v8762_v45  ;;  %8775 = vpow2.f32 %v5149_v35  ;;  %v5195_v21 = vand.u32 2147483647, %v8762_v45 }
 0x74e   : > { %v8766_v56 = vpop.eup %8765  ;;  %v5171_v38 = vadd.f32 1.0, %v8764_v50  ;;  %v5174_v61 = vmul.f32 -0.5, %v8764_v50  ;;  %v5133_v60 = vsub.f32 0.0, %v5117_v4  ;;  %v5177_v9 = vand.u32 2147483647, %v8764_v50 }
 0x74f   : > { %v8768_v42 = vpop.eup %8767  ;;  %8777 = vlog2.f32 %v5189_v18  ;;  %v5198_v43 = vadd.f32 1.0, %v8766_v56  ;;  %v5201_v63 = vmul.f32 -0.5, %v8766_v56  ;;  %v5193_v29 = vadd.f32 1.0, %v5192_v51 }
 0x750   : > { %8779 = vlog2.f32 %v5171_v38  ;;  %v5180_v39 = vadd.f32 1.0, %v8768_v42  ;;  %v5175_v34 = vadd.f32 1.0, %v5174_v61  ;;  %v5183_v27 = vmul.f32 -0.5, %v8768_v42 }
 0x751   : > { %8781 = vlog2.f32 %v5198_v43  ;;  %v10608_v6 = vpop.f32.mrb[60].mxu1  ;;  %vm10614_vm8 = vcmp.lt.f32.partialorder %v5195_v21, 0.0004427343  ;;  %v5159_v17 = vmul.f32 1.442695, %v5133_v60  ;;  %v5202_v2 = vadd.f32 1.0, %v5201_v63 }
 0x752   : > { %v10612_v11 = vpop.f32.mrb[61].mxu1  ;;  %8783 = vlog2.f32 %v5180_v39  ;;  %vm10623_vm9 = vcmp.lt.f32.partialorder %v5177_v9, 0.0004427343  ;;  %v5204_v10 = vand.u32 2147483647, %v8766_v56  ;;  %v5194_v59 = vmul.f32 %v8762_v45, %v5193_v29 }
 0x753   : > { %v10621_v20 = vpop.f32.mrb[62].mxu1  ;;  %8785 = vpow2.f32 %v5159_v17  ;;  %v5176_v0 = vmul.f32 %v8764_v50, %v5175_v34  ;;  %v5184_v31 = vadd.f32 1.0, %v5183_v27  ;;  %v5186_v40 = vand.u32 2147483647, %v8768_v42 }
 0x754   : > { %v8770_v26 = vpop.eup %8769  ;;  %v10630_v15 = vpop.f32.mrb[63].mxu1  ;;  %v5203_v35 = vmul.f32 %v8766_v56, %v5202_v2  ;;  %vm10634_vm10 = vcmp.lt.f32.partialorder %v5204_v10, 0.0004427343  ;;  %v5115_v51 = vand.u32 2147483647, %v10619_v13  ;;  %v10706_v27 = vadd.f32 %v10562_v28, %v10612_v11 }
 0x755   : > { %v8772_v53 = vpop.eup %8771  ;;  %v5225_v22 = vadd.f32 1.0, %v8770_v26  ;;  %v5228_v49 = vmul.f32 -0.5, %v8770_v26  ;;  %v5231_v62 = vand.u32 2147483647, %v8770_v26  ;;  %v5185_v21 = vmul.f32 %v8768_v42, %v5184_v31 }
 0x756   : > { %v8774_v57 = vpop.eup %8773  ;;  %v5207_v52 = vadd.f32 1.0, %v8772_v53  ;;  %v5210_v36 = vmul.f32 -0.5, %v8772_v53  ;;  %v5213_v45 = vand.u32 2147483647, %v8772_v53  ;;  %vm10640_vm11 = vcmp.lt.f32.partialorder %v5186_v40, 0.0004427343 }
 0x757   : > { %v10632_v3 = vpop.eup %8775  ;;  %8787 = vlog2.f32 %v5225_v22  ;;  %v5234_v32 = vadd.f32 1.0, %v8774_v57  ;;  %v5229_v18 = vadd.f32 1.0, %v5228_v49  ;;  %v5237_v56 = vmul.f32 -0.5, %v8774_v57 }
 0x758   : > { %8789 = vlog2.f32 %v5207_v52  ;;  %v5216_v50 = vadd.f32 1.0, %v10632_v3  ;;  %vm10644_vm12 = vcmp.lt.f32.partialorder %v5231_v62, 0.0004427343  ;;  %v5211_v29 = vadd.f32 1.0, %v5210_v36 }
 0x759   : > { %v8778_v4 = vpop.eup %8777  ;;  %8791 = vlog2.f32 %v5234_v32  ;;  %vm10650_vm13 = vcmp.lt.f32.partialorder %v5213_v45, 0.0004427343  ;;  %v5240_v42 = vand.u32 2147483647, %v8774_v57  ;;  %v5219_v17 = vmul.f32 -0.5, %v10632_v3 }
 0x75a   : > { %v8780_v38 = vpop.eup %8779  ;;  %v5191_v61 = vmul.f32 0.6931472, %v8778_v4  ;;  %8793 = vlog2.f32 %v5216_v50  ;;  %v5230_v49 = vmul.f32 %v8770_v26, %v5229_v18  ;;  %v5131_v31 = vsub.f32 0.0, %v5115_v51 }
 0x75b   : > { %v8782_v60 = vpop.eup %8781  ;;  %v5173_v9 = vmul.f32 0.6931472, %v8780_v38  ;;  %v5238_v52 = vadd.f32 1.0, %v5237_v56  ;;  %v5222_v16 = vand.u32 2147483647, %v10632_v3  ;;  %v10680_v50 = vadd.f32 %v10562_v28, %v10601_v44 }
 0x75c   : > { %v5197_v39 = vsel %vm10614_vm8, %v5194_v59, %v5191_v61  ;;  %v5200_v34 = vmul.f32 0.6931472, %v8782_v60  ;;  %v8784_v2 = vpop.eup %8783  ;;  %vm10670_vm14 = vcmp.lt.f32.partialorder %v5240_v42, 0.0004427343  ;;  %v5155_v32 = vmul.f32 1.442695, %v5131_v31 }
 0x75d   : > { %v5317_v10 = vadd.f32 %v5197_v39, %v5093_v54  ;;  %v5179_v22 = vsel %vm10623_vm9, %v5176_v0, %v5173_v9  ;;  %v5182_v40 = vmul.f32 0.6931472, %v8784_v2  ;;  %v10663_v62 = vpop.eup %8785  ;;  %v5212_v54 = vmul.f32 %v8772_v53, %v5211_v29 }
 0x75e   : > { %v5315_v5 = vadd.f32 %v5179_v22, %v5091_v33  ;;  %v5206_v59 = vsel %vm10634_vm10, %v5203_v35, %v5200_v34  ;;  %v5220_v33 = vadd.f32 1.0, %v5219_v17  ;;  %v5261_v45 = vadd.f32 1.0, %v10663_v62 }
 0x75f   : > { %8795 = vtanh.f32 %v5317_v10  ;;  %v5318_v36 = vadd.f32 %v5206_v59, %v5094_v7  ;;  %v5188_v26 = vsel %vm10640_vm11, %v5185_v21, %v5182_v40  ;;  %v5118_v7 = vand.u32 2147483647, %v10628_v14 }
 0x760   : > { %v5316_v58 = vadd.f32 %v5188_v26, %v5092_v19  ;;  %v5239_v18 = vmul.f32 %v8774_v57, %v5238_v52  ;;  %vm10682_vm15 = vcmp.lt.f32.partialorder %v5222_v16, 0.0004427343  ;;  %v5221_v56 = vmul.f32 %v10632_v3, %v5220_v33 }
 0x761   : > { %v8788_v35 = vpop.eup %8787  ;;  %8797 = vtanh.f32 %v5318_v36  ;;  %v5134_v19 = vsub.f32 0.0, %v5118_v7  ;;  %v5116_v34 = vand.u32 2147483647, %v10680_v50  ;;  %v10712_v17 = vadd.f32 %v10621_v20, %v10562_v28 }
 0x762   : > { %v8790_v53 = vpop.eup %8789  ;;  %8799 = vtanh.f32 %v5315_v5  ;;  %v5227_v4 = vmul.f32 0.6931472, %v8788_v35  ;;  %v10724_v0 = vadd.f32 %v10562_v28, %v10630_v15 }
 0x763   : > { %v8792_v51 = vpop.eup %8791  ;;  %8801 = vtanh.f32 %v5316_v58  ;;  %v5209_v38 = vmul.f32 0.6931472, %v8790_v53  ;;  %v5161_v9 = vmul.f32 1.442695, %v5134_v19  ;;  %v5132_v42 = vsub.f32 0.0, %v5116_v34 }
 0x764   : > { %v5233_v21 = vsel %vm10644_vm12, %v5230_v49, %v5227_v4  ;;  %v5236_v43 = vmul.f32 0.6931472, %v8792_v51  ;;  %8803 = vpow2.f32 %v5155_v32  ;;  %v8794_v57 = vpop.eup %8793  ;;  %v5119_v49 = vand.u32 2147483647, %v10706_v27 }
 0x765   : > { %v5321_v44 = vadd.f32 %v5233_v21, %v5097_v55  ;;  %v5215_v60 = vsel %vm10650_vm13, %v5212_v54, %v5209_v38  ;;  %8805 = vlog2.f32 %v5261_v45  ;;  %v5218_v39 = vmul.f32 0.6931472, %v8794_v57 }
 0x766   : > { %v5319_v29 = vadd.f32 %v5215_v60, %v5095_v30  ;;  %v5242_v63 = vsel %vm10670_vm14, %v5239_v18, %v5236_v43  ;;  %v10702_v55 = vadd.f32 %v10608_v6, %v10562_v28  ;;  %v5157_v10 = vmul.f32 1.442695, %v5132_v42 }
 0x767   : > { %8807 = vtanh.f32 %v5321_v44  ;;  %v5322_v3 = vadd.f32 %v5242_v63, %v5098_v37  ;;  %v5224_v30 = vsel %vm10682_vm15, %v5221_v56, %v5218_v39  ;;  %v5122_v59 = vand.u32 2147483647, %v10712_v17 }
 0x768   : > { %8809 = vtanh.f32 %v5319_v29  ;;  %v5320_v37 = vadd.f32 %v5224_v30, %v5096_v8  ;;  %v5121_v6 = vand.u32 2147483647, %v10702_v55  ;;  %v5135_v8 = vsub.f32 0.0, %v5119_v49 }
 0x769   : > { %v8796_v2 = vpop.eup %8795  ;;  %8811 = vtanh.f32 %v5322_v3  ;;  %v5138_v26 = vsub.f32 0.0, %v5122_v59  ;;  %v5120_v53 = vand.u32 2147483647, %v10724_v0  ;;  %v5267_v19 = vand.u32 2147483647, %v10663_v62 }
 0x76a   : > { %8813 = vpow2.f32 %v5161_v9  ;;  %v5137_v22 = vsub.f32 0.0, %v5121_v6  ;;  %v5349_v5 = vmul.f32 %v8796_v2, %v10565_v1  ;;  %v5264_v1 = vmul.f32 -0.5, %v10663_v62 }
 0x76b   : > { %v8798_v11 = vpop.eup %8797  ;;  %8815 = vtanh.f32 %v5320_v37  ;;  %v5163_v35 = vmul.f32 1.442695, %v5135_v8  ;;  %v5169_v58 = vmul.f32 1.442695, %v5138_v26  ;;  %v5136_v38 = vsub.f32 0.0, %v5120_v53 }
 0x76c   : > { %v8800_v31 = vpop.eup %8799  ;;  %v5350_v20 = vmul.f32 %v8798_v11, %v10572_v48  ;;  %8817 = vpow2.f32 %v5157_v10  ;;  %v5167_v52 = vmul.f32 1.442695, %v5137_v22  ;;  %v5265_v18 = vadd.f32 1.0, %v5264_v1 }
 0x76d   : > { %v8802_v40 = vpop.eup %8801  ;;  %v5347_v48 = vmul.f32 %v8800_v31, %v10568_v23  ;;  %v5165_v60 = vmul.f32 1.442695, %v5136_v38  ;;  %vm5268_vm0 = vcmp.lt.f32.partialorder %v5267_v19, 0.0004427343  ;;  %v5100_v26 = vmax.f32 %v10680_v50, 0.0 }
 0x76e   : > { %v8804_v36 = vpop.eup %8803  ;;  %v5364_v54 = vpack.c.bf16 %v5350_v20, %v5349_v5  ;;  %v5348_v16 = vmul.f32 %v8802_v40, %v10576_v12  ;;  %8819 = vpow2.f32 %v5167_v52  ;;  %v5099_v52 = vmax.f32 %v10619_v13, 0.0 }
 0x76f   : > { %v8806_v33 = vpop.eup %8805  ;;  %v5243_v32 = vadd.f32 1.0, %v8804_v36  ;;  %v5246_v21 = vmul.f32 -0.5, %v8804_v36  ;;  %v5249_v3 = vand.u32 2147483647, %v8804_v36 }
 0x770   : > { %v5363_v12 = vpack.c.bf16 %v5348_v16, %v5347_v48  ;;  %v5263_v61 = vmul.f32 0.6931472, %v8806_v33  ;;  %v5102_v16 = vmax.f32 %v10628_v14, 0.0 }
 0x771   : > { %v8808_v45 = vpop.eup %8807  ;;  %8821 = vlog2.f32 %v5243_v32  ;;  %v5247_v63 = vadd.f32 1.0, %v5246_v21  ;;  %vm10738_vm1 = vcmp.lt.f32.partialorder %v5249_v3, 0.0004427343 }
 0x772   : > { %v8810_v7 = vpop.eup %8809  ;;  %8823 = vpow2.f32 %v5163_v35  ;;  %v5353_v15 = vmul.f32 %v8808_v45, %v10581_v25  ;;  %8455 = vmatprep.mubr.bf16.mxu1 %v5363_v12 }
 0x773   : > { %v8812_v4 = vpop.eup %8811  ;;  %8825 = vpow2.f32 %v5169_v58  ;;  %8456 = vmatmul.mubr.bf16.vlgmr.msra.gmra.mrb[64].mxu1 %v5364_v54  ;;  %v5351_v57 = vmul.f32 %v8810_v7, %v10584_v24  ;;  %v5101_v24 = vmax.f32 %v10597_v47, 0.0  ;;  %v5248_v11 = vmul.f32 %v8804_v36, %v5247_v63 }
 0x774   : > { %v8814_v28 = vpop.eup %8813  ;;  %v5354_v51 = vmul.f32 %v8812_v4, %v10588_v46  ;;  %v5266_v46 = vmul.f32 %v10663_v62, %v5265_v18 }
 0x775   : > { %v8816_v23 = vpop.eup %8815  ;;  %v5270_v43 = vadd.f32 1.0, %v8814_v28  ;;  %v5273_v30 = vmul.f32 -0.5, %v8814_v28  ;;  %v5276_v20 = vand.u32 2147483647, %v8814_v28 }
 0x776   : > { %v8818_v56 = vpop.eup %8817  ;;  %v5352_v44 = vmul.f32 %v8816_v23, %v10592_v41  ;;  %v5366_v9 = vpack.c.bf16 %v5354_v51, %v5353_v15  ;;  %v5269_v34 = vsel %vm5268_vm0, %v5266_v46, %v5263_v61 }
 0x777   : > { %8827 = vlog2.f32 %v5270_v43  ;;  %v5252_v25 = vadd.f32 1.0, %v8818_v56  ;;  %v5255_v37 = vmul.f32 -0.5, %v8818_v56  ;;  %v5325_v10 = vadd.f32 %v5269_v34, %v5101_v24 }
 0x778   : > { %8829 = vpow2.f32 %v5165_v60  ;;  %v5365_v29 = vpack.c.bf16 %v5352_v44, %v5351_v57  ;;  %v8820_v39 = vpop.eup %8819  ;;  %v5274_v49 = vadd.f32 1.0, %v5273_v30  ;;  %v5258_v59 = vand.u32 2147483647, %v8818_v56 }
 0x779   : > { %8831 = vlog2.f32 %v5252_v25  ;;  %v5297_v41 = vadd.f32 1.0, %v8820_v39  ;;  %v5256_v8 = vadd.f32 1.0, %v5255_v37  ;;  %v5300_v36 = vmul.f32 -0.5, %v8820_v39 }
 0x77a   : > { %8459 = vmatprep.mubr.bf16.mxu1 %v5365_v29  ;;  %v5275_v48 = vmul.f32 %v8814_v28, %v5274_v49  ;;  %vm5277_vm2 = vcmp.lt.f32.partialorder %v5276_v20, 0.0004427343  ;;  %vm5259_vm3 = vcmp.lt.f32.partialorder %v5258_v59, 0.0004427343  ;;  %v5303_v15 = vand.u32 2147483647, %v8820_v39 }
 0x77b   : > { %v8822_v42 = vpop.eup %8821  ;;  %8833 = vlog2.f32 %v5297_v41  ;;  %8460 = vmatmul.mubr.bf16.gmra.mrb[68].mxu1 %v5366_v9  ;;  %v5257_v12 = vmul.f32 %v8818_v56, %v5256_v8  ;;  %v5301_v4 = vadd.f32 1.0, %v5300_v36  ;;  %v5105_v60 = vmax.f32 %v10702_v55, 0.0 }
 0x77c   : > { %v5245_v2 = vmul.f32 0.6931472, %v8822_v42  ;;  %v8824_v6 = vpop.eup %8823  ;;  %vm5304_vm4 = vcmp.lt.f32.partialorder %v5303_v15, 0.0004427343  ;;  %v5103_v30 = vmax.f32 %v10706_v27, 0.0  ;;  %v5106_v37 = vmax.f32 %v10712_v17, 0.0 }
 0x77d   : > { %v10736_v62 = vpop.eup %8825  ;;  %v5279_v31 = vadd.f32 1.0, %v8824_v6  ;;  %v5282_v58 = vmul.f32 -0.5, %v8824_v6  ;;  %v5302_v21 = vmul.f32 %v8820_v39, %v5301_v4  ;;  %v5285_v43 = vand.u32 2147483647, %v8824_v6  ;;  %v8744_v4 = vld [vmem:[%s11424_s2 + $0x2b8] sm:$0xff]  }
 0x77e   : > { %v5251_v5 = vsel %vm10738_vm1, %v5248_v11, %v5245_v2  ;;  %v5306_v40 = vadd.f32 1.0, %v10736_v62  ;;  %v5309_v51 = vmul.f32 -0.5, %v10736_v62  ;;  %v5312_v25 = vand.u32 2147483647, %v10736_v62 }
 0x77f   : > { %8835 = vlog2.f32 %v5279_v31  ;;  %v5323_v1 = vadd.f32 %v5251_v5, %v5099_v52  ;;  %v5283_v61 = vadd.f32 1.0, %v5282_v58  ;;  %vm5286_vm5 = vcmp.lt.f32.partialorder %v5285_v43, 0.0004427343 }
 0x780   : > { %8837 = vtanh.f32 %v5325_v10  ;;  %v5310_v44 = vadd.f32 1.0, %v5309_v51  ;;  %vm5313_vm6 = vcmp.lt.f32.partialorder %v5312_v25, 0.0004427343  ;;  %v5104_v59 = vmax.f32 %v10724_v0, 0.0 }
 0x781   : > { %v8828_v54 = vpop.eup %8827  ;;  %8839 = vlog2.f32 %v5306_v40  ;;  %v5284_v63 = vmul.f32 %v8824_v6, %v5283_v61 }
 0x782   : > { %v8830_v33 = vpop.eup %8829  ;;  %v5272_v32 = vmul.f32 0.6931472, %v8828_v54  ;;  %v5311_v41 = vmul.f32 %v10736_v62, %v5310_v44 }
 0x783   : > { %v8832_v35 = vpop.eup %8831  ;;  %v5288_v45 = vadd.f32 1.0, %v8830_v33  ;;  %v5291_v57 = vmul.f32 -0.5, %v8830_v33  ;;  %v5294_v2 = vand.u32 2147483647, %v8830_v33 }
 0x784   : > { %v5278_v7 = vsel %vm5277_vm2, %v5275_v48, %v5272_v32  ;;  %v5254_v53 = vmul.f32 0.6931472, %v8832_v35 }
 0x785   : > { %v5326_v18 = vadd.f32 %v5278_v7, %v5102_v16  ;;  %8841 = vlog2.f32 %v5288_v45  ;;  %v8834_v23 = vpop.eup %8833  ;;  %v5292_v39 = vadd.f32 1.0, %v5291_v57  ;;  %vm5295_vm7 = vcmp.lt.f32.partialorder %v5294_v2, 0.0004427343 }
 0x786   : > { %8843 = vtanh.f32 %v5323_v1  ;;  %v5260_v38 = vsel %vm5259_vm3, %v5257_v12, %v5254_v53  ;;  %v5299_v19 = vmul.f32 0.6931472, %v8834_v23  ;;  %v8742_v53 = vld [vmem:[%s11424_s2 + $0x2a8] sm:$0xff]   ;;  %v8743_v12 = vld [vmem:[%s11424_s2 + $0x2b0] sm:$0xff]  }
 0x787   : > { %8845 = vtanh.f32 %v5326_v18  ;;  %v5324_v28 = vadd.f32 %v5260_v38, %v5100_v26  ;;  %v5293_v5 = vmul.f32 %v8830_v33, %v5292_v39  ;;  %v10790_v18 = vld [vmem:[%s11425_s3 + $0x7] ss:$0 sm:$0xff] }
 0x788   : > { %v5305_v9 = vsel %vm5304_vm4, %v5302_v21, %v5299_v19 }
 0x789   : > { %8847 = vtanh.f32 %v5324_v28  ;;  %v8836_v56 = vpop.eup %8835  ;;  %v5329_v3 = vadd.f32 %v5305_v9, %v5105_v60 }
 0x78a   : > { %v8838_v46 = vpop.eup %8837  ;;  %v5281_v29 = vmul.f32 0.6931472, %v8836_v56 }
 0x78b   : > { %v8840_v34 = vpop.eup %8839  ;;  %8849 = vtanh.f32 %v5329_v3  ;;  %v5357_v40 = vmul.f32 %v8838_v46, %v10597_v47 }
 0x78c   : > { %v5287_v42 = vsel %vm5286_vm5, %v5284_v63, %v5281_v29  ;;  %v5308_v24 = vmul.f32 0.6931472, %v8840_v34 }
 0x78d   : > { %v5327_v11 = vadd.f32 %v5287_v42, %v5103_v30 }
 0x78e   : > { %v5314_v22 = vsel %vm5313_vm6, %v5311_v41, %v5308_v24 }
 0x78f   : > { %v8842_v10 = vpop.eup %8841  ;;  %v5330_v6 = vadd.f32 %v5314_v22, %v5106_v37 }
 0x790   : > { %v8844_v49 = vpop.eup %8843  ;;  %v5290_v31 = vmul.f32 0.6931472, %v8842_v10 }
 0x791   : > { %v8846_v20 = vpop.eup %8845  ;;  %8851 = vtanh.f32 %v5330_v6  ;;  %v5355_v54 = vmul.f32 %v8844_v49, %v10619_v13 }
 0x792   : > { %v5358_v62 = vmul.f32 %v8846_v20, %v10628_v14  ;;  %v5296_v52 = vsel %vm5295_vm7, %v5293_v5, %v5290_v31  ;;  %8853 = vtanh.f32 %v5327_v11 }
 0x793   : > { %v8848_v8 = vpop.eup %8847  ;;  %v5328_v36 = vadd.f32 %v5296_v52, %v5104_v59 }
 0x794   : > { %v5356_v16 = vmul.f32 %v8848_v8, %v10680_v50  ;;  %v5368_v26 = vpack.c.bf16 %v5358_v62, %v5357_v40  ;;  %v8737_v50 = vld [vmem:[%s11424_s2 + $0x280] sm:$0xff]  }
 0x795   : > { %8855 = vtanh.f32 %v5328_v36  ;;  %v8850_v1 = vpop.eup %8849  ;;  %8471 = vmatprep.subr.bf16.mxu0 %v8737_v50 }
 0x796   : > { %v5367_v33 = vpack.c.bf16 %v5356_v16, %v5355_v54  ;;  %v5361_v47 = vmul.f32 %v8850_v1, %v10702_v55  ;;  %8472 = vmatpush3.bf16.msra.mxu0 %v8737_v50  ;;  %v8738_v55 = vld [vmem:[%s11424_s2 + $0x288] sm:$0xff]  }
 0x797   : > { %8473 = vmatprep.subr.bf16.mxu0 %v8738_v55 }
 0x798   : > { %8463 = vmatprep.mubr.bf16.mxu1 %v5367_v33 }
 0x799   : > { %8464 = vmatmul.mubr.bf16.gmra.mrb[72].mxu1 %v5368_v26 }
 0x79a   : > { %8474 = vmatpush3.bf16.msra.mxu0 %v8738_v55 }
 0x79b   : > { %v8852_v32 = vpop.eup %8851 }
 0x79c   : > { %v8854_v48 = vpop.eup %8853  ;;  %v5362_v14 = vmul.f32 %v8852_v32, %v10712_v17  ;;  %v8740_v17 = vld [vmem:[%s11424_s2 + $0x298] sm:$0xff]  }
 0x79d   : > { %v5359_v45 = vmul.f32 %v8854_v48, %v10706_v27  ;;  %v8739_v27 = vld [vmem:[%s11424_s2 + $0x290] sm:$0xff]  }
 0x79e   : > { %v5370_v58 = vpack.c.bf16 %v5362_v14, %v5361_v47  ;;  %8475 = vmatprep.subr.bf16.mxu0 %v8739_v27 }
 0x79f   : > { %v8856_v35 = vpop.eup %8855  ;;  %8476 = vmatpush3.bf16.msra.mxu0 %v8739_v27 }
 0x7a0   : > { %v5360_v13 = vmul.f32 %v8856_v35, %v10724_v0  ;;  %8477 = vmatprep.subr.bf16.mxu0 %v8740_v17  ;;  %v8741_v0 = vld [vmem:[%s11424_s2 + $0x2a0] sm:$0xff]  }
 0x7a2   : > { %v5369_v7 = vpack.c.bf16 %v5360_v13, %v5359_v45 }
 0x7a3   : > { %8478 = vmatpush3.bf16.msra.mxu0 %v8740_v17 }
 0x7a4   : > { %8467 = vmatprep.mubr.bf16.mxu1 %v5369_v7  ;;  %8479 = vmatprep.subr.bf16.mxu0 %v8741_v0 }
 0x7a5   : > { %8468 = vmatmul.mubr.bf16.gmra.mrb[76].mxu1 %v5370_v58 }
 0x7a7   : > { %8480 = vmatpush3.bf16.msra.mxu0 %v8741_v0 }
 0x7a8   : > { %8481 = vmatprep.subr.bf16.mxu0 %v8742_v53 }
 0x7ab   : > { %8482 = vmatpush3.bf16.msra.mxu0 %v8742_v53 }
 0x7ac   : > { %8483 = vmatprep.subr.bf16.mxu0 %v8743_v12 }
 0x7af   : > { %8484 = vmatpush3.bf16.msra.mxu0 %v8743_v12 }
 0x7b0   : > { %8485 = vmatprep.subr.bf16.mxu0 %v8744_v4 }
 0x7b3   : > { %8486 = vmatpush3.bf16.msra.mxu0 %v8744_v4 }
 0x846   : > { %v8457_v15 = vpop.f32.mrb[64].mxu1 }
 0x847   : > { %v10793_v51 = vadd.f32 %v8457_v15, %v10790_v18  ;;  %v5475_v38 = vpop.f32.mrb[65].mxu1 }
 0x848   : > { %v10796_v23 = vadd.f32 %v10790_v18, %v5475_v38  ;;  %v8458_v28 = vpop.f32.mrb[66].mxu1 }
 0x849   : > { %v5556_v61 = vand.u32 2147483647, %v10793_v51  ;;  %v10800_v19 = vadd.f32 %v8458_v28, %v10790_v18  ;;  %v5478_v21 = vpop.f32.mrb[67].mxu1  ;;  %v5540_v58 = vmax.f32 %v10793_v51, 0.0 }
 0x84a   : > { %v5554_v43 = vand.u32 2147483647, %v10796_v23  ;;  %v10804_v57 = vadd.f32 %v10790_v18, %v5478_v21  ;;  %v5538_v7 = vmax.f32 %v10796_v23, 0.0 }
 0x84b   : > { %v5572_v44 = vsub.f32 0.0, %v5556_v61  ;;  %v5557_v56 = vand.u32 2147483647, %v10800_v19  ;;  %v5541_v50 = vmax.f32 %v10800_v19, 0.0 }
 0x84c   : > { %v5570_v60 = vsub.f32 0.0, %v5554_v43  ;;  %v5555_v9 = vand.u32 2147483647, %v10804_v57  ;;  %v5539_v27 = vmax.f32 %v10804_v57, 0.0 }
 0x84d   : > { %v5590_v25 = vmul.f32 1.442695, %v5572_v44  ;;  %v5573_v46 = vsub.f32 0.0, %v5557_v56 }
 0x84e   : > { %v5586_v29 = vmul.f32 1.442695, %v5570_v60  ;;  %v5571_v63 = vsub.f32 0.0, %v5555_v9  ;;  %v8461_v34 = vpop.f32.mrb[68].mxu1 }
 0x84f   : > { %8857 = vpow2.f32 %v5590_v25  ;;  %v5592_v3 = vmul.f32 1.442695, %v5573_v46  ;;  %v10809_v30 = vadd.f32 %v8461_v34, %v10790_v18  ;;  %v5491_v39 = vpop.f32.mrb[69].mxu1 }
 0x850   : > { %8859 = vpow2.f32 %v5586_v29  ;;  %v5588_v42 = vmul.f32 1.442695, %v5571_v63  ;;  %v10812_v24 = vadd.f32 %v10790_v18, %v5491_v39  ;;  %v8462_v41 = vpop.f32.mrb[70].mxu1 }
 0x851   : > { %8861 = vpow2.f32 %v5592_v3  ;;  %v5560_v2 = vand.u32 2147483647, %v10809_v30  ;;  %v10816_v37 = vadd.f32 %v8462_v41, %v10790_v18  ;;  %v5494_v10 = vpop.f32.mrb[71].mxu1  ;;  %v5544_v0 = vmax.f32 %v10809_v30, 0.0 }
 0x852   : > { %8863 = vpow2.f32 %v5588_v42  ;;  %v5558_v11 = vand.u32 2147483647, %v10812_v24  ;;  %v10820_v22 = vadd.f32 %v10790_v18, %v5494_v10  ;;  %v5542_v53 = vmax.f32 %v10812_v24, 0.0 }
 0x853   : > { %v5576_v49 = vsub.f32 0.0, %v5560_v2  ;;  %v5561_v6 = vand.u32 2147483647, %v10816_v37  ;;  %v5545_v28 = vmax.f32 %v10816_v37, 0.0 }
 0x854   : > { %v5574_v31 = vsub.f32 0.0, %v5558_v11  ;;  %v5559_v5 = vand.u32 2147483647, %v10820_v22 }
 0x855   : > { %v5598_v20 = vmul.f32 1.442695, %v5576_v49  ;;  %v5577_v59 = vsub.f32 0.0, %v5561_v6 }
 0x856   : > { %v5594_v40 = vmul.f32 1.442695, %v5574_v31  ;;  %v5575_v62 = vsub.f32 0.0, %v5559_v5 }
 0x857   : > { %8865 = vpow2.f32 %v5598_v20  ;;  %v5600_v52 = vmul.f32 1.442695, %v5577_v59 }
 0x858   : > { %8867 = vpow2.f32 %v5594_v40  ;;  %v5596_v8 = vmul.f32 1.442695, %v5575_v62 }
 0x859   : > { %v8858_v36 = vpop.eup %8857  ;;  %8869 = vpow2.f32 %v5600_v52 }
 0x85a   : > { %v8860_v54 = vpop.eup %8859  ;;  %v5636_v16 = vadd.f32 1.0, %v8858_v36  ;;  %v5639_v26 = vmul.f32 -0.5, %v8858_v36  ;;  %8871 = vpow2.f32 %v5596_v8  ;;  %v5642_v47 = vand.u32 2147483647, %v8858_v36 }
 0x85b   : > { %v8862_v33 = vpop.eup %8861  ;;  %v5618_v1 = vadd.f32 1.0, %v8860_v54  ;;  %v5621_v14 = vmul.f32 -0.5, %v8860_v54  ;;  %v5624_v35 = vand.u32 2147483647, %v8860_v54 }
 0x85c   : > { %v8864_v32 = vpop.eup %8863  ;;  %8873 = vlog2.f32 %v5636_v16  ;;  %v5645_v48 = vadd.f32 1.0, %v8862_v33  ;;  %v5640_v45 = vadd.f32 1.0, %v5639_v26  ;;  %v5648_v55 = vmul.f32 -0.5, %v8862_v33 }
 0x85d   : > { %8875 = vlog2.f32 %v5618_v1  ;;  %v5627_v13 = vadd.f32 1.0, %v8864_v32  ;;  %v5630_v17 = vmul.f32 -0.5, %v8864_v32  ;;  %vm10830_vm8 = vcmp.lt.f32.partialorder %v5642_v47, 0.0004427343 }
 0x85e   : > { %8877 = vlog2.f32 %v5645_v48  ;;  %v5622_v15 = vadd.f32 1.0, %v5621_v14  ;;  %vm10834_vm9 = vcmp.lt.f32.partialorder %v5624_v35, 0.0004427343  ;;  %v5641_v21 = vmul.f32 %v8858_v36, %v5640_v45 }
 0x85f   : > { %8879 = vlog2.f32 %v5627_v13  ;;  %v5651_v43 = vand.u32 2147483647, %v8862_v33  ;;  %v5649_v9 = vadd.f32 1.0, %v5648_v55  ;;  %v5633_v25 = vand.u32 2147483647, %v8864_v32 }
 0x860   : > { %v5631_v34 = vadd.f32 1.0, %v5630_v17  ;;  %v5623_v42 = vmul.f32 %v8860_v54, %v5622_v15 }
 0x861   : > { %v8866_v12 = vpop.eup %8865  ;;  %vm10841_vm10 = vcmp.lt.f32.partialorder %v5651_v43, 0.0004427343  ;;  %v5650_v20 = vmul.f32 %v8862_v33, %v5649_v9  ;;  %vm10846_vm11 = vcmp.lt.f32.partialorder %v5633_v25, 0.0004427343 }
 0x862   : > { %v8868_v61 = vpop.eup %8867  ;;  %v5672_v44 = vadd.f32 1.0, %v8866_v12  ;;  %v5675_v56 = vmul.f32 -0.5, %v8866_v12  ;;  %v5678_v3 = vand.u32 2147483647, %v8866_v12  ;;  %v5632_v8 = vmul.f32 %v8864_v32, %v5631_v34 }
 0x863   : > { %v8870_v60 = vpop.eup %8869  ;;  %v5654_v46 = vadd.f32 1.0, %v8868_v61  ;;  %v5657_v29 = vmul.f32 -0.5, %v8868_v61  ;;  %v5660_v2 = vand.u32 2147483647, %v8868_v61 }
 0x864   : > { %v10839_v63 = vpop.eup %8871  ;;  %8881 = vlog2.f32 %v5672_v44  ;;  %v5681_v39 = vadd.f32 1.0, %v8870_v60  ;;  %v5676_v41 = vadd.f32 1.0, %v5675_v56  ;;  %v5684_v40 = vmul.f32 -0.5, %v8870_v60 }
 0x865   : > { %8883 = vlog2.f32 %v5654_v46  ;;  %v5658_v49 = vadd.f32 1.0, %v5657_v29  ;;  %v5663_v6 = vadd.f32 1.0, %v10839_v63  ;;  %vm10850_vm12 = vcmp.lt.f32.partialorder %v5678_v3, 0.0004427343 }
 0x866   : > { %v8874_v10 = vpop.eup %8873  ;;  %8885 = vlog2.f32 %v5681_v39  ;;  %v5677_v26 = vmul.f32 %v8866_v12, %v5676_v41  ;;  %vm10856_vm13 = vcmp.lt.f32.partialorder %v5660_v2, 0.0004427343  ;;  %v5687_v1 = vand.u32 2147483647, %v8870_v60 }
 0x867   : > { %v8876_v31 = vpop.eup %8875  ;;  %v5638_v5 = vmul.f32 0.6931472, %v8874_v10  ;;  %8887 = vlog2.f32 %v5663_v6  ;;  %v5659_v14 = vmul.f32 %v8868_v61, %v5658_v49  ;;  %v5666_v35 = vmul.f32 -0.5, %v10839_v63 }
 0x868   : > { %v8878_v62 = vpop.eup %8877  ;;  %v5620_v52 = vmul.f32 0.6931472, %v8876_v31  ;;  %v5685_v12 = vadd.f32 1.0, %v5684_v40  ;;  %vm10875_vm14 = vcmp.lt.f32.partialorder %v5687_v1, 0.0004427343 }
 0x869   : > { %v5644_v54 = vsel %vm10830_vm8, %v5641_v21, %v5638_v5  ;;  %v5647_v16 = vmul.f32 0.6931472, %v8878_v62  ;;  %v8880_v48 = vpop.eup %8879  ;;  %v5667_v9 = vadd.f32 1.0, %v5666_v35  ;;  %v5669_v3 = vand.u32 2147483647, %v10839_v63 }
 0x86a   : > { %v5764_v47 = vadd.f32 %v5644_v54, %v5540_v58  ;;  %v5626_v32 = vsel %vm10834_vm9, %v5623_v42, %v5620_v52  ;;  %v5629_v17 = vmul.f32 0.6931472, %v8880_v48  ;;  %v5686_v34 = vmul.f32 %v8870_v60, %v5685_v12 }
 0x86b   : > { %v5762_v13 = vadd.f32 %v5626_v32, %v5538_v7  ;;  %v5653_v55 = vsel %vm10841_vm10, %v5650_v20, %v5647_v16  ;;  %v5668_v20 = vmul.f32 %v10839_v63, %v5667_v9  ;;  %vm5670_vm15 = vcmp.lt.f32.partialorder %v5669_v3, 0.0004427343 }
 0x86c   : > { %v8465_v45 = vpop.f32.mrb[72].mxu1  ;;  %8889 = vtanh.f32 %v5764_v47  ;;  %v5765_v15 = vadd.f32 %v5653_v55, %v5541_v50  ;;  %v5635_v7 = vsel %vm10846_vm11, %v5632_v8, %v5629_v17 }
 0x86d   : > { %v5507_v4 = vpop.f32.mrb[73].mxu1  ;;  %v10868_v58 = vadd.f32 %v8465_v45, %v10790_v18  ;;  %8891 = vtanh.f32 %v5762_v13  ;;  %v5763_v56 = vadd.f32 %v5635_v7, %v5539_v27 }
 0x86e   : > { %v10871_v38 = vadd.f32 %v10790_v18, %v5507_v4  ;;  %v8466_v61 = vpop.f32.mrb[74].mxu1  ;;  %v8882_v50 = vpop.eup %8881  ;;  %8893 = vtanh.f32 %v5765_v15 }
 0x86f   : > { %v10880_v43 = vadd.f32 %v8466_v61, %v10790_v18  ;;  %v5510_v44 = vpop.f32.mrb[75].mxu1  ;;  %v5564_v25 = vand.u32 2147483647, %v10868_v58  ;;  %v8884_v46 = vpop.eup %8883  ;;  %v5674_v29 = vmul.f32 0.6931472, %v8882_v50  ;;  %8895 = vtanh.f32 %v5763_v56 }
 0x870   : > { %v5562_v39 = vand.u32 2147483647, %v10871_v38  ;;  %v8886_v42 = vpop.eup %8885  ;;  %v5656_v41 = vmul.f32 0.6931472, %v8884_v46  ;;  %v10891_v6 = vadd.f32 %v10790_v18, %v5510_v44 }
 0x871   : > { %v5580_v2 = vsub.f32 0.0, %v5564_v25  ;;  %v5565_v10 = vand.u32 2147483647, %v10880_v43  ;;  %v5680_v11 = vsel %vm10850_vm12, %v5677_v26, %v5674_v29  ;;  %v5683_v27 = vmul.f32 0.6931472, %v8886_v42  ;;  %v8888_v31 = vpop.eup %8887 }
 0x872   : > { %v5578_v49 = vsub.f32 0.0, %v5562_v39  ;;  %v5768_v60 = vadd.f32 %v5680_v11, %v5544_v0  ;;  %v5662_v5 = vsel %vm10856_vm13, %v5659_v14, %v5656_v41  ;;  %v5665_v52 = vmul.f32 0.6931472, %v8888_v31 }
 0x873   : > { %v5581_v59 = vsub.f32 0.0, %v5565_v10  ;;  %v5766_v40 = vadd.f32 %v5662_v5, %v5542_v53  ;;  %v5689_v62 = vsel %vm10875_vm14, %v5686_v34, %v5683_v27  ;;  %v5606_v8 = vmul.f32 1.442695, %v5580_v2 }
 0x874   : > { %8897 = vtanh.f32 %v5768_v60  ;;  %v5769_v36 = vadd.f32 %v5689_v62, %v5545_v28  ;;  %v5543_v0 = vmax.f32 %v10820_v22, 0.0  ;;  %v5671_v54 = vsel %vm5670_vm15, %v5668_v20, %v5665_v52 }
 0x875   : > { %8899 = vtanh.f32 %v5766_v40  ;;  %v5602_v16 = vmul.f32 1.442695, %v5578_v49  ;;  %v5563_v63 = vand.u32 2147483647, %v10891_v6  ;;  %v5608_v33 = vmul.f32 1.442695, %v5581_v59 }
 0x876   : > { %v8890_v26 = vpop.eup %8889  ;;  %8901 = vtanh.f32 %v5769_v36  ;;  %v5767_v53 = vadd.f32 %v5671_v54, %v5543_v0 }
 0x877   : > { %v8892_v48 = vpop.eup %8891  ;;  %8903 = vpow2.f32 %v5606_v8  ;;  %v5579_v47 = vsub.f32 0.0, %v5563_v63  ;;  %v5796_v13 = vmul.f32 %v8890_v26, %v10793_v51  ;;  %v5548_v63 = vmax.f32 %v10868_v58, 0.0 }
 0x878   : > { %v8469_v1 = vpop.f32.mrb[76].mxu1  ;;  %v8894_v14 = vpop.eup %8893  ;;  %8905 = vtanh.f32 %v5767_v53  ;;  %v5794_v15 = vmul.f32 %v8892_v48, %v10796_v23 }
 0x879   : > { %v10907_v32 = vadd.f32 %v8469_v1, %v10790_v18  ;;  %v5523_v28 = vpop.f32.mrb[77].mxu1  ;;  %v5797_v55 = vmul.f32 %v8894_v14, %v10800_v19  ;;  %8907 = vpow2.f32 %v5602_v16  ;;  %v5604_v17 = vmul.f32 1.442695, %v5579_v47  ;;  %v8896_v4 = vpop.eup %8895 }
 0x87a   : > { %v10910_v35 = vadd.f32 %v10790_v18, %v5523_v28  ;;  %v8470_v45 = vpop.f32.mrb[78].mxu1  ;;  %8909 = vpow2.f32 %v5608_v33  ;;  %v5795_v44 = vmul.f32 %v8896_v4, %v10804_v57  ;;  %v5549_v14 = vmax.f32 %v10880_v43, 0.0 }
 0x87b   : > { %v5526_v12 = vpop.f32.mrb[79].mxu1  ;;  %v5568_v61 = vand.u32 2147483647, %v10907_v32  ;;  %v5811_v21 = vpack.c.bf16 %v5797_v55, %v5796_v13  ;;  %8911 = vpow2.f32 %v5604_v17  ;;  %v10919_v50 = vadd.f32 %v8470_v45, %v10790_v18 }
 0x87c   : > { %v5566_v7 = vand.u32 2147483647, %v10910_v35  ;;  %v10922_v56 = vadd.f32 %v10790_v18, %v5526_v12  ;;  %v5810_v23 = vpack.c.bf16 %v5795_v44, %v5794_v15  ;;  %v5547_v17 = vmax.f32 %v10891_v6, 0.0 }
 0x87d   : > { %v5584_v51 = vsub.f32 0.0, %v5568_v61  ;;  %v5569_v9 = vand.u32 2147483647, %v10919_v50 }
 0x87e   : > { %v5582_v19 = vsub.f32 0.0, %v5566_v7  ;;  %v8898_v25 = vpop.eup %8897  ;;  %v5567_v39 = vand.u32 2147483647, %v10922_v56  ;;  %8487 = vmatprep.mubr.bf16.mxu0 %v5810_v23 }
 0x87f   : > { %v5614_v46 = vmul.f32 1.442695, %v5584_v51  ;;  %v8900_v34 = vpop.eup %8899  ;;  %v5585_v3 = vsub.f32 0.0, %v5569_v9  ;;  %v5800_v42 = vmul.f32 %v8898_v25, %v10809_v30  ;;  %8488 = vmatmul.mubr.bf16.vlgmr.msra.gmra.mrb[48].mxu0 %v5811_v21 }
 0x880   : > { %v5610_v29 = vmul.f32 1.442695, %v5582_v19  ;;  %v8902_v57 = vpop.eup %8901  ;;  %v5583_v10 = vsub.f32 0.0, %v5567_v39 }
 0x881   : > { %8913 = vpow2.f32 %v5614_v46  ;;  %v8904_v41 = vpop.eup %8903  ;;  %v5801_v18 = vmul.f32 %v8902_v57, %v10816_v37  ;;  %v5616_v2 = vmul.f32 1.442695, %v5585_v3  ;;  %v5798_v37 = vmul.f32 %v8900_v34, %v10812_v24 }
 0x882   : > { %8915 = vpow2.f32 %v5610_v29  ;;  %v8906_v11 = vpop.eup %8905  ;;  %v5708_v27 = vadd.f32 1.0, %v8904_v41  ;;  %v5612_v40 = vmul.f32 1.442695, %v5583_v10  ;;  %v5711_v52 = vmul.f32 -0.5, %v8904_v41 }
 0x883   : > { %v8908_v49 = vpop.eup %8907  ;;  %8917 = vpow2.f32 %v5616_v2  ;;  %v5813_v31 = vpack.c.bf16 %v5801_v18, %v5800_v42  ;;  %v5799_v59 = vmul.f32 %v8906_v11, %v10820_v22  ;;  %v5714_v33 = vand.u32 2147483647, %v8904_v41 }
 0x884   : > { %v8910_v60 = vpop.eup %8909  ;;  %8919 = vlog2.f32 %v5708_v27  ;;  %v5690_v5 = vadd.f32 1.0, %v8908_v49  ;;  %v5693_v8 = vmul.f32 -0.5, %v8908_v49  ;;  %v5712_v22 = vadd.f32 1.0, %v5711_v52 }
 0x885   : > { %v8912_v20 = vpop.eup %8911  ;;  %v5717_v30 = vadd.f32 1.0, %v8910_v60  ;;  %v5812_v36 = vpack.c.bf16 %v5799_v59, %v5798_v37  ;;  %v5720_v54 = vmul.f32 -0.5, %v8910_v60  ;;  %v5546_v24 = vmax.f32 %v10871_v38, 0.0 }
 0x886   : > { %8921 = vlog2.f32 %v5690_v5  ;;  %v5699_v62 = vadd.f32 1.0, %v8912_v20  ;;  %v5702_v26 = vmul.f32 -0.5, %v8912_v20  ;;  %v5696_v1 = vand.u32 2147483647, %v8908_v49 }
 0x887   : > { %8923 = vlog2.f32 %v5717_v30  ;;  %8491 = vmatprep.mubr.bf16.mxu0 %v5812_v36  ;;  %v5694_v28 = vadd.f32 1.0, %v5693_v8  ;;  %v5723_v45 = vand.u32 2147483647, %v8910_v60  ;;  %v5721_v55 = vadd.f32 1.0, %v5720_v54 }
 0x888   : > { %8925 = vlog2.f32 %v5699_v62  ;;  %8492 = vmatmul.mubr.bf16.gmra.mrb[52].mxu0 %v5813_v31  ;;  %v5705_v12 = vand.u32 2147483647, %v8912_v20  ;;  %v5713_v61 = vmul.f32 %v8904_v41, %v5712_v22  ;;  %v5703_v7 = vadd.f32 1.0, %v5702_v26 }
 0x889   : > { %8927 = vpow2.f32 %v5612_v40  ;;  %vm5715_vm0 = vcmp.lt.f32.partialorder %v5714_v33, 0.0004427343  ;;  %vm10943_vm1 = vcmp.lt.f32.partialorder %v5696_v1, 0.0004427343  ;;  %v5695_v25 = vmul.f32 %v8908_v49, %v5694_v28 }
 0x88a   : > { %vm10948_vm2 = vcmp.lt.f32.partialorder %v5723_v45, 0.0004427343  ;;  %v5722_v39 = vmul.f32 %v8910_v60, %v5721_v55  ;;  %vm5706_vm3 = vcmp.lt.f32.partialorder %v5705_v12, 0.0004427343  ;;  %v5704_v18 = vmul.f32 %v8912_v20, %v5703_v7 }
 0x88b   : > { %v10930_v0 = vpop.eup %8913  ;;  %v5552_v36 = vmax.f32 %v10907_v32, 0.0  ;;  %v5551_v46 = vmax.f32 %v10922_v56, 0.0 }
 0x88c   : > { %v10932_v16 = vpop.eup %8915  ;;  %v5744_v53 = vadd.f32 1.0, %v10930_v0  ;;  %v5747_v51 = vmul.f32 -0.5, %v10930_v0  ;;  %v5750_v49 = vand.u32 2147483647, %v10930_v0 }
 0x88d   : > { %v5726_v48 = vadd.f32 1.0, %v10932_v16  ;;  %v10938_v47 = vpop.eup %8917  ;;  %v5729_v30 = vmul.f32 -0.5, %v10932_v16 }
 0x88e   : > { %8929 = vlog2.f32 %v5744_v53  ;;  %v8920_v13 = vpop.eup %8919  ;;  %v5753_v4 = vadd.f32 1.0, %v10938_v47  ;;  %v5756_v2 = vmul.f32 -0.5, %v10938_v47  ;;  %v5748_v27 = vadd.f32 1.0, %v5747_v51 }
 0x88f   : > { %v5710_v15 = vmul.f32 0.6931472, %v8920_v13  ;;  %8931 = vlog2.f32 %v5726_v48  ;;  %v5759_v52 = vand.u32 2147483647, %v10938_v47  ;;  %vm5751_vm4 = vcmp.lt.f32.partialorder %v5750_v49, 0.0004427343 }
 0x890   : > { %v8922_v21 = vpop.eup %8921  ;;  %8933 = vlog2.f32 %v5753_v4  ;;  %v5757_v20 = vadd.f32 1.0, %v5756_v2  ;;  %v5749_v37 = vmul.f32 %v10930_v0, %v5748_v27  ;;  %v5730_v22 = vadd.f32 1.0, %v5729_v30  ;;  %v8751_v27 = vld [vmem:[%s11424_s2 + $0x2f0] sm:$0xff]   ;;  %v8752_v49 = vld [vmem:[%s11424_s2 + $0x2f8] sm:$0xff]  }
 0x891   : > { %v8924_v19 = vpop.eup %8923  ;;  %v5716_v9 = vsel %vm5715_vm0, %v5713_v61, %v5710_v15  ;;  %v5692_v23 = vmul.f32 0.6931472, %v8922_v21  ;;  %v5732_v53 = vand.u32 2147483647, %v10932_v16  ;;  %v5553_v48 = vmax.f32 %v10919_v50, 0.0 }
 0x892   : > { %v8926_v29 = vpop.eup %8925  ;;  %v5772_v34 = vadd.f32 %v5716_v9, %v5548_v63  ;;  %v5719_v3 = vmul.f32 0.6931472, %v8924_v19  ;;  %vm5760_vm5 = vcmp.lt.f32.partialorder %v5759_v52, 0.0004427343  ;;  %v5550_v15 = vmax.f32 %v10910_v35, 0.0 }
 0x893   : > { %v8928_v57 = vpop.eup %8927  ;;  %v5698_v42 = vsel %vm10943_vm1, %v5695_v25, %v5692_v23  ;;  %v5701_v41 = vmul.f32 0.6931472, %v8926_v29  ;;  %vm5733_vm6 = vcmp.lt.f32.partialorder %v5732_v53, 0.0004427343 }
 0x894   : > { %v5770_v10 = vadd.f32 %v5698_v42, %v5546_v24  ;;  %v5725_v11 = vsel %vm10948_vm2, %v5722_v39, %v5719_v3  ;;  %8935 = vtanh.f32 %v5772_v34  ;;  %v5735_v60 = vadd.f32 1.0, %v8928_v57 }
 0x895   : > { %v5773_v31 = vadd.f32 %v5725_v11, %v5549_v14  ;;  %v5707_v5 = vsel %vm5706_vm3, %v5704_v18, %v5701_v41  ;;  %v5758_v24 = vmul.f32 %v10938_v47, %v5757_v20  ;;  %v5738_v0 = vmul.f32 -0.5, %v8928_v57  ;;  %v8750_v11 = vld [vmem:[%s11424_s2 + $0x2e8] sm:$0xff]  }
 0x896   : > { %8937 = vtanh.f32 %v5770_v10  ;;  %v5771_v59 = vadd.f32 %v5707_v5, %v5547_v17  ;;  %v5731_v14 = vmul.f32 %v10932_v16, %v5730_v22  ;;  %v5741_v47 = vand.u32 2147483647, %v8928_v57  ;;  %v8745_v10 = vld [vmem:[%s11424_s2 + $0x2c0] sm:$0xff]  }
 0x897   : > { %8939 = vtanh.f32 %v5773_v31  ;;  %v5739_v12 = vadd.f32 1.0, %v5738_v0  ;;  %8503 = vmatprep.subr.bf16.mxu1 %v8745_v10  ;;  %v11003_v31 = vld [vmem:[%s11425_s3 + $0x8] ss:$0 sm:$0xff] }
 0x898   : > { %v8930_v40 = vpop.eup %8929  ;;  %8941 = vtanh.f32 %v5771_v59  ;;  %vm5742_vm7 = vcmp.lt.f32.partialorder %v5741_v47, 0.0004427343  ;;  %8504 = vmatpush3.bf16.msra.mxu1 %v8745_v10 }
 0x899   : > { %v5746_v62 = vmul.f32 0.6931472, %v8930_v40  ;;  %v8932_v8 = vpop.eup %8931  ;;  %8943 = vlog2.f32 %v5735_v60  ;;  %v5740_v23 = vmul.f32 %v8928_v57, %v5739_v12 }
 0x89a   : > { %v8934_v54 = vpop.eup %8933  ;;  %v5728_v1 = vmul.f32 0.6931472, %v8932_v8 }
 0x89b   : > { %v5752_v63 = vsel %vm5751_vm4, %v5749_v37, %v5746_v62  ;;  %v5755_v33 = vmul.f32 0.6931472, %v8934_v54 }
 0x89c   : > { %v5776_v26 = vadd.f32 %v5752_v63, %v5552_v36  ;;  %v5734_v17 = vsel %vm5733_vm6, %v5731_v14, %v5728_v1 }
 0x89d   : > { %v5761_v28 = vsel %vm5760_vm5, %v5758_v24, %v5755_v33  ;;  %v5774_v19 = vadd.f32 %v5734_v17, %v5550_v15 }
 0x89e   : > { %8945 = vtanh.f32 %v5776_v26  ;;  %v5777_v45 = vadd.f32 %v5761_v28, %v5553_v48  ;;  %v8936_v13 = vpop.eup %8935 }
 0x89f   : > { %v5804_v7 = vmul.f32 %v8936_v13, %v10868_v58 }
 0x8a0   : > { %v8938_v55 = vpop.eup %8937  ;;  %8947 = vtanh.f32 %v5777_v45 }
 0x8a1   : > { %v8940_v4 = vpop.eup %8939  ;;  %v5802_v51 = vmul.f32 %v8938_v55, %v10871_v38  ;;  %8949 = vtanh.f32 %v5774_v19 }
 0x8a2   : > { %v8942_v61 = vpop.eup %8941  ;;  %v5805_v21 = vmul.f32 %v8940_v4, %v10880_v43 }
 0x8a3   : > { %v8944_v44 = vpop.eup %8943  ;;  %v5803_v16 = vmul.f32 %v8942_v61, %v10891_v6 }
 0x8a4   : > { %v5737_v9 = vmul.f32 0.6931472, %v8944_v44  ;;  %v5815_v25 = vpack.c.bf16 %v5805_v21, %v5804_v7 }
 0x8a5   : > { %v5814_v29 = vpack.c.bf16 %v5803_v16, %v5802_v51 }
 0x8a6   : > { %v5743_v34 = vsel %vm5742_vm7, %v5740_v23, %v5737_v9 }
 0x8a7   : > { %v5775_v3 = vadd.f32 %v5743_v34, %v5551_v46  ;;  %8495 = vmatprep.mubr.bf16.mxu0 %v5814_v29 }
 0x8a8   : > { %v8946_v58 = vpop.eup %8945  ;;  %8496 = vmatmul.mubr.bf16.gmra.mrb[56].mxu0 %v5815_v25 }
 0x8a9   : > { %8951 = vtanh.f32 %v5775_v3  ;;  %v5808_v38 = vmul.f32 %v8946_v58, %v10907_v32  ;;  %v8746_v32 = vld [vmem:[%s11424_s2 + $0x2c8] sm:$0xff]  }
 0x8aa   : > { %v8948_v43 = vpop.eup %8947  ;;  %8505 = vmatprep.subr.bf16.mxu1 %v8746_v32 }
 0x8ab   : > { %v5809_v6 = vmul.f32 %v8948_v43, %v10919_v50  ;;  %v8950_v42 = vpop.eup %8949  ;;  %8506 = vmatpush3.bf16.msra.mxu1 %v8746_v32  ;;  %v8748_v50 = vld [vmem:[%s11424_s2 + $0x2d8] sm:$0xff]  }
 0x8ac   : > { %v5806_v41 = vmul.f32 %v8950_v42, %v10910_v35  ;;  %v8747_v35 = vld [vmem:[%s11424_s2 + $0x2d0] sm:$0xff]  }
 0x8ad   : > { %v5817_v39 = vpack.c.bf16 %v5809_v6, %v5808_v38  ;;  %8507 = vmatprep.subr.bf16.mxu1 %v8747_v35 }
 0x8af   : > { %8508 = vmatpush3.bf16.msra.mxu1 %v8747_v35 }
 0x8b0   : > { %8509 = vmatprep.subr.bf16.mxu1 %v8748_v50 }
 0x8b3   : > { %v8952_v57 = vpop.eup %8951  ;;  %8510 = vmatpush3.bf16.msra.mxu1 %v8748_v50 }
 0x8b4   : > { %v5807_v18 = vmul.f32 %v8952_v57, %v10922_v56  ;;  %v8749_v56 = vld [vmem:[%s11424_s2 + $0x2e0] sm:$0xff]  }
 0x8b5   : > { %8511 = vmatprep.subr.bf16.mxu1 %v8749_v56 }
 0x8b6   : > { %v5816_v2 = vpack.c.bf16 %v5807_v18, %v5806_v41 }
 0x8b7   : > { %8512 = vmatpush3.bf16.msra.mxu1 %v8749_v56 }
 0x8b8   : > { %8499 = vmatprep.mubr.bf16.mxu0 %v5816_v2  ;;  %8513 = vmatprep.subr.bf16.mxu1 %v8750_v11 }
 0x8b9   : > { %8500 = vmatmul.mubr.bf16.gmra.mrb[60].mxu0 %v5817_v39 }
 0x8bb   : > { %8514 = vmatpush3.bf16.msra.mxu1 %v8750_v11 }
 0x8bc   : > { %8515 = vmatprep.subr.bf16.mxu1 %v8751_v27 }
 0x8bf   : > { %8516 = vmatpush3.bf16.msra.mxu1 %v8751_v27 }
 0x8c0   : > { %8517 = vmatprep.subr.bf16.mxu1 %v8752_v49 }
 0x8c3   : > { %8518 = vmatpush3.bf16.msra.mxu1 %v8752_v49 }
 0x952   : > { %v8489_v5 = vpop.f32.mrb[48].mxu0 }
 0x953   : > { %v11006_v60 = vadd.f32 %v8489_v5, %v11003_v31  ;;  %v5922_v59 = vpop.f32.mrb[49].mxu0 }
 0x954   : > { %v11009_v30 = vadd.f32 %v11003_v31, %v5922_v59  ;;  %v8490_v40 = vpop.f32.mrb[50].mxu0 }
 0x955   : > { %v6003_v20 = vand.u32 2147483647, %v11006_v60  ;;  %v11013_v62 = vadd.f32 %v8490_v40, %v11003_v31  ;;  %v5925_v37 = vpop.f32.mrb[51].mxu0  ;;  %v5987_v32 = vmax.f32 %v11006_v60, 0.0 }
 0x956   : > { %v6001_v52 = vand.u32 2147483647, %v11009_v30  ;;  %v11017_v8 = vadd.f32 %v11003_v31, %v5925_v37  ;;  %v5985_v11 = vmax.f32 %v11009_v30, 0.0 }
 0x957   : > { %v6019_v36 = vsub.f32 0.0, %v6003_v20  ;;  %v6004_v54 = vand.u32 2147483647, %v11013_v62  ;;  %v5988_v27 = vmax.f32 %v11013_v62, 0.0 }
 0x958   : > { %v6017_v63 = vsub.f32 0.0, %v6001_v52  ;;  %v6002_v22 = vand.u32 2147483647, %v11017_v8 }
 0x959   : > { %v6037_v26 = vmul.f32 1.442695, %v6019_v36  ;;  %v6020_v53 = vsub.f32 0.0, %v6004_v54 }
 0x95a   : > { %v6033_v33 = vmul.f32 1.442695, %v6017_v63  ;;  %v6018_v24 = vsub.f32 0.0, %v6002_v22 }
 0x95b   : > { %8953 = vpow2.f32 %v6037_v26  ;;  %v6039_v1 = vmul.f32 1.442695, %v6020_v53  ;;  %v8493_v0 = vpop.f32.mrb[52].mxu0 }
 0x95c   : > { %8955 = vpow2.f32 %v6033_v33  ;;  %v6035_v48 = vmul.f32 1.442695, %v6018_v24  ;;  %v11022_v28 = vadd.f32 %v8493_v0, %v11003_v31  ;;  %v5938_v14 = vpop.f32.mrb[53].mxu0 }
 0x95d   : > { %8957 = vpow2.f32 %v6039_v1  ;;  %v11025_v45 = vadd.f32 %v11003_v31, %v5938_v14  ;;  %v8494_v13 = vpop.f32.mrb[54].mxu0 }
 0x95e   : > { %8959 = vpow2.f32 %v6035_v48  ;;  %v6007_v55 = vand.u32 2147483647, %v11022_v28  ;;  %v11029_v17 = vadd.f32 %v8494_v13, %v11003_v31  ;;  %v5941_v12 = vpop.f32.mrb[55].mxu0  ;;  %v5986_v48 = vmax.f32 %v11017_v8, 0.0 }
 0x95f   : > { %v6005_v4 = vand.u32 2147483647, %v11025_v45  ;;  %v11034_v61 = vadd.f32 %v11003_v31, %v5941_v12 }
 0x960   : > { %v6023_v15 = vsub.f32 0.0, %v6007_v55  ;;  %v6008_v47 = vand.u32 2147483647, %v11029_v17 }
 0x961   : > { %v6021_v44 = vsub.f32 0.0, %v6005_v4  ;;  %v6006_v29 = vand.u32 2147483647, %v11034_v61 }
 0x962   : > { %v6045_v21 = vmul.f32 1.442695, %v6023_v15  ;;  %v6024_v46 = vsub.f32 0.0, %v6008_v47 }
 0x963   : > { %v6041_v34 = vmul.f32 1.442695, %v6021_v44  ;;  %v6022_v6 = vsub.f32 0.0, %v6006_v29  ;;  %v5991_v29 = vmax.f32 %v11022_v28, 0.0 }
 0x964   : > { %8961 = vpow2.f32 %v6045_v21  ;;  %v6047_v38 = vmul.f32 1.442695, %v6024_v46 }
 0x965   : > { %v8954_v7 = vpop.eup %8953  ;;  %v6043_v42 = vmul.f32 1.442695, %v6022_v6 }
 0x966   : > { %v8956_v51 = vpop.eup %8955  ;;  %v6083_v16 = vadd.f32 1.0, %v8954_v7  ;;  %v6086_v58 = vmul.f32 -0.5, %v8954_v7  ;;  %v6089_v41 = vand.u32 2147483647, %v8954_v7 }
 0x967   : > { %v8958_v19 = vpop.eup %8957  ;;  %v6065_v9 = vadd.f32 1.0, %v8956_v51  ;;  %v6068_v43 = vmul.f32 -0.5, %v8956_v51  ;;  %v6071_v35 = vand.u32 2147483647, %v8956_v51 }
 0x968   : > { %v8960_v23 = vpop.eup %8959  ;;  %8963 = vlog2.f32 %v6083_v16  ;;  %v6092_v25 = vadd.f32 1.0, %v8958_v19  ;;  %v6095_v39 = vmul.f32 -0.5, %v8958_v19  ;;  %v6087_v57 = vadd.f32 1.0, %v6086_v58 }
 0x969   : > { %8965 = vlog2.f32 %v6065_v9  ;;  %v6074_v3 = vadd.f32 1.0, %v8960_v23  ;;  %v6077_v18 = vmul.f32 -0.5, %v8960_v23  ;;  %v6069_v2 = vadd.f32 1.0, %v6068_v43 }
 0x96a   : > { %8967 = vlog2.f32 %v6092_v25  ;;  %v6096_v50 = vadd.f32 1.0, %v6095_v39  ;;  %v6098_v49 = vand.u32 2147483647, %v8958_v19  ;;  %v6088_v20 = vmul.f32 %v8954_v7, %v6087_v57 }
 0x96b   : > { %8969 = vlog2.f32 %v6074_v3  ;;  %vm6090_vm8 = vcmp.lt.f32.partialorder %v6089_v41, 0.0004427343  ;;  %v6078_v37 = vadd.f32 1.0, %v6077_v18  ;;  %v6070_v54 = vmul.f32 %v8956_v51, %v6069_v2 }
 0x96c   : > { %8971 = vpow2.f32 %v6041_v34  ;;  %v6080_v63 = vand.u32 2147483647, %v8960_v23  ;;  %vm6072_vm9 = vcmp.lt.f32.partialorder %v6071_v35, 0.0004427343  ;;  %v6097_v53 = vmul.f32 %v8958_v19, %v6096_v50 }
 0x96d   : > { %8973 = vpow2.f32 %v6047_v38  ;;  %vm6099_vm10 = vcmp.lt.f32.partialorder %v6098_v49, 0.0004427343  ;;  %v6079_v12 = vmul.f32 %v8960_v23, %v6078_v37  ;;  %v5989_v34 = vmax.f32 %v11025_v45, 0.0 }
 0x96e   : > { %8975 = vpow2.f32 %v6043_v42  ;;  %v11037_v10 = vpop.eup %8961  ;;  %vm6081_vm11 = vcmp.lt.f32.partialorder %v6080_v63, 0.0004427343  ;;  %v5992_v35 = vmax.f32 %v11029_v17, 0.0 }
 0x96f   : > { %v6119_v5 = vadd.f32 1.0, %v11037_v10  ;;  %v6122_v21 = vmul.f32 -0.5, %v11037_v10  ;;  %v6125_v25 = vand.u32 2147483647, %v11037_v10 }
 0x971   : > { %8977 = vlog2.f32 %v6119_v5  ;;  %v6123_v43 = vadd.f32 1.0, %v6122_v21  ;;  %vm11057_vm12 = vcmp.lt.f32.partialorder %v6125_v25, 0.0004427343 }
 0x972   : > { %v8964_v56 = vpop.eup %8963 }
 0x973   : > { %v8966_v59 = vpop.eup %8965  ;;  %v6085_v40 = vmul.f32 0.6931472, %v8964_v56  ;;  %v6124_v5 = vmul.f32 %v11037_v10, %v6123_v43 }
 0x974   : > { %v8968_v52 = vpop.eup %8967  ;;  %v6067_v36 = vmul.f32 0.6931472, %v8966_v59 }
 0x975   : > { %v6091_v22 = vsel %vm6090_vm8, %v6088_v20, %v6085_v40  ;;  %v6094_v26 = vmul.f32 0.6931472, %v8968_v52  ;;  %v8970_v33 = vpop.eup %8969 }
 0x976   : > { %v6211_v24 = vadd.f32 %v6091_v22, %v5987_v32  ;;  %v6073_v1 = vsel %vm6072_vm9, %v6070_v54, %v6067_v36  ;;  %v8972_v0 = vpop.eup %8971  ;;  %v6076_v55 = vmul.f32 0.6931472, %v8970_v33 }
 0x977   : > { %v6209_v14 = vadd.f32 %v6073_v1, %v5985_v11  ;;  %v6100_v13 = vsel %vm6099_vm10, %v6097_v53, %v6094_v26  ;;  %v8974_v4 = vpop.eup %8973  ;;  %v6101_v47 = vadd.f32 1.0, %v8972_v0  ;;  %v6104_v19 = vmul.f32 -0.5, %v8972_v0 }
 0x978   : > { %8979 = vtanh.f32 %v6211_v24  ;;  %v6212_v15 = vadd.f32 %v6100_v13, %v5988_v27  ;;  %v6082_v7 = vsel %vm6081_vm11, %v6079_v12, %v6076_v55  ;;  %v6128_v44 = vadd.f32 1.0, %v8974_v4  ;;  %v11045_v51 = vpop.eup %8975 }
 0x979   : > { %8981 = vtanh.f32 %v6209_v14  ;;  %v6210_v16 = vadd.f32 %v6082_v7, %v5986_v48  ;;  %v6110_v23 = vadd.f32 1.0, %v11045_v51  ;;  %v6131_v3 = vmul.f32 -0.5, %v8974_v4 }
 0x97a   : > { %8983 = vtanh.f32 %v6212_v15  ;;  %v6107_v38 = vand.u32 2147483647, %v8972_v0  ;;  %v6105_v57 = vadd.f32 1.0, %v6104_v19  ;;  %v6134_v41 = vand.u32 2147483647, %v8974_v4 }
 0x97b   : > { %v8497_v9 = vpop.f32.mrb[56].mxu0  ;;  %8985 = vlog2.f32 %v6101_v47  ;;  %v8978_v42 = vpop.eup %8977  ;;  %v6132_v56 = vadd.f32 1.0, %v6131_v3  ;;  %v6113_v11 = vmul.f32 -0.5, %v11045_v51  ;;  %v6116_v26 = vand.u32 2147483647, %v11045_v51 }
 0x97c   : > { %v5954_v46 = vpop.f32.mrb[57].mxu0  ;;  %8987 = vtanh.f32 %v6210_v16  ;;  %v11052_v6 = vadd.f32 %v8497_v9, %v11003_v31  ;;  %v6121_v2 = vmul.f32 0.6931472, %v8978_v42  ;;  %vm11069_vm13 = vcmp.lt.f32.partialorder %v6107_v38, 0.0004427343 }
 0x97d   : > { %v8498_v58 = vpop.f32.mrb[58].mxu0  ;;  %8989 = vlog2.f32 %v6128_v44  ;;  %v11055_v18 = vadd.f32 %v11003_v31, %v5954_v46  ;;  %v6106_v52 = vmul.f32 %v8972_v0, %v6105_v57  ;;  %vm11077_vm14 = vcmp.lt.f32.partialorder %v6134_v41, 0.0004427343 }
 0x97e   : > { %v5957_v39 = vpop.f32.mrb[59].mxu0  ;;  %8991 = vlog2.f32 %v6110_v23  ;;  %v11063_v50 = vadd.f32 %v8498_v58, %v11003_v31  ;;  %v6011_v27 = vand.u32 2147483647, %v11052_v6  ;;  %v6127_v10 = vsel %vm11057_vm12, %v6124_v5, %v6121_v2 }
 0x97f   : > { %v6009_v49 = vand.u32 2147483647, %v11055_v18  ;;  %v11075_v20 = vadd.f32 %v11003_v31, %v5957_v39  ;;  %v6133_v1 = vmul.f32 %v8974_v4, %v6132_v56  ;;  %v6114_v48 = vadd.f32 1.0, %v6113_v11 }
 0x980   : > { %v6012_v40 = vand.u32 2147483647, %v11063_v50  ;;  %v6027_v54 = vsub.f32 0.0, %v6011_v27  ;;  %v6215_v44 = vadd.f32 %v6127_v10, %v5991_v29  ;;  %vm6117_vm15 = vcmp.lt.f32.partialorder %v6116_v26, 0.0004427343 }
 0x981   : > { %v6025_v63 = vsub.f32 0.0, %v6009_v49  ;;  %v6010_v33 = vand.u32 2147483647, %v11075_v20 }
 0x982   : > { %v8980_v37 = vpop.eup %8979  ;;  %v6028_v53 = vsub.f32 0.0, %v6012_v40  ;;  %v6053_v14 = vmul.f32 1.442695, %v6027_v54 }
 0x983   : > { %v8982_v22 = vpop.eup %8981  ;;  %v6049_v0 = vmul.f32 1.442695, %v6025_v63  ;;  %v6243_v55 = vmul.f32 %v8980_v37, %v11006_v60  ;;  %v6026_v47 = vsub.f32 0.0, %v6010_v33 }
 0x984   : > { %v8984_v24 = vpop.eup %8983  ;;  %v6055_v15 = vmul.f32 1.442695, %v6028_v53  ;;  %v6241_v21 = vmul.f32 %v8982_v22, %v11009_v30  ;;  %8993 = vpow2.f32 %v6053_v14 }
 0x985   : > { %v8986_v13 = vpop.eup %8985  ;;  %v6244_v12 = vmul.f32 %v8984_v24, %v11013_v62  ;;  %8995 = vpow2.f32 %v6049_v0  ;;  %v6051_v25 = vmul.f32 1.442695, %v6026_v47  ;;  %v6115_v62 = vmul.f32 %v11045_v51, %v6114_v48 }
 0x986   : > { %v8988_v7 = vpop.eup %8987  ;;  %v6103_v16 = vmul.f32 0.6931472, %v8986_v13  ;;  %8997 = vpow2.f32 %v6055_v15 }
 0x987   : > { %v8990_v19 = vpop.eup %8989  ;;  %v6258_v9 = vpack.c.bf16 %v6244_v12, %v6243_v55  ;;  %v6242_v4 = vmul.f32 %v8988_v7, %v11017_v8  ;;  %8999 = vpow2.f32 %v6051_v25  ;;  %v5990_v8 = vmax.f32 %v11034_v61, 0.0 }
 0x988   : > { %v8992_v23 = vpop.eup %8991  ;;  %v6109_v60 = vsel %vm11069_vm13, %v6106_v52, %v6103_v16  ;;  %v6130_v46 = vmul.f32 0.6931472, %v8990_v19  ;;  %9001 = vtanh.f32 %v6215_v44  ;;  %v5993_v25 = vmax.f32 %v11055_v18, 0.0 }
 0x989   : > { %v6213_v3 = vadd.f32 %v6109_v60, %v5989_v34  ;;  %v6112_v58 = vmul.f32 0.6931472, %v8992_v23  ;;  %v6257_v30 = vpack.c.bf16 %v6242_v4, %v6241_v21  ;;  %v5995_v4 = vmax.f32 %v11052_v6, 0.0 }
 0x98a   : > { %v6136_v29 = vsel %vm11077_vm14, %v6133_v1, %v6130_v46  ;;  %v5996_v46 = vmax.f32 %v11063_v50, 0.0 }
 0x98b   : > { %v6216_v43 = vadd.f32 %v6136_v29, %v5992_v35  ;;  %v6118_v38 = vsel %vm6117_vm15, %v6115_v62, %v6112_v58  ;;  %8519 = vmatprep.mubr.bf16.mxu1 %v6257_v30  ;;  %9003 = vtanh.f32 %v6213_v3 }
 0x98c   : > { %v8501_v39 = vpop.f32.mrb[60].mxu0  ;;  %v6214_v42 = vadd.f32 %v6118_v38, %v5990_v8  ;;  %8520 = vmatmul.mubr.bf16.vlgmr.msra.gmra.mrb[80].mxu1 %v6258_v9 }
 0x98d   : > { %v11096_v51 = vadd.f32 %v8501_v39, %v11003_v31  ;;  %v5970_v34 = vpop.f32.mrb[61].mxu0  ;;  %9005 = vtanh.f32 %v6216_v43 }
 0x98e   : > { %v11099_v57 = vadd.f32 %v11003_v31, %v5970_v34  ;;  %v8502_v41 = vpop.f32.mrb[62].mxu0  ;;  %9007 = vtanh.f32 %v6214_v42  ;;  %v8994_v27 = vpop.eup %8993 }
 0x98f   : > { %v6015_v2 = vand.u32 2147483647, %v11096_v51  ;;  %v11103_v32 = vadd.f32 %v8502_v41, %v11003_v31  ;;  %v5973_v35 = vpop.f32.mrb[63].mxu0  ;;  %v8996_v5 = vpop.eup %8995  ;;  %v6155_v59 = vadd.f32 1.0, %v8994_v27  ;;  %v6158_v53 = vmul.f32 -0.5, %v8994_v27 }
 0x990   : > { %v6013_v56 = vand.u32 2147483647, %v11099_v57  ;;  %v11107_v11 = vadd.f32 %v11003_v31, %v5973_v35  ;;  %v11109_v40 = vpop.eup %8997  ;;  %v6137_v37 = vadd.f32 1.0, %v8996_v5  ;;  %v6140_v1 = vmul.f32 -0.5, %v8996_v5 }
 0x991   : > { %v6031_v49 = vsub.f32 0.0, %v6015_v2  ;;  %v11111_v52 = vpop.eup %8999  ;;  %9009 = vlog2.f32 %v6155_v59  ;;  %v6164_v36 = vadd.f32 1.0, %v11109_v40  ;;  %v6016_v10 = vand.u32 2147483647, %v11103_v32 }
 0x992   : > { %v6029_v54 = vsub.f32 0.0, %v6013_v56  ;;  %v9002_v63 = vpop.eup %9001  ;;  %9011 = vlog2.f32 %v6137_v37  ;;  %v6146_v31 = vadd.f32 1.0, %v11111_v52  ;;  %v6161_v13 = vand.u32 2147483647, %v8994_v27 }
 0x993   : > { %v6061_v22 = vmul.f32 1.442695, %v6031_v49  ;;  %9013 = vlog2.f32 %v6164_v36  ;;  %v6247_v24 = vmul.f32 %v9002_v63, %v11022_v28  ;;  %v6167_v55 = vmul.f32 -0.5, %v11109_v40 }
 0x994   : > { %9015 = vlog2.f32 %v6146_v31  ;;  %v6057_v48 = vmul.f32 1.442695, %v6029_v54  ;;  %v6032_v47 = vsub.f32 0.0, %v6016_v10  ;;  %v6159_v7 = vadd.f32 1.0, %v6158_v53 }
 0x995   : > { %v9004_v26 = vpop.eup %9003  ;;  %9017 = vpow2.f32 %v6061_v22  ;;  %v6149_v21 = vmul.f32 -0.5, %v11111_v52  ;;  %v6014_v28 = vand.u32 2147483647, %v11107_v11  ;;  %v6141_v16 = vadd.f32 1.0, %v6140_v1 }
 0x996   : > { %v6245_v12 = vmul.f32 %v9004_v26, %v11025_v45  ;;  %9019 = vpow2.f32 %v6057_v48  ;;  %v6143_v19 = vand.u32 2147483647, %v8996_v5  ;;  %v6063_v9 = vmul.f32 1.442695, %v6032_v47 }
 0x997   : > { %v9006_v33 = vpop.eup %9005  ;;  %v6168_v23 = vadd.f32 1.0, %v6167_v55  ;;  %v6030_v45 = vsub.f32 0.0, %v6014_v28  ;;  %vm11125_vm0 = vcmp.lt.f32.partialorder %v6161_v13, 0.0004427343  ;;  %v6170_v62 = vand.u32 2147483647, %v11109_v40 }
 0x998   : > { %v9008_v14 = vpop.eup %9007  ;;  %v6248_v0 = vmul.f32 %v9006_v33, %v11029_v17  ;;  %9021 = vpow2.f32 %v6063_v9  ;;  %v6160_v30 = vmul.f32 %v8994_v27, %v6159_v7  ;;  %v6150_v29 = vadd.f32 1.0, %v6149_v21 }
 0x999   : > { %v6246_v15 = vmul.f32 %v9008_v14, %v11034_v61  ;;  %v6059_v8 = vmul.f32 1.442695, %v6030_v45  ;;  %v6142_v39 = vmul.f32 %v8996_v5, %v6141_v16  ;;  %vm6144_vm1 = vcmp.lt.f32.partialorder %v6143_v19, 0.0004427343 }
 0x99a   : > { %v6260_v44 = vpack.c.bf16 %v6248_v0, %v6247_v24  ;;  %v6152_v42 = vand.u32 2147483647, %v11111_v52  ;;  %v6169_v2 = vmul.f32 %v11109_v40, %v6168_v23  ;;  %vm6171_vm2 = vcmp.lt.f32.partialorder %v6170_v62, 0.0004427343 }
 0x99b   : > { %v6259_v17 = vpack.c.bf16 %v6246_v15, %v6245_v12  ;;  %v9010_v60 = vpop.eup %9009  ;;  %9023 = vpow2.f32 %v6059_v8  ;;  %v5994_v27 = vmax.f32 %v11075_v20, 0.0  ;;  %v6151_v54 = vmul.f32 %v11111_v52, %v6150_v29 }
 0x99c   : > { %v9012_v3 = vpop.eup %9011  ;;  %v6157_v58 = vmul.f32 0.6931472, %v9010_v60  ;;  %vm6153_vm3 = vcmp.lt.f32.partialorder %v6152_v42, 0.0004427343  ;;  %v5999_v47 = vmax.f32 %v11096_v51, 0.0 }
 0x99d   : > { %8523 = vmatprep.mubr.bf16.mxu1 %v6259_v17  ;;  %v9014_v43 = vpop.eup %9013  ;;  %v6139_v38 = vmul.f32 0.6931472, %v9012_v3  ;;  %v5997_v3 = vmax.f32 %v11099_v57, 0.0 }
 0x99e   : > { %8524 = vmatmul.mubr.bf16.gmra.mrb[84].mxu1 %v6260_v44  ;;  %v6163_v34 = vsel %vm11125_vm0, %v6160_v30, %v6157_v58  ;;  %v6166_v41 = vmul.f32 0.6931472, %v9014_v43  ;;  %v9016_v35 = vpop.eup %9015 }
 0x99f   : > { %v6219_v56 = vadd.f32 %v6163_v34, %v5995_v4  ;;  %v6145_v49 = vsel %vm6144_vm1, %v6142_v39, %v6139_v38  ;;  %v9018_v59 = vpop.eup %9017  ;;  %v6148_v5 = vmul.f32 0.6931472, %v9016_v35 }
 0x9a0   : > { %v6217_v37 = vadd.f32 %v6145_v49, %v5993_v25  ;;  %v6172_v36 = vsel %vm6171_vm2, %v6169_v2, %v6166_v41  ;;  %v9020_v63 = vpop.eup %9019  ;;  %v6191_v31 = vadd.f32 1.0, %v9018_v59  ;;  %v6194_v24 = vmul.f32 -0.5, %v9018_v59 }
 0x9a1   : > { %9025 = vtanh.f32 %v6219_v56  ;;  %v6220_v22 = vadd.f32 %v6172_v36, %v5996_v46  ;;  %v6154_v40 = vsel %vm6153_vm3, %v6151_v54, %v6148_v5  ;;  %v6173_v10 = vadd.f32 1.0, %v9020_v63 }
 0x9a2   : > { %9027 = vtanh.f32 %v6217_v37  ;;  %v6218_v26 = vadd.f32 %v6154_v40, %v5994_v27  ;;  %v9022_v53 = vpop.eup %9021  ;;  %v6176_v48 = vmul.f32 -0.5, %v9020_v63  ;;  %v6195_v0 = vadd.f32 1.0, %v6194_v24  ;;  %v8759_v24 = vld [vmem:[%s11424_s2 + $0x330] sm:$0xff]  }
 0x9a3   : > { %9029 = vtanh.f32 %v6220_v22  ;;  %v6200_v33 = vadd.f32 1.0, %v9022_v53  ;;  %v6197_v13 = vand.u32 2147483647, %v9018_v59  ;;  %v6203_v55 = vmul.f32 -0.5, %v9022_v53 }
 0x9a4   : > { %9031 = vlog2.f32 %v6191_v31  ;;  %v6177_v7 = vadd.f32 1.0, %v6176_v48  ;;  %v6179_v16 = vand.u32 2147483647, %v9020_v63  ;;  %v6196_v4 = vmul.f32 %v9018_v59, %v6195_v0  ;;  %v11176_v48 = vld [vmem:[%s11425_s3 + $0x9] ss:$0 sm:$0xff] }
 0x9a5   : > { %9033 = vtanh.f32 %v6218_v26  ;;  %v9024_v1 = vpop.eup %9023  ;;  %vm6198_vm4 = vcmp.lt.f32.partialorder %v6197_v13, 0.0004427343  ;;  %v6204_v25 = vadd.f32 1.0, %v6203_v55  ;;  %v6206_v61 = vand.u32 2147483647, %v9022_v53 }
 0x9a6   : > { %9035 = vlog2.f32 %v6173_v10  ;;  %v6182_v52 = vadd.f32 1.0, %v9024_v1  ;;  %v6185_v19 = vmul.f32 -0.5, %v9024_v1  ;;  %v6178_v58 = vmul.f32 %v9020_v63, %v6177_v7 }
 0x9a7   : > { %9037 = vlog2.f32 %v6200_v33  ;;  %vm6180_vm5 = vcmp.lt.f32.partialorder %v6179_v16, 0.0004427343  ;;  %v6205_v39 = vmul.f32 %v9022_v53, %v6204_v25  ;;  %v6188_v42 = vand.u32 2147483647, %v9024_v1  ;;  %v8753_v53 = vld [vmem:[%s11424_s2 + $0x300] sm:$0xff]   ;;  %v8758_v33 = vld [vmem:[%s11424_s2 + $0x328] sm:$0xff]  }
 0x9a8   : > { %9039 = vlog2.f32 %v6182_v52  ;;  %v6186_v29 = vadd.f32 1.0, %v6185_v19  ;;  %vm6207_vm6 = vcmp.lt.f32.partialorder %v6206_v61, 0.0004427343  ;;  %v5998_v49 = vmax.f32 %v11107_v11, 0.0  ;;  %8535 = vmatprep.subr.bf16.mxu0 %v8753_v53  ;;  %8567 = vmatprep.subr.bf16.mxu1 %v8753_v53 }
 0x9a9   : > { %vm6189_vm7 = vcmp.lt.f32.partialorder %v6188_v42, 0.0004427343  ;;  %8536 = vmatpush3.bf16.msra.mxu0 %v8753_v53  ;;  %8575 = vmatpush3.bf16.msra.mxu1 %v8753_v53 }
 0x9aa   : > { %v6187_v56 = vmul.f32 %v9024_v1, %v6186_v29  ;;  %v8760_v1 = vld [vmem:[%s11424_s2 + $0x338] sm:$0xff]  }
 0x9ab   : > { %v9026_v14 = vpop.eup %9025 }
 0x9ac   : > { %v9028_v12 = vpop.eup %9027  ;;  %v6251_v28 = vmul.f32 %v9026_v14, %v11052_v6 }
 0x9ad   : > { %v9030_v15 = vpop.eup %9029  ;;  %v6249_v45 = vmul.f32 %v9028_v12, %v11055_v18  ;;  %v6000_v18 = vmax.f32 %v11103_v32, 0.0 }
 0x9ae   : > { %v9032_v21 = vpop.eup %9031  ;;  %v6252_v44 = vmul.f32 %v9030_v15, %v11063_v50 }
 0x9af   : > { %v9034_v9 = vpop.eup %9033  ;;  %v6193_v17 = vmul.f32 0.6931472, %v9032_v21 }
 0x9b0   : > { %v9036_v23 = vpop.eup %9035  ;;  %v6250_v60 = vmul.f32 %v9034_v9, %v11075_v20  ;;  %v6262_v46 = vpack.c.bf16 %v6252_v44, %v6251_v28 }
 0x9b1   : > { %v6199_v62 = vsel %vm6198_vm4, %v6196_v4, %v6193_v17  ;;  %v6175_v6 = vmul.f32 0.6931472, %v9036_v23  ;;  %v9038_v50 = vpop.eup %9037 }
 0x9b2   : > { %v6223_v30 = vadd.f32 %v6199_v62, %v5999_v47  ;;  %v6261_v8 = vpack.c.bf16 %v6250_v60, %v6249_v45  ;;  %v6202_v38 = vmul.f32 0.6931472, %v9038_v50  ;;  %v9040_v20 = vpop.eup %9039 }
 0x9b3   : > { %v6181_v43 = vsel %vm6180_vm5, %v6178_v58, %v6175_v6  ;;  %v6184_v35 = vmul.f32 0.6931472, %v9040_v20 }
 0x9b4   : > { %8527 = vmatprep.mubr.bf16.mxu1 %v6261_v8  ;;  %v6221_v34 = vadd.f32 %v6181_v43, %v5997_v3  ;;  %v6208_v41 = vsel %vm6207_vm6, %v6205_v39, %v6202_v38  ;;  %9041 = vtanh.f32 %v6223_v30 }
 0x9b5   : > { %8528 = vmatmul.mubr.bf16.gmra.mrb[88].mxu1 %v6262_v46  ;;  %v6224_v2 = vadd.f32 %v6208_v41, %v6000_v18  ;;  %v6190_v27 = vsel %vm6189_vm7, %v6187_v56, %v6184_v35 }
 0x9b6   : > { %v6222_v59 = vadd.f32 %v6190_v27, %v5998_v49 }
 0x9b7   : > { %9043 = vtanh.f32 %v6224_v2 }
 0x9b8   : > { %9045 = vtanh.f32 %v6221_v34 }
 0x9b9   : > { %9047 = vtanh.f32 %v6222_v59 }
 0x9be   : > { %v9042_v37 = vpop.eup %9041 }
 0x9bf   : > { %v6255_v54 = vmul.f32 %v9042_v37, %v11096_v51  ;;  %v8754_v51 = vld [vmem:[%s11424_s2 + $0x308] sm:$0xff]  }
 0x9c0   : > { %8537 = vmatprep.subr.bf16.mxu0 %v8754_v51  ;;  %8568 = vmatprep.subr.bf16.mxu1 %v8754_v51 }
 0x9c1   : > { %v9044_v36 = vpop.eup %9043  ;;  %8538 = vmatpush3.bf16.msra.mxu0 %v8754_v51  ;;  %8576 = vmatpush3.bf16.msra.mxu1 %v8754_v51 }
 0x9c2   : > { %v9046_v5 = vpop.eup %9045  ;;  %v6256_v63 = vmul.f32 %v9044_v36, %v11103_v32  ;;  %v8756_v32 = vld [vmem:[%s11424_s2 + $0x318] sm:$0xff]  }
 0x9c3   : > { %v9048_v22 = vpop.eup %9047  ;;  %v6253_v40 = vmul.f32 %v9046_v5, %v11099_v57  ;;  %v8755_v57 = vld [vmem:[%s11424_s2 + $0x310] sm:$0xff]  }
 0x9c4   : > { %v6264_v31 = vpack.c.bf16 %v6256_v63, %v6255_v54  ;;  %v6254_v10 = vmul.f32 %v9048_v22, %v11107_v11  ;;  %8539 = vmatprep.subr.bf16.mxu0 %v8755_v57  ;;  %8569 = vmatprep.subr.bf16.mxu1 %v8755_v57  ;;  %v8757_v11 = vld [vmem:[%s11424_s2 + $0x320] sm:$0xff]  }
 0x9c5   : > { %8540 = vmatpush3.bf16.msra.mxu0 %v8755_v57  ;;  %8577 = vmatpush3.bf16.msra.mxu1 %v8755_v57 }
 0x9c6   : > { %v6263_v26 = vpack.c.bf16 %v6254_v10, %v6253_v40  ;;  %8541 = vmatprep.subr.bf16.mxu0 %v8756_v32  ;;  %8570 = vmatprep.subr.bf16.mxu1 %v8756_v32 }
 0x9c8   : > { %8531 = vmatprep.mubr.bf16.mxu1 %v6263_v26 }
 0x9c9   : > { %8532 = vmatmul.mubr.bf16.gmra.mrb[92].mxu1 %v6264_v31  ;;  %8542 = vmatpush3.bf16.msra.mxu0 %v8756_v32 }
 0x9ca   : > { %8578 = vmatpush3.bf16.msra.mxu1 %v8756_v32  ;;  %8543 = vmatprep.subr.bf16.mxu0 %v8757_v11 }
 0x9cb   : > { %8571 = vmatprep.subr.bf16.mxu1 %v8757_v11 }
 0x9cd   : > { %8544 = vmatpush3.bf16.msra.mxu0 %v8757_v11 }
 0x9ce   : > { %8579 = vmatpush3.bf16.msra.mxu1 %v8757_v11  ;;  %8545 = vmatprep.subr.bf16.mxu0 %v8758_v33 }
 0x9cf   : > { %8572 = vmatprep.subr.bf16.mxu1 %v8758_v33 }
 0x9d1   : > { %8546 = vmatpush3.bf16.msra.mxu0 %v8758_v33 }
 0x9d2   : > { %8580 = vmatpush3.bf16.msra.mxu1 %v8758_v33  ;;  %8547 = vmatprep.subr.bf16.mxu0 %v8759_v24 }
 0x9d3   : > { %8573 = vmatprep.subr.bf16.mxu1 %v8759_v24 }
 0x9d5   : > { %8548 = vmatpush3.bf16.msra.mxu0 %v8759_v24 }
 0x9d6   : > { %8581 = vmatpush3.bf16.msra.mxu1 %v8759_v24  ;;  %8549 = vmatprep.subr.bf16.mxu0 %v8760_v1 }
 0x9d7   : > { %8574 = vmatprep.subr.bf16.mxu1 %v8760_v1 }
 0x9d9   : > { %8550 = vmatpush3.bf16.msra.mxu0 %v8760_v1 }
 0x9da   : > { %8582 = vmatpush3.bf16.msra.mxu1 %v8760_v1 }
 0xa5f   : > { %v8521_v52 = vpop.f32.mrb[80].mxu1 }
 0xa60   : > { %v11179_v14 = vadd.f32 %v8521_v52, %v11176_v48  ;;  %v6369_v0 = vpop.f32.mrb[81].mxu1 }
 0xa61   : > { %v11182_v13 = vadd.f32 %v11176_v48, %v6369_v0  ;;  %v8522_v55 = vpop.f32.mrb[82].mxu1 }
 0xa62   : > { %v6450_v12 = vand.u32 2147483647, %v11179_v14  ;;  %v11186_v15 = vadd.f32 %v8522_v55, %v11176_v48  ;;  %v6372_v47 = vpop.f32.mrb[83].mxu1  ;;  %v6434_v41 = vmax.f32 %v11179_v14, 0.0 }
 0xa63   : > { %v6448_v7 = vand.u32 2147483647, %v11182_v13  ;;  %v11190_v21 = vadd.f32 %v11176_v48, %v6372_v47  ;;  %v6432_v56 = vmax.f32 %v11182_v13, 0.0 }
 0xa64   : > { %v6466_v28 = vsub.f32 0.0, %v6450_v12  ;;  %v6451_v44 = vand.u32 2147483647, %v11186_v15  ;;  %v6435_v53 = vmax.f32 %v11186_v15, 0.0 }
 0xa65   : > { %v6464_v16 = vsub.f32 0.0, %v6448_v7  ;;  %v6449_v19 = vand.u32 2147483647, %v11190_v21 }
 0xa66   : > { %v6484_v9 = vmul.f32 1.442695, %v6466_v28  ;;  %v6467_v17 = vsub.f32 0.0, %v6451_v44 }
 0xa67   : > { %v6480_v4 = vmul.f32 1.442695, %v6464_v16  ;;  %v6465_v25 = vsub.f32 0.0, %v6449_v19 }
 0xa68   : > { %9049 = vpow2.f32 %v6484_v9  ;;  %v6486_v23 = vmul.f32 1.442695, %v6467_v17 }
 0xa69   : > { %9051 = vpow2.f32 %v6480_v4  ;;  %v6482_v45 = vmul.f32 1.442695, %v6465_v25 }
 0xa6a   : > { %9053 = vpow2.f32 %v6486_v23 }
 0xa6b   : > { %9055 = vpow2.f32 %v6482_v45 }
 0xa71   : > { %v8525_v60 = vpop.f32.mrb[84].mxu1 }
 0xa72   : > { %v9050_v61 = vpop.eup %9049  ;;  %v6385_v46 = vpop.f32.mrb[85].mxu1  ;;  %v11197_v43 = vadd.f32 %v8525_v60, %v11176_v48 }
 0xa73   : > { %v9052_v62 = vpop.eup %9051  ;;  %v6530_v3 = vadd.f32 1.0, %v9050_v61  ;;  %v8526_v6 = vpop.f32.mrb[86].mxu1  ;;  %v6533_v38 = vmul.f32 -0.5, %v9050_v61  ;;  %v11200_v39 = vadd.f32 %v11176_v48, %v6385_v46  ;;  %v6536_v18 = vand.u32 2147483647, %v9050_v61 }
 0xa74   : > { %v9054_v58 = vpop.eup %9053  ;;  %v6512_v50 = vadd.f32 1.0, %v9052_v62  ;;  %v6388_v30 = vpop.f32.mrb[87].mxu1  ;;  %v6515_v20 = vmul.f32 -0.5, %v9052_v62  ;;  %v6518_v34 = vand.u32 2147483647, %v9052_v62  ;;  %v11209_v36 = vadd.f32 %v8526_v6, %v11176_v48 }
 0xa75   : > { %v11194_v29 = vpop.eup %9055  ;;  %9057 = vlog2.f32 %v6530_v3  ;;  %v6539_v8 = vadd.f32 1.0, %v9054_v58  ;;  %v6454_v2 = vand.u32 2147483647, %v11197_v43  ;;  %v6534_v35 = vadd.f32 1.0, %v6533_v38 }
 0xa76   : > { %9059 = vlog2.f32 %v6512_v50  ;;  %v6521_v42 = vadd.f32 1.0, %v11194_v29  ;;  %v6542_v49 = vmul.f32 -0.5, %v9054_v58  ;;  %v6452_v27 = vand.u32 2147483647, %v11200_v39 }
 0xa77   : > { %9061 = vlog2.f32 %v6539_v8  ;;  %v6524_v59 = vmul.f32 -0.5, %v11194_v29  ;;  %v6470_v37 = vsub.f32 0.0, %v6454_v2  ;;  %v11212_v5 = vadd.f32 %v11176_v48, %v6388_v30 }
 0xa78   : > { %9063 = vlog2.f32 %v6521_v42  ;;  %vm11214_vm8 = vcmp.lt.f32.partialorder %v6536_v18, 0.0004427343  ;;  %v6516_v63 = vadd.f32 1.0, %v6515_v20  ;;  %vm11218_vm9 = vcmp.lt.f32.partialorder %v6518_v34, 0.0004427343 }
 0xa79   : > { %v6468_v31 = vsub.f32 0.0, %v6452_v27  ;;  %v6545_v40 = vand.u32 2147483647, %v9054_v58  ;;  %v6492_v10 = vmul.f32 1.442695, %v6470_v37  ;;  %v6543_v51 = vadd.f32 1.0, %v6542_v49 }
 0xa7a   : > { %v6455_v26 = vand.u32 2147483647, %v11209_v36  ;;  %v6453_v32 = vand.u32 2147483647, %v11212_v5  ;;  %v6535_v33 = vmul.f32 %v9050_v61, %v6534_v35  ;;  %v6525_v24 = vadd.f32 1.0, %v6524_v59 }
 0xa7b   : > { %v6488_v57 = vmul.f32 1.442695, %v6468_v31  ;;  %9065 = vpow2.f32 %v6492_v10  ;;  %v6527_v55 = vand.u32 2147483647, %v11194_v29  ;;  %v6517_v28 = vmul.f32 %v9052_v62, %v6516_v63 }
 0xa7c   : > { %v6471_v1 = vsub.f32 0.0, %v6455_v26  ;;  %v6469_v12 = vsub.f32 0.0, %v6453_v32  ;;  %vm11226_vm10 = vcmp.lt.f32.partialorder %v6545_v40, 0.0004427343  ;;  %v6544_v17 = vmul.f32 %v9054_v58, %v6543_v51 }
 0xa7d   : > { %9067 = vpow2.f32 %v6488_v57  ;;  %v6526_v60 = vmul.f32 %v11194_v29, %v6525_v24  ;;  %v6433_v6 = vmax.f32 %v11190_v21, 0.0  ;;  %vm6528_vm11 = vcmp.lt.f32.partialorder %v6527_v55, 0.0004427343 }
 0xa7e   : > { %v6494_v16 = vmul.f32 1.442695, %v6471_v1  ;;  %v6490_v4 = vmul.f32 1.442695, %v6469_v12  ;;  %v6438_v40 = vmax.f32 %v11197_v43, 0.0  ;;  %v6436_v26 = vmax.f32 %v11200_v39, 0.0 }
 0xa7f   : > { %v9058_v11 = vpop.eup %9057 }
 0xa80   : > { %v9060_v52 = vpop.eup %9059  ;;  %v6532_v0 = vmul.f32 0.6931472, %v9058_v11  ;;  %9069 = vpow2.f32 %v6494_v16 }
 0xa81   : > { %v9062_v47 = vpop.eup %9061  ;;  %v6514_v7 = vmul.f32 0.6931472, %v9060_v52  ;;  %9071 = vpow2.f32 %v6490_v4 }
 0xa82   : > { %v6538_v19 = vsel %vm11214_vm8, %v6535_v33, %v6532_v0  ;;  %v6541_v9 = vmul.f32 0.6931472, %v9062_v47  ;;  %v9064_v25 = vpop.eup %9063 }
 0xa83   : > { %v6658_v23 = vadd.f32 %v6538_v19, %v6434_v41  ;;  %v6520_v45 = vsel %vm11218_vm9, %v6517_v28, %v6514_v7  ;;  %v6523_v62 = vmul.f32 0.6931472, %v9064_v25 }
 0xa84   : > { %v6656_v61 = vadd.f32 %v6520_v45, %v6432_v56  ;;  %v6547_v46 = vsel %vm11226_vm10, %v6544_v17, %v6541_v9 }
 0xa85   : > { %9073 = vtanh.f32 %v6658_v23  ;;  %v6659_v3 = vadd.f32 %v6547_v46, %v6435_v53  ;;  %v6529_v58 = vsel %vm6528_vm11, %v6526_v60, %v6523_v62  ;;  %v9066_v30 = vpop.eup %9065 }
 0xa86   : > { %9075 = vtanh.f32 %v6656_v61  ;;  %v6657_v50 = vadd.f32 %v6529_v58, %v6433_v6  ;;  %v6566_v29 = vadd.f32 1.0, %v9066_v30  ;;  %v6569_v20 = vmul.f32 -0.5, %v9066_v30 }
 0xa87   : > { %9077 = vtanh.f32 %v6659_v3  ;;  %v9068_v8 = vpop.eup %9067  ;;  %v6572_v2 = vand.u32 2147483647, %v9066_v30 }
 0xa88   : > { %9079 = vtanh.f32 %v6657_v50  ;;  %v8529_v38 = vpop.f32.mrb[88].mxu1  ;;  %v6548_v42 = vadd.f32 1.0, %v9068_v8  ;;  %v6551_v35 = vmul.f32 -0.5, %v9068_v8  ;;  %v6554_v56 = vand.u32 2147483647, %v9068_v8 }
 0xa89   : > { %v6401_v18 = vpop.f32.mrb[89].mxu1  ;;  %9081 = vlog2.f32 %v6566_v29  ;;  %v11244_v37 = vadd.f32 %v8529_v38, %v11176_v48  ;;  %v6570_v10 = vadd.f32 1.0, %v6569_v20  ;;  %vm11252_vm12 = vcmp.lt.f32.partialorder %v6572_v2, 0.0004427343 }
 0xa8a   : > { %v8530_v34 = vpop.f32.mrb[90].mxu1  ;;  %v11238_v41 = vpop.eup %9069  ;;  %9083 = vlog2.f32 %v6548_v42  ;;  %v11248_v22 = vadd.f32 %v11176_v48, %v6401_v18  ;;  %v6552_v57 = vadd.f32 1.0, %v6551_v35  ;;  %vm11256_vm13 = vcmp.lt.f32.partialorder %v6554_v56, 0.0004427343 }
 0xa8b   : > { %v6404_v49 = vpop.f32.mrb[91].mxu1  ;;  %v11240_v27 = vpop.eup %9071  ;;  %v6575_v59 = vadd.f32 1.0, %v11238_v41  ;;  %v6578_v24 = vmul.f32 -0.5, %v11238_v41  ;;  %v6458_v1 = vand.u32 2147483647, %v11244_v37  ;;  %v11267_v12 = vadd.f32 %v8530_v34, %v11176_v48 }
 0xa8c   : > { %v6557_v63 = vadd.f32 1.0, %v11240_v27  ;;  %v6560_v0 = vmul.f32 -0.5, %v11240_v27  ;;  %v6456_v55 = vand.u32 2147483647, %v11248_v22  ;;  %v11270_v47 = vadd.f32 %v11176_v48, %v6404_v49 }
 0xa8d   : > { %9085 = vlog2.f32 %v6575_v59  ;;  %v6474_v28 = vsub.f32 0.0, %v6458_v1  ;;  %v6571_v44 = vmul.f32 %v9066_v30, %v6570_v10  ;;  %v6581_v16 = vand.u32 2147483647, %v11238_v41 }
 0xa8e   : > { %9087 = vlog2.f32 %v6557_v63  ;;  %v6472_v19 = vsub.f32 0.0, %v6456_v55  ;;  %v6459_v9 = vand.u32 2147483647, %v11267_v12  ;;  %v6553_v4 = vmul.f32 %v9068_v8, %v6552_v57 }
 0xa8f   : > { %v9074_v54 = vpop.eup %9073  ;;  %v6500_v25 = vmul.f32 1.442695, %v6474_v28  ;;  %v6457_v23 = vand.u32 2147483647, %v11270_v47  ;;  %v6579_v46 = vadd.f32 1.0, %v6578_v24  ;;  %v6439_v35 = vmax.f32 %v11209_v36, 0.0 }
 0xa90   : > { %v9076_v31 = vpop.eup %9075  ;;  %v6690_v11 = vmul.f32 %v9074_v54, %v11179_v14  ;;  %v6475_v62 = vsub.f32 0.0, %v6459_v9  ;;  %v6563_v50 = vand.u32 2147483647, %v11240_v27  ;;  %vm6582_vm14 = vcmp.lt.f32.partialorder %v6581_v16, 0.0004427343 }
 0xa91   : > { %v9078_v53 = vpop.eup %9077  ;;  %v6688_v7 = vmul.f32 %v9076_v31, %v11182_v13  ;;  %v6496_v13 = vmul.f32 1.442695, %v6472_v19  ;;  %9089 = vpow2.f32 %v6500_v25  ;;  %v6473_v6 = vsub.f32 0.0, %v6457_v23 }
 0xa92   : > { %v6691_v33 = vmul.f32 %v9078_v53, %v11186_v15  ;;  %v9080_v52 = vpop.eup %9079  ;;  %v6502_v30 = vmul.f32 1.442695, %v6475_v62  ;;  %v6580_v2 = vmul.f32 %v11238_v41, %v6579_v46  ;;  %v6437_v54 = vmax.f32 %v11212_v5, 0.0 }
 0xa93   : > { %v6689_v15 = vmul.f32 %v9080_v52, %v11190_v21  ;;  %v9082_v17 = vpop.eup %9081  ;;  %v6561_v21 = vadd.f32 1.0, %v6560_v0  ;;  %9091 = vpow2.f32 %v6496_v13  ;;  %v6498_v42 = vmul.f32 1.442695, %v6473_v6 }
 0xa94   : > { %v6705_v14 = vpack.c.bf16 %v6691_v33, %v6690_v11  ;;  %v9084_v60 = vpop.eup %9083  ;;  %v6568_v61 = vmul.f32 0.6931472, %v9082_v17  ;;  %9093 = vpow2.f32 %v6502_v30  ;;  %vm6564_vm15 = vcmp.lt.f32.partialorder %v6563_v50, 0.0004427343 }
 0xa95   : > { %v6704_v45 = vpack.c.bf16 %v6689_v15, %v6688_v7  ;;  %v6550_v3 = vmul.f32 0.6931472, %v9084_v60  ;;  %v6562_v49 = vmul.f32 %v11240_v27, %v6561_v21  ;;  %v6442_v15 = vmax.f32 %v11244_v37, 0.0 }
 0xa96   : > { %v6574_v58 = vsel %vm11252_vm12, %v6571_v44, %v6568_v61 }
 0xa97   : > { %8551 = vmatprep.mubr.bf16.mxu0 %v6704_v45  ;;  %v9086_v8 = vpop.eup %9085  ;;  %v6662_v29 = vadd.f32 %v6574_v58, %v6438_v40  ;;  %v6556_v38 = vsel %vm11256_vm13, %v6553_v4, %v6550_v3 }
 0xa98   : > { %8552 = vmatmul.mubr.bf16.vlgmr.msra.gmra.mrb[64].mxu0 %v6705_v14  ;;  %v9088_v18 = vpop.eup %9087  ;;  %v6660_v20 = vadd.f32 %v6556_v38, %v6436_v26  ;;  %v6577_v34 = vmul.f32 0.6931472, %v9086_v8 }
 0xa99   : > { %v6559_v56 = vmul.f32 0.6931472, %v9088_v18  ;;  %9095 = vtanh.f32 %v6662_v29  ;;  %v6440_v18 = vmax.f32 %v11248_v22, 0.0 }
 0xa9a   : > { %v6583_v59 = vsel %vm6582_vm14, %v6580_v2, %v6577_v34  ;;  %9097 = vpow2.f32 %v6498_v42 }
 0xa9b   : > { %v6663_v63 = vadd.f32 %v6583_v59, %v6439_v35  ;;  %v6565_v31 = vsel %vm6564_vm15, %v6562_v49, %v6559_v56  ;;  %9099 = vtanh.f32 %v6660_v20  ;;  %v9090_v53 = vpop.eup %9089 }
 0xa9c   : > { %v6661_v40 = vadd.f32 %v6565_v31, %v6437_v54  ;;  %v8533_v10 = vpop.f32.mrb[92].mxu1  ;;  %v6602_v57 = vadd.f32 1.0, %v9090_v53  ;;  %v6605_v1 = vmul.f32 -0.5, %v9090_v53  ;;  %v6608_v7 = vand.u32 2147483647, %v9090_v53 }
 0xa9d   : > { %9101 = vtanh.f32 %v6663_v63  ;;  %v11287_v41 = vadd.f32 %v8533_v10, %v11176_v48  ;;  %v6417_v26 = vpop.f32.mrb[93].mxu1  ;;  %v9092_v27 = vpop.eup %9091 }
 0xa9e   : > { %9103 = vtanh.f32 %v6661_v40  ;;  %v8534_v51 = vpop.f32.mrb[94].mxu1  ;;  %v6584_v11 = vadd.f32 1.0, %v9092_v27  ;;  %v11290_v24 = vpop.eup %9093  ;;  %v11294_v0 = vadd.f32 %v11176_v48, %v6417_v26  ;;  %v6587_v16 = vmul.f32 -0.5, %v9092_v27 }
 0xa9f   : > { %v6420_v32 = vpop.f32.mrb[95].mxu1  ;;  %v6462_v33 = vand.u32 2147483647, %v11287_v41  ;;  %9105 = vlog2.f32 %v6602_v57  ;;  %v6611_v52 = vadd.f32 1.0, %v11290_v24  ;;  %v6590_v19 = vand.u32 2147483647, %v9092_v27 }
 0xaa0   : > { %9107 = vlog2.f32 %v6584_v11  ;;  %v6614_v9 = vmul.f32 -0.5, %v11290_v24  ;;  %v6606_v25 = vadd.f32 1.0, %v6605_v1  ;;  %v6460_v45 = vand.u32 2147483647, %v11294_v0 }
 0xaa1   : > { %9109 = vlog2.f32 %v6611_v52  ;;  %v6478_v28 = vsub.f32 0.0, %v6462_v33  ;;  %v11303_v60 = vadd.f32 %v8534_v51, %v11176_v48  ;;  %vm11307_vm0 = vcmp.lt.f32.partialorder %v6608_v7, 0.0004427343 }
 0xaa2   : > { %v6476_v6 = vsub.f32 0.0, %v6460_v45  ;;  %v6588_v58 = vadd.f32 1.0, %v6587_v16  ;;  %v6615_v50 = vadd.f32 1.0, %v6614_v9  ;;  %v11315_v8 = vadd.f32 %v11176_v48, %v6420_v32 }
 0xaa3   : > { %v9096_v55 = vpop.eup %9095  ;;  %v6508_v23 = vmul.f32 1.442695, %v6478_v28  ;;  %v6463_v30 = vand.u32 2147483647, %v11303_v60  ;;  %vm11319_vm1 = vcmp.lt.f32.partialorder %v6590_v19, 0.0004427343  ;;  %v6607_v35 = vmul.f32 %v9090_v53, %v6606_v25 }
 0xaa4   : > { %v11296_v14 = vpop.eup %9097  ;;  %v6694_v46 = vmul.f32 %v9096_v55, %v11197_v43  ;;  %v6461_v20 = vand.u32 2147483647, %v11315_v8  ;;  %v6617_v48 = vand.u32 2147483647, %v11290_v24  ;;  %v6589_v49 = vmul.f32 %v9092_v27, %v6588_v58 }
 0xaa5   : > { %v9100_v44 = vpop.eup %9099  ;;  %v6593_v17 = vadd.f32 1.0, %v11296_v14  ;;  %v6596_v43 = vmul.f32 -0.5, %v11296_v14  ;;  %v6616_v40 = vmul.f32 %v11290_v24, %v6615_v50  ;;  %v6599_v26 = vand.u32 2147483647, %v11296_v14 }
 0xaa6   : > { %v6692_v3 = vmul.f32 %v9100_v44, %v11200_v39  ;;  %v6477_v54 = vsub.f32 0.0, %v6461_v20  ;;  %v6443_v27 = vmax.f32 %v11267_v12, 0.0  ;;  %vm6618_vm2 = vcmp.lt.f32.partialorder %v6617_v48, 0.0004427343 }
 0xaa7   : > { %v9102_v4 = vpop.eup %9101  ;;  %9111 = vlog2.f32 %v6593_v17  ;;  %v6597_v10 = vadd.f32 1.0, %v6596_v43  ;;  %vm6600_vm3 = vcmp.lt.f32.partialorder %v6599_v26, 0.0004427343 }
 0xaa8   : > { %v9104_v61 = vpop.eup %9103  ;;  %v6695_v13 = vmul.f32 %v9102_v4, %v11209_v36  ;;  %9113 = vpow2.f32 %v6508_v23  ;;  %v6504_v36 = vmul.f32 1.442695, %v6476_v6  ;;  %v6506_v11 = vmul.f32 1.442695, %v6477_v54 }
 0xaa9   : > { %v6693_v21 = vmul.f32 %v9104_v61, %v11212_v5  ;;  %v9106_v42 = vpop.eup %9105  ;;  %v6479_v5 = vsub.f32 0.0, %v6463_v30  ;;  %v6598_v7 = vmul.f32 %v11296_v14, %v6597_v10 }
 0xaaa   : > { %v6707_v38 = vpack.c.bf16 %v6695_v13, %v6694_v46  ;;  %v9108_v34 = vpop.eup %9107  ;;  %v6604_v2 = vmul.f32 0.6931472, %v9106_v42  ;;  %9115 = vpow2.f32 %v6504_v36 }
 0xaab   : > { %v6706_v29 = vpack.c.bf16 %v6693_v21, %v6692_v3  ;;  %v6586_v56 = vmul.f32 0.6931472, %v9108_v34  ;;  %v6510_v59 = vmul.f32 1.442695, %v6479_v5  ;;  %v9110_v63 = vpop.eup %9109 }
 0xaac   : > { %v6610_v31 = vsel %vm11307_vm0, %v6607_v35, %v6604_v2  ;;  %v6613_v57 = vmul.f32 0.6931472, %v9110_v63 }
 0xaad   : > { %8555 = vmatprep.mubr.bf16.mxu0 %v6706_v29  ;;  %v6666_v51 = vadd.f32 %v6610_v31, %v6442_v15  ;;  %v6592_v53 = vsel %vm11319_vm1, %v6589_v49, %v6586_v56  ;;  %9117 = vpow2.f32 %v6510_v59  ;;  %v6441_v15 = vmax.f32 %v11270_v47, 0.0 }
 0xaae   : > { %8556 = vmatmul.mubr.bf16.gmra.mrb[68].mxu0 %v6707_v38  ;;  %v6664_v32 = vadd.f32 %v6592_v53, %v6440_v18  ;;  %v6619_v1 = vsel %vm6618_vm2, %v6616_v40, %v6613_v57  ;;  %v6444_v31 = vmax.f32 %v11294_v0, 0.0  ;;  %v6447_v40 = vmax.f32 %v11303_v60, 0.0 }
 0xaaf   : > { %9119 = vtanh.f32 %v6666_v51  ;;  %v6667_v24 = vadd.f32 %v6619_v1, %v6443_v27 }
 0xab0   : > { %9121 = vtanh.f32 %v6664_v32 }
 0xab1   : > { %v9112_v33 = vpop.eup %9111  ;;  %9123 = vpow2.f32 %v6506_v11  ;;  %v6445_v11 = vmax.f32 %v11315_v8, 0.0 }
 0xab2   : > { %v9114_v52 = vpop.eup %9113  ;;  %v6595_v55 = vmul.f32 0.6931472, %v9112_v33  ;;  %9125 = vtanh.f32 %v6667_v24 }
 0xab3   : > { %v6638_v28 = vadd.f32 1.0, %v9114_v52  ;;  %v6641_v4 = vmul.f32 -0.5, %v9114_v52  ;;  %v6644_v62 = vand.u32 2147483647, %v9114_v52 }
 0xab4   : > { %v6601_v44 = vsel %vm6600_vm3, %v6598_v7, %v6595_v55  ;;  %v9116_v19 = vpop.eup %9115 }
 0xab5   : > { %v6665_v16 = vadd.f32 %v6601_v44, %v6441_v15  ;;  %9127 = vlog2.f32 %v6638_v28  ;;  %v6620_v9 = vadd.f32 1.0, %v9116_v19  ;;  %v6642_v61 = vadd.f32 1.0, %v6641_v4 }
 0xab6   : > { %v6623_v46 = vmul.f32 -0.5, %v9116_v19  ;;  %vm6645_vm4 = vcmp.lt.f32.partialorder %v6644_v62, 0.0004427343  ;;  %v6626_v39 = vand.u32 2147483647, %v9116_v19 }
 0xab7   : > { %9129 = vtanh.f32 %v6665_v16  ;;  %v9118_v17 = vpop.eup %9117  ;;  %v6643_v29 = vmul.f32 %v9114_v52, %v6642_v61 }
 0xab8   : > { %9131 = vlog2.f32 %v6620_v9  ;;  %v6647_v25 = vadd.f32 1.0, %v9118_v17  ;;  %v6650_v50 = vmul.f32 -0.5, %v9118_v17  ;;  %v6624_v38 = vadd.f32 1.0, %v6623_v46 }
 0xab9   : > { %v9120_v23 = vpop.eup %9119  ;;  %v6653_v35 = vand.u32 2147483647, %v9118_v17  ;;  %vm6627_vm5 = vcmp.lt.f32.partialorder %v6626_v39, 0.0004427343 }
 0xaba   : > { %v9122_v45 = vpop.eup %9121  ;;  %9133 = vlog2.f32 %v6647_v25  ;;  %v6698_v6 = vmul.f32 %v9120_v23, %v11244_v37  ;;  %v6651_v34 = vadd.f32 1.0, %v6650_v50  ;;  %v6446_v37 = vmax.f32 %v11287_v41, 0.0 }
 0xabb   : > { %v9124_v14 = vpop.eup %9123  ;;  %v6696_v42 = vmul.f32 %v9122_v45, %v11248_v22  ;;  %v6625_v56 = vmul.f32 %v9116_v19, %v6624_v38  ;;  %vm6654_vm6 = vcmp.lt.f32.partialorder %v6653_v35, 0.0004427343 }
 0xabc   : > { %v9126_v13 = vpop.eup %9125  ;;  %v6629_v3 = vadd.f32 1.0, %v9124_v14  ;;  %v6632_v2 = vmul.f32 -0.5, %v9124_v14  ;;  %v6652_v63 = vmul.f32 %v9118_v17, %v6651_v34  ;;  %v6635_v10 = vand.u32 2147483647, %v9124_v14  ;;  %v7290_v17 = vld [vmem:[%s11425_s3 + $0xa] ss:$0 sm:$0xff] }
 0xabd   : > { %v6699_v58 = vmul.f32 %v9126_v13, %v11267_v12 }
 0xabe   : > { %9135 = vlog2.f32 %v6629_v3  ;;  %vm6636_vm7 = vcmp.lt.f32.partialorder %v6635_v10, 0.0004427343 }
 0xabf   : > { %v9128_v21 = vpop.eup %9127  ;;  %v6709_v36 = vpack.c.bf16 %v6699_v58, %v6698_v6 }
 0xac0   : > { %v6640_v30 = vmul.f32 0.6931472, %v9128_v21 }
 0xac1   : > { %v9130_v43 = vpop.eup %9129 }
 0xac2   : > { %v6697_v18 = vmul.f32 %v9130_v43, %v11270_v47  ;;  %v9132_v5 = vpop.eup %9131  ;;  %v6646_v20 = vsel %vm6645_vm4, %v6643_v29, %v6640_v30  ;;  %v6633_v47 = vadd.f32 1.0, %v6632_v2 }
 0xac3   : > { %v6622_v12 = vmul.f32 0.6931472, %v9132_v5  ;;  %v6670_v59 = vadd.f32 %v6646_v20, %v6446_v37 }
 0xac4   : > { %v6708_v48 = vpack.c.bf16 %v6697_v18, %v6696_v42  ;;  %v9134_v49 = vpop.eup %9133  ;;  %v6634_v27 = vmul.f32 %v9124_v14, %v6633_v47 }
 0xac5   : > { %v6628_v54 = vsel %vm6627_vm5, %v6625_v56, %v6622_v12  ;;  %v6649_v22 = vmul.f32 0.6931472, %v9134_v49  ;;  %9137 = vtanh.f32 %v6670_v59 }
 0xac6   : > { %8559 = vmatprep.mubr.bf16.mxu1 %v6708_v48  ;;  %v6668_v53 = vadd.f32 %v6628_v54, %v6444_v31 }
 0xac7   : > { %8560 = vmatmul.mubr.bf16.vlgmr.msra.gmra.mrb[96].mxu1 %v6709_v36  ;;  %v6655_v26 = vsel %vm6654_vm6, %v6652_v63, %v6649_v22 }
 0xac8   : > { %v9136_v51 = vpop.eup %9135  ;;  %v6671_v57 = vadd.f32 %v6655_v26, %v6447_v40 }
 0xac9   : > { %v6631_v32 = vmul.f32 0.6931472, %v9136_v51 }
 0xaca   : > { %9139 = vtanh.f32 %v6671_v57 }
 0xacb   : > { %v6637_v33 = vsel %vm6636_vm7, %v6634_v27, %v6631_v32  ;;  %9141 = vtanh.f32 %v6668_v53 }
 0xacc   : > { %v6669_v1 = vadd.f32 %v6637_v33, %v6445_v11 }
 0xace   : > { %9143 = vtanh.f32 %v6669_v1 }
 0xacf   : > { %v9138_v52 = vpop.eup %9137 }
 0xad0   : > { %v6702_v55 = vmul.f32 %v9138_v52, %v11287_v41 }
 0xad4   : > { %v9140_v24 = vpop.eup %9139 }
 0xad5   : > { %v6703_v7 = vmul.f32 %v9140_v24, %v11303_v60  ;;  %v9142_v15 = vpop.eup %9141 }
 0xad6   : > { %v6700_v16 = vmul.f32 %v9142_v15, %v11294_v0 }
 0xad7   : > { %v6711_v28 = vpack.c.bf16 %v6703_v7, %v6702_v55 }
 0xad8   : > { %v9144_v44 = vpop.eup %9143 }
 0xad9   : > { %v6701_v19 = vmul.f32 %v9144_v44, %v11315_v8 }
 0xadb   : > { %v6710_v9 = vpack.c.bf16 %v6701_v19, %v6700_v16 }
 0xadd   : > { %8563 = vmatprep.mubr.bf16.mxu1 %v6710_v9 }
 0xade   : > { %8564 = vmatmul.mubr.bf16.gmra.mrb[100].mxu1 %v6711_v28 }
 0xb6b   : > { %v8553_v41 = vpop.f32.mrb[64].mxu0 }
 0xb6c   : > { %v6825_v4 = vadd.f32 %v8553_v41, %v7290_v17  ;;  %v6816_v60 = vpop.f32.mrb[65].mxu0 }
 0xb6d   : > { %v6817_v25 = vadd.f32 %v7290_v17, %v6816_v60  ;;  %v8554_v23 = vpop.f32.mrb[66].mxu0 }
 0xb6e   : > { %6881 = vst [vmem:[%s11352_s12 + $0x10] sm:$0xff] %v6825_v4  ;;  %v6828_v0 = vadd.f32 %v8554_v23, %v7290_v17  ;;  %v6819_v8 = vpop.f32.mrb[67].mxu0 }
 0xb6f   : > { %6879 = vst [vmem:[%s11352_s12] sm:$0xff] %v6817_v25  ;;  %v6820_v45 = vadd.f32 %v7290_v17, %v6819_v8 }
 0xb70   : > { %6882 = vst [vmem:[%s11352_s12 + $0x18] sm:$0xff] %v6828_v0 }
 0xb71   : > { %6880 = vst [vmem:[%s11352_s12 + $0x8] sm:$0xff] %v6820_v45 }
 0xb81   : > { %v8557_v14 = vpop.f32.mrb[68].mxu0 }
 0xb82   : > { %v6841_v61 = vadd.f32 %v8557_v14, %v7290_v17  ;;  %v6832_v46 = vpop.f32.mrb[69].mxu0 }
 0xb83   : > { %v6833_v13 = vadd.f32 %v7290_v17, %v6832_v46  ;;  %v8558_v62 = vpop.f32.mrb[70].mxu0 }
 0xb84   : > { %6885 = vst [vmem:[%s11352_s12 + $0x30] sm:$0xff] %v6841_v61  ;;  %v6844_v3 = vadd.f32 %v8558_v62, %v7290_v17  ;;  %v6835_v21 = vpop.f32.mrb[71].mxu0 }
 0xb85   : > { %6883 = vst [vmem:[%s11352_s12 + $0x20] sm:$0xff] %v6833_v13  ;;  %v6836_v6 = vadd.f32 %v7290_v17, %v6835_v21 }
 0xb86   : > { %6886 = vst [vmem:[%s11352_s12 + $0x38] sm:$0xff] %v6844_v3 }
 0xb87   : > { %6884 = vst [vmem:[%s11352_s12 + $0x28] sm:$0xff] %v6836_v6 }
 0xb9a   : > { %v8561_v58 = vpop.f32.mrb[96].mxu1 }
 0xb9b   : > { %v6857_v50 = vadd.f32 %v8561_v58, %v7290_v17  ;;  %v6848_v30 = vpop.f32.mrb[97].mxu1 }
 0xb9c   : > { %v6849_v43 = vadd.f32 %v7290_v17, %v6848_v30  ;;  %v8562_v36 = vpop.f32.mrb[98].mxu1 }
 0xb9d   : > { %6889 = vst [vmem:[%s11352_s12 + $0x50] sm:$0xff] %v6857_v50  ;;  %v6860_v29 = vadd.f32 %v8562_v36, %v7290_v17  ;;  %v6851_v38 = vpop.f32.mrb[99].mxu1 }
 0xb9e   : > { %6887 = vst [vmem:[%s11352_s12 + $0x40] sm:$0xff] %v6849_v43  ;;  %v6852_v42 = vadd.f32 %v7290_v17, %v6851_v38 }
 0xb9f   : > { %6890 = vst [vmem:[%s11352_s12 + $0x58] sm:$0xff] %v6860_v29 }
 0xba0   : > { %6888 = vst [vmem:[%s11352_s12 + $0x48] sm:$0xff] %v6852_v42 }
 0xbb1   : > { %v8565_v18 = vpop.f32.mrb[100].mxu1 }
 0xbb2   : > { %v6873_v39 = vadd.f32 %v8565_v18, %v7290_v17  ;;  %v6864_v5 = vpop.f32.mrb[101].mxu1 }
 0xbb3   : > { %v6865_v20 = vadd.f32 %v7290_v17, %v6864_v5  ;;  %v8566_v34 = vpop.f32.mrb[102].mxu1 }
 0xbb4   : > { %6893 = vst [vmem:[%s11352_s12 + $0x70] sm:$0xff] %v6873_v39  ;;  %v6876_v2 = vadd.f32 %v8566_v34, %v7290_v17  ;;  %v6867_v37 = vpop.f32.mrb[103].mxu1 }
 0xbb5   : > { %6891 = vst [vmem:[%s11352_s12 + $0x60] sm:$0xff] %v6865_v20  ;;  %v6868_v12 = vadd.f32 %v7290_v17, %v6867_v37 }
 0xbb6   : > { %6894 = vst [vmem:[%s11352_s12 + $0x78] sm:$0xff] %v6876_v2 }
 0xbb7   : > { %6892 = vst [vmem:[%s11352_s12 + $0x68] sm:$0xff] %v6868_v12 }
 0xbb8   : > { %9158 = shalt.err (!%p9155_p3)
}
 0xbb9   : > { %s9159_s29 = scalar_lea.hbm %s11372_s14, 2048  ;;  %s9163_s8 = scalar_lea.hbm %s11426_s4, 4096 }
 0xbba   : > { %p9160_p4 = scmp.ne.s32.totalorder %s11372_s14, %s9159_s29  ;;  %p9164_p9 = scmp.lt.u32.totalorder %s11372_s14, %s11426_s4 }
 0xbbb   : > { %p9165_p10 = scmp.lt.u32.totalorder %s9163_s8, %s9159_s29  ;;  %p9167_p12 = scmp.lt.u32.totalorder %s9159_s29, %s11372_s14 }
 0xbbc   : > { %p9161_p7 = pnand %p9160_p4, %p9276_p5 }
 0xbbd   : > { %p9166_p11 = por %p9165_p10, %p9164_p9 }
 0xbbe   : > { %p9162_p8 = pneg %p9161_p7 }
 0xbbf   : > { %p9168_p13 = por %p9167_p12, %p9166_p11 }
 0xbc1   : > { %p9169_p0 = pnand %p9168_p13, %p9162_p8 }
 0xbc3   : > { %9172 = shalt.err (!%p9169_p0)
}
 0xbc4   : > { %s9211_s11 = smov 128   ;;  %s9212_s12 = smov 8  }
 0xbc5   : > { %8615 = dma.vmem_to_hbm [thread:$0]  (%p9276_p5), %s11374_s13, 2048, %s11372_s14, %s11381_s19, %s9211_s11, %s9211_s11, %s9212_s12  }
 0xbc6 PF: > { %p8621_p1 = scmp.ge.s32.totalorder %s9207_s18, 2  ;;  %s6924_s5 = sand.u32 1, %s9195_s15  }
 0xbc7   : > { %s6925_s27 = scalar_lea.sflag [#allocation3], %s6924_s5 }
 0xbc8   : > { %p8618_p2 = pnand %p8621_p1, %p9280_p6 }
 0xbca   : > { %9190 = dma.done.wait (!%p8618_p2), %s6925_s27, 2048  }
 0xbcb   : > { %9192 = vsyncadd (!%p8618_p2), %s6925_s27, 4294965248  ;;  %p14_p3 = scmp.ge.s32.totalorder %s9263_s21, 4   ;;  %s11487_s15 = smov %s9199_s16 }
 0xbcc   : > { %s11488_s16 = smov %s9203_s17  ;;  %s11489_s17 = smov %s9274_s24 }
 0xbcd   : > { %s11490_s18 = smov %s9263_s21  ;;  %16 = sbr.rel (!%p14_p3) target bundleno = 3 (0x3), region = 86 }
 0xbd4   :  { %6930 = vsyncpa [#allocation3], 1 }
 0xbd5   :  { %6932 = vsyncpa [#allocation3 + $0x1], 1 }

</bundles_post_ra>
